<compile_context>
chip_gen: v5e
topology: v5e:2x2
jax: 0.10.0
libtpu: 0.0.40
codegen_flags: <defaults>
</compile_context>

<pallas_src>
import math

import jax
import jax.numpy as jnp
from jax.experimental import pallas as pl
from jax.experimental.pallas import tpu as pltpu

# ---- FEMRTransformerConfig fields used by the layer ----
HIDDEN = 32            # hidden_size
N_HEADS = 4            # n_heads
HEAD = HIDDEN // N_HEADS
INTER = 64             # intermediate_size
HIDDEN_MULT = 2        # hidden_act == "swiglu"
N_TIME = 2             # number of normed-age features in time_data
RMS_EPS = 1e-8         # femr.models.rmsnorm eps (added after sqrt)

FF_COLS = HIDDEN_MULT * INTER        # 128 ff columns of input_proj output
IN_COLS = FF_COLS + 3 * HIDDEN       # 224 total input_proj columns
NEG_INF = -1e30


# --------------------------------------------------------------------------
# Kernel 1: per-token projection pre-pass.
# --------------------------------------------------------------------------
def proj_kernel(x_ref, tpad_ref, sin_ref, cos_ref,
                g_ref, w_in_ref, b_in_ref, rot_ref,
                q_ref, k_ref, v_ref, ff_ref):
    x = x_ref[...]
    ms = jnp.mean(x * x, axis=-1, keepdims=True)
    inv = pl.reciprocal(jnp.sqrt(ms) + RMS_EPS, approx=True)
    # g is pre-masked (last 2*N_TIME cols zeroed) and tpad is the pre-padded
    # [0..0, time, time^2] slab, so the normed-ages overwrite is one FMA.
    xn = (x * inv * g_ref[...] + tpad_ref[...]).astype(jnp.bfloat16)

    proj = jnp.dot(xn, w_in_ref[...],
                   preferred_element_type=jnp.float32) + b_in_ref[...]
    ff = proj[:, :FF_COLS]
    q = proj[:, FF_COLS:FF_COLS + HIDDEN]              # already * 1/sqrt(HEAD)
    k = proj[:, FF_COLS + HIDDEN:FF_COLS + 2 * HIDDEN]
    v = proj[:, FF_COLS + 2 * HIDDEN:]

    sin = sin_ref[...]
    cos = cos_ref[...]

    def rope(z):
        # rotate_every_two_v2 as a signed-permutation matmul (tiny MXU push).
        zr = jnp.dot(z.astype(jnp.bfloat16), rot_ref[...],
                     preferred_element_type=jnp.float32)
        return z * cos + zr * sin

    q_ref[...] = rope(q).astype(jnp.bfloat16)
    k_ref[...] = rope(k).astype(jnp.bfloat16)
    v_ref[...] = v.astype(jnp.bfloat16)

    x1 = ff[:, :INTER]
    x2 = ff[:, INTER:]
    ff_ref[...] = (x1 * jax.nn.sigmoid(x1) * x2).astype(jnp.bfloat16)


# --------------------------------------------------------------------------
# Kernel 2: flash attention (online softmax) + fused output projection.
# Grid = (q tiles, k tiles); q axis "parallel", k axis "arbitrary".
# --------------------------------------------------------------------------
def attn_kernel(q_ref, k_ref, v_ref, ffa_ref, bias_ref,
                w_attn_ref, w_ff_ref, b_out_ref,
                o_ref,
                m_scr, l_scr, acc_scr):
    j = pl.program_id(1)
    nj = pl.num_programs(1)

    @pl.when(j == 0)
    def _init():
        m_scr[...] = jnp.full(m_scr.shape, NEG_INF, dtype=jnp.float32)
        l_scr[...] = jnp.zeros(l_scr.shape, dtype=jnp.float32)
        acc_scr[...] = jnp.zeros(acc_scr.shape, dtype=jnp.float32)

    # Head-batched scores; q already carries the 1/sqrt(HEAD) scale.
    s = jnp.einsum('hqd,hkd->hqk', q_ref[...], k_ref[...],
                   preferred_element_type=jnp.float32)
    s = s + bias_ref[...].astype(jnp.float32)[None]

    m_prev = m_scr[...]
    m_new = jnp.maximum(m_prev, jnp.max(s, axis=-1, keepdims=True))
    alpha = jnp.exp(m_prev - m_new)
    # NOTE(v6e/v7x): `jnp.exp((s - m_new).astype(jnp.bfloat16))` uses the bf16
    # EUP path (~2x exp throughput); kept f32 here so v5e stays correct/fast.
    p = jnp.exp(s - m_new)
    l_scr[...] = alpha * l_scr[...] + jnp.sum(p, axis=-1, keepdims=True)
    acc_scr[...] = alpha * acc_scr[...] + jnp.einsum(
        'hqk,hkd->hqd', p.astype(jnp.bfloat16), v_ref[...],
        preferred_element_type=jnp.float32)
    m_scr[...] = m_new

    @pl.when(j == nj - 1)
    def _finalize():
        attn = acc_scr[...] * pl.reciprocal(l_scr[...], approx=True)
        out = jnp.dot(ffa_ref[...], w_ff_ref[...],
                      preferred_element_type=jnp.float32) + b_out_ref[...]
        # Split output projection per head (runs only once per q tile).
        for h in range(N_HEADS):
            out = out + jnp.dot(attn[h].astype(jnp.bfloat16), w_attn_ref[h],
                                preferred_element_type=jnp.float32)
        o_ref[...] = out.astype(o_ref.dtype)


# --------------------------------------------------------------------------
# Wrapper
# --------------------------------------------------------------------------
def femr_encoder_layer(x, time_data, pos_embed, attn_bias, params,
                       *, tq=256, tk=512, tp=512):
    """Fused FEMREncoderLayer forward (use_hawk=False).

    x:         (N, HIDDEN) f32        time_data: (N, N_TIME) f32
    pos_embed: (sin, cos), each (N, HEAD) f32 (interleave-expanded, as fed to
               apply_rotary_pos_emb)
    attn_bias: (N, N) f32 additive attention bias (broadcast over heads)
    params:    (g, w_in, b_in, w_out, b_out); linear weights pre-transposed to
               [in_features, out_features].
    """
    # TODO(synk): use_hawk=True path (torch_hawk.RecurrentBlock) not implemented.
    sin, cos = pos_embed
    g, w_in, b_in, w_out, b_out = params
    n = x.shape[0]
    f32, bf16 = jnp.float32, jnp.bfloat16

    tp = min(tp, n)
    tq = min(tq, n)
    tk = min(tk, n)
    assert n % tp == 0 and n % tq == 0 and n % tk == 0, \
        "N must be divisible by the tile sizes"
    assert tp % 8 == 0 and tq % 8 == 0 and (tk % 128 == 0 or tk == n)
    assert HEAD % 2 == 0
    ni, nj = n // tq, n // tk
    npt = n // tp

    # ---- wrapper-side layout plumbing (no concats / selects in-kernel) ----
    lane = jnp.arange(HIDDEN)
    keep = (lane < HIDDEN - 2 * N_TIME).astype(f32)
    g_masked = g.astype(f32).reshape(1, HIDDEN) * keep[None, :]

    time_pad = jnp.zeros((n, HIDDEN), f32)
    time_pad = time_pad.at[:, HIDDEN - 2 * N_TIME:HIDDEN - N_TIME].set(time_data)
    time_pad = time_pad.at[:, HIDDEN - N_TIME:].set(time_data * time_data)

    sin_t = jnp.tile(sin.astype(f32), (1, N_HEADS))     # (N, HIDDEN)
    cos_t = jnp.tile(cos.astype(f32), (1, N_HEADS))

    # rotate_every_two as a signed permutation matrix:
    #   (z @ R)[2i] = -z[2i+1],  (z @ R)[2i+1] = z[2i]
    rot = jnp.zeros((HIDDEN, HIDDEN), f32)
    rot = rot.at[lane[1::2], lane[::2]].set(-1.0)
    rot = rot.at[lane[::2], lane[1::2]].set(1.0)
    rot = rot.astype(bf16)

    # Fold 1/sqrt(HEAD) into the q columns of input_proj (rope is linear).
    scale = 1.0 / math.sqrt(HEAD)
    col_scale = jnp.concatenate([jnp.ones((FF_COLS,), f32),
                                 jnp.full((HIDDEN,), scale, f32),
                                 jnp.ones((2 * HIDDEN,), f32)])
    w_in_s = (w_in.astype(f32) * col_scale[None, :]).astype(bf16)    # (32, 224)
    b_in_s = b_in.astype(f32).reshape(1, IN_COLS) * col_scale[None, :]

    w_attn = w_out[:HIDDEN, :].reshape(N_HEADS, HEAD, HIDDEN).astype(bf16)
    w_ff = w_out[HIDDEN:, :].astype(bf16)                            # (64, 32)
    b_out_ = b_out.astype(f32).reshape(1, HIDDEN)

    # ------------------------- pass 1: projection -------------------------
    tok = lambda i: (i, 0)

    def const1(a):
        zeros = (0,) * a.ndim
        return pl.BlockSpec(a.shape, lambda i: zeros)

    proj_cost = pl.CostEstimate(
        flops=int(2 * n * HIDDEN * IN_COLS + 4 * n * HIDDEN * HIDDEN
                  + 10 * n * IN_COLS),
        transcendentals=int(n * (INTER + 2)),
        bytes_accessed=int(16 * n * HIDDEN + 2 * n * (3 * HIDDEN + INTER)
                           + 2 * HIDDEN * (IN_COLS + HIDDEN)))

    q, k, v, ffa = pl.pallas_call(
        proj_kernel,
        out_shape=(jax.ShapeDtypeStruct((n, HIDDEN), bf16),
                   jax.ShapeDtypeStruct((n, HIDDEN), bf16),
                   jax.ShapeDtypeStruct((n, HIDDEN), bf16),
                   jax.ShapeDtypeStruct((n, INTER), bf16)),
        grid_spec=pltpu.PrefetchScalarGridSpec(
            num_scalar_prefetch=0,
            grid=(npt,),
            in_specs=[pl.BlockSpec((tp, HIDDEN), tok),     # x
                      pl.BlockSpec((tp, HIDDEN), tok),     # time_pad
                      pl.BlockSpec((tp, HIDDEN), tok),     # sin (tiled)
                      pl.BlockSpec((tp, HIDDEN), tok),     # cos (tiled)
                      const1(g_masked), const1(w_in_s), const1(b_in_s),
                      const1(rot)],
            out_specs=(pl.BlockSpec((tp, HIDDEN), tok),
                       pl.BlockSpec((tp, HIDDEN), tok),
                       pl.BlockSpec((tp, HIDDEN), tok),
                       pl.BlockSpec((tp, INTER), tok))),
        compiler_params=pltpu.CompilerParams(
            dimension_semantics=("parallel",),
            vmem_limit_bytes=32 * 1024 * 1024),
        cost_estimate=proj_cost,
    )(x, time_pad, sin_t, cos_t, g_masked, w_in_s, b_in_s, rot)

    # Head-major layout for the attention pass (wrapper-side plumbing).
    qh = q.reshape(n, N_HEADS, HEAD).transpose(1, 0, 2)     # (H, N, D) bf16
    kh = k.reshape(n, N_HEADS, HEAD).transpose(1, 0, 2)
    vh = v.reshape(n, N_HEADS, HEAD).transpose(1, 0, 2)
    bias_bf = attn_bias.astype(bf16)                        # halve O(N^2) stream

    # ------------------ pass 2: attention + output proj -------------------
    q_tok = lambda i, j: (0, i, 0)
    k_tok = lambda i, j: (0, j, 0)

    def const2(a):
        zeros = (0,) * a.ndim
        return pl.BlockSpec(a.shape, lambda i, j: zeros)

    attn_cost = pl.CostEstimate(
        flops=int(4 * n * n * HIDDEN + 2 * n * (HIDDEN + INTER) * HIDDEN),
        transcendentals=int(N_HEADS * n * (n + nj)),
        bytes_accessed=int(2 * n * n                        # bf16 bias
                           + ni * 4 * n * HIDDEN            # bf16 K,V per q tile
                           + 2 * n * (HIDDEN + INTER)       # bf16 q + swiglu(ff)
                           + 4 * n * HIDDEN))               # f32 output

    out = pl.pallas_call(
        attn_kernel,
        out_shape=jax.ShapeDtypeStruct((n, HIDDEN), x.dtype),
        grid_spec=pltpu.PrefetchScalarGridSpec(
            num_scalar_prefetch=0,
            grid=(ni, nj),
            in_specs=[pl.BlockSpec((N_HEADS, tq, HEAD), q_tok),
                      pl.BlockSpec((N_HEADS, tk, HEAD), k_tok),
                      pl.BlockSpec((N_HEADS, tk, HEAD), k_tok),
                      pl.BlockSpec((tq, INTER), lambda i, j: (i, 0)),
                      pl.BlockSpec((tq, tk), lambda i, j: (i, j)),
                      const2(w_attn), const2(w_ff), const2(b_out_)],
            out_specs=pl.BlockSpec((tq, HIDDEN), lambda i, j: (i, 0)),
            scratch_shapes=[pltpu.VMEM((N_HEADS, tq, 1), f32),      # running max
                            pltpu.VMEM((N_HEADS, tq, 1), f32),      # running sum
                            pltpu.VMEM((N_HEADS, tq, HEAD), f32)]), # running acc
        compiler_params=pltpu.CompilerParams(
            dimension_semantics=("parallel", "arbitrary"),
            vmem_limit_bytes=32 * 1024 * 1024),
        cost_estimate=attn_cost,
    )(qh, kh, vh, ffa, bias_bf, w_attn, w_ff, b_out_)

    return out


# ---------------- glue: rotary tables + pure-JAX reference ----------------
def fixed_pos_embedding(ages, dim):
    """(sin, cos) each (N, dim), each frequency repeated twice (interleaved)."""
    inv_freq = 1.0 / (10000.0 ** (jnp.arange(0, dim, 2, dtype=jnp.float32) / dim))
    t = ages[:, None] * inv_freq[None, :]                           # (N, dim//2)
    sin = jnp.stack([jnp.sin(t), jnp.sin(t)], axis=-1).reshape(ages.shape[0], dim)
    cos = jnp.stack([jnp.cos(t), jnp.cos(t)], axis=-1).reshape(ages.shape[0], dim)
    return sin, cos


def reference(x, time_data, pos_embed, attn_bias, params):
    """Faithful f32 re-implementation of the PyTorch forward (use_hawk=False)."""
    sin, cos = pos_embed
    g, w_in, b_in, w_out, b_out = params
    n = x.shape[0]
    rms = jnp.sqrt(jnp.mean(x * x, axis=-1, keepdims=True))
    xn = x / (rms + RMS_EPS) * g
    all_time = jnp.concatenate([time_data, time_data ** 2], axis=-1)
    xn = xn.at[:, -all_time.shape[1]:].set(all_time)
    tr = xn @ w_in + b_in
    ff = tr[:, :FF_COLS]
    qkv = tr[:, FF_COLS:].reshape(n, 3, N_HEADS, HEAD)

    def rot(z):  # rotate_every_two_v2
        z1, z2 = z[..., ::2], z[..., 1::2]
        return jnp.stack([-z2, z1], axis=-1).reshape(z.shape)

    sin3, cos3 = sin[:, None, :], cos[:, None, :]
    q = qkv[:, 0] * cos3 + rot(qkv[:, 0]) * sin3
    k = qkv[:, 1] * cos3 + rot(qkv[:, 1]) * sin3
    v = qkv[:, 2]
    s = jnp.einsum('qhd,khd->hqk', q, k) / math.sqrt(HEAD) + attn_bias[None]
    p = jax.nn.softmax(s, axis=-1)
    attn = jnp.einsum('hqk,khd->qhd', p, v).reshape(n, HIDDEN)
    x1, x2 = ff[:, :INTER], ff[:, INTER:]
    return jnp.concatenate([attn, jax.nn.silu(x1) * x2], axis=-1) @ w_out + b_out


if __name__ == "__main__":
    N = 512  # flattened token count -> grid (2, 1) with tq=256, tk=512
    key = jax.random.PRNGKey(0)
    ks = jax.random.split(key, 8)

    x = jax.random.normal(ks[0], (N, HIDDEN), jnp.float32)
    time_data = jax.random.normal(ks[1], (N, N_TIME), jnp.float32)
    attn_bias = 0.1 * jax.random.normal(ks[2], (N, N), jnp.float32)

    ages = jnp.arange(N, dtype=jnp.float32)
    pos_embed = fixed_pos_embedding(ages, HEAD)                     # (N, HEAD) each

    in_out = 3 * HIDDEN + HIDDEN_MULT * INTER
    g = jnp.ones((1, HIDDEN), jnp.float32)                          # RMSNorm gain
    w_in = jax.random.normal(ks[3], (HIDDEN, in_out), jnp.float32) / math.sqrt(HIDDEN)
    b_in = 0.01 * jax.random.normal(ks[4], (1, in_out), jnp.float32)
    w_out = jax.random.normal(ks[5], (HIDDEN + INTER, HIDDEN),
                              jnp.float32) / math.sqrt(HIDDEN + INTER)
    b_out = 0.01 * jax.random.normal(ks[6], (1, HIDDEN), jnp.float32)
    params = (g, w_in, b_in, w_out, b_out)

    out = jax.block_until_ready(
        femr_encoder_layer(x, time_data, pos_embed, attn_bias, params))
    ref = reference(x, time_data, pos_embed, attn_bias, params)

    assert out.shape == (N, HIDDEN)
    err_max = float(jnp.max(jnp.abs(out - ref)))
    err_mean = float(jnp.mean(jnp.abs(out - ref)))
    # bf16 MXU operands, bf16 attn_bias and approx reciprocals => tolerance
    # looser than pure-f32.
    assert err_mean < 2.5e-2 and jnp.allclose(out, ref, atol=1e-1, rtol=1e-1), \
        f"max abs err = {err_max}, mean abs err = {err_mean}"
    print("KERNEL_OK")
</pallas_src>

<mosaic_0001>
module attributes {stable_mosaic.version = 11 : i64} {
  func.func @proj_kernel(%arg0: i32, %arg1: memref<512x32xf32, #tpu.memory_space<vmem>>, %arg2: memref<512x32xf32, #tpu.memory_space<vmem>>, %arg3: memref<512x32xf32, #tpu.memory_space<vmem>>, %arg4: memref<512x32xf32, #tpu.memory_space<vmem>>, %arg5: memref<1x32xf32, #tpu.memory_space<vmem>>, %arg6: memref<32x224xbf16, #tpu.memory_space<vmem>>, %arg7: memref<1x224xf32, #tpu.memory_space<vmem>>, %arg8: memref<32x32xbf16, #tpu.memory_space<vmem>>, %arg9: memref<512x32xbf16, #tpu.memory_space<vmem>>, %arg10: memref<512x32xbf16, #tpu.memory_space<vmem>>, %arg11: memref<512x32xbf16, #tpu.memory_space<vmem>>, %arg12: memref<512x64xbf16, #tpu.memory_space<vmem>>) attributes {dimension_semantics = [#tpu.dimension_semantics<parallel>], iteration_bounds = array<i64: 1>, scalar_prefetch = 0 : i64, scratch_operands = 0 : i64, tpu.core_type = #tpu.core_type<tc>, window_params = [{transform_indices = @transform_0, window_bounds = array<i64: 512, 32>}, {transform_indices = @transform_1, window_bounds = array<i64: 512, 32>}, {transform_indices = @transform_2, window_bounds = array<i64: 512, 32>}, {transform_indices = @transform_3, window_bounds = array<i64: 512, 32>}, {pipeline_mode = #tpu.pipeline_mode<synchronous>, transform_indices = @transform_4, window_bounds = array<i64: 1, 32>}, {pipeline_mode = #tpu.pipeline_mode<synchronous>, transform_indices = @transform_5, window_bounds = array<i64: 32, 224>}, {pipeline_mode = #tpu.pipeline_mode<synchronous>, transform_indices = @transform_6, window_bounds = array<i64: 1, 224>}, {pipeline_mode = #tpu.pipeline_mode<synchronous>, transform_indices = @transform_7, window_bounds = array<i64: 32, 32>}, {transform_indices = @transform_8, window_bounds = array<i64: 512, 32>}, {transform_indices = @transform_9, window_bounds = array<i64: 512, 32>}, {transform_indices = @transform_10, window_bounds = array<i64: 512, 32>}, {transform_indices = @transform_11, window_bounds = array<i64: 512, 64>}]} {
    %c0 = arith.constant 0 : index
    %c0_0 = arith.constant 0 : index
    %0 = vector.load %arg1[%c0, %c0_0] : memref<512x32xf32, #tpu.memory_space<vmem>>, vector<512x32xf32>
    %1 = arith.mulf %0, %0 : vector<512x32xf32>
    %cst = arith.constant dense<0.000000e+00> : vector<512xf32>
    %2 = vector.multi_reduction <add>, %1, %cst [1] : vector<512x32xf32> to vector<512xf32>
    %3 = vector.shape_cast %2 : vector<512xf32> to vector<512x1xf32>
    %cst_1 = arith.constant 3.200000e+01 : f32
    %4 = vector.broadcast %cst_1 : f32 to vector<512x1xf32>
    %5 = arith.divf %3, %4 : vector<512x1xf32>
    %6 = math.sqrt %5 : vector<512x1xf32>
    %cst_2 = arith.constant 9.99999993E-9 : f32
    %7 = vector.broadcast %cst_2 : f32 to vector<512x1xf32>
    %8 = arith.addf %6, %7 : vector<512x1xf32>
    %9 = tpu.reciprocal %8 {approx = true} : vector<512x1xf32> -> vector<512x1xf32>
    %10 = vector.broadcast %9 : vector<512x1xf32> to vector<512x32xf32>
    %11 = arith.mulf %0, %10 : vector<512x32xf32>
    %c0_3 = arith.constant 0 : index
    %c0_4 = arith.constant 0 : index
    %12 = vector.load %arg5[%c0_3, %c0_4] : memref<1x32xf32, #tpu.memory_space<vmem>>, vector<1x32xf32>
    %13 = vector.broadcast %12 : vector<1x32xf32> to vector<512x32xf32>
    %14 = arith.mulf %11, %13 : vector<512x32xf32>
    %c0_5 = arith.constant 0 : index
    %c0_6 = arith.constant 0 : index
    %15 = vector.load %arg2[%c0_5, %c0_6] : memref<512x32xf32, #tpu.memory_space<vmem>>, vector<512x32xf32>
    %16 = arith.addf %14, %15 : vector<512x32xf32>
    %17 = arith.truncf %16 : vector<512x32xf32> to vector<512x32xbf16>
    %c0_7 = arith.constant 0 : index
    %c0_8 = arith.constant 0 : index
    %18 = vector.load %arg6[%c0_7, %c0_8] : memref<32x224xbf16, #tpu.memory_space<vmem>>, vector<32x224xbf16>
    %cst_9 = arith.constant dense<0.000000e+00> : vector<512x224xf32>
    %19 = tpu.matmul %17, %18, %cst_9 {dimension_numbers = #tpu.dot_dimension_numbers<[1], [0], [0], [1], [0, 0, 1, 1], [], []>} : vector<512x32xbf16>, vector<32x224xbf16>, vector<512x224xf32> -> vector<512x224xf32>
    %c0_10 = arith.constant 0 : index
    %c0_11 = arith.constant 0 : index
    %20 = vector.load %arg7[%c0_10, %c0_11] : memref<1x224xf32, #tpu.memory_space<vmem>>, vector<1x224xf32>
    %21 = vector.broadcast %20 : vector<1x224xf32> to vector<512x224xf32>
    %22 = arith.addf %19, %21 : vector<512x224xf32>
    %23 = vector.extract_strided_slice %22 {offsets = [0, 0], sizes = [512, 128], strides = [1, 1]} : vector<512x224xf32> to vector<512x128xf32>
    %24 = vector.extract_strided_slice %22 {offsets = [0, 128], sizes = [512, 32], strides = [1, 1]} : vector<512x224xf32> to vector<512x32xf32>
    %25 = vector.extract_strided_slice %22 {offsets = [0, 160], sizes = [512, 32], strides = [1, 1]} : vector<512x224xf32> to vector<512x32xf32>
    %26 = vector.extract_strided_slice %22 {offsets = [0, 192], sizes = [512, 32], strides = [1, 1]} : vector<512x224xf32> to vector<512x32xf32>
    %c0_12 = arith.constant 0 : index
    %c0_13 = arith.constant 0 : index
    %27 = vector.load %arg3[%c0_12, %c0_13] : memref<512x32xf32, #tpu.memory_space<vmem>>, vector<512x32xf32>
    %c0_14 = arith.constant 0 : index
    %c0_15 = arith.constant 0 : index
    %28 = vector.load %arg4[%c0_14, %c0_15] : memref<512x32xf32, #tpu.memory_space<vmem>>, vector<512x32xf32>
    %29 = arith.truncf %24 : vector<512x32xf32> to vector<512x32xbf16>
    %c0_16 = arith.constant 0 : index
    %c0_17 = arith.constant 0 : index
    %30 = vector.load %arg8[%c0_16, %c0_17] : memref<32x32xbf16, #tpu.memory_space<vmem>>, vector<32x32xbf16>
    %cst_18 = arith.constant dense<0.000000e+00> : vector<512x32xf32>
    %31 = tpu.matmul %29, %30, %cst_18 {dimension_numbers = #tpu.dot_dimension_numbers<[1], [0], [0], [1], [0, 0, 1, 1], [], []>} : vector<512x32xbf16>, vector<32x32xbf16>, vector<512x32xf32> -> vector<512x32xf32>
    %32 = arith.mulf %24, %28 : vector<512x32xf32>
    %33 = arith.mulf %31, %27 : vector<512x32xf32>
    %34 = arith.addf %32, %33 : vector<512x32xf32>
    %35 = arith.truncf %34 : vector<512x32xf32> to vector<512x32xbf16>
    %c0_19 = arith.constant 0 : index
    %c0_20 = arith.constant 0 : index
    %36 = vector.load %arg9[%c0_19, %c0_20] : memref<512x32xbf16, #tpu.memory_space<vmem>>, vector<512x32xbf16>
    tpu.vector_store %arg9[%c0_19, %c0_20], %35 {strides = array<i32>} : memref<512x32xbf16, #tpu.memory_space<vmem>>, vector<512x32xbf16>,
    %37 = arith.truncf %25 : vector<512x32xf32> to vector<512x32xbf16>
    %c0_21 = arith.constant 0 : index
    %c0_22 = arith.constant 0 : index
    %38 = vector.load %arg8[%c0_21, %c0_22] : memref<32x32xbf16, #tpu.memory_space<vmem>>, vector<32x32xbf16>
    %cst_23 = arith.constant dense<0.000000e+00> : vector<512x32xf32>
    %39 = tpu.matmul %37, %38, %cst_23 {dimension_numbers = #tpu.dot_dimension_numbers<[1], [0], [0], [1], [0, 0, 1, 1], [], []>} : vector<512x32xbf16>, vector<32x32xbf16>, vector<512x32xf32> -> vector<512x32xf32>
    %40 = arith.mulf %25, %28 : vector<512x32xf32>
    %41 = arith.mulf %39, %27 : vector<512x32xf32>
    %42 = arith.addf %40, %41 : vector<512x32xf32>
    %43 = arith.truncf %42 : vector<512x32xf32> to vector<512x32xbf16>
    %c0_24 = arith.constant 0 : index
    %c0_25 = arith.constant 0 : index
    %44 = vector.load %arg10[%c0_24, %c0_25] : memref<512x32xbf16, #tpu.memory_space<vmem>>, vector<512x32xbf16>
    tpu.vector_store %arg10[%c0_24, %c0_25], %43 {strides = array<i32>} : memref<512x32xbf16, #tpu.memory_space<vmem>>, vector<512x32xbf16>,
    %45 = arith.truncf %26 : vector<512x32xf32> to vector<512x32xbf16>
    %c0_26 = arith.constant 0 : index
    %c0_27 = arith.constant 0 : index
    %46 = vector.load %arg11[%c0_26, %c0_27] : memref<512x32xbf16, #tpu.memory_space<vmem>>, vector<512x32xbf16>
    tpu.vector_store %arg11[%c0_26, %c0_27], %45 {strides = array<i32>} : memref<512x32xbf16, #tpu.memory_space<vmem>>, vector<512x32xbf16>,
    %47 = vector.extract_strided_slice %23 {offsets = [0, 0], sizes = [512, 64], strides = [1, 1]} : vector<512x128xf32> to vector<512x64xf32>
    %48 = vector.extract_strided_slice %23 {offsets = [0, 64], sizes = [512, 64], strides = [1, 1]} : vector<512x128xf32> to vector<512x64xf32>
    %49 = arith.negf %47 : vector<512x64xf32>
    %50 = math.exp %49 : vector<512x64xf32>
    %cst_28 = arith.constant 1.000000e+00 : f32
    %51 = vector.broadcast %cst_28 : f32 to vector<512x64xf32>
    %52 = arith.addf %51, %50 : vector<512x64xf32>
    %53 = arith.divf %51, %52 : vector<512x64xf32>
    %54 = arith.mulf %47, %53 : vector<512x64xf32>
    %55 = arith.mulf %54, %48 : vector<512x64xf32>
    %56 = arith.truncf %55 : vector<512x64xf32> to vector<512x64xbf16>
    %c0_29 = arith.constant 0 : index
    %c0_30 = arith.constant 0 : index
    %57 = vector.load %arg12[%c0_29, %c0_30] : memref<512x64xbf16, #tpu.memory_space<vmem>>, vector<512x64xbf16>
    tpu.vector_store %arg12[%c0_29, %c0_30], %56 {strides = array<i32>} : memref<512x64xbf16, #tpu.memory_space<vmem>>, vector<512x64xbf16>,
    return
  }
  func.func @transform_0(%arg0: i32) -> (i32, i32) {
    %c0_i32 = arith.constant 0 : i32
    %c0_i32_0 = arith.constant 0 : i32
    return %arg0, %c0_i32 : i32, i32
  }
  func.func @transform_1(%arg0: i32) -> (i32, i32) {
    %c0_i32 = arith.constant 0 : i32
    %c0_i32_0 = arith.constant 0 : i32
    return %arg0, %c0_i32 : i32, i32
  }
  func.func @transform_2(%arg0: i32) -> (i32, i32) {
    %c0_i32 = arith.constant 0 : i32
    %c0_i32_0 = arith.constant 0 : i32
    return %arg0, %c0_i32 : i32, i32
  }
  func.func @transform_3(%arg0: i32) -> (i32, i32) {
    %c0_i32 = arith.constant 0 : i32
    %c0_i32_0 = arith.constant 0 : i32
    return %arg0, %c0_i32 : i32, i32
  }
  func.func @transform_4(%arg0: i32) -> (i32, i32) {
    %c0_i32 = arith.constant 0 : i32
    %c0_i32_0 = arith.constant 0 : i32
    %c0_i32_1 = arith.constant 0 : i32
    return %c0_i32, %c0_i32_0 : i32, i32
  }
  func.func @transform_5(%arg0: i32) -> (i32, i32) {
    %c0_i32 = arith.constant 0 : i32
    %c0_i32_0 = arith.constant 0 : i32
    %c0_i32_1 = arith.constant 0 : i32
    return %c0_i32, %c0_i32_0 : i32, i32
  }
  func.func @transform_6(%arg0: i32) -> (i32, i32) {
    %c0_i32 = arith.constant 0 : i32
    %c0_i32_0 = arith.constant 0 : i32
    %c0_i32_1 = arith.constant 0 : i32
    return %c0_i32, %c0_i32_0 : i32, i32
  }
  func.func @transform_7(%arg0: i32) -> (i32, i32) {
    %c0_i32 = arith.constant 0 : i32
    %c0_i32_0 = arith.constant 0 : i32
    %c0_i32_1 = arith.constant 0 : i32
    return %c0_i32, %c0_i32_0 : i32, i32
  }
  func.func @transform_8(%arg0: i32) -> (i32, i32) {
    %c0_i32 = arith.constant 0 : i32
    %c0_i32_0 = arith.constant 0 : i32
    return %arg0, %c0_i32 : i32, i32
  }
  func.func @transform_9(%arg0: i32) -> (i32, i32) {
    %c0_i32 = arith.constant 0 : i32
    %c0_i32_0 = arith.constant 0 : i32
    return %arg0, %c0_i32 : i32, i32
  }
  func.func @transform_10(%arg0: i32) -> (i32, i32) {
    %c0_i32 = arith.constant 0 : i32
    %c0_i32_0 = arith.constant 0 : i32
    return %arg0, %c0_i32 : i32, i32
  }
  func.func @transform_11(%arg0: i32) -> (i32, i32) {
    %c0_i32 = arith.constant 0 : i32
    %c0_i32_0 = arith.constant 0 : i32
    return %arg0, %c0_i32 : i32, i32
  }
}

</mosaic_0001>

<bundles_post_ra>
// kernel: tpu_custom_call.1
= control target key start
LH: loop header
LB: loop body
LE: loop exit
PB: predicated region body
PF: predicated region fallthrough
CT: control target
= control target key end

     0   :  { %vm162_vm0 = vcmask 261120   ;;  %s7353_s21 = smov 32   ;;  %s7354_s15 = smov 96   ;;  %s14883_s0 = inlined_call_operand.vmem [shape: f32[512,32], index: 0, kind: input, shape index: {}]   ;;  %s14884_s4 = inlined_call_operand.vmem [shape: f32[1,32], index: 4, kind: input, shape index: {}]   ;;  %s14885_s5 = inlined_call_operand.vmem [shape: bf16[32,224], index: 5, kind: input, shape index: {}]   ;;  %s14886_s1 = inlined_call_operand.vmem [shape: f32[512,32], index: 1, kind: input, shape index: {}]   ;;  %s14887_s3 = inlined_call_operand.vmem [shape: f32[512,32], index: 3, kind: input, shape index: {}]   ;;  %s14888_s7 = inlined_call_operand.vmem [shape: bf16[32,32], index: 7, kind: input, shape index: {}]   ;;  %s14889_s6 = inlined_call_operand.vmem [shape: f32[1,224], index: 6, kind: input, shape index: {}]   ;;  %s14890_s2 = inlined_call_operand.vmem [shape: f32[512,32], index: 2, kind: input, shape index: {}]   ;;  %s14891_s8 = inlined_call_operand.vmem [shape: bf16[512,32], index: 8, kind: output, shape index: {0}]   ;;  %s14892_s10 = inlined_call_operand.vmem [shape: bf16[512,32], index: 10, kind: output, shape index: {2}]   ;;  %s14893_s11 = inlined_call_operand.vmem [shape: bf16[512,64], index: 11, kind: output, shape index: {3}]   ;;  %s14894_s9 = inlined_call_operand.vmem [shape: bf16[512,32], index: 9, kind: output, shape index: {1}]  }
   0x1   :  { %v7419_v0 = vld [vmem:[%s14883_s0 + $0x20] sm:$0xff]  ;;  %v7424_v1 = vld [vmem:[%s14883_s0 + $0x10] sm:$0xff]  ;;  %v7440_v6 = vld [vmem:[%s14883_s0 + $0x28] sm:$0xff]  ;;  %s7355_s23 = smov 64  }
   0x2   :  { %v7429_v2 = vld [vmem:[%s14883_s0] sm:$0xff]  ;;  %v102_v3 = vmul.f32 %v7419_v0, %v7419_v0  ;;  %v100_v4 = vmul.f32 %v7424_v1, %v7424_v1  ;;  %v7445_v7 = vld [vmem:[%s14883_s0 + $0x18] sm:$0xff]  ;;  %v7453_v11 = vld [vmem:[%s14883_s0 + $0x8] sm:$0xff]  ;;  %v103_v12 = vmul.f32 %v7440_v6, %v7440_v6 }
   0x3   :  { %v98_v5 = vmul.f32 %v7429_v2, %v7429_v2  ;;  %v101_v13 = vmul.f32 %v7445_v7, %v7445_v7  ;;  %v99_v14 = vmul.f32 %v7453_v11, %v7453_v11  ;;  %v42_v18 = vld [vmem:[%s14883_s0 + $0x40] sm:$0xff]  ;;  %v41_v19 = vld [vmem:[%s14883_s0 + $0x38] sm:$0xff]  ;;  %v40_v20 = vld [vmem:[%s14883_s0 + $0x30] sm:$0xff] }
   0x4   :  { %v175_v8 = vsel %vm162_vm0, %v102_v3, 0.0  ;;  %v169_v9 = vsel %vm162_vm0, %v100_v4, 0.0  ;;  %v178_v15 = vsel %vm162_vm0, %v103_v12, 0.0  ;;  %v106_v21 = vmul.f32 %v42_v18, %v42_v18  ;;  %v45_v27 = vld [vmem:[%s14883_s0 + $0x58] sm:$0xff]  ;;  %v44_v28 = vld [vmem:[%s14883_s0 + $0x50] sm:$0xff]  ;;  %v43_v29 = vld [vmem:[%s14883_s0 + $0x48] sm:$0xff] }
   0x5   :  { %v163_v10 = vsel %vm162_vm0, %v98_v5, 0.0  ;;  %176 = vadd.xlane.f32.xlu2 %v175_v8  ;;  %170 = vadd.xlane.f32.xlu1 %v169_v9  ;;  %v172_v16 = vsel %vm162_vm0, %v101_v13, 0.0  ;;  %v166_v17 = vsel %vm162_vm0, %v99_v14, 0.0  ;;  %v105_v22 = vmul.f32 %v41_v19, %v41_v19  ;;  %v48_v36 = vld [vmem:[%s14883_s0 + $0x70] sm:$0xff]  ;;  %v47_v37 = vld [vmem:[%s14883_s0 + $0x68] sm:$0xff]  ;;  %v46_v38 = vld [vmem:[%s14883_s0 + $0x60] sm:$0xff] }
   0x6   :  { %164 = vadd.xlane.f32.xlu0 %v163_v10  ;;  %v104_v23 = vmul.f32 %v40_v20, %v40_v20  ;;  %v187_v24 = vsel %vm162_vm0, %v106_v21, 0.0  ;;  %v109_v30 = vmul.f32 %v45_v27, %v45_v27  ;;  %v108_v31 = vmul.f32 %v44_v28, %v44_v28  ;;  %v51_v45 = vld [vmem:[%s14883_s0 + $0x88] sm:$0xff]  ;;  %v50_v46 = vld [vmem:[%s14883_s0 + $0x80] sm:$0xff]  ;;  %v49_v47 = vld [vmem:[%s14883_s0 + $0x78] sm:$0xff] }
   0x7   :  { %v184_v25 = vsel %vm162_vm0, %v105_v22, 0.0  ;;  %v107_v32 = vmul.f32 %v43_v29, %v43_v29  ;;  %v112_v39 = vmul.f32 %v48_v36, %v48_v36  ;;  %v111_v40 = vmul.f32 %v47_v37, %v47_v37  ;;  %v54_v54 = vld [vmem:[%s14883_s0 + $0xa0] sm:$0xff]  ;;  %v53_v55 = vld [vmem:[%s14883_s0 + $0x98] sm:$0xff]  ;;  %v52_v56 = vld [vmem:[%s14883_s0 + $0x90] sm:$0xff] }
   0x8   :  { %v181_v26 = vsel %vm162_vm0, %v104_v23, 0.0  ;;  %v196_v33 = vsel %vm162_vm0, %v109_v30, 0.0  ;;  %v193_v34 = vsel %vm162_vm0, %v108_v31, 0.0  ;;  %v110_v41 = vmul.f32 %v46_v38, %v46_v38  ;;  %v57_v63 = vld [vmem:[%s14883_s0 + $0xb8] sm:$0xff]  ;;  %v56_v3 = vld [vmem:[%s14883_s0 + $0xb0] sm:$0xff]  ;;  %v55_v4 = vld [vmem:[%s14883_s0 + $0xa8] sm:$0xff] }
   0x9   :  { %v190_v35 = vsel %vm162_vm0, %v107_v32, 0.0  ;;  %v205_v42 = vsel %vm162_vm0, %v112_v39, 0.0  ;;  %v202_v43 = vsel %vm162_vm0, %v111_v40, 0.0  ;;  %v115_v48 = vmul.f32 %v51_v45, %v51_v45  ;;  %v60_v14 = vld [vmem:[%s14883_s0 + $0xd0] sm:$0xff]  ;;  %v63_v23 = vld [vmem:[%s14883_s0 + $0xe8] sm:$0xff]  ;;  %v66_v32 = vld [vmem:[%s14883_s0 + $0x100] sm:$0xff] }
   0xa   :  { %v199_v44 = vsel %vm162_vm0, %v110_v41, 0.0  ;;  %v114_v49 = vmul.f32 %v50_v46, %v50_v46  ;;  %v113_v50 = vmul.f32 %v49_v47, %v49_v47  ;;  %v118_v57 = vmul.f32 %v54_v54, %v54_v54  ;;  %v69_v41 = vld [vmem:[%s14883_s0 + $0x118] sm:$0xff] }
   0xb   :  { %v214_v51 = vsel %vm162_vm0, %v115_v48, 0.0  ;;  %v117_v58 = vmul.f32 %v53_v55, %v53_v55  ;;  %v116_v59 = vmul.f32 %v52_v56, %v52_v56  ;;  %v121_v5 = vmul.f32 %v57_v63, %v57_v63  ;;  %v73_v63 = vld [vmem:[%s14883_s0 + $0x138] sm:$0xff] }
   0xc   :  { %v211_v52 = vsel %vm162_vm0, %v114_v49, 0.0  ;;  %v208_v53 = vsel %vm162_vm0, %v113_v50, 0.0  ;;  %v223_v60 = vsel %vm162_vm0, %v118_v57, 0.0  ;;  %v120_v8 = vmul.f32 %v56_v3, %v56_v3  ;;  %v72_v50 = vld [vmem:[%s14883_s0 + $0x130] sm:$0xff] }
   0xd   :  { %179 = vadd.xlane.f32.xlu2 %v178_v15  ;;  %173 = vadd.xlane.f32.xlu1 %v172_v16  ;;  %v220_v61 = vsel %vm162_vm0, %v117_v58, 0.0  ;;  %v217_v62 = vsel %vm162_vm0, %v116_v59, 0.0  ;;  %v119_v9 = vmul.f32 %v55_v4, %v55_v4  ;;  %v232_v10 = vsel %vm162_vm0, %v121_v5, 0.0  ;;  %v59_v15 = vld [vmem:[%s14883_s0 + $0xc8] sm:$0xff]  ;;  %v58_v16 = vld [vmem:[%s14883_s0 + $0xc0] sm:$0xff] }
   0xe   :  { %167 = vadd.xlane.f32.xlu0 %v166_v17  ;;  %v229_v12 = vsel %vm162_vm0, %v120_v8, 0.0  ;;  %v124_v17 = vmul.f32 %v60_v14, %v60_v14  ;;  %v123_v18 = vmul.f32 %v59_v15, %v59_v15  ;;  %v122_v19 = vmul.f32 %v58_v16, %v58_v16  ;;  %v78_v14 = vld [vmem:[%s14883_s0 + $0x160] sm:$0xff]  ;;  %v77_v15 = vld [vmem:[%s14883_s0 + $0x158] sm:$0xff]  ;;  %v76_v16 = vld [vmem:[%s14883_s0 + $0x150] sm:$0xff] }
   0xf   :  { %v226_v13 = vsel %vm162_vm0, %v119_v9, 0.0  ;;  %v136_v54 = vmul.f32 %v72_v50, %v72_v50  ;;  %v137_v8 = vmul.f32 %v73_v63, %v73_v63  ;;  %v6444_v50 = vld [vmem:[%s14885_s5 + $0x10] sm:$0xf] }
  0x10   :  { %v241_v20 = vsel %vm162_vm0, %v124_v17, 0.0  ;;  %v238_v21 = vsel %vm162_vm0, %v123_v18, 0.0  ;;  %v235_v22 = vsel %vm162_vm0, %v122_v19, 0.0  ;;  %v142_v17 = vmul.f32 %v78_v14, %v78_v14 }
  0x11   :  { %v277_v57 = vsel %vm162_vm0, %v136_v54, 0.0  ;;  %v141_v18 = vmul.f32 %v77_v15, %v77_v15 }
  0x15   :  { %188 = vadd.xlane.f32.xlu2 %v187_v24  ;;  %185 = vadd.xlane.f32.xlu1 %v184_v25  ;;  %v62_v24 = vld [vmem:[%s14883_s0 + $0xe0] sm:$0xff]  ;;  %v61_v25 = vld [vmem:[%s14883_s0 + $0xd8] sm:$0xff] }
  0x16   :  { %182 = vadd.xlane.f32.xlu0 %v181_v26  ;;  %v127_v26 = vmul.f32 %v63_v23, %v63_v23  ;;  %v126_v27 = vmul.f32 %v62_v24, %v62_v24  ;;  %v125_v28 = vmul.f32 %v61_v25, %v61_v25  ;;  %v81_v25 = vld [vmem:[%s14883_s0 + $0x178] sm:$0xff] }
  0x18   :  { %v250_v29 = vsel %vm162_vm0, %v127_v26, 0.0  ;;  %v247_v30 = vsel %vm162_vm0, %v126_v27, 0.0  ;;  %v244_v31 = vsel %vm162_vm0, %v125_v28, 0.0  ;;  %v80_v26 = vld [vmem:[%s14883_s0 + $0x170] sm:$0xff]  ;;  %v79_v27 = vld [vmem:[%s14883_s0 + $0x168] sm:$0xff] }
  0x1d   :  { %197 = vadd.xlane.f32.xlu2 %v196_v33  ;;  %194 = vadd.xlane.f32.xlu1 %v193_v34  ;;  %v65_v33 = vld [vmem:[%s14883_s0 + $0xf8] sm:$0xff]  ;;  %v64_v34 = vld [vmem:[%s14883_s0 + $0xf0] sm:$0xff] }
  0x1e   :  { %191 = vadd.xlane.f32.xlu0 %v190_v35  ;;  %v130_v35 = vmul.f32 %v66_v32, %v66_v32  ;;  %v129_v36 = vmul.f32 %v65_v33, %v65_v33  ;;  %v128_v37 = vmul.f32 %v64_v34, %v64_v34 }
  0x20   :  { %v259_v38 = vsel %vm162_vm0, %v130_v35, 0.0  ;;  %v256_v39 = vsel %vm162_vm0, %v129_v36, 0.0  ;;  %v253_v40 = vsel %vm162_vm0, %v128_v37, 0.0 }
  0x25   :  { %206 = vadd.xlane.f32.xlu2 %v205_v42  ;;  %203 = vadd.xlane.f32.xlu1 %v202_v43  ;;  %v68_v42 = vld [vmem:[%s14883_s0 + $0x110] sm:$0xff]  ;;  %v67_v43 = vld [vmem:[%s14883_s0 + $0x108] sm:$0xff] }
  0x26   :  { %200 = vadd.xlane.f32.xlu0 %v199_v44  ;;  %v133_v44 = vmul.f32 %v69_v41, %v69_v41  ;;  %v132_v45 = vmul.f32 %v68_v42, %v68_v42  ;;  %v131_v46 = vmul.f32 %v67_v43, %v67_v43  ;;  %v83_v41 = vld [vmem:[%s14883_s0 + $0x188] sm:$0xff]  ;;  %v82_v42 = vld [vmem:[%s14883_s0 + $0x180] sm:$0xff] }
  0x28   :  { %v268_v47 = vsel %vm162_vm0, %v133_v44, 0.0  ;;  %v265_v48 = vsel %vm162_vm0, %v132_v45, 0.0  ;;  %v262_v49 = vsel %vm162_vm0, %v131_v46, 0.0  ;;  %v147_v44 = vmul.f32 %v83_v41, %v83_v41 }
  0x29   :  { %v146_v45 = vmul.f32 %v82_v42, %v82_v42 }
  0x2d   :  { %215 = vadd.xlane.f32.xlu2 %v214_v51  ;;  %212 = vadd.xlane.f32.xlu1 %v211_v52  ;;  %v71_v51 = vld [vmem:[%s14883_s0 + $0x128] sm:$0xff]  ;;  %v70_v52 = vld [vmem:[%s14883_s0 + $0x120] sm:$0xff] }
  0x2e   :  { %209 = vadd.xlane.f32.xlu0 %v208_v53  ;;  %v7352_v53 = vmov 32.0   ;;  %v135_v55 = vmul.f32 %v71_v51, %v71_v51  ;;  %v134_v56 = vmul.f32 %v70_v52, %v70_v52  ;;  %v6661_v51 = vld [vmem:[%s14885_s5 + $0x14] sm:$0xf0]  ;;  %v6660_v52 = vld [vmem:[%s14885_s5 + $0x14] sm:$0xf] }
  0x2f   :  { %6671 = vrcp.f32 %v7352_v53 }
  0x30   :  { %v274_v58 = vsel %vm162_vm0, %v135_v55, 0.0 }
  0x35   :  { %224 = vadd.xlane.f32.xlu2 %v223_v60  ;;  %221 = vadd.xlane.f32.xlu1 %v220_v61  ;;  %v6672_v59 = vpop.eup %6671  ;;  %v271_v60 = vsel %vm162_vm0, %v134_v56, 0.0  ;;  %v75_v61 = vld [vmem:[%s14883_s0 + $0x148] sm:$0xff]  ;;  %v310_v56 = vsel %vm162_vm0, %v147_v44, 0.0 }
  0x36   :  { %218 = vadd.xlane.f32.xlu0 %v217_v62  ;;  %v74_v62 = vld [vmem:[%s14883_s0 + $0x140] sm:$0xff]  ;;  %v139_v3 = vmul.f32 %v75_v61, %v75_v61  ;;  %v356_v5 = vmul.f32 32.0, %v6672_v59  ;;  %vm360_vm1 = vweird.f32 %v6672_v59 }
  0x37   :  { %v138_v4 = vmul.f32 %v74_v62, %v74_v62  ;;  %v307_v62 = vsel %vm162_vm0, %v146_v45, 0.0 }
  0x38   :  { %v286_v9 = vsel %vm162_vm0, %v139_v3, 0.0 }
  0x3d   :  { %233 = vadd.xlane.f32.xlu2 %v232_v10  ;;  %230 = vadd.xlane.f32.xlu1 %v229_v12  ;;  %v283_v10 = vsel %vm162_vm0, %v138_v4, 0.0  ;;  %v357_v12 = vsub.f32 1.0, %v356_v5  ;;  %v85_v4 = vld [vmem:[%s14883_s0 + $0x198] sm:$0xff] }
  0x3e   :  { %227 = vadd.xlane.f32.xlu0 %v226_v13  ;;  %v280_v13 = vsel %vm162_vm0, %v137_v8, 0.0 }
  0x3f   :  { %v358_v19 = vmul.f32 %v6672_v59, %v357_v12  ;;  %v6658_v12 = vld [vmem:[%s14885_s5 + $0x4] sm:$0xf] }
  0x41   :  { %v359_v23 = vadd.f32 %v6672_v59, %v358_v19 }
  0x43   :  { %v7629_v28 = vsel %vm360_vm1, %v6672_v59, %v359_v23  ;;  %v6445_v59 = vor.u32 %v6661_v51, %v6444_v50 }
  0x45   :  { %242 = vadd.xlane.f32.xlu2 %v241_v20  ;;  %239 = vadd.xlane.f32.xlu1 %v238_v21  ;;  %v140_v20 = vmul.f32 %v76_v16, %v76_v16  ;;  %v295_v21 = vsel %vm162_vm0, %v142_v17, 0.0  ;;  %v6438_v16 = vld [vmem:[%s14885_s5 + $0x8] sm:$0xf0] }
  0x46   :  { %236 = vadd.xlane.f32.xlu0 %v235_v22  ;;  %v292_v22 = vsel %vm162_vm0, %v141_v18, 0.0  ;;  %1746 = vmatpush.bf16.msra.mxu0 %v6445_v59  ;;  %v149_v18 = vmul.f32 %v85_v4, %v85_v4  ;;  %v6441_v19 = vor.u32 %v6658_v12, %v6438_v16  ;;  %v93_v59 = vld [vmem:[%s14883_s0 + $0x1d8] sm:$0xff] }
  0x47   :  { %v289_v24 = vsel %vm162_vm0, %v140_v20, 0.0  ;;  %v157_v12 = vmul.f32 %v93_v59, %v93_v59 }
  0x4d   :  { %251 = vadd.xlane.f32.xlu2 %v250_v29  ;;  %248 = vadd.xlane.f32.xlu1 %v247_v30  ;;  %v145_v29 = vmul.f32 %v81_v25, %v81_v25  ;;  %v144_v30 = vmul.f32 %v80_v26, %v80_v26 }
  0x4e   :  { %245 = vadd.xlane.f32.xlu0 %v244_v31  ;;  %v143_v31 = vmul.f32 %v79_v27, %v79_v27 }
  0x4f   :  { %v304_v37 = vsel %vm162_vm0, %v145_v29, 0.0 }
  0x55   :  { %260 = vadd.xlane.f32.xlu2 %v259_v38  ;;  %257 = vadd.xlane.f32.xlu1 %v256_v39  ;;  %v301_v38 = vsel %vm162_vm0, %v144_v30, 0.0  ;;  %v298_v39 = vsel %vm162_vm0, %v143_v31, 0.0  ;;  %v90_v30 = vld [vmem:[%s14883_s0 + $0x1c0] sm:$0xff] }
  0x56   :  { %254 = vadd.xlane.f32.xlu0 %v253_v40  ;;  %v84_v40 = vld [vmem:[%s14883_s0 + $0x190] sm:$0xff]  ;;  %v154_v42 = vmul.f32 %v90_v30, %v90_v30 }
  0x57   :  { %v148_v43 = vmul.f32 %v84_v40, %v84_v40 }
  0x59   :  { %v313_v55 = vsel %vm162_vm0, %v148_v43, 0.0 }
  0x5d   :  { %269 = vadd.xlane.f32.xlu2 %v268_v47  ;;  %266 = vadd.xlane.f32.xlu1 %v265_v48 }
  0x5e   :  { %263 = vadd.xlane.f32.xlu0 %v262_v49 }
  0x65   :  { %278 = vadd.xlane.f32.xlu2 %v277_v57  ;;  %275 = vadd.xlane.f32.xlu1 %v274_v58  ;;  %v87_v57 = vld [vmem:[%s14883_s0 + $0x1a8] sm:$0xff]  ;;  %v86_v58 = vld [vmem:[%s14883_s0 + $0x1a0] sm:$0xff] }
  0x66   :  { %272 = vadd.xlane.f32.xlu0 %v271_v60  ;;  %v6446_v60 = vld [vmem:[%s14885_s5 + $0x18] sm:$0xf0]  ;;  %v151_v5 = vmul.f32 %v87_v57, %v87_v57  ;;  %v150_v8 = vmul.f32 %v86_v58, %v86_v58 }
  0x67   :  { %v6449_v63 = vor.u32 %v6660_v52, %v6446_v60 }
  0x68   :  { %v322_v27 = vsel %vm162_vm0, %v151_v5, 0.0  ;;  %v319_v29 = vsel %vm162_vm0, %v150_v8, 0.0 }
  0x69   :  { %1915 = vmatpush.bf16.msra.mxu1 %v6449_v63  ;;  %v92_v63 = vld [vmem:[%s14883_s0 + $0x1d0] sm:$0xff] }
  0x6d   :  { %287 = vadd.xlane.f32.xlu2 %v286_v9  ;;  %284 = vadd.xlane.f32.xlu1 %v283_v10  ;;  %v6436_v9 = vld [vmem:[%s14885_s5] sm:$0xf]  ;;  %v6659_v10 = vld [vmem:[%s14885_s5 + $0x4] sm:$0xf0] }
  0x6e   :  { %281 = vadd.xlane.f32.xlu0 %v280_v13  ;;  %v6437_v15 = vor.u32 %v6659_v10, %v6436_v9  ;;  %1916 = vmatpush.bf16.msra.mxu1 %v6441_v19 }
  0x70   :  { %1747 = vmatpush.bf16.msra.mxu0 %v6437_v15  ;;  %v156_v15 = vmul.f32 %v92_v63, %v92_v63 }
  0x75   :  { %296 = vadd.xlane.f32.xlu2 %v295_v21  ;;  %293 = vadd.xlane.f32.xlu1 %v292_v22 }
  0x76   :  { %290 = vadd.xlane.f32.xlu0 %v289_v24 }
  0x78   :  { %v7631_v32 = vpop.xlane.xlu2 %176  ;;  %v171_v33 = vpop.xlane.xlu1 %170 }
  0x79   :  { %v7634_v34 = vmul.f32 %v7629_v28, %v171_v33  ;;  %v165_v35 = vpop.xlane.xlu0 %164  ;;  %v7711_v23 = vmul.f32 %v7629_v28, %v7631_v32 }
  0x7a   :  { %v7637_v36 = vmul.f32 %v7629_v28, %v165_v35  ;;  %v316_v35 = vsel %vm162_vm0, %v149_v18, 0.0 }
  0x7b   :  { %6673 = vrsqrt.f32 %v7634_v34  ;;  %vm457_vm7 = vcmp.eq.f32.partialorder %v7634_v34, inf  ;;  %vm459_vm9 = vcmp.eq.f32.partialorder %v7634_v34, 0.0  ;;  %vm481_vm11 = vcmp.eq.f32.partialorder %v7711_v23, inf }
  0x7c   :  { %6675 = vrsqrt.f32 %v7637_v36  ;;  %vm433_vm2 = vcmp.eq.f32.partialorder %v7637_v36, inf  ;;  %v436_v50 = vand.u32 2147483648, %v7637_v36  ;;  %vm435_vm3 = vcmp.eq.f32.partialorder %v7637_v36, 0.0 }
  0x7d   :  { %305 = vadd.xlane.f32.xlu2 %v304_v37  ;;  %302 = vadd.xlane.f32.xlu1 %v301_v38  ;;  %v89_v37 = vld [vmem:[%s14883_s0 + $0x1b8] sm:$0xff]  ;;  %vm483_vm13 = vcmp.eq.f32.partialorder %v7711_v23, 0.0 }
  0x7e   :  { %299 = vadd.xlane.f32.xlu0 %v298_v39  ;;  %v88_v39 = vld [vmem:[%s14883_s0 + $0x1b0] sm:$0xff]  ;;  %v153_v45 = vmul.f32 %v89_v37, %v89_v37 }
  0x80   :  { %v180_v46 = vpop.xlane.xlu2 %179  ;;  %v174_v47 = vpop.xlane.xlu1 %173 }
  0x81   :  { %v7654_v48 = vmul.f32 %v7629_v28, %v174_v47  ;;  %v168_v49 = vpop.xlane.xlu0 %167  ;;  %v7665_v53 = vpop.eup %6673  ;;  %v7703_v17 = vmul.f32 %v7629_v28, %v180_v46 }
  0x82   :  { %v7668_v54 = vmul.f32 %v7629_v28, %v168_v49  ;;  %v6676_v61 = vpop.eup %6675  ;;  %v451_v13 = vmul.f32 %v7665_v53, %v7634_v34  ;;  %v152_v49 = vmul.f32 %v88_v39, %v88_v39  ;;  %v96_v39 = vld [vmem:[%s14883_s0 + $0x1f0] sm:$0xff] }
  0x83   :  { %v427_v3 = vmul.f32 %v6676_v61, %v7637_v36  ;;  %6677 = vrsqrt.f32 %v7654_v48  ;;  %vm469_vm6 = vcmp.eq.f32.partialorder %v7654_v48, inf  ;;  %vm471_vm8 = vcmp.eq.f32.partialorder %v7654_v48, 0.0 }
  0x84   :  { %6679 = vrsqrt.f32 %v7668_v54  ;;  %v452_v26 = vmul.f32 %v7665_v53, %v451_v13  ;;  %v325_v8 = vsel %vm162_vm0, %v152_v49, 0.0  ;;  %vm445_vm4 = vcmp.eq.f32.partialorder %v7668_v54, inf }
  0x85   :  { %314 = vadd.xlane.f32.xlu2 %v313_v55  ;;  %311 = vadd.xlane.f32.xlu1 %v310_v56  ;;  %v428_v14 = vmul.f32 %v6676_v61, %v427_v3  ;;  %6681 = vrsqrt.f32 %v7703_v17  ;;  %vm447_vm5 = vcmp.eq.f32.partialorder %v7668_v54, 0.0  ;;  %v472_v49 = vand.u32 2147483648, %v7654_v48 }
  0x86   :  { %308 = vadd.xlane.f32.xlu0 %v307_v62  ;;  %6683 = vrsqrt.f32 %v7711_v23  ;;  %v453_v43 = vmul.f32 0.5, %v452_v26  ;;  %v328_v62 = vsel %vm162_vm0, %v153_v45, 0.0  ;;  %vm493_vm10 = vcmp.eq.f32.partialorder %v7703_v17, inf }
  0x87   :  { %v429_v20 = vmul.f32 0.5, %v428_v14  ;;  %vm495_vm12 = vcmp.eq.f32.partialorder %v7703_v17, 0.0 }
  0x88   :  { %v7705_v21 = vpop.xlane.xlu2 %188  ;;  %v7707_v22 = vpop.xlane.xlu1 %185  ;;  %v454_v4 = vsub.f32 1.5, %v453_v43 }
  0x89   :  { %v183_v24 = vpop.xlane.xlu0 %182  ;;  %v6678_v25 = vpop.eup %6677  ;;  %v430_v31 = vsub.f32 1.5, %v429_v20 }
  0x8a   :  { %v6680_v33 = vpop.eup %6679  ;;  %v463_v32 = vmul.f32 %v6678_v25, %v7654_v48  ;;  %v7762_v20 = vmul.f32 %v7629_v28, %v183_v24 }
  0x8b   :  { %v439_v38 = vmul.f32 %v6680_v33, %v7668_v54  ;;  %v431_v40 = vmul.f32 %v6676_v61, %v430_v31  ;;  %v7739_v57 = vpop.eup %6681  ;;  %v331_v61 = vsel %vm162_vm0, %v154_v42, 0.0 }
  0x8c   :  { %v464_v41 = vmul.f32 %v6678_v25, %v463_v32  ;;  %v7754_v5 = vpop.eup %6683  ;;  %v487_v10 = vmul.f32 %v7739_v57, %v7703_v17  ;;  %vm505_vm14 = vcmp.eq.f32.partialorder %v7762_v20, inf  ;;  %vm507_vm1 = vcmp.eq.f32.partialorder %v7762_v20, 0.0 }
  0x8d   :  { %323 = vadd.xlane.f32.xlu2 %v322_v27  ;;  %320 = vadd.xlane.f32.xlu1 %v319_v29  ;;  %v440_v44 = vmul.f32 %v6680_v33, %v439_v38  ;;  %v432_v46 = vmul.f32 %v431_v40, %v7637_v36  ;;  %v475_v19 = vmul.f32 %v7754_v5, %v7711_v23 }
  0x8e   :  { %317 = vadd.xlane.f32.xlu0 %v316_v35  ;;  %v465_v47 = vmul.f32 0.5, %v464_v41  ;;  %v455_v27 = vmul.f32 %v7665_v53, %v454_v4  ;;  %v7768_v29 = vmul.f32 %v7629_v28, %v7707_v22  ;;  %v488_v30 = vmul.f32 %v7739_v57, %v487_v10 }
  0x8f   :  { %v441_v51 = vmul.f32 0.5, %v440_v44  ;;  %v434_v56 = vsel %vm433_vm2, %v7637_v36, %v432_v46  ;;  %v91_v36 = vld [vmem:[%s14883_s0 + $0x1c8] sm:$0xff]  ;;  %v340_v22 = vsel %vm162_vm0, %v157_v12, 0.0  ;;  %v337_v35 = vsel %vm162_vm0, %v156_v15, 0.0  ;;  %v94_v44 = vld [vmem:[%s14883_s0 + $0x1e0] sm:$0xff] }
  0x90   :  { %v7733_v52 = vpop.xlane.xlu2 %197  ;;  %v7735_v55 = vpop.xlane.xlu1 %194  ;;  %v437_v60 = vsel %vm435_vm3, %v436_v50, %v434_v56  ;;  %v466_v9 = vsub.f32 1.5, %v465_v47  ;;  %v155_v16 = vmul.f32 %v91_v36, %v91_v36  ;;  %v476_v38 = vmul.f32 %v7754_v5, %v475_v19 }
  0x91   :  { %v7741_v58 = vpop.xlane.xlu0 %191  ;;  %v442_v3 = vsub.f32 1.5, %v441_v51  ;;  %v1194_v14 = vadd.f32 1e-08, %v437_v60  ;;  %v456_v41 = vmul.f32 %v455_v27, %v7634_v34  ;;  %v489_v43 = vmul.f32 0.5, %v488_v30 }
  0x92   :  { %v467_v18 = vmul.f32 %v6678_v25, %v466_v9  ;;  %v448_v25 = vand.u32 2147483648, %v7668_v54  ;;  %v334_v42 = vsel %vm162_vm0, %v155_v16, 0.0  ;;  %v160_v46 = vmul.f32 %v96_v39, %v96_v39 }
  0x93   :  { %v443_v13 = vmul.f32 %v6680_v33, %v442_v3  ;;  %6685 = vrcp.f32 %v1194_v14  ;;  %v477_v51 = vmul.f32 0.5, %v476_v38  ;;  %v458_v56 = vsel %vm457_vm7, %v7634_v34, %v456_v41 }
  0x94   :  { %v468_v53 = vmul.f32 %v467_v18, %v7654_v48  ;;  %6687 = vrsqrt.f32 %v7762_v20  ;;  %v158_v59 = vmul.f32 %v94_v44, %v94_v44  ;;  %v460_v60 = vand.u32 2147483648, %v7634_v34 }
  0x95   :  { %332 = vadd.xlane.f32.xlu2 %v331_v61  ;;  %329 = vadd.xlane.f32.xlu1 %v328_v62  ;;  %v444_v26 = vmul.f32 %v443_v13, %v7668_v54  ;;  %6689 = vrsqrt.f32 %v7768_v29  ;;  %v490_v3 = vsub.f32 1.5, %v489_v43  ;;  %v349_v12 = vsel %vm162_vm0, %v160_v46, 0.0 }
  0x96   :  { %326 = vadd.xlane.f32.xlu0 %v325_v8  ;;  %v470_v45 = vsel %vm469_vm6, %v7654_v48, %v468_v53  ;;  %v7820_v48 = vld [vmem:[%s14884_s4] ss:$0 sm:$0xff]  ;;  %v461_v10 = vsel %vm459_vm9, %v460_v60, %v458_v56  ;;  %v478_v15 = vsub.f32 1.5, %v477_v51  ;;  %v343_v16 = vsel %vm162_vm0, %v158_v59, 0.0  ;;  %v1455_v53 = vld [vmem:[%s14886_s1 + $0x8] sm:$0xff] }
  0x97   :  { %v446_v33 = vsel %vm445_vm4, %v7668_v54, %v444_v26  ;;  %v95_v54 = vld [vmem:[%s14883_s0 + $0x1e8] sm:$0xff]  ;;  %v473_v61 = vsel %vm471_vm8, %v472_v49, %v470_v45  ;;  %v1196_v26 = vadd.f32 1e-08, %v461_v10  ;;  %v491_v27 = vmul.f32 %v7739_v57, %v490_v3 }
  0x98   :  { %v7774_v31 = vpop.xlane.xlu2 %206  ;;  %v7776_v24 = vpop.xlane.xlu1 %203  ;;  %v449_v37 = vsel %vm447_vm5, %v448_v25, %v446_v33  ;;  %v159_v47 = vmul.f32 %v95_v54, %v95_v54  ;;  %v1197_v14 = vadd.f32 1e-08, %v473_v61  ;;  %v1454_v33 = vld [vmem:[%s14886_s1] sm:$0xff]  ;;  %v484_v51 = vand.u32 2147483648, %v7711_v23 }
  0x99   :  { %v7780_v32 = vpop.xlane.xlu0 %200  ;;  %v1195_v40 = vadd.f32 1e-08, %v449_v37  ;;  %v6686_v50 = vpop.eup %6685  ;;  %vm517_vm15 = vcmp.eq.f32.partialorder %v7768_v29, inf  ;;  %vm519_vm2 = vcmp.eq.f32.partialorder %v7768_v29, 0.0 }
  0x9a   :  { %v7805_v62 = vpop.eup %6687  ;;  %v1322_v9 = vmul.f32 %v6686_v50, %v7429_v2  ;;  %v346_v13 = vsel %vm162_vm0, %v159_v47, 0.0  ;;  %v97_v2 = vld [vmem:[%s14883_s0 + $0x1f8] sm:$0xff]  ;;  %v496_v47 = vand.u32 2147483648, %v7703_v17 }
  0x9b   :  { %6691 = vrcp.f32 %v1195_v40  ;;  %v7812_v4 = vpop.eup %6689  ;;  %v499_v34 = vmul.f32 %v7805_v62, %v7762_v20  ;;  %v492_v40 = vmul.f32 %v491_v27, %v7703_v17 }
  0x9c   :  { %v511_v19 = vmul.f32 %v7812_v4, %v7768_v29  ;;  %v1390_v30 = vmul.f32 %v7820_v48, %v1322_v9  ;;  %6693 = vrcp.f32 %v1197_v14 }
  0x9d   :  { %341 = vadd.xlane.f32.xlu2 %v340_v22  ;;  %338 = vadd.xlane.f32.xlu1 %v337_v35  ;;  %v161_v22 = vmul.f32 %v97_v2, %v97_v2  ;;  %v479_v35 = vmul.f32 %v7754_v5, %v478_v15  ;;  %v500_v57 = vmul.f32 %v7805_v62, %v499_v34  ;;  %6695 = vrcp.f32 %v1196_v26 }
  0x9e   :  { %335 = vadd.xlane.f32.xlu0 %v334_v42  ;;  %v512_v38 = vmul.f32 %v7812_v4, %v511_v19  ;;  %v7856_v5 = vmul.f32 %v7629_v28, %v7705_v21  ;;  %v1518_v42 = vadd.f32 %v1454_v33, %v1390_v30  ;;  %v494_v50 = vsel %vm493_vm10, %v7703_v17, %v492_v40 }
  0x9f   :  { %v352_v43 = vsel %vm162_vm0, %v161_v22, 0.0  ;;  %v480_v44 = vmul.f32 %v479_v35, %v7711_v23  ;;  %v501_v45 = vmul.f32 0.5, %v500_v57  ;;  %v497_v61 = vsel %vm495_vm12, %v496_v47, %v494_v50 }
  0xa0   :  { %v7807_v63 = vpop.xlane.xlu2 %215  ;;  %v7809_v36 = vpop.xlane.xlu1 %212  ;;  %v513_v49 = vmul.f32 0.5, %v512_v38  ;;  %v1199_v34 = vadd.f32 1e-08, %v497_v61  ;;  %v7906_v30 = vmul.f32 %v7629_v28, %v7733_v52  ;;  %v508_v38 = vand.u32 2147483648, %v7762_v20 }
  0xa1   :  { %v7814_v8 = vpop.xlane.xlu0 %209  ;;  %v6692_v18 = vpop.eup %6691  ;;  %v482_v59 = vsel %vm481_vm11, %v7711_v23, %v480_v44  ;;  %v502_v3 = vsub.f32 1.5, %v501_v45  ;;  %v520_v47 = vand.u32 2147483648, %v7768_v29  ;;  %vm529_vm4 = vcmp.eq.f32.partialorder %v7856_v5, inf }
  0xa2   :  { %v1323_v25 = vmul.f32 %v6692_v18, %v7453_v11  ;;  %v7845_v11 = vmul.f32 %v7629_v28, %v7741_v58  ;;  %v6694_v21 = vpop.eup %6693  ;;  %v514_v10 = vsub.f32 1.5, %v513_v49  ;;  %v485_v15 = vsel %vm483_vm13, %v484_v51, %v482_v59  ;;  %v1457_v18 = vld [vmem:[%s14886_s1 + $0x18] sm:$0xff]  ;;  %v2142_v51 = vld [vmem:[%s14887_s3] sm:$0xff] }
  0xa3   :  { %v6696_v56 = vpop.eup %6695  ;;  %v1325_v60 = vmul.f32 %v6694_v21, %v7445_v7  ;;  %v503_v7 = vmul.f32 %v7805_v62, %v502_v3  ;;  %v1198_v19 = vadd.f32 1e-08, %v485_v15  ;;  %v1456_v62 = vld [vmem:[%s14886_s1 + $0x10] sm:$0xff]  ;;  %vm531_vm5 = vcmp.eq.f32.partialorder %v7856_v5, 0.0 }
  0xa4   :  { %v1391_v37 = vmul.f32 %v7820_v48, %v1323_v25  ;;  %6697 = vrsqrt.f32 %v7845_v11  ;;  %v1324_v14 = vmul.f32 %v6696_v56, %v7424_v1  ;;  %v515_v26 = vmul.f32 %v7812_v4, %v514_v10 }
  0xa5   :  { %350 = vadd.xlane.f32.xlu2 %v349_v12  ;;  %347 = vadd.xlane.f32.xlu1 %v346_v13  ;;  %6699 = vrsqrt.f32 %v7856_v5  ;;  %v1393_v23 = vmul.f32 %v7820_v48, %v1325_v60  ;;  %v7899_v25 = vmul.f32 %v7629_v28, %v7735_v55  ;;  %v504_v4 = vmul.f32 %v503_v7, %v7762_v20 }
  0xa6   :  { %344 = vadd.xlane.f32.xlu0 %v343_v16  ;;  %v1519_v58 = vadd.f32 %v1455_v53, %v1391_v37  ;;  %v1392_v1 = vmul.f32 %v7820_v48, %v1324_v14  ;;  %6701 = vrcp.f32 %v1199_v34  ;;  %v516_v55 = vmul.f32 %v515_v26, %v7768_v29 }
  0xa7   :  { %v1521_v33 = vadd.f32 %v1457_v18, %v1393_v23  ;;  %6703 = vrcp.f32 %v1198_v19  ;;  %v2147_v18 = vld [vmem:[%s14887_s3 + $0x28] sm:$0xff]  ;;  %vm541_vm3 = vcmp.eq.f32.partialorder %v7845_v11, inf  ;;  %vm543_vm6 = vcmp.eq.f32.partialorder %v7845_v11, 0.0 }
  0xa8   :  { %v7849_v39 = vpop.xlane.xlu2 %224  ;;  %v7851_v54 = vpop.xlane.xlu1 %221  ;;  %v1582_v46 = vpack.c.bf16 %v1519_v58, %v1518_v42  ;;  %v1520_v37 = vadd.f32 %v1456_v62, %v1392_v1  ;;  %6705 = vrsqrt.f32 %v7899_v25  ;;  %v2143_v42 = vld [vmem:[%s14887_s3 + $0x8] sm:$0xff]  ;;  %v2144_v58 = vld [vmem:[%s14887_s3 + $0x10] sm:$0xff]  ;;  %v7971_v1 = vmul.f32 %v7629_v28, %v7776_v24 }
  0xa9   :  { %v7858_v41 = vpop.xlane.xlu0 %218  ;;  %6707 = vrsqrt.f32 %v7906_v30  ;;  %v1459_v19 = vld [vmem:[%s14886_s1 + $0x28] sm:$0xff]  ;;  %v7976_v62 = vmul.f32 %v7629_v28, %v7780_v32  ;;  %vm565_vm7 = vcmp.eq.f32.partialorder %v7906_v30, inf  ;;  %vm553_vm8 = vcmp.eq.f32.partialorder %v7899_v25, inf }
  0xaa   :  { %6450 = vmatmul.msk.bf16.vlgmr.msra.gmra.mxu0 %vm162_vm0, %v1582_v46  ;;  %6482 = vmatmul.msk.bf16.vlgmr.msra.gmra.mxu1 %vm162_vm0, %v1582_v46  ;;  %v7879_v12 = vpop.eup %6697  ;;  %v1583_v40 = vpack.c.bf16 %v1521_v33, %v1520_v37  ;;  %v518_v46 = vsel %vm517_vm15, %v7768_v29, %v516_v55  ;;  %v1458_v33 = vld [vmem:[%s14886_s1 + $0x20] sm:$0xff]  ;;  %vm567_vm9 = vcmp.eq.f32.partialorder %v7906_v30, 0.0  ;;  %vm555_vm10 = vcmp.eq.f32.partialorder %v7899_v25, 0.0 }
  0xab   :  { %v7884_v16 = vpop.eup %6699  ;;  %v535_v2 = vmul.f32 %v7879_v12, %v7845_v11  ;;  %v521_v59 = vsel %vm519_vm2, %v520_v47, %v518_v46  ;;  %v544_v46 = vand.u32 2147483648, %v7845_v11  ;;  %vm577_vm11 = vcmp.eq.f32.partialorder %v7976_v62, inf }
  0xac   :  { %v523_v27 = vmul.f32 %v7884_v16, %v7856_v5  ;;  %v6702_v44 = vpop.eup %6701  ;;  %v1201_v34 = vadd.f32 1e-08, %v521_v59  ;;  %v7185_v59 = vld [vmem:[%s14883_s0 + $0x30] sm:$0xff]  ;;  %vm589_vm12 = vcmp.eq.f32.partialorder %v7971_v1, inf  ;;  %vm579_vm13 = vcmp.eq.f32.partialorder %v7976_v62, 0.0 }
  0xad   :  { %v536_v53 = vmul.f32 %v7879_v12, %v535_v2  ;;  %v6704_v21 = vpop.eup %6703  ;;  %v1327_v56 = vmul.f32 %v6702_v44, %v7440_v6  ;;  %v2146_v2 = vld [vmem:[%s14887_s3 + $0x20] sm:$0xff]  ;;  %v2149_v44 = vld [vmem:[%s14887_s3 + $0x38] sm:$0xff] }
  0xae   :  { %353 = vadd.xlane.f32.xlu0 %v352_v43  ;;  %v524_v52 = vmul.f32 %v7884_v16, %v523_v27  ;;  %v506_v43 = vsel %vm505_vm14, %v7762_v20, %v504_v4  ;;  %v7942_v20 = vpop.eup %6705  ;;  %v1326_v29 = vmul.f32 %v6704_v21, %v7419_v0  ;;  %vm591_vm14 = vcmp.eq.f32.partialorder %v7971_v1, 0.0 }
  0xaf   :  { %v537_v45 = vmul.f32 0.5, %v536_v53  ;;  %v509_v50 = vsel %vm507_vm1, %v508_v38, %v506_v43  ;;  %v7948_v10 = vpop.eup %6707  ;;  %v547_v6 = vmul.f32 %v7942_v20, %v7899_v25  ;;  %v1395_v7 = vmul.f32 %v7820_v48, %v1327_v56  ;;  %v2145_v53 = vld [vmem:[%s14887_s3 + $0x18] sm:$0xff] }
  0xb0   :  { %v7875_v9 = vpop.xlane.xlu2 %233  ;;  %v7877_v17 = vpop.xlane.xlu1 %230  ;;  %v525_v49 = vmul.f32 0.5, %v524_v52  ;;  %v1200_v15 = vadd.f32 1e-08, %v509_v50  ;;  %v559_v0 = vmul.f32 %v7948_v10, %v7906_v30  ;;  %v1394_v27 = vmul.f32 %v7820_v48, %v1326_v29  ;;  %v7186_v29 = vld [vmem:[%s14883_s0 + $0x38] sm:$0xff] }
  0xb1   :  { %v7881_v13 = vpop.xlane.xlu0 %227  ;;  %v538_v3 = vsub.f32 1.5, %v537_v45  ;;  %v548_v24 = vmul.f32 %v7942_v20, %v547_v6  ;;  %v1523_v4 = vadd.f32 %v1459_v19, %v1395_v7  ;;  %v2150_v45 = vld [vmem:[%s14887_s3 + $0x40] sm:$0xff]  ;;  %v532_v50 = vand.u32 2147483648, %v7856_v5 }
  0xb2   :  { %v526_v23 = vsub.f32 1.5, %v525_v49  ;;  %6709 = vrcp.f32 %v1200_v15  ;;  %v560_v32 = vmul.f32 %v7948_v10, %v559_v0 }
  0xb3   :  { %v539_v26 = vmul.f32 %v7879_v12, %v538_v3  ;;  %6711 = vrcp.f32 %v1201_v34  ;;  %v2148_v34 = vld [vmem:[%s14887_s3 + $0x30] sm:$0xff] }
  0xb4   :  { %v527_v12 = vmul.f32 %v7884_v16, %v526_v23  ;;  %6713 = vrsqrt.f32 %v7971_v1  ;;  %v1522_v16 = vadd.f32 %v1458_v33, %v1394_v27  ;;  %v561_v21 = vmul.f32 0.5, %v560_v32  ;;  %v1460_v32 = vld [vmem:[%s14886_s1 + $0x30] sm:$0xff] }
  0xb5   :  { %v540_v52 = vmul.f32 %v539_v26, %v7845_v11  ;;  %6715 = vrsqrt.f32 %v7976_v62 }
  0xb6   :  { %v1584_v43 = vpack.c.bf16 %v1523_v4, %v1522_v16 }
  0xb7   :  { %v542_v49 = vsel %vm541_vm3, %v7845_v11, %v540_v52  ;;  %v1461_v52 = vld [vmem:[%s14886_s1 + $0x38] sm:$0xff] }
  0xb8   :  { %v7910_v22 = vpop.xlane.xlu2 %242  ;;  %v7912_v35 = vpop.xlane.xlu1 %239  ;;  %v545_v23 = vsel %vm543_vm6, %v544_v46, %v542_v49 }
  0xb9   :  { %v7916_v57 = vpop.xlane.xlu0 %236  ;;  %v1203_v19 = vadd.f32 1e-08, %v545_v23  ;;  %v556_v23 = vand.u32 2147483648, %v7899_v25 }
  0xba   :  { %6451 = vmatmul.msk.bf16.gmra.mxu0 %vm162_vm0, %v1583_v40  ;;  %6483 = vmatmul.msk.bf16.gmra.mxu1 %vm162_vm0, %v1583_v40  ;;  %v528_v40 = vmul.f32 %v527_v12, %v7856_v5  ;;  %v2152_v12 = vld [vmem:[%s14887_s3 + $0x50] sm:$0xff] }
  0xbb   :  { %6717 = vrcp.f32 %v1203_v19 }
  0xbd   :  { %3283 = vrot.lane.b32.xlu2 %v2143_v42, %s7353_s21  ;;  %v6710_v42 = vpop.eup %6709 }
  0xbe   :  { %3285 = vrot.lane.b32.xlu1 %v2144_v58, %s7353_s21  ;;  %v549_v58 = vmul.f32 0.5, %v548_v24  ;;  %v6712_v47 = vpop.eup %6711  ;;  %v1328_v3 = vmul.f32 %v7185_v59, %v6710_v42  ;;  %v2153_v24 = vld [vmem:[%s14887_s3 + $0x58] sm:$0xff]  ;;  %v8060_v42 = vmul.f32 %v7629_v28, %v7774_v31  ;;  %v2156_v59 = vld [vmem:[%s14887_s3 + $0x70] sm:$0xff] }
  0xbf   :  { %v8018_v56 = vpop.eup %6713  ;;  %v1329_v15 = vmul.f32 %v7186_v29, %v6712_v47  ;;  %v568_v29 = vand.u32 2147483648, %v7906_v30 }
  0xc0   :  { %v7944_v60 = vpop.xlane.xlu2 %251  ;;  %v7946_v61 = vpop.xlane.xlu1 %248  ;;  %v1396_v27 = vmul.f32 %v7820_v48, %v1328_v3  ;;  %vm601_vm15 = vcmp.eq.f32.partialorder %v8060_v42, inf  ;;  %vm603_vm1 = vcmp.eq.f32.partialorder %v8060_v42, 0.0 }
  0xc1   :  { %v7950_v14 = vpop.xlane.xlu0 %245  ;;  %v8029_v6 = vpop.eup %6715  ;;  %v1397_v33 = vmul.f32 %v7820_v48, %v1329_v15 }
  0xc2   :  { %3281 = vrot.lane.b32.xlu0 %v2142_v51, %s7353_s21  ;;  %v530_v51 = vsel %vm529_vm4, %v7856_v5, %v528_v40  ;;  %v550_v5 = vsub.f32 1.5, %v549_v58  ;;  %v571_v26 = vmul.f32 %v8029_v6, %v7976_v62  ;;  %v1524_v58 = vadd.f32 %v1460_v32, %v1396_v27  ;;  %v6718_v15 = vpop.eup %6717  ;;  %v2154_v27 = vld [vmem:[%s14887_s3 + $0x60] sm:$0xff] }
  0xc3   :  { %v533_v0 = vsel %vm531_vm5, %v532_v50, %v530_v51  ;;  %v2155_v51 = vld [vmem:[%s14887_s3 + $0x68] sm:$0xff] }
  0xc4   :  { %v551_v4 = vmul.f32 %v7942_v20, %v550_v5  ;;  %v1202_v16 = vadd.f32 1e-08, %v533_v0  ;;  %v572_v20 = vmul.f32 %v8029_v6, %v571_v26  ;;  %v8097_v0 = vmul.f32 %v7629_v28, %v7814_v8 }
  0xc5   :  { %3289 = vrot.lane.b32.xlu2 %v2146_v2, %s7353_s21  ;;  %v562_v2 = vsub.f32 1.5, %v561_v21 }
  0xc6   :  { %3291 = vrot.lane.b32.xlu1 %v2147_v18, %s7353_s21  ;;  %6719 = vrcp.f32 %v1202_v16  ;;  %v573_v49 = vmul.f32 0.5, %v572_v20  ;;  %vm613_vm2 = vcmp.eq.f32.partialorder %v8097_v0, inf  ;;  %vm615_vm3 = vcmp.eq.f32.partialorder %v8097_v0, 0.0 }
  0xc7   :  { %v563_v40 = vmul.f32 %v7948_v10, %v562_v2  ;;  %6721 = vrsqrt.f32 %v8060_v42 }
  0xc8   :  { %v7989_v55 = vpop.xlane.xlu2 %260  ;;  %v7991_v37 = vpop.xlane.xlu1 %257  ;;  %6723 = vrsqrt.f32 %v8097_v0 }
  0xc9   :  { %v7995_v38 = vpop.xlane.xlu0 %254  ;;  %v564_v47 = vmul.f32 %v563_v40, %v7906_v30 }
  0xca   :  { %3287 = vrot.lane.b32.xlu0 %v2145_v53, %s7353_s21  ;;  %6452 = vmatmul.msk.bf16.gmra.mxu0 %vm162_vm0, %v1584_v43  ;;  %v583_v53 = vmul.f32 %v8018_v56, %v7971_v1 }
  0xcb   :  { %6484 = vmatmul.msk.bf16.gmra.mxu1 %vm162_vm0, %v1584_v43  ;;  %v1525_v43 = vadd.f32 %v1461_v52, %v1397_v33  ;;  %v566_v5 = vsel %vm565_vm7, %v7906_v30, %v564_v47  ;;  %v7187_v30 = vld [vmem:[%s14883_s0 + $0x48] sm:$0xff]  ;;  %v574_v33 = vsub.f32 1.5, %v573_v49 }
  0xcc   :  { %v584_v10 = vmul.f32 %v8018_v56, %v583_v53  ;;  %v6720_v2 = vpop.eup %6719  ;;  %v1331_v26 = vmul.f32 %v7187_v30, %v6718_v15  ;;  %v7188_v53 = vld [vmem:[%s14883_s0 + $0x40] sm:$0xff] }
  0xcd   :  { %3295 = vrot.lane.b32.xlu2 %v2149_v44, %s7353_s21  ;;  %v2151_v44 = vld [vmem:[%s14887_s3 + $0x48] sm:$0xff]  ;;  %v1585_v50 = vpack.c.bf16 %v1525_v43, %v1524_v58  ;;  %v1330_v32 = vmul.f32 %v7188_v53, %v6720_v2  ;;  %v2158_v58 = vld [vmem:[%s14887_s3 + $0x80] sm:$0xff] }
  0xce   :  { %3297 = vrot.lane.b32.xlu1 %v2150_v45, %s7353_s21  ;;  %v552_v45 = vmul.f32 %v551_v4, %v7899_v25  ;;  %v1399_v20 = vmul.f32 %v7820_v48, %v1331_v26  ;;  %v2159_v43 = vld [vmem:[%s14887_s3 + $0x88] sm:$0xff]  ;;  %v2161_v26 = vld [vmem:[%s14887_s3 + $0x98] sm:$0xff] }
  0xcf   :  { %v1398_v49 = vmul.f32 %v7820_v48, %v1330_v32 }
  0xd0   :  { %v8031_v11 = vpop.xlane.xlu2 %269  ;;  %v8033_v7 = vpop.xlane.xlu1 %266  ;;  %v554_v3 = vsel %vm553_vm8, %v7899_v25, %v552_v45  ;;  %v569_v25 = vsel %vm567_vm9, %v568_v29, %v566_v5  ;;  %v1463_v45 = vld [vmem:[%s14886_s1 + $0x48] sm:$0xff]  ;;  %v580_v5 = vand.u32 2147483648, %v7976_v62 }
  0xd1   :  { %v8035_v18 = vpop.xlane.xlu0 %263  ;;  %v557_v19 = vsel %vm555_vm10, %v556_v23, %v554_v3  ;;  %v1205_v40 = vadd.f32 1e-08, %v569_v25 }
  0xd2   :  { %3293 = vrot.lane.b32.xlu0 %v2148_v34, %s7353_s21  ;;  %v585_v34 = vmul.f32 0.5, %v584_v10  ;;  %v1204_v52 = vadd.f32 1e-08, %v557_v19 }
  0xd4   :  { %6725 = vrcp.f32 %v1204_v52  ;;  %v592_v52 = vand.u32 2147483648, %v7971_v1 }
  0xd5   :  { %3301 = vrot.lane.b32.xlu2 %v2152_v12, %s7353_s21  ;;  %v8107_v12 = vpop.eup %6721  ;;  %6727 = vrcp.f32 %v1205_v40 }
  0xd6   :  { %3303 = vrot.lane.b32.xlu1 %v2153_v24, %s7353_s21  ;;  %v586_v24 = vsub.f32 1.5, %v585_v34  ;;  %v595_v47 = vmul.f32 %v8107_v12, %v8060_v42 }
  0xd8   :  { %v8070_v46 = vpop.xlane.xlu2 %278  ;;  %v8072_v31 = vpop.xlane.xlu1 %275  ;;  %v587_v10 = vmul.f32 %v8018_v56, %v586_v24  ;;  %v2157_v56 = vld [vmem:[%s14887_s3 + $0x78] sm:$0xff]  ;;  %v596_v15 = vmul.f32 %v8107_v12, %v595_v47 }
  0xd9   :  { %v8075_v21 = vpop.xlane.xlu0 %272 }
  0xda   :  { %3299 = vrot.lane.b32.xlu0 %v2151_v44, %s7353_s21  ;;  %6453 = vmatmul.msk.bf16.gmra.mxu0 %vm162_vm0, %v1585_v50  ;;  %v575_v44 = vmul.f32 %v8029_v6, %v574_v33  ;;  %v1527_v6 = vadd.f32 %v1463_v45, %v1399_v20  ;;  %v588_v29 = vmul.f32 %v587_v10, %v7971_v1  ;;  %v597_v32 = vmul.f32 0.5, %v596_v15  ;;  %v2160_v45 = vld [vmem:[%s14887_s3 + $0x90] sm:$0xff] }
  0xdb   :  { %6485 = vmatmul.msk.bf16.gmra.mxu1 %vm162_vm0, %v1585_v50  ;;  %v1462_v50 = vld [vmem:[%s14886_s1 + $0x40] sm:$0xff]  ;;  %v2164_v15 = vld [vmem:[%s14887_s3 + $0xb0] sm:$0xff] }
  0xdc   :  { %v1526_v23 = vadd.f32 %v1462_v50, %v1398_v49  ;;  %v590_v53 = vsel %vm589_vm12, %v7971_v1, %v588_v29  ;;  %v598_v50 = vsub.f32 1.5, %v597_v32 }
  0xdd   :  { %3307 = vrot.lane.b32.xlu2 %v2155_v51, %s7353_s21  ;;  %v576_v51 = vmul.f32 %v575_v44, %v7976_v62  ;;  %v593_v10 = vsel %vm591_vm14, %v592_v52, %v590_v53 }
  0xde   :  { %3309 = vrot.lane.b32.xlu1 %v2156_v59, %s7353_s21  ;;  %v8144_v59 = vpop.eup %6723  ;;  %v1586_v30 = vpack.c.bf16 %v1527_v6, %v1526_v23  ;;  %v1207_v6 = vadd.f32 1e-08, %v593_v10  ;;  %v2165_v23 = vld [vmem:[%s14887_s3 + $0xb8] sm:$0xff] }
  0xdf   :  { %v6726_v2 = vpop.eup %6725  ;;  %v607_v19 = vmul.f32 %v8144_v59, %v8097_v0  ;;  %v578_v25 = vsel %vm577_vm11, %v7976_v62, %v576_v51  ;;  %v7190_v62 = vld [vmem:[%s14883_s0 + $0x58] sm:$0xff] }
  0xe0   :  { %v8109_v8 = vpop.xlane.xlu2 %287  ;;  %v8117_v16 = vpop.xlane.xlu1 %284  ;;  %v581_v40 = vsel %vm579_vm13, %v580_v5, %v578_v25  ;;  %v1464_v5 = vld [vmem:[%s14886_s1 + $0x50] sm:$0xff] }
  0xe1   :  { %v8111_v4 = vpop.xlane.xlu0 %281  ;;  %v6728_v33 = vpop.eup %6727  ;;  %v608_v20 = vmul.f32 %v8144_v59, %v607_v19  ;;  %v1206_v49 = vadd.f32 1e-08, %v581_v40  ;;  %v8206_v19 = vmul.f32 %v7629_v28, %v7809_v36 }
  0xe2   :  { %3305 = vrot.lane.b32.xlu0 %v2154_v27, %s7353_s21  ;;  %v2162_v27 = vld [vmem:[%s14887_s3 + $0xa0] sm:$0xff]  ;;  %v1333_v44 = vmul.f32 %v7190_v62, %v6728_v33  ;;  %v2163_v33 = vld [vmem:[%s14887_s3 + $0xa8] sm:$0xff] }
  0xe3   :  { %6729 = vrcp.f32 %v1206_v49  ;;  %vm625_vm4 = vcmp.eq.f32.partialorder %v8206_v19, inf  ;;  %vm627_vm6 = vcmp.eq.f32.partialorder %v8206_v19, 0.0 }
  0xe4   :  { %v1401_v29 = vmul.f32 %v7820_v48, %v1333_v44  ;;  %6731 = vrcp.f32 %v1207_v6  ;;  %v8233_v44 = vmul.f32 %v7629_v28, %v7807_v63  ;;  %v7191_v63 = vld [vmem:[%s14883_s0 + $0x60] sm:$0xff] }
  0xe5   :  { %3313 = vrot.lane.b32.xlu2 %v2158_v58, %s7353_s21  ;;  %v7189_v58 = vld [vmem:[%s14883_s0 + $0x50] sm:$0xff]  ;;  %6733 = vrsqrt.f32 %v8206_v19 }
  0xe6   :  { %3315 = vrot.lane.b32.xlu1 %v2159_v43, %s7353_s21  ;;  %v1332_v43 = vmul.f32 %v7189_v58, %v6726_v2  ;;  %v1465_v2 = vld [vmem:[%s14886_s1 + $0x58] sm:$0xff]  ;;  %v2168_v58 = vld [vmem:[%s14887_s3 + $0xd0] sm:$0xff]  ;;  %6735 = vrsqrt.f32 %v8233_v44  ;;  %vm637_vm5 = vcmp.eq.f32.partialorder %v8233_v44, inf  ;;  %vm639_vm7 = vcmp.eq.f32.partialorder %v8233_v44, 0.0 }
  0xe7   :  { %v1529_v25 = vadd.f32 %v1465_v2, %v1401_v29 }
  0xe8   :  { %v8146_v3 = vpop.xlane.xlu2 %296  ;;  %v8165_v24 = vpop.xlane.xlu1 %293  ;;  %v1400_v51 = vmul.f32 %v7820_v48, %v1332_v43 }
  0xe9   :  { %v8151_v34 = vpop.xlane.xlu0 %290  ;;  %v6730_v52 = vpop.eup %6729 }
  0xea   :  { %3311 = vrot.lane.b32.xlu0 %v2157_v56, %s7353_s21  ;;  %6454 = vmatmul.msk.bf16.gmra.mxu0 %vm162_vm0, %v1586_v30  ;;  %v609_v56 = vmul.f32 0.5, %v608_v20  ;;  %v2167_v20 = vld [vmem:[%s14887_s3 + $0xc8] sm:$0xff]  ;;  %v6732_v62 = vpop.eup %6731  ;;  %v1334_v49 = vmul.f32 %v7191_v63, %v6730_v52  ;;  %v8292_v63 = vmul.f32 %v7629_v28, %v7858_v41  ;;  %v2174_v41 = vld [vmem:[%s14887_s3 + $0x100] sm:$0xff] }
  0xeb   :  { %6486 = vmatmul.msk.bf16.gmra.mxu1 %vm162_vm0, %v1586_v30  ;;  %v599_v30 = vmul.f32 %v8107_v12, %v598_v50  ;;  %v7192_v50 = vld [vmem:[%s14883_s0 + $0x68] sm:$0xff] }
  0xec   :  { %v610_v53 = vsub.f32 1.5, %v609_v56  ;;  %v1335_v6 = vmul.f32 %v7192_v50, %v6732_v62  ;;  %vm649_vm8 = vcmp.eq.f32.partialorder %v8292_v63, inf  ;;  %vm651_vm9 = vcmp.eq.f32.partialorder %v8292_v63, 0.0 }
  0xed   :  { %3319 = vrot.lane.b32.xlu2 %v2161_v26, %s7353_s21  ;;  %v600_v36 = vmul.f32 %v599_v30, %v8060_v42  ;;  %v1402_v30 = vmul.f32 %v7820_v48, %v1334_v49 }
  0xee   :  { %3321 = vrot.lane.b32.xlu1 %v2162_v27, %s7353_s21  ;;  %v1528_v27 = vadd.f32 %v1464_v5, %v1400_v51  ;;  %v611_v43 = vmul.f32 %v8144_v59, %v610_v53  ;;  %v8243_v59 = vpop.eup %6733 }
  0xef   :  { %v602_v10 = vsel %vm601_vm15, %v8060_v42, %v600_v36  ;;  %v619_v2 = vmul.f32 %v8243_v59, %v8206_v19 }
  0xf0   :  { %v8185_v47 = vpop.xlane.xlu2 %305  ;;  %v8209_v26 = vpop.xlane.xlu1 %302  ;;  %v1587_v40 = vpack.c.bf16 %v1529_v25, %v1528_v27  ;;  %v612_v56 = vmul.f32 %v611_v43, %v8097_v0  ;;  %v1403_v27 = vmul.f32 %v7820_v48, %v1335_v6  ;;  %v2170_v25 = vld [vmem:[%s14887_s3 + $0xe0] sm:$0xff] }
  0xf1   :  { %v8187_v1 = vpop.xlane.xlu0 %299  ;;  %v620_v43 = vmul.f32 %v8243_v59, %v619_v2 }
  0xf2   :  { %3317 = vrot.lane.b32.xlu0 %v2160_v45, %s7353_s21  ;;  %v604_v45 = vand.u32 2147483648, %v8060_v42  ;;  %v2166_v42 = vld [vmem:[%s14887_s3 + $0xc0] sm:$0xff]  ;;  %v614_v5 = vsel %vm613_vm2, %v8097_v0, %v612_v56 }
  0xf3   :  { %v621_v6 = vmul.f32 0.5, %v620_v43 }
  0xf5   :  { %3325 = vrot.lane.b32.xlu2 %v2164_v15, %s7353_s21  ;;  %v605_v15 = vsel %vm603_vm1, %v604_v45, %v602_v10  ;;  %v2169_v10 = vld [vmem:[%s14887_s3 + $0xd8] sm:$0xff] }
  0xf6   :  { %3327 = vrot.lane.b32.xlu1 %v2165_v23, %s7353_s21  ;;  %v616_v23 = vand.u32 2147483648, %v8097_v0  ;;  %v1208_v36 = vadd.f32 1e-08, %v605_v15  ;;  %v1466_v0 = vld [vmem:[%s14886_s1 + $0x60] sm:$0xff]  ;;  %v2173_v15 = vld [vmem:[%s14887_s3 + $0xf8] sm:$0xff] }
  0xf7   :  { %v1530_v62 = vadd.f32 %v1466_v0, %v1402_v30 }
  0xf8   :  { %v8216_v32 = vpop.xlane.xlu2 %314  ;;  %v8256_v51 = vpop.xlane.xlu1 %311  ;;  %v617_v53 = vsel %vm615_vm3, %v616_v23, %v614_v5  ;;  %6737 = vrcp.f32 %v1208_v36  ;;  %v2172_v36 = vld [vmem:[%s14887_s3 + $0xf0] sm:$0xff] }
  0xf9   :  { %v8220_v12 = vpop.xlane.xlu0 %308 }
  0xfa   :  { %3323 = vrot.lane.b32.xlu0 %v2163_v33, %s7353_s21  ;;  %6455 = vmatmul.msk.bf16.gmra.mxu0 %vm162_vm0, %v1587_v40  ;;  %v2171_v33 = vld [vmem:[%s14887_s3 + $0xe8] sm:$0xff] }
  0xfb   :  { %6487 = vmatmul.msk.bf16.gmra.mxu1 %vm162_vm0, %v1587_v40  ;;  %v1467_v40 = vld [vmem:[%s14886_s1 + $0x68] sm:$0xff] }
  0xfc   :  { %v1531_v45 = vadd.f32 %v1467_v40, %v1403_v27  ;;  %v622_v27 = vsub.f32 1.5, %v621_v6 }
  0xfd   :  { %3331 = vrot.lane.b32.xlu2 %v2167_v20, %s7353_s21  ;;  %v1209_v20 = vadd.f32 1e-08, %v617_v53 }
  0xfe   :  { %3333 = vrot.lane.b32.xlu1 %v2168_v58, %s7353_s21  ;;  %v8282_v58 = vpop.eup %6735  ;;  %v1588_v56 = vpack.c.bf16 %v1531_v45, %v1530_v62 }
  0xff   :  { %6739 = vrcp.f32 %v1209_v20  ;;  %v631_v50 = vmul.f32 %v8282_v58, %v8233_v44  ;;  %v6738_v23 = vpop.eup %6737  ;;  %v7194_v20 = vld [vmem:[%s14883_s0 + $0x70] sm:$0xff] }
 0x100   :  { %v8258_v29 = vpop.xlane.xlu2 %323  ;;  %6741 = vrsqrt.f32 %v8292_v63  ;;  %v1336_v43 = vmul.f32 %v7194_v20, %v6738_v23  ;;  %v8352_v23 = vmul.f32 %v7629_v28, %v7849_v39 }
 0x101   :  { %15061 = vst [vmem:[#allocation2_spill] sm:$0xff] %v8258_v29  ;;  %v8274_v52 = vpop.xlane.xlu0 %317  ;;  %v632_v5 = vmul.f32 %v8282_v58, %v631_v50  ;;  %v2177_v50 = vld [vmem:[%s14887_s3 + $0x118] sm:$0xff] }
 0x102   :  { %3329 = vrot.lane.b32.xlu0 %v2166_v42, %s7353_s21  ;;  %15062 = vst [vmem:[#allocation3_spill] sm:$0xff] %v8274_v52  ;;  %v8298_v42 = vpop.xlane.xlu1 %320  ;;  %vm673_vm12 = vcmp.eq.f32.partialorder %v8352_v23, inf  ;;  %vm675_vm14 = vcmp.eq.f32.partialorder %v8352_v23, 0.0 }
 0x103   :  { %15064 = vst [vmem:[#allocation5_spill] sm:$0xff] %v8298_v42  ;;  %v633_v40 = vmul.f32 0.5, %v632_v5  ;;  %v1468_v5 = vld [vmem:[%s14886_s1 + $0x70] sm:$0xff] }
 0x105   :  { %3337 = vrot.lane.b32.xlu2 %v2170_v25, %s7353_s21  ;;  %v6740_v2 = vpop.eup %6739  ;;  %v8317_v25 = vmul.f32 %v7629_v28, %v7851_v54  ;;  %v623_v54 = vmul.f32 %v8243_v59, %v622_v27 }
 0x106   :  { %3339 = vrot.lane.b32.xlu1 %v2171_v33, %s7353_s21  ;;  %v7193_v33 = vld [vmem:[%s14883_s0 + $0x78] sm:$0xff]  ;;  %v8330_v62 = vpop.eup %6741 }
 0x107   :  { %v1337_v53 = vmul.f32 %v7193_v33, %v6740_v2  ;;  %6743 = vrsqrt.f32 %v8317_v25  ;;  %v643_v59 = vmul.f32 %v8330_v62, %v8292_v63  ;;  %v624_v2 = vmul.f32 %v623_v54, %v8206_v19  ;;  %v6663_v54 = vld [vmem:[%s14888_s7 + $0x8] sm:$0xff] }
 0x108   :  { %v8294_v49 = vpop.xlane.xlu2 %332  ;;  %v8365_v33 = vmul.f32 %v7629_v28, %v7881_v13  ;;  %6745 = vrsqrt.f32 %v8352_v23  ;;  %v8382_v13 = vmul.f32 %v7629_v28, %v7875_v9  ;;  %2356 = vmatpush.bf16.msra.mxu2 %v6663_v54  ;;  %v6662_v54 = vld [vmem:[%s14888_s7] sm:$0xff]  ;;  %vm661_vm10 = vcmp.eq.f32.partialorder %v8317_v25, inf }
 0x109   :  { %15063 = vst [vmem:[#allocation4_spill] sm:$0xff] %v8294_v49  ;;  %v8311_v30 = vpop.xlane.xlu0 %326  ;;  %v1405_v45 = vmul.f32 %v7820_v48, %v1337_v53  ;;  %vm663_vm11 = vcmp.eq.f32.partialorder %v8317_v25, 0.0 }
 0x10a   :  { %3335 = vrot.lane.b32.xlu0 %v2169_v10, %s7353_s21  ;;  %6456 = vmatmul.msk.bf16.gmra.mxu0 %vm162_vm0, %v1588_v56  ;;  %15065 = vst [vmem:[#allocation6_spill] sm:$0xff] %v8311_v30  ;;  %v2176_v10 = vld [vmem:[%s14887_s3 + $0x110] sm:$0xff]  ;;  %v8342_v6 = vpop.xlane.xlu1 %329  ;;  %6747 = vrsqrt.f32 %v8365_v33  ;;  %vm685_vm13 = vcmp.eq.f32.partialorder %v8365_v33, inf  ;;  %vm687_vm15 = vcmp.eq.f32.partialorder %v8365_v33, 0.0  ;;  %vm709_vm1 = vcmp.eq.f32.partialorder %v8382_v13, inf }
 0x10b   :  { %6488 = vmatmul.msk.bf16.gmra.mxu1 %vm162_vm0, %v1588_v56  ;;  %15067 = vst [vmem:[#allocation8_spill] sm:$0xff] %v8342_v6  ;;  %v1469_v56 = vld [vmem:[%s14886_s1 + $0x78] sm:$0xff]  ;;  %6749 = vrsqrt.f32 %v8382_v13  ;;  %vm711_vm3 = vcmp.eq.f32.partialorder %v8382_v13, 0.0 }
 0x10c   :  { %v1533_v27 = vadd.f32 %v1469_v56, %v1405_v45  ;;  %v626_v45 = vsel %vm625_vm4, %v8206_v19, %v624_v2  ;;  %v628_v56 = vand.u32 2147483648, %v8206_v19  ;;  %v640_v19 = vand.u32 2147483648, %v8233_v44  ;;  %2357 = vmatpush.bf16.msra.mxu2 %v6662_v54  ;;  %v2181_v54 = vld [vmem:[%s14887_s3 + $0x138] sm:$0xff] }
 0x10d   :  { %3343 = vrot.lane.b32.xlu2 %v2173_v15, %s7353_s21  ;;  %v1404_v15 = vmul.f32 %v7820_v48, %v1336_v43  ;;  %v2175_v48 = vld [vmem:[%s14887_s3 + $0x108] sm:$0xff] }
 0x10e   :  { %3345 = vrot.lane.b32.xlu1 %v2174_v41, %s7353_s21  ;;  %v634_v41 = vsub.f32 1.5, %v633_v40  ;;  %v644_v40 = vmul.f32 %v8330_v62, %v643_v59 }
 0x10f   :  { %v1532_v20 = vadd.f32 %v1468_v5, %v1404_v15  ;;  %v8403_v5 = vmul.f32 %v7629_v28, %v7877_v17 }
 0x110   :  { %v8325_v0 = vpop.xlane.xlu2 %341  ;;  %v635_v43 = vmul.f32 %v8282_v58, %v634_v41  ;;  %v2180_v58 = vld [vmem:[%s14887_s3 + $0x130] sm:$0xff]  ;;  %v645_v15 = vmul.f32 0.5, %v644_v40  ;;  %v629_v41 = vsel %vm627_vm6, %v628_v56, %v626_v45 }
 0x111   :  { %15066 = vst [vmem:[#allocation7_spill] sm:$0xff] %v8325_v0  ;;  %v8367_v39 = vpop.xlane.xlu0 %335  ;;  %6751 = vrsqrt.f32 %v8403_v5  ;;  %vm697_vm2 = vcmp.eq.f32.partialorder %v8403_v5, inf  ;;  %vm699_vm4 = vcmp.eq.f32.partialorder %v8403_v5, 0.0 }
 0x112   :  { %3341 = vrot.lane.b32.xlu0 %v2172_v36, %s7353_s21  ;;  %15068 = vst [vmem:[#allocation9_spill] sm:$0xff] %v8367_v39  ;;  %v8371_v36 = vpop.eup %6743  ;;  %v636_v59 = vmul.f32 %v635_v43, %v8233_v44  ;;  %v8405_v2 = vpop.xlane.xlu1 %338  ;;  %v1210_v43 = vadd.f32 1e-08, %v629_v41 }
 0x113   :  { %v655_v9 = vmul.f32 %v8371_v36, %v8317_v25  ;;  %15070 = vst [vmem:[#allocation11_spill] sm:$0xff] %v8405_v2  ;;  %v8416_v17 = vpop.eup %6745 }
 0x114   :  { %6753 = vrcp.f32 %v1210_v43 }
 0x115   :  { %3349 = vrot.lane.b32.xlu2 %v2176_v10, %s7353_s21  ;;  %v1589_v10 = vpack.c.bf16 %v1533_v27, %v1532_v20  ;;  %v638_v27 = vsel %vm637_vm5, %v8233_v44, %v636_v59  ;;  %v656_v40 = vmul.f32 %v8371_v36, %v655_v9  ;;  %v2182_v59 = vld [vmem:[%s14887_s3 + $0x140] sm:$0xff]  ;;  %v2183_v9 = vld [vmem:[%s14887_s3 + $0x148] sm:$0xff] }
 0x116   :  { %3351 = vrot.lane.b32.xlu1 %v2177_v50, %s7353_s21  ;;  %v2179_v50 = vld [vmem:[%s14887_s3 + $0x128] sm:$0xff]  ;;  %v641_v45 = vsel %vm639_vm7, %v640_v19, %v638_v27 }
 0x117   :  { %v1211_v56 = vadd.f32 1e-08, %v641_v45  ;;  %v657_v41 = vmul.f32 0.5, %v656_v40  ;;  %v8454_v40 = vmul.f32 %v7629_v28, %v7912_v35 }
 0x118   :  { %v8369_v53 = vpop.xlane.xlu2 %350 }
 0x119   :  { %15069 = vst [vmem:[#allocation10_spill] sm:$0xff] %v8369_v53  ;;  %v8427_v44 = vpop.xlane.xlu0 %344  ;;  %6755 = vrcp.f32 %v1211_v56  ;;  %vm733_vm6 = vcmp.eq.f32.partialorder %v8454_v40, inf }
 0x11a   :  { %3347 = vrot.lane.b32.xlu0 %v2175_v48, %s7353_s21  ;;  %6457 = vmatmul.msk.bf16.gmra.mxu0 %vm162_vm0, %v1589_v10  ;;  %v2178_v48 = vld [vmem:[%s14887_s3 + $0x120] sm:$0xff]  ;;  %15072 = vst [vmem:[#allocation13_spill] sm:$0xff] %v8427_v44  ;;  %v8463_v56 = vpop.xlane.xlu1 %347 }
 0x11b   :  { %6489 = vmatmul.msk.bf16.gmra.mxu1 %vm162_vm0, %v1589_v10  ;;  %v646_v10 = vsub.f32 1.5, %v645_v15  ;;  %15073 = vst [vmem:[#allocation14_spill] sm:$0xff] %v8463_v56  ;;  %v7195_v56 = vld [vmem:[%s14883_s0 + $0x80] sm:$0xff] }
 0x11d   :  { %3355 = vrot.lane.b32.xlu2 %v2179_v50, %s7353_s21  ;;  %v8424_v50 = vpop.eup %6747  ;;  %v647_v15 = vmul.f32 %v8330_v62, %v646_v10  ;;  %v8450_v62 = vmul.f32 %v7629_v28, %v7910_v22 }
 0x11e   :  { %3357 = vrot.lane.b32.xlu1 %v2180_v58, %s7353_s21  ;;  %v667_v58 = vmul.f32 %v8416_v17, %v8352_v23  ;;  %v8439_v27 = vpop.eup %6749  ;;  %v679_v19 = vmul.f32 %v8424_v50, %v8365_v33 }
 0x11f   :  { %v8459_v45 = vpop.eup %6751  ;;  %v703_v10 = vmul.f32 %v8439_v27, %v8382_v13  ;;  %6757 = vrsqrt.f32 %v8450_v62 }
 0x120   :  { %v8419_v20 = vpop.permute.xlu2 %3283  ;;  %v668_v43 = vmul.f32 %v8416_v17, %v667_v58  ;;  %v6754_v35 = vpop.eup %6753  ;;  %6759 = vrsqrt.f32 %v8454_v40 }
 0x121   :  { %15071 = vst [vmem:[#allocation12_spill] sm:$0xff] %v8419_v20  ;;  %v8472_v20 = vmul.f32 %v7629_v28, %v7916_v57  ;;  %v1618_v57 = vld [vmem:[%s14889_s6] sm:$0x3]  ;;  %v6756_v39 = vpop.eup %6755 }
 0x122   :  { %3353 = vrot.lane.b32.xlu0 %v2178_v48, %s7353_s21  ;;  %v648_v48 = vmul.f32 %v647_v15, %v8292_v63  ;;  %v680_v15 = vmul.f32 %v8424_v50, %v679_v19  ;;  %v2185_v19 = vld [vmem:[%s14887_s3 + $0x158] sm:$0xff] }
 0x123   :  { %6761 = vrsqrt.f32 %v8472_v20  ;;  %vm721_vm5 = vcmp.eq.f32.partialorder %v8472_v20, inf  ;;  %vm723_vm7 = vcmp.eq.f32.partialorder %v8472_v20, 0.0 }
 0x124   :  { %v650_v22 = vsel %vm649_vm8, %v8292_v63, %v648_v48  ;;  %vm735_vm8 = vcmp.eq.f32.partialorder %v8454_v40, 0.0 }
 0x125   :  { %3361 = vrot.lane.b32.xlu2 %v2182_v59, %s7353_s21  ;;  %v652_v59 = vand.u32 2147483648, %v8292_v63  ;;  %v691_v63 = vmul.f32 %v8459_v45, %v8403_v5  ;;  %v8528_v49 = vpop.eup %6757 }
 0x126   :  { %3363 = vrot.lane.b32.xlu1 %v2183_v9, %s7353_s21  ;;  %v658_v9 = vsub.f32 1.5, %v657_v41  ;;  %v669_v41 = vmul.f32 0.5, %v668_v43  ;;  %v8493_v43 = vpop.xlane.xlu0 %353 }
 0x127   :  { %v8474_v44 = vpop.f32.mrf.mxu0  ;;  %v1918_v53 = vpop.f32.mrf.mxu1  ;;  %v653_v48 = vsel %vm651_vm9, %v652_v59, %v650_v22  ;;  %15076 = vst [vmem:[#allocation17_spill] sm:$0xff] %v8493_v43  ;;  %v681_v22 = vmul.f32 0.5, %v680_v15  ;;  %v8509_v43 = vperm.slane %v1618_v57, 1  ;;  %v664_v15 = vand.u32 2147483648, %v8317_v25 }
 0x128   :  { %v8465_v58 = vpop.permute.xlu2 %3289  ;;  %15075 = vst [vmem:[#allocation16_spill] sm:$0xff] %v8474_v44  ;;  %v659_v44 = vmul.f32 %v8371_v36, %v658_v9  ;;  %v1470_v36 = vld [vmem:[%s14886_s1 + $0x80] sm:$0xff]  ;;  %v1212_v2 = vadd.f32 1e-08, %v653_v48  ;;  %v692_v57 = vmul.f32 %v8459_v45, %v691_v63  ;;  %v670_v48 = vsub.f32 1.5, %v669_v41 }
 0x129   :  { %15074 = vst [vmem:[#allocation15_spill] sm:$0xff] %v8465_v58  ;;  %v1338_v58 = vmul.f32 %v7195_v56, %v6754_v35  ;;  %v704_v56 = vmul.f32 %v8439_v27, %v703_v10  ;;  %v7197_v10 = vld [vmem:[%s14883_s0 + $0x88] sm:$0xff]  ;;  %v8539_v63 = vadd.f32 %v1918_v53, %v8509_v43  ;;  %v682_v41 = vsub.f32 1.5, %v681_v22 }
 0x12a   :  { %3359 = vrot.lane.b32.xlu0 %v2181_v54, %s7353_s21  ;;  %v8498_v54 = vld [vmem:[%s14884_s4] ss:$0 sm:$0xff]  ;;  %v1339_v59 = vmul.f32 %v7197_v10, %v6756_v39  ;;  %v660_v9 = vmul.f32 %v659_v44, %v8317_v25  ;;  %v2184_v44 = vld [vmem:[%s14887_s3 + $0x150] sm:$0xff]  ;;  %6763 = vrcp.f32 %v1212_v2  ;;  %v671_v2 = vmul.f32 %v8416_v17, %v670_v48 }
 0x12b   :  { %v1406_v35 = vmul.f32 %v8498_v54, %v1338_v58  ;;  %v1471_v58 = vld [vmem:[%s14886_s1 + $0x88] sm:$0xff]  ;;  %15079 = vst [vmem:[#allocation20_spill] sm:$0xff] %v8539_v63  ;;  %v693_v53 = vmul.f32 0.5, %v692_v57  ;;  %v676_v57 = vand.u32 2147483648, %v8352_v23  ;;  %v8572_v48 = vmul.f32 %v7629_v28, %v7950_v14  ;;  %v7198_v14 = vld [vmem:[%s14883_s0 + $0x90] sm:$0xff] }
 0x12c   :  { %v1407_v0 = vmul.f32 %v8498_v54, %v1339_v59  ;;  %v662_v39 = vsel %vm661_vm10, %v8317_v25, %v660_v9  ;;  %v8532_v25 = vpop.eup %6759  ;;  %v8536_v9 = vmul.f32 %v7629_v28, %v7944_v60  ;;  %v2188_v60 = vld [vmem:[%s14887_s3 + $0x170] sm:$0xff]  ;;  %v672_v22 = vmul.f32 %v671_v2, %v8352_v23  ;;  %v2187_v2 = vld [vmem:[%s14887_s3 + $0x168] sm:$0xff] }
 0x12d   :  { %3367 = vrot.lane.b32.xlu2 %v2185_v19, %s7353_s21  ;;  %v1534_v30 = vadd.f32 %v1470_v36, %v1406_v35  ;;  %v665_v6 = vsel %vm663_vm11, %v664_v15, %v662_v39  ;;  %v8530_v35 = vmul.f32 0.5, %v704_v56  ;;  %v8545_v56 = vpop.eup %6761  ;;  %v739_v39 = vmul.f32 %v8528_v49, %v8450_v62 }
 0x12e   :  { %v1535_v36 = vadd.f32 %v1471_v58, %v1407_v0  ;;  %v1213_v59 = vadd.f32 1e-08, %v665_v6  ;;  %v8556_v58 = vmul.f32 %v7629_v28, %v7946_v61  ;;  %vm757_vm9 = vcmp.eq.f32.partialorder %v8572_v48, inf }
 0x12f   :  { %v1920_v15 = vpop.f32.mrf.mxu1  ;;  %vm745_vm10 = vcmp.eq.f32.partialorder %v8450_v62, inf  ;;  %vm747_vm11 = vcmp.eq.f32.partialorder %v8450_v62, 0.0 }
 0x130   :  { %v8524_v10 = vpop.permute.xlu2 %3295  ;;  %v8526_v19 = vpop.permute.xlu1 %3285  ;;  %v1590_v0 = vpack.c.bf16 %v1535_v36, %v1534_v30  ;;  %v8548_v6 = vadd.f32 %v1920_v15, %v8509_v43  ;;  %6765 = vrcp.f32 %v1213_v59  ;;  %v683_v30 = vmul.f32 %v8424_v50, %v682_v41 }
 0x131   :  { %15077 = vst [vmem:[#allocation18_spill] sm:$0xff] %v8524_v10  ;;  %v8541_v10 = vpop.f32.mrf.mxu0  ;;  %v6764_v61 = vpop.eup %6763  ;;  %v674_v50 = vsel %vm673_vm12, %v8352_v23, %v672_v22  ;;  %v727_v59 = vmul.f32 %v8532_v25, %v8454_v40  ;;  %6767 = vrsqrt.f32 %v8536_v9  ;;  %v688_v41 = vand.u32 2147483648, %v8365_v33 }
 0x132   :  { %15078 = vst [vmem:[#allocation19_spill] sm:$0xff] %v8526_v19  ;;  %3365 = vrot.lane.b32.xlu0 %v2184_v44, %s7353_s21  ;;  %6458 = vmatmul.msk.bf16.gmra.mxu0 %vm162_vm0, %v1590_v0  ;;  %v2206_v44 = vpack.c.bf16 %v8548_v6, %v8539_v63  ;;  %v684_v36 = vmul.f32 %v683_v30, %v8365_v33  ;;  %6769 = vrsqrt.f32 %v8556_v58  ;;  %vm759_vm12 = vcmp.eq.f32.partialorder %v8572_v48, 0.0 }
 0x133   :  { %15080 = vst [vmem:[#allocation21_spill] sm:$0xff] %v8541_v10  ;;  %6490 = vmatmul.msk.bf16.gmra.mxu1 %vm162_vm0, %v1590_v0  ;;  %v1340_v15 = vmul.f32 %v7198_v14, %v6764_v61  ;;  %v8592_v0 = vmul.f32 %v7629_v28, %v7989_v55  ;;  %v715_v14 = vmul.f32 %v8545_v56, %v8472_v20  ;;  %6771 = vrsqrt.f32 %v8572_v48 }
 0x134   :  { %15081 = vst [vmem:[#allocation22_spill] sm:$0xff] %v8548_v6  ;;  %v8558_v17 = vpop.permute.xlu0 %3281  ;;  %2876 = vrot.lane.b32.xlu1 %v2206_v44, %s7354_s15  ;;  %6522 = vmatmul.msk.bf16.vlgmr.msra.gmra.mxu2 %vm162_vm0, %v2206_v44  ;;  %v686_v30 = vsel %vm685_vm13, %v8365_v33, %v684_v36  ;;  %v694_v44 = vsub.f32 1.5, %v693_v53  ;;  %v677_v55 = vsel %vm675_vm14, %v676_v57, %v674_v50  ;;  %v7199_v36 = vld [vmem:[%s14883_s0 + $0x98] sm:$0xff]  ;;  %v1472_v50 = vld [vmem:[%s14886_s1 + $0x90] sm:$0xff]  ;;  %vm769_vm13 = vcmp.eq.f32.partialorder %v8556_v58, inf }
 0x135   :  { %15082 = vst [vmem:[#allocation23_spill] sm:$0xff] %v8558_v17  ;;  %3373 = vrot.lane.b32.xlu2 %v2188_v60, %s7353_s21  ;;  %v689_v19 = vsel %vm687_vm15, %v688_v41, %v686_v30  ;;  %v740_v53 = vmul.f32 %v8528_v49, %v739_v39  ;;  %v1408_v10 = vmul.f32 %v8498_v54, %v1340_v15  ;;  %6773 = vrsqrt.f32 %v8592_v0  ;;  %v2186_v39 = vld [vmem:[%s14887_s3 + $0x160] sm:$0xff] }
 0x136   :  { %15083 = vst [vmem:[#allocation24_spill] sm:$0xff] %v8592_v0  ;;  %v6766_v61 = vpop.eup %6765  ;;  %v1215_v33 = vadd.f32 1e-08, %v689_v19  ;;  %v695_v23 = vmul.f32 %v8459_v45, %v694_v44  ;;  %v1473_v19 = vld [vmem:[%s14886_s1 + $0x98] sm:$0xff]  ;;  %v1214_v15 = vadd.f32 1e-08, %v677_v55  ;;  %v716_v30 = vmul.f32 %v8545_v56, %v715_v14 }
 0x137   :  { %v1341_v17 = vmul.f32 %v7199_v36, %v6766_v61  ;;  %v706_v45 = vsub.f32 1.5, %v8530_v35  ;;  %v8631_v41 = vpop.eup %6767  ;;  %v8637_v44 = vmul.f32 %v7629_v28, %v7991_v37  ;;  %v8641_v61 = vmul.f32 %v7629_v28, %v7995_v38 }
 0x138   :  { %v8594_v60 = vpop.permute.xlu2 %3301  ;;  %v8596_v22 = vpop.permute.xlu1 %3291  ;;  %6775 = vrcp.f32 %v1215_v33  ;;  %v1536_v35 = vadd.f32 %v1472_v50, %v1408_v10  ;;  %v696_v37 = vmul.f32 %v695_v23, %v8403_v5  ;;  %v8651_v14 = vmul.f32 0.5, %v740_v53 }
 0x139   :  { %15084 = vst [vmem:[#allocation25_spill] sm:$0xff] %v8594_v60  ;;  %v8607_v60 = vpop.f32.mrf.mxu0  ;;  %v1409_v57 = vmul.f32 %v8498_v54, %v1341_v17  ;;  %v728_v17 = vmul.f32 %v8532_v25, %v727_v59  ;;  %v707_v36 = vmul.f32 %v8439_v27, %v706_v45  ;;  %v8644_v55 = vpop.eup %6769  ;;  %v2190_v59 = vld [vmem:[%s14887_s3 + $0x180] sm:$0xff]  ;;  %v775_v38 = vmul.f32 %v8631_v41, %v8536_v9 }
 0x13a   :  { %15085 = vst [vmem:[#allocation26_spill] sm:$0xff] %v8596_v22  ;;  %v1923_v22 = vpop.f32.mrf.mxu1  ;;  %3371 = vrot.lane.b32.xlu0 %v2187_v2, %s7353_s21  ;;  %6777 = vrcp.f32 %v1214_v15  ;;  %v763_v23 = vmul.f32 %v8644_v55, %v8556_v58  ;;  %v8704_v63 = vmul.f32 %v7629_v28, %v8031_v11  ;;  %vm781_vm14 = vcmp.eq.f32.partialorder %v8536_v9, inf }
 0x13b   :  { %15086 = vst [vmem:[#allocation27_spill] sm:$0xff] %v8607_v60  ;;  %v708_v10 = vmul.f32 %v707_v36, %v8382_v13  ;;  %v729_v50 = vmul.f32 0.5, %v728_v17  ;;  %6779 = vrsqrt.f32 %v8637_v44  ;;  %v698_v36 = vsel %vm697_vm2, %v8403_v5, %v696_v37 }
 0x13c   :  { %v8628_v2 = vpop.permute.xlu0 %3287  ;;  %3369 = vrot.lane.b32.xlu1 %v2186_v39, %s7353_s21  ;;  %6781 = vrsqrt.f32 %v8641_v61  ;;  %v8670_v39 = vadd.f32 %v1923_v22, %v8509_v43  ;;  %v776_v60 = vmul.f32 %v8631_v41, %v775_v38  ;;  %v2189_v22 = vld [vmem:[%s14887_s3 + $0x178] sm:$0xff]  ;;  %vm783_vm15 = vcmp.eq.f32.partialorder %v8536_v9, 0.0 }
 0x13d   :  { %15087 = vst [vmem:[#allocation28_spill] sm:$0xff] %v8628_v2  ;;  %v1537_v2 = vadd.f32 %v1473_v19, %v1409_v57  ;;  %v8660_v57 = vpop.eup %6771  ;;  %v717_v19 = vmul.f32 0.5, %v716_v30  ;;  %v730_v29 = vsub.f32 1.5, %v729_v50  ;;  %v8723_v50 = vmul.f32 %v7629_v28, %v8035_v18 }
 0x13e   :  { %v8664_v53 = vpop.eup %6773  ;;  %15090 = vst [vmem:[#allocation31_spill] sm:$0xff] %v8670_v39  ;;  %6783 = vrsqrt.f32 %v8704_v63  ;;  %vm793_vm2 = vcmp.eq.f32.partialorder %v8641_v61, inf }
 0x13f   :  { %v1591_v17 = vpack.c.bf16 %v1537_v2, %v1536_v35  ;;  %v710_v2 = vsel %vm709_vm1, %v8382_v13, %v708_v10  ;;  %v751_v35 = vmul.f32 %v8660_v57, %v8572_v48  ;;  %v811_v37 = vmul.f32 %v8664_v53, %v8592_v0 }
 0x140   :  { %v8655_v33 = vpop.permute.xlu2 %3307  ;;  %v8657_v27 = vpop.permute.xlu1 %3297  ;;  %v764_v10 = vmul.f32 %v8644_v55, %v763_v23  ;;  %vm771_vm1 = vcmp.eq.f32.partialorder %v8556_v58, 0.0 }
 0x141   :  { %15088 = vst [vmem:[#allocation29_spill] sm:$0xff] %v8655_v33  ;;  %v8672_v15 = vpop.f32.mrf.mxu0  ;;  %v712_v33 = vand.u32 2147483648, %v8382_v13  ;;  %v7201_v13 = vld [vmem:[%s14883_s0 + $0xa0] sm:$0xff] }
 0x142   :  { %15089 = vst [vmem:[#allocation30_spill] sm:$0xff] %v8657_v27  ;;  %v1925_v45 = vpop.f32.mrf.mxu1  ;;  %3377 = vrot.lane.b32.xlu0 %v2190_v59, %s7353_s21  ;;  %v6776_v27 = vpop.eup %6775  ;;  %v700_v59 = vand.u32 2147483648, %v8403_v5  ;;  %6459 = vmatmul.msk.bf16.gmra.mxu0 %vm162_vm0, %v1591_v17  ;;  %v7200_v5 = vld [vmem:[%s14883_s0 + $0xa8] sm:$0xff] }
 0x143   :  { %15091 = vst [vmem:[#allocation32_spill] sm:$0xff] %v8672_v15  ;;  %v8677_v30 = vadd.f32 %v1925_v45, %v8509_v43  ;;  %6491 = vmatmul.msk.bf16.gmra.mxu1 %vm162_vm0, %v1591_v17  ;;  %v6778_v45 = vpop.eup %6777  ;;  %v8710_v17 = vmul.f32 %v7629_v28, %v8033_v7  ;;  %v713_v11 = vsel %vm711_vm3, %v712_v33, %v710_v2  ;;  %v742_v2 = vsub.f32 1.5, %v8651_v14  ;;  %v1475_v14 = vld [vmem:[%s14886_s1 + $0xa8] sm:$0xff] }
 0x144   :  { %v8685_v15 = vpop.permute.xlu0 %3293  ;;  %v701_v52 = vsel %vm699_vm4, %v700_v59, %v698_v36  ;;  %v8706_v42 = vpop.eup %6779  ;;  %3375 = vrot.lane.b32.xlu1 %v2189_v22, %s7353_s21  ;;  %v777_v36 = vmul.f32 0.5, %v776_v60  ;;  %v752_v59 = vmul.f32 %v8660_v57, %v751_v35  ;;  %v1342_v33 = vmul.f32 %v7201_v13, %v6778_v45 }
 0x145   :  { %15092 = vst [vmem:[#allocation33_spill] sm:$0xff] %v8677_v30  ;;  %v2207_v38 = vpack.c.bf16 %v8677_v30, %v8670_v39  ;;  %v8719_v23 = vpop.eup %6781  ;;  %v1216_v60 = vadd.f32 1e-08, %v701_v52  ;;  %v731_v35 = vmul.f32 %v8532_v25, %v730_v29  ;;  %6785 = vrsqrt.f32 %v8710_v17  ;;  %v2191_v29 = vld [vmem:[%s14887_s3 + $0x188] sm:$0xff]  ;;  %v2192_v25 = vld [vmem:[%s14887_s3 + $0x190] sm:$0xff] }
 0x146   :  { %15093 = vst [vmem:[#allocation34_spill] sm:$0xff] %v8685_v15  ;;  %v718_v15 = vsub.f32 1.5, %v717_v19  ;;  %v1343_v19 = vmul.f32 %v7200_v5, %v6776_v27  ;;  %v812_v27 = vmul.f32 %v8664_v53, %v811_v37  ;;  %v778_v45 = vsub.f32 1.5, %v777_v36 }
 0x147   :  { %15094 = vst [vmem:[#allocation35_spill] sm:$0xff] %v8710_v17  ;;  %2878 = vrot.lane.b32.xlu2 %v2207_v38, %s7354_s15  ;;  %6523 = vmatmul.msk.bf16.gmra.mxu2 %vm162_vm0, %v2207_v38  ;;  %v799_v52 = vmul.f32 %v8706_v42, %v8637_v44  ;;  %6787 = vrsqrt.f32 %v8723_v50  ;;  %v8769_v13 = vmul.f32 %v7629_v28, %v8070_v46  ;;  %vm805_vm3 = vcmp.eq.f32.partialorder %v8637_v44, inf }
 0x148   :  { %v8726_v7 = vpop.permute.xlu2 %3313  ;;  %v8728_v22 = vpop.permute.xlu1 %3303  ;;  %v719_v18 = vmul.f32 %v8545_v56, %v718_v15  ;;  %v1411_v37 = vmul.f32 %v8498_v54, %v1343_v19  ;;  %v787_v56 = vmul.f32 %v8719_v23, %v8641_v61  ;;  %v8763_v19 = vmul.f32 0.5, %v812_v27 }
 0x149   :  { %15095 = vst [vmem:[#allocation36_spill] sm:$0xff] %v8726_v7  ;;  %v8738_v38 = vpop.f32.mrf.mxu0  ;;  %v1217_v7 = vadd.f32 1e-08, %v713_v11  ;;  %v1410_v11 = vmul.f32 %v8498_v54, %v1342_v33  ;;  %6789 = vrcp.f32 %v1216_v60  ;;  %v8779_v33 = vpop.eup %6783  ;;  %v779_v46 = vmul.f32 %v8631_v41, %v778_v45 }
 0x14a   :  { %15096 = vst [vmem:[#allocation37_spill] sm:$0xff] %v8728_v22  ;;  %v1928_v5 = vpop.f32.mrf.mxu1  ;;  %v8741_v22 = vmul.f32 0.5, %v764_v10  ;;  %v8761_v10 = vmul.f32 0.5, %v752_v59  ;;  %v720_v36 = vmul.f32 %v719_v18, %v8472_v20  ;;  %v732_v59 = vmul.f32 %v731_v35, %v8454_v40 }
 0x14b   :  { %15097 = vst [vmem:[#allocation38_spill] sm:$0xff] %v8738_v38  ;;  %v1474_v38 = vld [vmem:[%s14886_s1 + $0xa0] sm:$0xff]  ;;  %6791 = vrcp.f32 %v1217_v7  ;;  %v1539_v27 = vadd.f32 %v1475_v14, %v1411_v37  ;;  %v800_v18 = vmul.f32 %v8706_v42, %v799_v52  ;;  %v788_v7 = vmul.f32 %v8719_v23, %v787_v56  ;;  %v8789_v35 = vpop.eup %6785 }
 0x14c   :  { %v8759_v15 = vpop.permute.xlu0 %3299  ;;  %3381 = vrot.lane.b32.xlu1 %v2192_v25, %s7353_s21  ;;  %v766_v60 = vsub.f32 1.5, %v8741_v22  ;;  %v754_v37 = vsub.f32 1.5, %v8761_v10  ;;  %v814_v14 = vsub.f32 1.5, %v8763_v19  ;;  %v1538_v41 = vadd.f32 %v1474_v38, %v1410_v11 }
 0x14d   :  { %15098 = vst [vmem:[#allocation39_spill] sm:$0xff] %v8759_v15  ;;  %v743_v15 = vmul.f32 %v8528_v49, %v742_v2  ;;  %v8797_v22 = vpop.eup %6787  ;;  %6793 = vrsqrt.f32 %v8769_v13  ;;  %v8802_v45 = vmul.f32 %v7629_v28, %v8075_v21  ;;  %v722_v25 = vsel %vm721_vm5, %v8472_v20, %v720_v36  ;;  %v2194_v36 = vld [vmem:[%s14887_s3 + $0x1a0] sm:$0xff] }
 0x14e   :  { %v724_v10 = vand.u32 2147483648, %v8472_v20  ;;  %v8811_v38 = vadd.f32 %v1928_v5, %v8509_v43  ;;  %v1592_v19 = vpack.c.bf16 %v1539_v27, %v1538_v41  ;;  %v734_v5 = vsel %vm733_vm6, %v8454_v40, %v732_v59  ;;  %v7202_v20 = vld [vmem:[%s14883_s0 + $0xb0] sm:$0xff] }
 0x14f   :  { %3379 = vrot.lane.b32.xlu2 %v2191_v29, %s7353_s21  ;;  %v8795_v29 = vmul.f32 %v7629_v28, %v8072_v31  ;;  %v6790_v31 = vpop.eup %6789  ;;  %v835_v27 = vmul.f32 %v8789_v35, %v8710_v17  ;;  %v736_v41 = vand.u32 2147483648, %v8454_v40  ;;  %v823_v59 = vmul.f32 %v8797_v22, %v8723_v50 }
 0x150   :  { %v8785_v49 = vpop.permute.xlu2 %3319  ;;  %v8787_v2 = vpop.permute.xlu1 %3309  ;;  %15102 = vst [vmem:[#allocation43_spill] sm:$0xff] %v8811_v38  ;;  %v8854_v40 = vmul.f32 %v743_v15, %v8450_v62  ;;  %v8867_v15 = vmul.f32 %v779_v46, %v8536_v9  ;;  %v1476_v46 = vld [vmem:[%s14886_s1 + $0xb0] sm:$0xff]  ;;  %vm795_vm4 = vcmp.eq.f32.partialorder %v8641_v61, 0.0  ;;  %vm807_vm5 = vcmp.eq.f32.partialorder %v8637_v44, 0.0 }
 0x151   :  { %15099 = vst [vmem:[#allocation40_spill] sm:$0xff] %v8785_v49  ;;  %v8804_v52 = vpop.f32.mrf.mxu0  ;;  %v6792_v21 = vpop.eup %6791  ;;  %v801_v49 = vmul.f32 0.5, %v800_v18  ;;  %6795 = vrsqrt.f32 %v8795_v29  ;;  %vm829_vm6 = vcmp.eq.f32.partialorder %v8723_v50, inf }
 0x152   :  { %15100 = vst [vmem:[#allocation41_spill] sm:$0xff] %v8787_v2  ;;  %v1930_v56 = vpop.f32.mrf.mxu1  ;;  %v8817_v2 = vmul.f32 0.5, %v788_v7  ;;  %6460 = vmatmul.msk.bf16.gmra.mxu0 %vm162_vm0, %v1592_v19  ;;  %v2195_v7 = vld [vmem:[%s14887_s3 + $0x1a8] sm:$0xff]  ;;  %6797 = vrsqrt.f32 %v8802_v45 }
 0x153   :  { %15101 = vst [vmem:[#allocation42_spill] sm:$0xff] %v8804_v52  ;;  %v8814_v11 = vadd.f32 %v1930_v56, %v8509_v43  ;;  %v847_v52 = vmul.f32 %v8779_v33, %v8704_v63  ;;  %6492 = vmatmul.msk.bf16.gmra.mxu1 %vm162_vm0, %v1592_v19  ;;  %v725_v56 = vsel %vm723_vm7, %v724_v10, %v722_v25  ;;  %v8851_v25 = vpop.eup %6793 }
 0x154   :  { %v8824_v30 = vpop.permute.xlu0 %3305  ;;  %v1344_v19 = vmul.f32 %v7202_v20, %v6790_v31  ;;  %v767_v10 = vmul.f32 %v8644_v55, %v766_v60  ;;  %3387 = vrot.lane.b32.xlu1 %v2195_v7, %s7353_s21  ;;  %v836_v55 = vmul.f32 %v8789_v35, %v835_v27  ;;  %v790_v7 = vsub.f32 1.5, %v8817_v2 }
 0x155   :  { %15103 = vst [vmem:[#allocation44_spill] sm:$0xff] %v8814_v11  ;;  %v2208_v18 = vpack.c.bf16 %v8814_v11, %v8811_v38  ;;  %v737_v38 = vsel %vm735_vm8, %v736_v41, %v734_v5  ;;  %v848_v5 = vmul.f32 %v8779_v33, %v847_v52  ;;  %v1218_v41 = vadd.f32 1e-08, %v725_v56  ;;  %v2197_v56 = vld [vmem:[%s14887_s3 + $0x1b8] sm:$0xff] }
 0x156   :  { %15104 = vst [vmem:[#allocation45_spill] sm:$0xff] %v8824_v30  ;;  %v7203_v30 = vld [vmem:[%s14883_s0 + $0xb8] sm:$0xff]  ;;  %v8886_v27 = vmul.f32 %v767_v10, %v8556_v58  ;;  %v883_v2 = vmul.f32 %v8851_v25, %v8769_v13 }
 0x157   :  { %2880 = vrot.lane.b32.xlu0 %v2208_v18, %s7354_s15  ;;  %3385 = vrot.lane.b32.xlu2 %v2194_v36, %s7353_s21  ;;  %v1345_v11 = vmul.f32 %v7203_v30, %v6792_v21  ;;  %v755_v36 = vmul.f32 %v8660_v57, %v754_v37  ;;  %v815_v30 = vmul.f32 %v8664_v53, %v814_v14  ;;  %v802_v21 = vsub.f32 1.5, %v801_v49  ;;  %v8883_v52 = vpop.eup %6795 }
 0x158   :  { %6524 = vmatmul.msk.bf16.gmra.mxu2 %vm162_vm0, %v2208_v18  ;;  %v8860_v31 = vpop.permute.xlu2 %3325  ;;  %v8862_v20 = vpop.permute.xlu1 %3315  ;;  %v824_v57 = vmul.f32 %v8797_v22, %v823_v59  ;;  %v1219_v18 = vadd.f32 1e-08, %v737_v38  ;;  %v8876_v53 = vmul.f32 %v7629_v28, %v8109_v8  ;;  %v1412_v49 = vmul.f32 %v8498_v54, %v1344_v19  ;;  %v2193_v59 = vld [vmem:[%s14887_s3 + $0x198] sm:$0xff] }
 0x159   :  { %15105 = vst [vmem:[#allocation46_spill] sm:$0xff] %v8860_v31  ;;  %v8871_v60 = vpop.f32.mrf.mxu0  ;;  %v1413_v14 = vmul.f32 %v8498_v54, %v1345_v11  ;;  %v756_v38 = vmul.f32 %v755_v36, %v8572_v48  ;;  %v8893_v8 = vmul.f32 %v7629_v28, %v8117_v16  ;;  %v1477_v11 = vld [vmem:[%s14886_s1 + $0xb8] sm:$0xff]  ;;  %v8906_v10 = vpop.eup %6797  ;;  %v8909_v36 = vmul.f32 %v815_v30, %v8592_v0 }
 0x15a   :  { %15106 = vst [vmem:[#allocation47_spill] sm:$0xff] %v8862_v20  ;;  %v1933_v37 = vpop.f32.mrf.mxu1  ;;  %v803_v16 = vmul.f32 %v8706_v42, %v802_v21  ;;  %v8912_v31 = vmul.f32 0.5, %v848_v5  ;;  %v2198_v20 = vld [vmem:[%s14887_s3 + $0x1c0] sm:$0xff]  ;;  %6799 = vrcp.f32 %v1218_v41  ;;  %v8917_v39 = vmul.f32 0.5, %v824_v57 }
 0x15b   :  { %15107 = vst [vmem:[#allocation48_spill] sm:$0xff] %v8871_v60  ;;  %v837_v60 = vmul.f32 0.5, %v836_v55  ;;  %6801 = vrcp.f32 %v1219_v18  ;;  %v8924_v30 = vmul.f32 %v8719_v23, %v790_v7  ;;  %v1540_v42 = vadd.f32 %v1476_v46, %v1412_v49 }
 0x15c   :  { %15108 = vst [vmem:[#allocation49_spill] sm:$0xff] %v8876_v53  ;;  %v8904_v19 = vpop.permute.xlu0 %3311  ;;  %6803 = vrsqrt.f32 %v8876_v53  ;;  %v1541_v21 = vadd.f32 %v1477_v11, %v1413_v14  ;;  %v884_v5 = vmul.f32 %v8851_v25, %v883_v2  ;;  %v871_v41 = vmul.f32 %v8883_v52, %v8795_v29  ;;  %3393 = vrot.lane.b32.xlu1 %v2198_v20, %s7353_s21 }
 0x15d   :  { %15109 = vst [vmem:[#allocation50_spill] sm:$0xff] %v8893_v8  ;;  %6805 = vrsqrt.f32 %v8893_v8  ;;  %v8941_v57 = vmul.f32 %v803_v16, %v8637_v44  ;;  %v850_v18 = vsub.f32 1.5, %v8912_v31  ;;  %v8946_v7 = vmul.f32 %v7629_v28, %v8146_v3 }
 0x15e   :  { %15110 = vst [vmem:[#allocation51_spill] sm:$0xff] %v8904_v19  ;;  %v8921_v19 = vmul.f32 %v7629_v28, %v8111_v4  ;;  %v859_v4 = vmul.f32 %v8906_v10, %v8802_v45  ;;  %v838_v49 = vsub.f32 1.5, %v837_v60  ;;  %v826_v14 = vsub.f32 1.5, %v8917_v39 }
 0x15f   :  { %15111 = vst [vmem:[#allocation52_spill] sm:$0xff] %v8909_v36  ;;  %3383 = vrot.lane.b32.xlu0 %v2193_v59, %s7353_s21  ;;  %3391 = vrot.lane.b32.xlu2 %v2197_v56, %s7353_s21  ;;  %v8953_v2 = vadd.f32 %v1933_v37, %v8509_v43  ;;  %v1593_v11 = vpack.c.bf16 %v1541_v21, %v1540_v42  ;;  %v760_v59 = vand.u32 2147483648, %v8572_v48  ;;  %v8961_v56 = vmul.f32 0.5, %v884_v5  ;;  %v2196_v37 = vld [vmem:[%s14887_s3 + $0x1b0] sm:$0xff] }
 0x160   :  { %v8936_v23 = vpop.permute.xlu2 %3331  ;;  %v8938_v55 = vpop.permute.xlu1 %3321  ;;  %15114 = vst [vmem:[#allocation55_spill] sm:$0xff] %v8946_v7  ;;  %6807 = vrsqrt.f32 %v8921_v19  ;;  %v872_v39 = vmul.f32 %v8883_v52, %v871_v41  ;;  %v860_v16 = vmul.f32 %v8906_v10, %v859_v4  ;;  %v758_v42 = vsel %vm757_vm9, %v8572_v48, %v756_v38  ;;  %v2201_v41 = vld [vmem:[%s14887_s3 + $0x1d8] sm:$0xff] }
 0x161   :  { %15112 = vst [vmem:[#allocation53_spill] sm:$0xff] %v8936_v23  ;;  %v6800_v46 = vpop.eup %6799  ;;  %v8955_v31 = vpop.f32.mrf.mxu0  ;;  %6809 = vrsqrt.f32 %v8946_v7  ;;  %v8978_v5 = vmul.f32 %v7629_v28, %v8165_v24  ;;  %v748_v38 = vand.u32 2147483648, %v8450_v62  ;;  %v746_v24 = vsel %vm745_vm10, %v8450_v62, %v8854_v40 }
 0x162   :  { %15113 = vst [vmem:[#allocation54_spill] sm:$0xff] %v8938_v55  ;;  %v1935_v20 = vpop.f32.mrf.mxu1  ;;  %v6802_v60 = vpop.eup %6801  ;;  %6461 = vmatmul.msk.bf16.gmra.mxu0 %vm162_vm0, %v1593_v11  ;;  %v8992_v55 = vmul.f32 %v7629_v28, %v8151_v34  ;;  %v7205_v34 = vld [vmem:[%s14883_s0 + $0xc8] sm:$0xff]  ;;  %v851_v36 = vmul.f32 %v8779_v33, %v850_v18  ;;  %v839_v48 = vmul.f32 %v8789_v35, %v838_v49  ;;  %v886_v18 = vsub.f32 1.5, %v8961_v56 }
 0x163   :  { %15115 = vst [vmem:[#allocation56_spill] sm:$0xff] %v8953_v2  ;;  %v8958_v3 = vadd.f32 %v1935_v20, %v8509_v43  ;;  %v8973_v21 = vpop.eup %6803  ;;  %6493 = vmatmul.msk.bf16.gmra.mxu1 %vm162_vm0, %v1593_v11  ;;  %v7204_v11 = vld [vmem:[%s14883_s0 + $0xc0] sm:$0xff]  ;;  %6811 = vrsqrt.f32 %v8978_v5  ;;  %v749_v33 = vsel %vm747_vm11, %v748_v38, %v746_v24  ;;  %v9028_v35 = vmul.f32 %v8924_v30, %v8641_v61 }
 0x164   :  { %15116 = vst [vmem:[#allocation57_spill] sm:$0xff] %v8955_v31  ;;  %v8968_v23 = vpop.permute.xlu0 %3317  ;;  %v8988_v20 = vpop.eup %6805  ;;  %v1347_v31 = vmul.f32 %v7205_v34, %v6802_v60  ;;  %v919_v0 = vmul.f32 %v8973_v21, %v8876_v53  ;;  %3399 = vrot.lane.b32.xlu1 %v2201_v41, %s7353_s21  ;;  %v9031_v49 = vmul.f32 0.5, %v860_v16  ;;  %6813 = vrsqrt.f32 %v8992_v55  ;;  %v1478_v30 = vld [vmem:[%s14886_s1 + $0xc0] sm:$0xff] }
 0x165   :  { %15117 = vst [vmem:[#allocation58_spill] sm:$0xff] %v8958_v3  ;;  %v2209_v4 = vpack.c.bf16 %v8958_v3, %v8953_v2  ;;  %v761_v2 = vsel %vm759_vm12, %v760_v59, %v758_v42  ;;  %v827_v59 = vmul.f32 %v8797_v22, %v826_v14  ;;  %v907_v60 = vmul.f32 %v8988_v20, %v8893_v8 }
 0x166   :  { %15118 = vst [vmem:[#allocation59_spill] sm:$0xff] %v8968_v23  ;;  %v1346_v23 = vmul.f32 %v7204_v11, %v6800_v46  ;;  %v9008_v40 = vpop.eup %6807  ;;  %v1221_v42 = vadd.f32 1e-08, %v761_v2  ;;  %v9038_v22 = vmul.f32 %v7629_v28, %v8185_v47  ;;  %v1415_v14 = vmul.f32 %v8498_v54, %v1347_v31  ;;  %v2199_v47 = vld [vmem:[%s14887_s3 + $0x1c8] sm:$0xff] }
 0x167   :  { %15119 = vst [vmem:[#allocation60_spill] sm:$0xff] %v8978_v5  ;;  %3389 = vrot.lane.b32.xlu0 %v2196_v37, %s7353_s21  ;;  %2882 = vrot.lane.b32.xlu2 %v2209_v4, %s7354_s15  ;;  %v873_v37 = vmul.f32 0.5, %v872_v39  ;;  %v9033_v41 = vpop.eup %6809  ;;  %v920_v16 = vmul.f32 %v8973_v21, %v919_v0  ;;  %v895_v2 = vmul.f32 %v9008_v40, %v8921_v19  ;;  %v1220_v38 = vadd.f32 1e-08, %v749_v33 }
 0x168   :  { %15120 = vst [vmem:[#allocation61_spill] sm:$0xff] %v8992_v55  ;;  %6525 = vmatmul.msk.bf16.gmra.mxu2 %vm162_vm0, %v2209_v4  ;;  %v9016_v46 = vpop.permute.xlu2 %3337  ;;  %v9018_v11 = vpop.permute.xlu1 %3327  ;;  %v1414_v62 = vmul.f32 %v8498_v54, %v1346_v23  ;;  %v1479_v4 = vld [vmem:[%s14886_s1 + $0xc8] sm:$0xff]  ;;  %v2200_v23 = vld [vmem:[%s14887_s3 + $0x1d0] sm:$0xff]  ;;  %v9060_v0 = vmul.f32 %v851_v36, %v8704_v63  ;;  %v9063_v24 = vmul.f32 %v839_v48, %v8710_v17  ;;  %6815 = vrcp.f32 %v1221_v42 }
 0x169   :  { %15121 = vst [vmem:[#allocation62_spill] sm:$0xff] %v9016_v46  ;;  %v874_v56 = vsub.f32 1.5, %v873_v37  ;;  %v9066_v34 = vmul.f32 %v827_v59, %v8723_v50  ;;  %v908_v37 = vmul.f32 %v8988_v20, %v907_v60  ;;  %v9069_v46 = vpop.f32.mrf.mxu0  ;;  %v955_v36 = vmul.f32 %v9033_v41, %v8946_v7  ;;  %v9083_v59 = vpop.eup %6811 }
 0x16a   :  { %15122 = vst [vmem:[#allocation63_spill] sm:$0xff] %v9018_v11  ;;  %v1938_v39 = vpop.f32.mrf.mxu1  ;;  %v2204_v11 = vld [vmem:[%s14887_s3 + $0x1f0] sm:$0xff]  ;;  %v9081_v48 = vmul.f32 %v7629_v28, %v8209_v26  ;;  %v862_v60 = vsub.f32 1.5, %v9031_v49  ;;  %6817 = vrsqrt.f32 %v9038_v22  ;;  %v1542_v33 = vadd.f32 %v1478_v30, %v1414_v62  ;;  %v9098_v49 = vpop.eup %6813 }
 0x16b   :  { %15123 = vst [vmem:[#allocation64_spill] sm:$0xff] %v9038_v22  ;;  %v896_v26 = vmul.f32 %v9008_v40, %v895_v2  ;;  %6819 = vrcp.f32 %v1220_v38  ;;  %v909_v62 = vmul.f32 0.5, %v908_v37  ;;  %v2202_v38 = vld [vmem:[%s14887_s3 + $0x1e0] sm:$0xff]  ;;  %v782_v37 = vsel %vm781_vm14, %v8536_v9, %v8867_v15 }
 0x16c   :  { %v9057_v31 = vpop.permute.xlu0 %3323  ;;  %15125 = vst [vmem:[#allocation66_spill] sm:$0xff] %v9060_v0  ;;  %3405 = vrot.lane.b32.xlu1 %v2204_v11, %s7353_s21  ;;  %v943_v11 = vmul.f32 %v9083_v59, %v8978_v5  ;;  %6821 = vrsqrt.f32 %v9081_v48  ;;  %vm831_vm9 = vcmp.eq.f32.partialorder %v8723_v50, 0.0  ;;  %vm853_vm10 = vcmp.eq.f32.partialorder %v8704_v63, inf }
 0x16d   :  { %15124 = vst [vmem:[#allocation65_spill] sm:$0xff] %v9057_v31  ;;  %v9075_v31 = vmul.f32 %v8851_v25, %v886_v18  ;;  %v875_v25 = vmul.f32 %v8883_v52, %v874_v56  ;;  %v9090_v18 = vmul.f32 0.5, %v920_v16  ;;  %v956_v52 = vmul.f32 %v9033_v41, %v955_v36 }
 0x16e   :  { %15126 = vst [vmem:[#allocation67_spill] sm:$0xff] %v9063_v24  ;;  %v770_v56 = vsel %vm769_vm13, %v8556_v58, %v8886_v27  ;;  %v9113_v16 = vadd.f32 %v1938_v39, %v8509_v43  ;;  %v2203_v27 = vld [vmem:[%s14887_s3 + $0x1e8] sm:$0xff]  ;;  %vm855_vm12 = vcmp.eq.f32.partialorder %v8704_v63, 0.0  ;;  %vm865_vm14 = vcmp.eq.f32.partialorder %v8802_v45, inf }
 0x16f   :  { %15127 = vst [vmem:[#allocation68_spill] sm:$0xff] %v9069_v46  ;;  %v1543_v46 = vadd.f32 %v1479_v4, %v1415_v14  ;;  %3395 = vrot.lane.b32.xlu0 %v2199_v47, %s7353_s21  ;;  %3397 = vrot.lane.b32.xlu2 %v2200_v23, %s7353_s21  ;;  %v9102_v14 = vmul.f32 %v7629_v28, %v8187_v1  ;;  %v784_v4 = vand.u32 2147483648, %v8536_v9  ;;  %v6816_v47 = vpop.eup %6815  ;;  %v922_v15 = vsub.f32 1.5, %v9090_v18 }
 0x170   :  { %15128 = vst [vmem:[#allocation69_spill] sm:$0xff] %v9081_v48  ;;  %v9094_v42 = vpop.permute.xlu2 %3343  ;;  %v9096_v0 = vpop.permute.xlu1 %3333  ;;  %v931_v23 = vmul.f32 %v9098_v49, %v8992_v55  ;;  %v957_v17 = vmul.f32 0.5, %v956_v52  ;;  %v9172_v9 = vmul.f32 %v9075_v31, %v8769_v13 }
 0x171   :  { %15129 = vst [vmem:[#allocation70_spill] sm:$0xff] %v9094_v42  ;;  %v1594_v1 = vpack.c.bf16 %v1543_v46, %v1542_v33  ;;  %v772_v46 = vand.u32 2147483648, %v8556_v58  ;;  %v9135_v36 = vpop.eup %6817  ;;  %v863_v33 = vmul.f32 %v8906_v10, %v862_v60  ;;  %6823 = vrsqrt.f32 %v9102_v14  ;;  %v9149_v60 = vpop.f32.mrf.mxu0  ;;  %v7206_v58 = vld [vmem:[%s14883_s0 + $0xd8] sm:$0xff] }
 0x172   :  { %15130 = vst [vmem:[#allocation71_spill] sm:$0xff] %v9096_v0  ;;  %v1940_v30 = vpop.f32.mrf.mxu1  ;;  %v6820_v42 = vpop.eup %6819  ;;  %v910_v0 = vsub.f32 1.5, %v909_v62  ;;  %v9147_v10 = vmul.f32 %v7629_v28, %v8216_v32  ;;  %v785_v18 = vsel %vm783_vm15, %v784_v4, %v782_v37  ;;  %v944_v62 = vmul.f32 %v9083_v59, %v943_v11  ;;  %v7207_v11 = vld [vmem:[%s14883_s0 + $0xd0] sm:$0xff] }
 0x173   :  { %15131 = vst [vmem:[#allocation72_spill] sm:$0xff] %v9102_v14  ;;  %v9116_v2 = vadd.f32 %v1940_v30, %v8509_v43  ;;  %6462 = vmatmul.msk.bf16.gmra.mxu0 %vm162_vm0, %v1594_v1  ;;  %6494 = vmatmul.msk.bf16.gmra.mxu1 %vm162_vm0, %v1594_v1  ;;  %v773_v24 = vsel %vm771_vm1, %v772_v46, %v770_v56  ;;  %vm877_vm15 = vcmp.eq.f32.partialorder %v8795_v29, inf  ;;  %vm867_vm1 = vcmp.eq.f32.partialorder %v8802_v45, 0.0 }
 0x174   :  { %15132 = vst [vmem:[#allocation73_spill] sm:$0xff] %v9113_v16  ;;  %v9127_v39 = vpop.permute.xlu0 %3329  ;;  %v1349_v1 = vmul.f32 %v7206_v58, %v6816_v47  ;;  %v932_v32 = vmul.f32 %v9098_v49, %v931_v23  ;;  %v991_v52 = vmul.f32 %v9135_v36, %v9038_v22  ;;  %v9175_v4 = vmul.f32 %v875_v25, %v8795_v29 }
 0x175   :  { %15133 = vst [vmem:[#allocation74_spill] sm:$0xff] %v9116_v2  ;;  %v2210_v30 = vpack.c.bf16 %v9116_v2, %v9113_v16  ;;  %v1348_v47 = vmul.f32 %v7207_v11, %v6820_v42  ;;  %v1222_v23 = vadd.f32 1e-08, %v773_v24  ;;  %v923_v46 = vmul.f32 %v8973_v21, %v922_v15 }
 0x176   :  { %15134 = vst [vmem:[#allocation75_spill] sm:$0xff] %v9127_v39  ;;  %v897_v39 = vmul.f32 0.5, %v896_v26  ;;  %v9158_v26 = vpop.eup %6821  ;;  %v1223_v58 = vadd.f32 1e-08, %v785_v18  ;;  %v911_v31 = vmul.f32 %v8988_v20, %v910_v0  ;;  %v958_v25 = vsub.f32 1.5, %v957_v17  ;;  %v2205_v17 = vld [vmem:[%s14887_s3 + $0x1f8] sm:$0xff] }
 0x177   :  { %15135 = vst [vmem:[#allocation76_spill] sm:$0xff] %v9147_v10  ;;  %3401 = vrot.lane.b32.xlu0 %v2202_v38, %s7353_s21  ;;  %3403 = vrot.lane.b32.xlu2 %v2203_v27, %s7353_s21  ;;  %v9181_v27 = vmul.f32 %v863_v33, %v8802_v45  ;;  %6825 = vrsqrt.f32 %v9147_v10  ;;  %v9191_v24 = vmul.f32 0.5, %v932_v32  ;;  %v992_v42 = vmul.f32 %v9135_v36, %v991_v52  ;;  %v15140_v32 = vld [vmem:[#allocation31_spill] sm:$0xff] }
 0x178   :  { %15136 = vst [vmem:[#allocation77_spill] sm:$0xff] %v9149_v60  ;;  %2884 = vrot.lane.b32.xlu1 %v2210_v30, %s7354_s15  ;;  %6526 = vmatmul.msk.bf16.gmra.mxu2 %vm162_vm0, %v2210_v30  ;;  %v9166_v56 = vpop.permute.xlu2 %3349  ;;  %v9168_v38 = vpop.permute.xlu1 %3339  ;;  %v898_v37 = vsub.f32 1.5, %v897_v39  ;;  %v9189_v60 = vmul.f32 0.5, %v944_v62  ;;  %v979_v21 = vmul.f32 %v9158_v26, %v9081_v48  ;;  %v1481_v39 = vld [vmem:[%s14886_s1 + $0xd8] sm:$0xff]  ;;  %v9206_v0 = vmul.f32 %v7629_v28, %v8256_v51  ;;  %v1480_v62 = vld [vmem:[%s14886_s1 + $0xd0] sm:$0xff] }
 0x179   :  { %15137 = vst [vmem:[#allocation78_spill] sm:$0xff] %v9166_v56  ;;  %v9184_v56 = vpop.eup %6823  ;;  %v1416_v33 = vmul.f32 %v8498_v54, %v1348_v47  ;;  %v4306_v15 = vpack.c.bf16 %v8548_v6, %v8548_v6  ;;  %6827 = vrcp.f32 %v1222_v23  ;;  %v9215_v18 = vmul.f32 %v7629_v28, %v8220_v12 }
 0x17a   :  { %15138 = vst [vmem:[#allocation79_spill] sm:$0xff] %v9168_v38  ;;  %v1943_v30 = vpop.f32.mrf.mxu1  ;;  %v1417_v38 = vmul.f32 %v8498_v54, %v1349_v1  ;;  %v967_v1 = vmul.f32 %v9184_v56, %v9102_v14  ;;  %v4307_v51 = vpack.c.bf16 %v15140_v32, %v15140_v32  ;;  %6829 = vrcp.f32 %v1223_v58 }
 0x17b   :  { %v9223_v54 = vmul.f32 %v923_v46, %v8876_v53  ;;  %v899_v52 = vmul.f32 %v9008_v40, %v898_v37  ;;  %v9230_v12 = vmul.f32 %v911_v31, %v8893_v8  ;;  %v959_v47 = vmul.f32 %v9033_v41, %v958_v25  ;;  %v9246_v25 = vpop.f32.mrf.mxu0 }
 0x17c   :  { %v9202_v20 = vpop.permute.xlu0 %3335  ;;  %v1545_v11 = vadd.f32 %v1481_v39, %v1417_v38  ;;  %v993_v23 = vmul.f32 0.5, %v992_v42  ;;  %v980_v58 = vmul.f32 %v9158_v26, %v979_v21  ;;  %v946_v38 = vsub.f32 1.5, %v9189_v60  ;;  %15145 = vst [vmem:[#allocation85_spill] sm:$0xff] %v9246_v25 }
 0x17d   :  { %15139 = vst [vmem:[#allocation80_spill] sm:$0xff] %v9202_v20  ;;  %v9237_v40 = vpop.eup %6825  ;;  %v934_v37 = vsub.f32 1.5, %v9191_v24  ;;  %6831 = vrsqrt.f32 %v9206_v0  ;;  %v1544_v39 = vadd.f32 %v1480_v62, %v1416_v33  ;;  %v968_v41 = vmul.f32 %v9184_v56, %v967_v1 }
 0x17e   :  { %15141 = vst [vmem:[#allocation81_spill] sm:$0xff] %v9223_v54  ;;  %6833 = vrsqrt.f32 %v9215_v18  ;;  %v794_v21 = vsel %vm793_vm2, %v8641_v61, %v9028_v35  ;;  %v796_v60 = vand.u32 2147483648, %v8641_v61  ;;  %v994_v62 = vsub.f32 1.5, %v993_v23  ;;  %v7208_v61 = vld [vmem:[%s14883_s0 + $0xe0] sm:$0xff]  ;;  %v15153_v54 = vld [vmem:[#allocation5_spill] sm:$0xff] }
 0x17f   :  { %3407 = vrot.lane.b32.xlu0 %v2205_v17, %s7353_s21  ;;  %4435 = vrot.lane.b32.xlu2 %v4306_v15, %s7355_s23  ;;  %15142 = vst [vmem:[#allocation82_spill] sm:$0xff] %v9230_v12  ;;  %v6828_v24 = vpop.eup %6827  ;;  %v9254_v17 = vadd.f32 %v1943_v30, %v8509_v43  ;;  %v1595_v33 = vpack.c.bf16 %v1545_v11, %v1544_v39  ;;  %v15149_v30 = vld [vmem:[#allocation43_spill] sm:$0xff]  ;;  %v808_v23 = vand.u32 2147483648, %v8637_v44  ;;  %vm879_vm2 = vcmp.eq.f32.partialorder %v8795_v29, 0.0 }
 0x180   :  { %4437 = vrot.lane.b32.xlu1 %v4307_v51, %s7355_s23  ;;  %v9235_v46 = vpop.permute.xlu2 %3355  ;;  %v9242_v31 = vpop.permute.xlu1 %3345  ;;  %v981_v51 = vmul.f32 0.5, %v980_v58  ;;  %v806_v35 = vsel %vm805_vm3, %v8637_v44, %v8941_v57  ;;  %v4309_v11 = vpack.c.bf16 %v15149_v30, %v15149_v30  ;;  %v15150_v58 = vld [vmem:[#allocation2_spill] sm:$0xff]  ;;  %v797_v20 = vsel %vm795_vm4, %v796_v60, %v794_v21 }
 0x181   :  { %15143 = vst [vmem:[#allocation83_spill] sm:$0xff] %v9235_v46  ;;  %v6830_v1 = vpop.eup %6829  ;;  %v1027_v46 = vmul.f32 %v9237_v40, %v9147_v10  ;;  %v9283_v30 = vmul.f32 0.5, %v968_v41  ;;  %v809_v60 = vsel %vm807_vm5, %v808_v23, %v806_v35  ;;  %v9296_v41 = vmul.f32 %v899_v52, %v8921_v19  ;;  %v15156_v35 = vld [vmem:[#allocation3_spill] sm:$0xff] }
 0x182   :  { %15144 = vst [vmem:[#allocation84_spill] sm:$0xff] %v9242_v31  ;;  %v1945_v42 = vpop.f32.mrf.mxu1  ;;  %v982_v25 = vsub.f32 1.5, %v981_v51  ;;  %v9301_v12 = vmul.f32 %v7629_v28, %v15153_v54  ;;  %v935_v52 = vmul.f32 %v9098_v49, %v934_v37  ;;  %v1224_v51 = vadd.f32 1e-08, %v797_v20 }
 0x183   :  { %15146 = vst [vmem:[#allocation86_spill] sm:$0xff] %v9254_v17  ;;  %v9257_v15 = vadd.f32 %v1945_v42, %v8509_v43  ;;  %6463 = vmatmul.msk.bf16.gmra.mxu0 %vm162_vm0, %v1595_v33  ;;  %6495 = vmatmul.msk.bf16.gmra.mxu1 %vm162_vm0, %v1595_v33  ;;  %v9276_v42 = vmul.f32 %v7629_v28, %v15150_v58  ;;  %v9281_v33 = vpop.eup %6831  ;;  %vm2775_vm3 = vcmask 257024   ;;  %vm901_vm4 = vcmp.eq.f32.partialorder %v8921_v19, inf }
 0x184   :  { %v9262_v31 = vpop.permute.xlu0 %3341  ;;  %v1350_v58 = vmul.f32 %v7208_v61, %v6828_v24  ;;  %v9293_v44 = vpop.eup %6833  ;;  %v1015_v54 = vmul.f32 %v9281_v33, %v9206_v0  ;;  %v9317_v23 = vmul.f32 %v7629_v28, %v15156_v35  ;;  %v970_v61 = vsub.f32 1.5, %v9283_v30  ;;  %v1482_v30 = vld [vmem:[%s14886_s1 + $0xe0] sm:$0xff] }
 0x185   :  { %15147 = vst [vmem:[#allocation87_spill] sm:$0xff] %v9257_v15  ;;  %v2211_v39 = vpack.c.bf16 %v9257_v15, %v9254_v17  ;;  %6835 = vrsqrt.f32 %v9276_v42  ;;  %v1003_v37 = vmul.f32 %v9293_v44, %v9215_v18  ;;  %vm889_vm5 = vcmp.eq.f32.partialorder %v8769_v13, inf }
 0x186   :  { %15148 = vst [vmem:[#allocation88_spill] sm:$0xff] %v9262_v31  ;;  %v15152_v31 = vld [vmem:[#allocation44_spill] sm:$0xff]  ;;  %6837 = vrsqrt.f32 %v9301_v12 }
 0x187   :  { %15151 = vst [vmem:[#allocation2_spill] sm:$0xff] %v9276_v42  ;;  %v4310_v57 = vpack.c.bf16 %v15152_v31, %v15152_v31  ;;  %4441 = vrot.lane.b32.xlu2 %v4309_v11, %s7355_s23  ;;  %2886 = vrot.lane.b32.xlu0 %v2211_v39, %s7354_s15  ;;  %v7209_v31 = vld [vmem:[%s14883_s0 + $0xe8] sm:$0xff]  ;;  %v1028_v11 = vmul.f32 %v9237_v40, %v1027_v46  ;;  %6839 = vrcp.f32 %v1224_v51 }
 0x188   :  { %v1351_v21 = vmul.f32 %v7209_v31, %v6830_v1  ;;  %6527 = vmatmul.msk.bf16.gmra.mxu2 %vm162_vm0, %v2211_v39  ;;  %v9305_v24 = vpop.permute.xlu2 %3361  ;;  %v9308_v31 = vmul.f32 %v959_v47, %v8946_v7  ;;  %v947_v1 = vmul.f32 %v9083_v59, %v946_v38  ;;  %v995_v46 = vmul.f32 %v9135_v36, %v994_v62  ;;  %v9324_v59 = vld [vmem:[%s14884_s4] ss:$0 sm:$0xff]  ;;  %v9328_v20 = vpop.permute.xlu1 %3351 }
 0x189   :  { %4443 = vrot.lane.b32.xlu1 %v4310_v57, %s7355_s23  ;;  %15154 = vst [vmem:[#allocation5_spill] sm:$0xff] %v9305_v24  ;;  %v1225_v57 = vadd.f32 1e-08, %v809_v60  ;;  %v1418_v49 = vmul.f32 %v9324_v59, %v1350_v58  ;;  %v983_v47 = vmul.f32 %v9158_v26, %v982_v25  ;;  %v9331_v38 = vmul.f32 0.5, %v1028_v11  ;;  %v9336_v62 = vpop.f32.mrf.mxu0  ;;  %v1483_v58 = vld [vmem:[%s14886_s1 + $0xe8] sm:$0xff]  ;;  %v15161_v60 = vld [vmem:[#allocation20_spill] sm:$0xff] }
 0x18a   :  { %15155 = vst [vmem:[#allocation89_spill] sm:$0xff] %v9308_v31  ;;  %v1948_v39 = vpop.f32.mrf.mxu1  ;;  %v1419_v36 = vmul.f32 %v9324_v59, %v1351_v21  ;;  %v15159_v21 = vld [vmem:[#allocation4_spill] sm:$0xff]  ;;  %v4312_v25 = vpack.c.bf16 %v8958_v3, %v8958_v3  ;;  %v4305_v11 = vpack.c.bf16 %v15161_v60, %v15161_v60  ;;  %v1016_v24 = vmul.f32 %v9281_v33, %v1015_v54 }
 0x18b   :  { %15157 = vst [vmem:[#allocation3_spill] sm:$0xff] %v9328_v20  ;;  %v9346_v26 = vmul.f32 %v7629_v28, %v15159_v21  ;;  %v15163_v20 = vld [vmem:[#allocation8_spill] sm:$0xff]  ;;  %v4313_v31 = vpack.c.bf16 %v9113_v16, %v9113_v16  ;;  %6841 = vrcp.f32 %v1225_v57  ;;  %v9362_v21 = vmul.f32 %v947_v1, %v8978_v5  ;;  %v15168_v57 = vld [vmem:[#allocation6_spill] sm:$0xff] }
 0x18c   :  { %15158 = vst [vmem:[#allocation90_spill] sm:$0xff] %v9336_v62  ;;  %v9352_v35 = vpop.permute.xlu0 %3347  ;;  %v9357_v62 = vmul.f32 %v7629_v28, %v15163_v20  ;;  %6843 = vrsqrt.f32 %v9317_v23  ;;  %v1546_v3 = vadd.f32 %v1482_v30, %v1418_v49  ;;  %v1547_v7 = vadd.f32 %v1483_v58, %v1419_v36  ;;  %v6665_v36 = vld [vmem:[%s14888_s7 + $0x8] sm:$0xff]  ;;  %v9384_v30 = vpop.eup %6835 }
 0x18d   :  { %15160 = vst [vmem:[#allocation4_spill] sm:$0xff] %v9346_v26  ;;  %v9368_v51 = vmul.f32 %v935_v52, %v8992_v55  ;;  %v9371_v54 = vmul.f32 %v995_v46, %v9038_v22  ;;  %v1004_v20 = vmul.f32 %v9293_v44, %v1003_v37  ;;  %v9376_v1 = vmul.f32 %v7629_v28, %v15168_v57  ;;  %v9392_v37 = vpop.eup %6837  ;;  %v15180_v22 = vld [vmem:[#allocation52_spill] sm:$0xff] }
 0x18e   :  { %15162 = vst [vmem:[#allocation91_spill] sm:$0xff] %v9352_v35  ;;  %v9387_v52 = vmul.f32 %v983_v47, %v9081_v48  ;;  %v971_v46 = vmul.f32 %v9184_v56, %v970_v61  ;;  %6845 = vrsqrt.f32 %v9346_v26  ;;  %v9395_v58 = vmul.f32 0.5, %v1016_v24  ;;  %3054 = vmatpush.bf16.msra.mxu3 %v6665_v36  ;;  %v6664_v47 = vld [vmem:[%s14888_s7] sm:$0xff]  ;;  %v6840_v56 = vpop.eup %6839 }
 0x18f   :  { %15164 = vst [vmem:[#allocation8_spill] sm:$0xff] %v9357_v62  ;;  %4447 = vrot.lane.b32.xlu2 %v4312_v25, %s7355_s23  ;;  %4433 = vrot.lane.b32.xlu0 %v4305_v11, %s7355_s23  ;;  %6847 = vrsqrt.f32 %v9357_v62  ;;  %v15172_v11 = vld [vmem:[#allocation24_spill] sm:$0xff]  ;;  %v9403_v61 = vadd.f32 %v1948_v39, %v8509_v43  ;;  %v1596_v57 = vpack.c.bf16 %v1547_v7, %v1546_v3  ;;  %v832_v24 = vand.u32 2147483648, %v8723_v50  ;;  %v15175_v7 = vld [vmem:[#allocation7_spill] sm:$0xff] }
 0x190   :  { %15165 = vst [vmem:[#allocation92_spill] sm:$0xff] %v9362_v21  ;;  %v9379_v49 = vpop.permute.xlu2 %3367  ;;  %vm817_vm7 = vcmp.eq.f32.partialorder %v15172_v11, inf  ;;  %v9409_v35 = vmul.f32 0.5, %v1004_v20  ;;  %v1063_v36 = vmul.f32 %v9384_v30, %v9276_v42  ;;  %6849 = vrsqrt.f32 %v9376_v1  ;;  %v15177_v20 = vld [vmem:[#allocation33_spill] sm:$0xff] }
 0x191   :  { %15166 = vst [vmem:[#allocation93_spill] sm:$0xff] %v9368_v51  ;;  %4449 = vrot.lane.b32.xlu1 %v4313_v31, %s7355_s23  ;;  %v1030_v31 = vsub.f32 1.5, %v9331_v38  ;;  %v6842_v38 = vpop.eup %6841  ;;  %v830_v39 = vsel %vm829_vm6, %v8723_v50, %v9066_v34  ;;  %v9422_v3 = vmul.f32 %v7629_v28, %v15175_v7  ;;  %v820_v34 = vand.u32 2147483648, %v15172_v11  ;;  %v9433_v48 = vpop.f32.mrf.mxu0 }
 0x192   :  { %15167 = vst [vmem:[#allocation94_spill] sm:$0xff] %v9371_v54  ;;  %v1950_v25 = vpop.f32.mrf.mxu1  ;;  %v9418_v16 = vpop.eup %6843  ;;  %v4316_v7 = vpack.c.bf16 %v9257_v15, %v9257_v15  ;;  %3055 = vmatpush.bf16.msra.mxu3 %v6664_v47  ;;  %vm819_vm8 = vcmp.eq.f32.partialorder %v15172_v11, 0.0  ;;  %v7212_v15 = vld [vmem:[%s14883_s0 + $0xf8] sm:$0xff]  ;;  %v833_v5 = vsel %vm831_vm9, %v832_v24, %v830_v39  ;;  %v1064_v51 = vmul.f32 %v9384_v30, %v1063_v36 }
 0x193   :  { %15169 = vst [vmem:[#allocation6_spill] sm:$0xff] %v9376_v1  ;;  %6464 = vmatmul.msk.bf16.gmra.mxu0 %vm162_vm0, %v1596_v57  ;;  %6496 = vmatmul.msk.bf16.gmra.mxu1 %vm162_vm0, %v1596_v57  ;;  %v818_v57 = vsel %vm817_vm7, %v15172_v11, %v15180_v22  ;;  %v1353_v22 = vmul.f32 %v7212_v15, %v6842_v38  ;;  %v1018_v24 = vsub.f32 1.5, %v9395_v58  ;;  %v1006_v39 = vsub.f32 1.5, %v9409_v35 }
 0x194   :  { %15170 = vst [vmem:[#allocation95_spill] sm:$0xff] %v9379_v49  ;;  %v9406_v49 = vadd.f32 %v1950_v25, %v8509_v43  ;;  %v4308_v25 = vpack.c.bf16 %v15177_v20, %v15177_v20  ;;  %v9443_v21 = vpop.eup %6845  ;;  %v1039_v55 = vmul.f32 %v9418_v16, %v9317_v23  ;;  %v9467_v15 = vmul.f32 %v971_v46, %v9102_v14 }
 0x195   :  { %15171 = vst [vmem:[#allocation96_spill] sm:$0xff] %v9387_v52  ;;  %v9430_v52 = vpop.permute.xlu1 %3357  ;;  %v9455_v50 = vpop.eup %6847  ;;  %v821_v38 = vsel %vm819_vm8, %v820_v34, %v818_v57  ;;  %6851 = vrsqrt.f32 %v9422_v3  ;;  %v1421_v58 = vmul.f32 %v9324_v59, %v1353_v22  ;;  %v1065_v11 = vmul.f32 0.5, %v1064_v51  ;;  %v1484_v57 = vld [vmem:[%s14886_s1 + $0xf0] sm:$0xff] }
 0x196   :  { %15173 = vst [vmem:[#allocation24_spill] sm:$0xff] %v9403_v61  ;;  %v2212_v54 = vpack.c.bf16 %v9406_v49, %v9403_v61  ;;  %v9473_v36 = vpop.eup %6849  ;;  %v1040_v34 = vmul.f32 %v9418_v16, %v1039_v55  ;;  %v4315_v22 = vpack.c.bf16 %v9254_v17, %v9254_v17  ;;  %v1087_v14 = vmul.f32 %v9455_v50, %v9357_v62 }
 0x197   :  { %15174 = vst [vmem:[#allocation97_spill] sm:$0xff] %v9406_v49  ;;  %4439 = vrot.lane.b32.xlu0 %v4308_v25, %s7355_s23  ;;  %v1051_v25 = vmul.f32 %v9392_v37, %v9301_v12  ;;  %v1007_v8 = vmul.f32 %v9293_v44, %v1006_v39  ;;  %v1066_v53 = vsub.f32 1.5, %v1065_v11  ;;  %v15193_v11 = vld [vmem:[#allocation35_spill] sm:$0xff]  ;;  %vm891_vm6 = vcmp.eq.f32.partialorder %v8769_v13, 0.0 }
 0x198   :  { %15176 = vst [vmem:[#allocation7_spill] sm:$0xff] %v9422_v3  ;;  %2888 = vrot.lane.b32.xlu2 %v2212_v54, %s7354_s15  ;;  %6528 = vmatmul.msk.bf16.gmra.mxu2 %vm162_vm0, %v2212_v54  ;;  %v15184_v54 = vld [vmem:[#allocation11_spill] sm:$0xff]  ;;  %v1088_v44 = vmul.f32 %v9455_v50, %v1087_v14  ;;  %vm841_vm11 = vcmp.eq.f32.partialorder %v15193_v11, inf  ;;  %v844_v14 = vand.u32 2147483648, %v15193_v11  ;;  %vm843_vm13 = vcmp.eq.f32.partialorder %v15193_v11, 0.0 }
 0x199   :  { %15178 = vst [vmem:[#allocation98_spill] sm:$0xff] %v9430_v52  ;;  %v7211_v52 = vld [vmem:[%s14883_s0 + $0xf0] sm:$0xff]  ;;  %4455 = vrot.lane.b32.xlu1 %v4316_v7, %s7355_s23  ;;  %v1099_v7 = vmul.f32 %v9443_v21, %v9346_v26  ;;  %v1052_v35 = vmul.f32 %v9392_v37, %v1051_v25  ;;  %v9521_v32 = vpop.f32.mrf.mxu0  ;;  %vm903_vm7 = vcmp.eq.f32.partialorder %v8921_v19, 0.0 }
 0x19a   :  { %15179 = vst [vmem:[#allocation99_spill] sm:$0xff] %v9433_v48  ;;  %v1352_v47 = vmul.f32 %v7211_v52, %v6840_v56  ;;  %v9453_v48 = vpop.permute.xlu0 %3353  ;;  %v9464_v52 = vpop.permute.xlu2 %3373  ;;  %v1031_v56 = vmul.f32 %v9237_v40, %v1030_v31 }
 0x19b   :  { %15181 = vst [vmem:[#allocation52_spill] sm:$0xff] %v9453_v48  ;;  %v1953_v46 = vpop.f32.mrf.mxu1  ;;  %v1227_v48 = vadd.f32 1e-08, %v833_v5  ;;  %v1485_v5 = vld [vmem:[%s14886_s1 + $0xf8] sm:$0xff]  ;;  %v1100_v25 = vmul.f32 %v9443_v21, %v1099_v7  ;;  %v1019_v7 = vmul.f32 %v9281_v33, %v1018_v24 }
 0x19c   :  { %15182 = vst [vmem:[#allocation100_spill] sm:$0xff] %v9464_v52  ;;  %v9480_v52 = vmul.f32 %v7629_v28, %v15184_v54  ;;  %v9484_v40 = vadd.f32 %v1953_v46, %v8509_v43  ;;  %v1420_v31 = vmul.f32 %v9324_v59, %v1352_v47  ;;  %v1226_v54 = vadd.f32 1e-08, %v821_v38  ;;  %v15187_v46 = vld [vmem:[#allocation9_spill] sm:$0xff]  ;;  %v15188_v47 = vld [vmem:[#allocation56_spill] sm:$0xff] }
 0x19d   :  { %15183 = vst [vmem:[#allocation101_spill] sm:$0xff] %v9467_v15  ;;  %v9498_v15 = vmul.f32 %v7629_v28, %v15187_v46  ;;  %v4311_v51 = vpack.c.bf16 %v15188_v47, %v15188_v47  ;;  %v1075_v38 = vmul.f32 %v9473_v36, %v9376_v1  ;;  %6853 = vrcp.f32 %v1227_v48  ;;  %v9517_v17 = vpop.permute.xlu1 %3363  ;;  %v9524_v48 = vpop.eup %6851 }
 0x19e   :  { %15185 = vst [vmem:[#allocation11_spill] sm:$0xff] %v9480_v52  ;;  %v4319_v55 = vpack.c.bf16 %v9484_v40, %v9484_v40  ;;  %v9512_v46 = vmul.f32 %v1031_v56, %v9147_v10  ;;  %6855 = vrsqrt.f32 %v9480_v52  ;;  %v1548_v47 = vadd.f32 %v1484_v57, %v1420_v31 }
 0x19f   :  { %15186 = vst [vmem:[#allocation102_spill] sm:$0xff] %v9484_v40  ;;  %v1549_v20 = vadd.f32 %v1485_v5, %v1421_v58  ;;  %4445 = vrot.lane.b32.xlu0 %v4311_v51, %s7355_s23  ;;  %6857 = vrcp.f32 %v1226_v54  ;;  %v1053_v56 = vmul.f32 0.5, %v1052_v35  ;;  %v1041_v31 = vmul.f32 0.5, %v1040_v34  ;;  %v15195_v34 = vld [vmem:[#allocation67_spill] sm:$0xff] }
 0x1a0   :  { %15189 = vst [vmem:[#allocation9_spill] sm:$0xff] %v9512_v46  ;;  %4453 = vrot.lane.b32.xlu2 %v4315_v22, %s7355_s23  ;;  %6859 = vrsqrt.f32 %v9498_v15  ;;  %v1101_v33 = vmul.f32 0.5, %v1100_v25  ;;  %v1076_v24 = vmul.f32 %v9473_v36, %v1075_v38  ;;  %v842_v54 = vsel %vm841_vm11, %v15193_v11, %v15195_v34  ;;  %v15196_v25 = vld [vmem:[#allocation66_spill] sm:$0xff]  ;;  %v7213_v11 = vld [vmem:[%s14883_s0 + $0x108] sm:$0xff] }
 0x1a1   :  { %15190 = vst [vmem:[#allocation103_spill] sm:$0xff] %v9517_v17  ;;  %4461 = vrot.lane.b32.xlu1 %v4319_v55, %s7355_s23  ;;  %v1597_v5 = vpack.c.bf16 %v1549_v20, %v1548_v47  ;;  %v856_v51 = vand.u32 2147483648, %v8704_v63  ;;  %v1135_v55 = vmul.f32 %v9524_v48, %v9422_v3  ;;  %v854_v38 = vsel %vm853_vm10, %v8704_v63, %v15196_v25 }
 0x1a2   :  { %15191 = vst [vmem:[#allocation104_spill] sm:$0xff] %v9521_v32  ;;  %v9527_v58 = vpop.permute.xlu2 %2878  ;;  %v9529_v57 = vpop.permute.xlu0 %3359  ;;  %v4314_v47 = vpack.c.bf16 %v9116_v2, %v9116_v2  ;;  %v9559_v17 = vmul.f32 %v1019_v7, %v9206_v0  ;;  %v1054_v46 = vsub.f32 1.5, %v1053_v56  ;;  %v845_v10 = vsel %vm843_vm13, %v844_v14, %v842_v54 }
 0x1a3   :  { %15192 = vst [vmem:[#allocation105_spill] sm:$0xff] %v9529_v57  ;;  %v1955_v39 = vpop.f32.mrf.mxu1  ;;  %v6854_v22 = vpop.eup %6853  ;;  %6465 = vmatmul.msk.bf16.gmra.mxu0 %vm162_vm0, %v1597_v5  ;;  %6497 = vmatmul.msk.bf16.gmra.mxu1 %vm162_vm0, %v1597_v5  ;;  %v1067_v57 = vmul.f32 %v9384_v30, %v1066_v53  ;;  %v1042_v32 = vsub.f32 1.5, %v1041_v31  ;;  %v1102_v2 = vsub.f32 1.5, %v1101_v33  ;;  %v857_v7 = vsel %vm855_vm12, %v856_v51, %v854_v38  ;;  %v15197_v30 = vld [vmem:[#allocation10_spill] sm:$0xff] }
 0x1a4   :  { %v9536_v35 = vadd.f32 %v1955_v39, %v8509_v43  ;;  %v9547_v20 = vpop.eup %6855  ;;  %v4318_v39 = vpack.c.bf16 %v9406_v49, %v9406_v49  ;;  %v1089_v49 = vmul.f32 0.5, %v1088_v44  ;;  %v1136_v53 = vmul.f32 %v9524_v48, %v1135_v55  ;;  %v7214_v31 = vld [vmem:[%s14889_s6] sm:$0x3] }
 0x1a5   :  { %v6858_v25 = vpop.eup %6857  ;;  %v9574_v56 = vmul.f32 %v7629_v28, %v15197_v30  ;;  %v9579_v33 = vperm.slane %v7214_v31, 0  ;;  %v9584_v63 = vmul.f32 %v1007_v8, %v9215_v18  ;;  %v1077_v44 = vmul.f32 0.5, %v1076_v24 }
 0x1a6   :  { %15194 = vst [vmem:[#allocation35_spill] sm:$0xff] %v9536_v35  ;;  %v2213_v34 = vpack.c.bf16 %v9536_v35, %v9484_v40  ;;  %v9562_v5 = vpop.eup %6859  ;;  %v1355_v40 = vmul.f32 %v7213_v11, %v6854_v22  ;;  %v2877_v54 = vpop.permute.xlu1 %2876  ;;  %v7215_v22 = vld [vmem:[%s14883_s0 + $0x100] sm:$0xff]  ;;  %v1228_v14 = vadd.f32 1e-08, %v845_v10  ;;  %v9592_v38 = vmul.f32 %v1067_v57, %v9276_v42 }
 0x1a7   :  { %4451 = vrot.lane.b32.xlu0 %v4314_v47, %s7355_s23  ;;  %15198 = vst [vmem:[#allocation67_spill] sm:$0xff] %v9574_v56  ;;  %v1354_v55 = vmul.f32 %v7215_v22, %v6858_v25  ;;  %v1123_v47 = vmul.f32 %v9547_v20, %v9480_v52  ;;  %v1111_v8 = vmul.f32 %v9562_v5, %v9498_v15  ;;  %v1229_v24 = vadd.f32 1e-08, %v857_v7  ;;  %v15203_v22 = vld [vmem:[#allocation16_spill] sm:$0xff]  ;;  %v1486_v7 = vld [vmem:[%s14886_s1 + $0x100] sm:$0xff] }
 0x1a8   :  { %4459 = vrot.lane.b32.xlu2 %v4318_v39, %s7355_s23  ;;  %15199 = vst [vmem:[#allocation66_spill] sm:$0xff] %v9579_v33  ;;  %6529 = vmatmul.msk.bf16.gmra.mxu2 %vm162_vm0, %v2213_v34  ;;  %v9598_v39 = vpop.f32.mrf.mxu0  ;;  %v1043_v11 = vmul.f32 %v9418_v16, %v1042_v32  ;;  %v1103_v10 = vmul.f32 %v9443_v21, %v1102_v2  ;;  %v1090_v30 = vsub.f32 1.5, %v1089_v49  ;;  %v1137_v31 = vmul.f32 0.5, %v1136_v53  ;;  %v15205_v49 = vld [vmem:[#allocation14_spill] sm:$0xff] }
 0x1a9   :  { %2890 = vrot.lane.b32.xlu1 %v2213_v34, %s7354_s15  ;;  %15201 = vst [vmem:[#allocation106_spill] sm:$0xff] %v9592_v38  ;;  %6562 = vmatmul.msk.bf16.vlgmr.msra.gmra.mxu3 %vm162_vm0, %v2877_v54  ;;  %v1055_v34 = vmul.f32 %v9392_v37, %v1054_v46  ;;  %v1423_v57 = vmul.f32 %v9324_v59, %v1355_v40  ;;  %6861 = vrsqrt.f32 %v9574_v56  ;;  %v1487_v37 = vld [vmem:[%s14886_s1 + $0x108] sm:$0xff]  ;;  %v1078_v46 = vsub.f32 1.5, %v1077_v44  ;;  %v15206_v54 = vld [vmem:[#allocation13_spill] sm:$0xff] }
 0x1aa   :  { %v9586_v51 = vpop.permute.xlu2 %3379  ;;  %v9605_v25 = vpop.permute.xlu0 %3365  ;;  %v1422_v16 = vmul.f32 %v9324_v59, %v1354_v55  ;;  %v4317_v2 = vpack.c.bf16 %v9403_v61, %v9403_v61  ;;  %6863 = vrcp.f32 %v1228_v14  ;;  %v1124_v32 = vmul.f32 %v9547_v20, %v1123_v47 }
 0x1ab   :  { %15200 = vst [vmem:[#allocation10_spill] sm:$0xff] %v9586_v51  ;;  %v9610_v51 = vadd.f32 %v15203_v22, %v9579_v33  ;;  %v1112_v21 = vmul.f32 %v9562_v5, %v1111_v8  ;;  %v9622_v40 = vmul.f32 %v7629_v28, %v15205_v49  ;;  %6865 = vrcp.f32 %v1229_v24 }
 0x1ac   :  { %15202 = vst [vmem:[#allocation107_spill] sm:$0xff] %v9605_v25  ;;  %v9628_v53 = vmul.f32 %v1055_v34, %v9301_v12  ;;  %v9631_v44 = vmul.f32 %v1043_v11, %v9317_v23  ;;  %v9635_v55 = vmul.f32 %v7629_v28, %v15206_v54  ;;  %v1551_v14 = vadd.f32 %v1487_v37, %v1423_v57  ;;  %v15208_v11 = vld [vmem:[#allocation21_spill] sm:$0xff] }
 0x1ad   :  { %15204 = vst [vmem:[#allocation16_spill] sm:$0xff] %v9610_v51  ;;  %v9639_v47 = vmul.f32 %v1103_v10, %v9346_v26  ;;  %v1138_v8 = vsub.f32 1.5, %v1137_v31  ;;  %v6594_v22 = vmul.f32 -1.442695, %v9610_v51  ;;  %v1091_v24 = vmul.f32 %v9455_v50, %v1090_v30 }
 0x1ae   :  { %v1079_v34 = vmul.f32 %v9473_v36, %v1078_v46  ;;  %v9647_v49 = vadd.f32 %v15208_v11, %v9579_v33  ;;  %v1550_v54 = vadd.f32 %v1486_v7, %v1422_v16  ;;  %v9649_v57 = vpop.permute.xlu1 %3369  ;;  %v1125_v31 = vmul.f32 0.5, %v1124_v32 }
 0x1af   :  { %4457 = vrot.lane.b32.xlu0 %v4317_v2, %s7355_s23  ;;  %15207 = vst [vmem:[#allocation14_spill] sm:$0xff] %v9639_v47  ;;  %v9653_v10 = vpop.eup %6861  ;;  %v1113_v2 = vmul.f32 0.5, %v1112_v21  ;;  %6867 = vrsqrt.f32 %v9622_v40  ;;  %v868_v50 = vand.u32 2147483648, %v8802_v45  ;;  %v866_v16 = vsel %vm865_vm14, %v8802_v45, %v9181_v27  ;;  %v15213_v21 = vld [vmem:[#allocation27_spill] sm:$0xff]  ;;  %v7217_v45 = vld [vmem:[%s14883_s0 + $0x118] sm:$0xff] }
 0x1b0   :  { %15209 = vst [vmem:[#allocation13_spill] sm:$0xff] %v9647_v49  ;;  %v1958_v25 = vpop.f32.mrf.mxu1  ;;  %v6864_v30 = vpop.eup %6863  ;;  %v1598_v46 = vpack.c.bf16 %v1551_v14, %v1550_v54  ;;  %v1139_v32 = vmul.f32 %v9524_v48, %v1138_v8  ;;  %6869 = vpow2.f32 %v6594_v22  ;;  %v9668_v11 = vadd.f32 %v15213_v21, %v9579_v33 }
 0x1b1   :  { %15210 = vst [vmem:[#allocation21_spill] sm:$0xff] %v9649_v57  ;;  %v9658_v36 = vadd.f32 %v1958_v25, %v8509_v43  ;;  %v6866_v7 = vpop.eup %6865  ;;  %v878_v25 = vsel %vm877_vm15, %v8795_v29, %v9175_v4  ;;  %v6595_v14 = vmul.f32 -1.442695, %v9647_v49  ;;  %v880_v8 = vand.u32 2147483648, %v8795_v29 }
 0x1b2   :  { %v9651_v37 = vpop.permute.xlu2 %3385  ;;  %15214 = vst [vmem:[#allocation27_spill] sm:$0xff] %v9668_v11  ;;  %v9679_v48 = vpop.permute.xlu0 %3371  ;;  %v1126_v22 = vsub.f32 1.5, %v1125_v31  ;;  %v1171_v54 = vmul.f32 %v9653_v10, %v9574_v56  ;;  %v869_v4 = vsel %vm867_vm1, %v868_v50, %v866_v16  ;;  %6871 = vrsqrt.f32 %v9635_v55 }
 0x1b3   :  { %15211 = vst [vmem:[#allocation108_spill] sm:$0xff] %v9651_v37  ;;  %v9670_v37 = vpop.f32.mrf.mxu0  ;;  %6466 = vmatmul.msk.bf16.gmra.mxu0 %vm162_vm0, %v1598_v46  ;;  %6498 = vmatmul.msk.bf16.gmra.mxu1 %vm162_vm0, %v1598_v46  ;;  %v4321_v27 = vpack.c.bf16 %v9658_v36, %v9658_v36  ;;  %v7216_v46 = vld [vmem:[%s14883_s0 + $0x110] sm:$0xff]  ;;  %v1357_v31 = vmul.f32 %v7217_v45, %v6866_v7  ;;  %v1114_v16 = vsub.f32 1.5, %v1113_v2  ;;  %6873 = vpow2.f32 %v6595_v14 }
 0x1b4   :  { %15212 = vst [vmem:[#allocation109_spill] sm:$0xff] %v9658_v36  ;;  %v1356_v21 = vmul.f32 %v7216_v46, %v6864_v30  ;;  %v881_v57 = vsel %vm879_vm2, %v880_v8, %v878_v25  ;;  %v9697_v50 = vmul.f32 %v1091_v24, %v9357_v62  ;;  %v9700_v29 = vmul.f32 %v1079_v34, %v9376_v1  ;;  %v15219_v30 = vld [vmem:[#allocation17_spill] sm:$0xff]  ;;  %v2078_v24 = vld [vmem:[%s14890_s2] sm:$0xff]  ;;  %v15223_v45 = vld [vmem:[#allocation32_spill] sm:$0xff] }
 0x1b5   :  { %15215 = vst [vmem:[#allocation110_spill] sm:$0xff] %v9679_v48  ;;  %4465 = vrot.lane.b32.xlu2 %v4321_v27, %s7355_s23  ;;  %v9694_v48 = vpop.eup %6867  ;;  %v6596_v27 = vmul.f32 -1.442695, %v9668_v11  ;;  %v9704_v47 = vmul.f32 %v1139_v32, %v9422_v3  ;;  %v9708_v46 = vmul.f32 %v7629_v28, %v15219_v30  ;;  %v1230_v34 = vadd.f32 1e-08, %v869_v4 }
 0x1b6   :  { %15216 = vst [vmem:[#allocation111_spill] sm:$0xff] %v9697_v50  ;;  %v9710_v7 = vpop.permute.xlu1 %3375  ;;  %v6870_v2 = vpop.eup %6869  ;;  %v1127_v8 = vmul.f32 %v9547_v20, %v1126_v22  ;;  %v1172_v32 = vmul.f32 %v9653_v10, %v1171_v54  ;;  %v1231_v14 = vadd.f32 1e-08, %v881_v57  ;;  %v1159_v30 = vmul.f32 %v9694_v48, %v9622_v40 }
 0x1b7   :  { %15217 = vst [vmem:[#allocation112_spill] sm:$0xff] %v9700_v29  ;;  %v2359_v4 = vpop.f32.mrf.mxu2  ;;  %v1424_v20 = vmul.f32 %v9324_v59, %v1356_v21  ;;  %v1425_v22 = vmul.f32 %v9324_v59, %v1357_v31  ;;  %v9733_v54 = vmul.f32 %v9562_v5, %v1114_v16  ;;  %6875 = vpow2.f32 %v6596_v27  ;;  %v1489_v21 = vld [vmem:[%s14886_s1 + $0x118] sm:$0xff] }
 0x1b8   :  { %15218 = vst [vmem:[#allocation113_spill] sm:$0xff] %v9704_v47  ;;  %v9721_v47 = vadd.f32 %v15223_v45, %v9579_v33  ;;  %v1960_v28 = vpop.f32.mrf.mxu1  ;;  %v2583_v45 = vmul.f32 %v2359_v4, %v2078_v24  ;;  %v9745_v31 = vpop.eup %6871  ;;  %v9747_v5 = vadd.f32 1.0, %v6870_v2  ;;  %6877 = vrcp.f32 %v1230_v34  ;;  %v15226_v4 = vld [vmem:[#allocation38_spill] sm:$0xff]  ;;  %v15250_v29 = vld [vmem:[#allocation49_spill] sm:$0xff] }
 0x1b9   :  { %15220 = vst [vmem:[#allocation17_spill] sm:$0xff] %v9708_v46  ;;  %6563 = vmatmul.msk.bf16.gmra.mxu3 %vm162_vm0, %v9527_v58  ;;  %v7218_v58 = vld [vmem:[%s14887_s3] sm:$0xff]  ;;  %6879 = vrcp.f32 %v1231_v14  ;;  %v6874_v3 = vpop.eup %6873  ;;  %v1147_v14 = vmul.f32 %v9745_v31, %v9635_v55  ;;  %v4320_v50 = vpack.c.bf16 %v9536_v35, %v9536_v35  ;;  %v7221_v35 = vld [vmem:[%s14883_s0 + $0x128] sm:$0xff]  ;;  %vm925_vm8 = vcmp.eq.f32.partialorder %v15250_v29, inf }
 0x1ba   :  { %15221 = vst [vmem:[#allocation114_spill] sm:$0xff] %v9710_v7  ;;  %v9715_v25 = vpop.permute.xlu2 %3391  ;;  %v2519_v57 = vmul.f32 %v7218_v58, %v15161_v60  ;;  %v6597_v24 = vmul.f32 -1.442695, %v9721_v47  ;;  %v9756_v58 = vadd.f32 %v15226_v4, %v9579_v33  ;;  %v15229_v2 = vld [vmem:[#allocation42_spill] sm:$0xff]  ;;  %v9770_v4 = vmul.f32 %v1127_v8, %v9480_v52  ;;  %v2079_v8 = vld [vmem:[%s14890_s2 + $0x8] sm:$0xff] }
 0x1bb   :  { %15222 = vst [vmem:[#allocation115_spill] sm:$0xff] %v9715_v25  ;;  %v9728_v25 = vadd.f32 %v1960_v28, %v8509_v43  ;;  %v1488_v28 = vld [vmem:[%s14886_s1 + $0x110] sm:$0xff]  ;;  %v9758_v7 = vpop.f32.mrf.mxu0  ;;  %v9762_v61 = vadd.f32 %v15229_v2, %v9579_v33  ;;  %6881 = vrsqrt.f32 %v9708_v46  ;;  %vm927_vm10 = vcmp.eq.f32.partialorder %v15250_v29, 0.0 }
 0x1bc   :  { %15224 = vst [vmem:[#allocation32_spill] sm:$0xff] %v9721_v47  ;;  %v2647_v60 = vadd.f32 %v2583_v45, %v2519_v57  ;;  %v1552_v34 = vadd.f32 %v1488_v28, %v1424_v20  ;;  %v9777_v45 = vmul.f32 0.5, %v1172_v32  ;;  %v9780_v20 = vmul.f32 %v9694_v48, %v1159_v30 }
 0x1bd   :  { %15225 = vst [vmem:[#allocation116_spill] sm:$0xff] %v9728_v25  ;;  %v2214_v16 = vpack.c.bf16 %v9728_v25, %v9658_v36  ;;  %v4322_v27 = vpack.c.bf16 %v9728_v25, %v9728_v25  ;;  %6033 = vrot.lane.b32.xlu2 %v9610_v51, %s7355_s23  ;;  %v1553_v25 = vadd.f32 %v1489_v21, %v1425_v22  ;;  %v9767_v36 = vpop.permute.xlu0 %3377  ;;  %6883 = vrcp.f32 %v9747_v5  ;;  %v6876_v21 = vpop.eup %6875 }
 0x1be   :  { %15227 = vst [vmem:[#allocation38_spill] sm:$0xff] %v9756_v58  ;;  %v2711_v57 = vpack.c.bf16 %v2647_v60, %v2647_v60  ;;  %v9783_v22 = vpop.permute.xlu1 %3381  ;;  %6885 = vpow2.f32 %v6597_v24  ;;  %v15235_v60 = vld [vmem:[#allocation48_spill] sm:$0xff]  ;;  %v6598_v2 = vmul.f32 -1.442695, %v9756_v58  ;;  %v904_v24 = vand.u32 2147483648, %v8921_v19 }
 0x1bf   :  { %15228 = vst [vmem:[#allocation117_spill] sm:$0xff] %v9758_v7  ;;  %2892 = vrot.lane.b32.xlu0 %v2214_v16, %s7354_s15  ;;  %4467 = vrot.lane.b32.xlu1 %v4322_v27, %s7355_s23  ;;  %v9795_v32 = vadd.f32 %v15235_v60, %v9579_v33  ;;  %v6878_v27 = vpop.eup %6877  ;;  %v7219_v60 = vld [vmem:[%s14887_s3 + $0x8] sm:$0xff]  ;;  %v902_v51 = vsel %vm901_vm4, %v8921_v19, %v9296_v41  ;;  %v15240_v19 = vld [vmem:[#allocation68_spill] sm:$0xff] }
 0x1c0   :  { %15230 = vst [vmem:[#allocation42_spill] sm:$0xff] %v9762_v61  ;;  %6530 = vmatmul.msk.bf16.gmra.mxu2 %vm162_vm0, %v2214_v16  ;;  %v9791_v16 = vadd.f32 1.0, %v6874_v3  ;;  %v1963_v30 = vpop.f32.mrf.mxu1  ;;  %v1599_v3 = vpack.c.bf16 %v1553_v25, %v1552_v34  ;;  %v2520_v52 = vmul.f32 %v7219_v60, %v8548_v6  ;;  %v15237_v25 = vld [vmem:[#allocation57_spill] sm:$0xff]  ;;  %v905_v62 = vsel %vm903_vm7, %v904_v24, %v902_v51 }
 0x1c1   :  { %15231 = vst [vmem:[#allocation118_spill] sm:$0xff] %v9767_v36  ;;  %v2361_v36 = vpop.f32.mrf.mxu2  ;;  %v9816_v34 = vadd.f32 %v15237_v25, %v9579_v33  ;;  %v6600_v41 = vmul.f32 -1.442695, %v9795_v32  ;;  %v9834_v25 = vadd.f32 1.0, %v6876_v21  ;;  %v9856_v51 = vadd.f32 %v1963_v30, %v8509_v43 }
 0x1c2   :  { %15232 = vst [vmem:[#allocation119_spill] sm:$0xff] %v9770_v4  ;;  %v9788_v28 = vpop.permute.xlu2 %2882  ;;  %v6880_v4 = vpop.eup %6879  ;;  %v2584_v26 = vmul.f32 %v2361_v36, %v2079_v8  ;;  %v890_v36 = vsel %vm889_vm5, %v8769_v13, %v9172_v9  ;;  %6887 = vrcp.f32 %v9791_v16  ;;  %v7220_v9 = vld [vmem:[%s14883_s0 + $0x120] sm:$0xff] }
 0x1c3   :  { %15233 = vst [vmem:[#allocation120_spill] sm:$0xff] %v9783_v22  ;;  %v6599_v22 = vmul.f32 -1.442695, %v9762_v61  ;;  %6467 = vmatmul.msk.bf16.gmra.mxu0 %vm162_vm0, %v1599_v3  ;;  %6499 = vmatmul.msk.bf16.gmra.mxu1 %vm162_vm0, %v1599_v3  ;;  %v9827_v8 = vpop.eup %6881  ;;  %v1358_v6 = vmul.f32 %v7220_v9, %v6878_v27  ;;  %v1359_v7 = vmul.f32 %v7221_v35, %v6880_v4  ;;  %6889 = vpow2.f32 %v6598_v2  ;;  %v9847_v21 = vpop.f32.mrf.mxu0  ;;  %v2080_v2 = vld [vmem:[%s14890_s2 + $0x10] sm:$0xff] }
 0x1c4   :  { %15234 = vst [vmem:[#allocation121_spill] sm:$0xff] %v9791_v16  ;;  %v2648_v60 = vadd.f32 %v2584_v26, %v2520_v52  ;;  %v9832_v3 = vpop.eup %6883  ;;  %v9845_v52 = vadd.f32 %v15240_v19, %v9579_v33  ;;  %v1148_v9 = vmul.f32 %v9745_v31, %v1147_v14  ;;  %v6601_v35 = vmul.f32 -1.442695, %v9816_v34  ;;  %v15263_v16 = vld [vmem:[#allocation33_spill] sm:$0xff] }
 0x1c5   :  { %15236 = vst [vmem:[#allocation48_spill] sm:$0xff] %v9795_v32  ;;  %v6886_v26 = vpop.eup %6885  ;;  %6891 = vpow2.f32 %v6599_v22  ;;  %v1233_v22 = vadd.f32 1e-08, %v905_v62  ;;  %v1426_v19 = vmul.f32 %v9324_v59, %v1358_v6  ;;  %v7222_v62 = vld [vmem:[%s14887_s3 + $0x10] sm:$0xff]  ;;  %v1490_v6 = vld [vmem:[%s14886_s1 + $0x120] sm:$0xff] }
 0x1c6   :  { %2776 = vst.msk [vmem:[%s14891_s8] sm:$0xf] %vm2775_vm3, %v2711_v57  ;;  %v892_v57 = vand.u32 2147483648, %v8769_v13  ;;  %v1183_v13 = vmul.f32 %v9827_v8, %v9708_v46  ;;  %6893 = vpow2.f32 %v6600_v41 }
 0x1c7   :  { %15238 = vst [vmem:[#allocation57_spill] sm:$0xff] %v9816_v34  ;;  %4463 = vrot.lane.b32.xlu0 %v4320_v50, %s7355_s23  ;;  %6035 = vrot.lane.b32.xlu1 %v9647_v49, %s7355_s23  ;;  %v2712_v50 = vpack.c.bf16 %v2648_v60, %v2648_v60  ;;  %v1427_v60 = vmul.f32 %v9324_v59, %v1359_v7  ;;  %6895 = vrcp.f32 %v9834_v25  ;;  %v1491_v7 = vld [vmem:[%s14886_s1 + $0x128] sm:$0xff] }
 0x1c8   :  { %15239 = vst [vmem:[#allocation122_spill] sm:$0xff] %v9834_v25  ;;  %v893_v27 = vsel %vm891_vm6, %v892_v57, %v890_v36  ;;  %v1965_v14 = vpop.f32.mrf.mxu1  ;;  %v9874_v57 = vpop.permute.xlu1 %3387  ;;  %6897 = vpow2.f32 %v6601_v35 }
 0x1c9   :  { %15241 = vst [vmem:[#allocation68_spill] sm:$0xff] %v9845_v52  ;;  %v2881_v4 = vpop.permute.xlu0 %2880  ;;  %v9872_v30 = vadd.f32 %v1965_v14, %v8509_v43  ;;  %v1232_v41 = vadd.f32 1e-08, %v893_v27  ;;  %v9892_v27 = vadd.f32 1.0, %v6886_v26  ;;  %6899 = vrcp.f32 %v1233_v22 }
 0x1ca   :  { %15242 = vst [vmem:[#allocation123_spill] sm:$0xff] %v9847_v21  ;;  %v9861_v24 = vpop.permute.xlu2 %3397  ;;  %6564 = vmatmul.msk.bf16.gmra.mxu3 %vm162_vm0, %v2881_v4  ;;  %v2364_v36 = vpop.f32.mrf.mxu2  ;;  %v15248_v4 = vld [vmem:[#allocation31_spill] sm:$0xff]  ;;  %v1554_v26 = vadd.f32 %v1490_v6, %v1426_v19  ;;  %v1555_v35 = vadd.f32 %v1491_v7, %v1427_v60  ;;  %v15255_v19 = vld [vmem:[#allocation82_spill] sm:$0xff] }
 0x1cb   :  { %15243 = vst [vmem:[#allocation124_spill] sm:$0xff] %v9856_v51  ;;  %v2521_v14 = vmul.f32 %v7222_v62, %v15248_v4  ;;  %v2585_v49 = vmul.f32 %v2364_v36, %v2080_v2  ;;  %v2215_v25 = vpack.c.bf16 %v9872_v30, %v9856_v51  ;;  %v9899_v2 = vmul.f32 0.5, %v9780_v20  ;;  %v15251_v20 = vld [vmem:[#allocation50_spill] sm:$0xff]  ;;  %v9930_v6 = vpop.f32.mrf.mxu0 }
 0x1cc   :  { %15244 = vst [vmem:[#allocation125_spill] sm:$0xff] %v9861_v24  ;;  %v9878_v24 = vpop.eup %6887  ;;  %v9901_v36 = vmul.f32 0.5, %v1148_v9  ;;  %6901 = vrcp.f32 %v1232_v41  ;;  %vm913_vm9 = vcmp.eq.f32.partialorder %v15251_v20, inf  ;;  %v15252_v9 = vld [vmem:[#allocation77_spill] sm:$0xff]  ;;  %v928_v41 = vand.u32 2147483648, %v15250_v29 }
 0x1cd   :  { %2777 = vst.msk [vmem:[%s14891_s8 + $0x4] sm:$0xf] %vm2775_vm3, %v2712_v50  ;;  %v6602_v50 = vmul.f32 -1.442695, %v9845_v52  ;;  %v6890_v21 = vpop.eup %6889  ;;  %v2649_v62 = vadd.f32 %v2585_v49, %v2521_v14  ;;  %2894 = vrot.lane.b32.xlu2 %v2215_v25, %s7354_s15  ;;  %v9914_v60 = vadd.f32 %v15252_v9, %v9579_v33  ;;  %v15258_v9 = vld [vmem:[#allocation81_spill] sm:$0xff]  ;;  %vm915_vm11 = vcmp.eq.f32.partialorder %v15251_v20, 0.0 }
 0x1ce   :  { %15245 = vst [vmem:[#allocation126_spill] sm:$0xff] %v9872_v30  ;;  %v6892_v4 = vpop.eup %6891  ;;  %v9928_v14 = vadd.f32 1.0, %v6890_v21 }
 0x1cf   :  { %15246 = vst [vmem:[#allocation127_spill] sm:$0xff] %v9874_v57  ;;  %v4323_v57 = vpack.c.bf16 %v9856_v51, %v9856_v51  ;;  %v1184_v51 = vmul.f32 %v9827_v8, %v1183_v13  ;;  %6903 = vpow2.f32 %v6602_v50  ;;  %6041 = vrot.lane.b32.xlu1 %v9756_v58, %s7355_s23  ;;  %v2713_v49 = vpack.c.bf16 %v2649_v62, %v2649_v62  ;;  %v2081_v13 = vld [vmem:[%s14890_s2 + $0x18] sm:$0xff] }
 0x1d0   :  { %15247 = vst [vmem:[#allocation128_spill] sm:$0xff] %v9878_v24  ;;  %v6894_v24 = vpop.eup %6893  ;;  %6531 = vmatmul.msk.bf16.gmra.mxu2 %vm162_vm0, %v2215_v25  ;;  %6905 = vrcp.f32 %v9892_v27  ;;  %v914_v25 = vsel %vm913_vm9, %v15251_v20, %v15255_v19  ;;  %v1968_v7 = vpop.f32.mrf.mxu1  ;;  %v916_v62 = vand.u32 2147483648, %v15251_v20  ;;  %v926_v19 = vsel %vm925_vm8, %v15250_v29, %v15258_v9  ;;  %v7223_v9 = vld [vmem:[%s14887_s3 + $0x18] sm:$0xff] }
 0x1d1   :  { %15249 = vst [vmem:[#allocation129_spill] sm:$0xff] %v9892_v27  ;;  %4469 = vrot.lane.b32.xlu0 %v4323_v57, %s7355_s23  ;;  %v9916_v22 = vpop.permute.xlu0 %3383  ;;  %v9926_v50 = vpop.eup %6895  ;;  %v9942_v21 = vadd.f32 1.0, %v6892_v4  ;;  %v1600_v58 = vpack.c.bf16 %v1555_v35, %v1554_v26  ;;  %v9950_v27 = vadd.f32 1.0, %v6894_v24  ;;  %v2522_v38 = vmul.f32 %v7223_v9, %v15263_v16  ;;  %v7224_v29 = vld [vmem:[%s14883_s0 + $0x138] sm:$0xff]  ;;  %v7225_v9 = vld [vmem:[%s14883_s0 + $0x130] sm:$0xff] }
 0x1d2   :  { %15253 = vst [vmem:[#allocation49_spill] sm:$0xff] %v9916_v22  ;;  %v9921_v57 = vpop.permute.xlu2 %3403  ;;  %v9945_v22 = vadd.f32 %v1968_v7, %v8509_v43  ;;  %v917_v1 = vsel %vm915_vm11, %v916_v62, %v914_v25  ;;  %v6603_v7 = vmul.f32 -1.442695, %v9914_v60  ;;  %v4324_v26 = vpack.c.bf16 %v9872_v30, %v9872_v30 }
 0x1d3   :  { %15254 = vst [vmem:[#allocation50_spill] sm:$0xff] %v9921_v57  ;;  %v6898_v57 = vpop.eup %6897  ;;  %6468 = vmatmul.msk.bf16.gmra.mxu0 %vm162_vm0, %v1600_v58  ;;  %6500 = vmatmul.msk.bf16.gmra.mxu1 %vm162_vm0, %v1600_v58  ;;  %v929_v35 = vsel %vm927_vm10, %v928_v41, %v926_v19  ;;  %6907 = vrcp.f32 %v9928_v14  ;;  %v1234_v41 = vadd.f32 1e-08, %v917_v1  ;;  %v15264_v19 = vld [vmem:[#allocation61_spill] sm:$0xff]  ;;  %v10024_v16 = vpop.f32.mrf.mxu0  ;;  %vm1009_vm10 = vcmp.eq.f32.partialorder %v9215_v18, inf }
 0x1d4   :  { %15256 = vst [vmem:[#allocation77_spill] sm:$0xff] %v9926_v50  ;;  %v2366_v50 = vpop.f32.mrf.mxu2  ;;  %v4325_v24 = vpack.c.bf16 %v9945_v22, %v9945_v22  ;;  %6909 = vrcp.f32 %v9942_v21  ;;  %vm937_vm12 = vcmp.eq.f32.partialorder %v15264_v19, inf  ;;  %v1235_v25 = vadd.f32 1e-08, %v929_v35  ;;  %v15271_v35 = vld [vmem:[#allocation60_spill] sm:$0xff] }
 0x1d5   :  { %15257 = vst [vmem:[#allocation82_spill] sm:$0xff] %v9930_v6  ;;  %v9947_v6 = vpop.permute.xlu1 %3393  ;;  %v2586_v4 = vmul.f32 %v2366_v50, %v2081_v13  ;;  %4471 = vrot.lane.b32.xlu2 %v4324_v26, %s7355_s23  ;;  %6911 = vrcp.f32 %v9950_v27  ;;  %v9983_v26 = vmul.f32 0.5, %v1184_v51  ;;  %v9985_v13 = vadd.f32 1.0, %v6898_v57  ;;  %v15270_v51 = vld [vmem:[#allocation93_spill] sm:$0xff] }
 0x1d6   :  { %2778 = vst.msk [vmem:[%s14891_s8 + $0x8] sm:$0xf] %vm2775_vm3, %v2713_v49  ;;  %v6900_v49 = vpop.eup %6899  ;;  %6913 = vpow2.f32 %v6603_v7  ;;  %v938_v57 = vsel %vm937_vm12, %v15264_v19, %v15270_v51  ;;  %v940_v7 = vand.u32 2147483648, %v15264_v19  ;;  %vm949_vm13 = vcmp.eq.f32.partialorder %v15271_v35, inf }
 0x1d7   :  { %15259 = vst [vmem:[#allocation81_spill] sm:$0xff] %v9942_v21  ;;  %v6902_v42 = vpop.eup %6901  ;;  %v2650_v50 = vadd.f32 %v2586_v4, %v2522_v38  ;;  %v1361_v58 = vmul.f32 %v7224_v29, %v6900_v49  ;;  %4473 = vrot.lane.b32.xlu1 %v4325_v24, %s7355_s23  ;;  %v2082_v49 = vld [vmem:[%s14890_s2 + $0x20] sm:$0xff]  ;;  %6915 = vrcp.f32 %v1234_v41  ;;  %vm939_vm15 = vcmp.eq.f32.partialorder %v15264_v19, 0.0  ;;  %v15281_v19 = vld [vmem:[#allocation89_spill] sm:$0xff] }
 0x1d8   :  { %15260 = vst [vmem:[#allocation130_spill] sm:$0xff] %v9945_v22  ;;  %v6904_v20 = vpop.eup %6903  ;;  %v1360_v4 = vmul.f32 %v7225_v9, %v6902_v42  ;;  %v1970_v42 = vpop.f32.mrf.mxu1  ;;  %6917 = vrcp.f32 %v1235_v25  ;;  %vm951_vm1 = vcmp.eq.f32.partialorder %v15271_v35, 0.0  ;;  %v15280_v25 = vld [vmem:[#allocation72_spill] sm:$0xff]  ;;  %vm1021_vm11 = vcmp.eq.f32.partialorder %v9206_v0, inf }
 0x1d9   :  { %15261 = vst [vmem:[#allocation131_spill] sm:$0xff] %v9947_v6  ;;  %v9968_v62 = vpop.eup %6905  ;;  %6037 = vrot.lane.b32.xlu0 %v9668_v11, %s7355_s23  ;;  %v2714_v38 = vpack.c.bf16 %v2650_v50, %v2650_v50  ;;  %v9987_v6 = vadd.f32 1.0, %v6904_v20  ;;  %v9989_v1 = vpop.permute.xlu0 %3389  ;;  %v15268_v50 = vld [vmem:[#allocation85_spill] sm:$0xff]  ;;  %v10011_v20 = vadd.f32 %v1970_v42, %v8509_v43  ;;  %v7226_v42 = vld [vmem:[%s14887_s3 + $0x20] sm:$0xff]  ;;  %vm973_vm2 = vcmp.eq.f32.partialorder %v15280_v25, inf }
 0x1da   :  { %15262 = vst [vmem:[#allocation132_spill] sm:$0xff] %v9950_v27  ;;  %v4436_v24 = vpop.permute.xlu2 %4435  ;;  %v9996_v29 = vadd.f32 %v15268_v50, %v9579_v33  ;;  %6565 = vmatmul.msk.bf16.gmra.mxu3 %vm162_vm0, %v9788_v28  ;;  %v1429_v28 = vmul.f32 %v9324_v59, %v1361_v58  ;;  %v1428_v21 = vmul.f32 %v9324_v59, %v1360_v4  ;;  %v1493_v58 = vld [vmem:[%s14886_s1 + $0x138] sm:$0xff]  ;;  %v952_v27 = vand.u32 2147483648, %v15271_v35  ;;  %v1492_v4 = vld [vmem:[%s14886_s1 + $0x130] sm:$0xff] }
 0x1db   :  { %15265 = vst [vmem:[#allocation61_spill] sm:$0xff] %v9985_v13  ;;  %6919 = vrcp.f32 %v9985_v13  ;;  %v15284_v13 = vld [vmem:[#allocation90_spill] sm:$0xff]  ;;  %vm975_vm5 = vcmp.eq.f32.partialorder %v15280_v25, 0.0  ;;  %vm1011_vm12 = vcmp.eq.f32.partialorder %v9215_v18, 0.0 }
 0x1dc   :  { %15266 = vst [vmem:[#allocation133_spill] sm:$0xff] %v9987_v6  ;;  %v2369_v50 = vpop.f32.mrf.mxu2  ;;  %6921 = vrcp.f32 %v9987_v6 }
 0x1dd   :  { %15267 = vst [vmem:[#allocation134_spill] sm:$0xff] %v9989_v1  ;;  %v10013_v9 = vpop.permute.xlu1 %3399  ;;  %v10022_v1 = vpop.eup %6907  ;;  %v2587_v11 = vmul.f32 %v2369_v50, %v2082_v49  ;;  %6039 = vrot.lane.b32.xlu2 %v9721_v47, %s7355_s23 }
 0x1de   :  { %15269 = vst [vmem:[#allocation85_spill] sm:$0xff] %v9996_v29  ;;  %v10034_v41 = vpop.eup %6909 }
 0x1df   :  { %2779 = vst.msk [vmem:[%s14891_s8 + $0xc] sm:$0xf] %vm2775_vm3, %v2714_v38  ;;  %v15274_v38 = vld [vmem:[#allocation92_spill] sm:$0xff]  ;;  %v10042_v49 = vpop.eup %6911 }
 0x1e0   :  { %15272 = vst [vmem:[#allocation93_spill] sm:$0xff] %v10011_v20  ;;  %v950_v51 = vsel %vm949_vm13, %v15271_v35, %v15274_v38  ;;  %v2216_v38 = vpack.c.bf16 %v10011_v20, %v9945_v22  ;;  %v6914_v50 = vpop.eup %6913  ;;  %v976_v22 = vand.u32 2147483648, %v15280_v25  ;;  %vm1023_vm13 = vcmp.eq.f32.partialorder %v9206_v0, 0.0 }
 0x1e1   :  { %15273 = vst [vmem:[#allocation60_spill] sm:$0xff] %v10013_v9  ;;  %v15276_v9 = vld [vmem:[#allocation43_spill] sm:$0xff] }
 0x1e2   :  { %4626 = vst.msk [vmem:[%s14892_s10 + $0x4] sm:$0xf] %vm2775_vm3, %v4436_v24  ;;  %v2523_v30 = vmul.f32 %v7226_v42, %v15276_v9  ;;  %v4326_v24 = vpack.c.bf16 %v10011_v20, %v10011_v20  ;;  %v1557_v42 = vadd.f32 %v1493_v58, %v1429_v28  ;;  %v941_v9 = vsel %vm939_vm15, %v940_v7, %v938_v57  ;;  %v10064_v7 = vpop.permute.xlu0 %3395  ;;  %v2083_v28 = vld [vmem:[%s14890_s2 + $0x28] sm:$0xff]  ;;  %v15283_v58 = vld [vmem:[#allocation101_spill] sm:$0xff] }
 0x1e3   :  { %15275 = vst [vmem:[#allocation92_spill] sm:$0xff] %v10022_v1  ;;  %v15278_v1 = vld [vmem:[#allocation55_spill] sm:$0xff]  ;;  %v953_v20 = vsel %vm951_vm1, %v952_v27, %v950_v51  ;;  %2896 = vrot.lane.b32.xlu1 %v2216_v38, %s7354_s15  ;;  %6532 = vmatmul.msk.bf16.gmra.mxu2 %vm162_vm0, %v2216_v38  ;;  %v6604_v27 = vmul.f32 -1.442695, %v9996_v29  ;;  %v1556_v57 = vadd.f32 %v1492_v4, %v1428_v21  ;;  %v4442_v51 = vpop.permute.xlu2 %4441  ;;  %v1973_v4 = vpop.f32.mrf.mxu1  ;;  %vm1045_vm15 = vcmp.eq.f32.partialorder %v9317_v23, inf }
 0x1e4   :  { %15277 = vst [vmem:[#allocation135_spill] sm:$0xff] %v10034_v41  ;;  %vm961_vm14 = vcmp.eq.f32.partialorder %v15278_v1, inf  ;;  %v2651_v59 = vadd.f32 %v2587_v11, %v2523_v30  ;;  %4475 = vrot.lane.b32.xlu0 %v4326_v24, %s7355_s23  ;;  %v964_v11 = vand.u32 2147483648, %v15278_v1  ;;  %vm963_vm4 = vcmp.eq.f32.partialorder %v15278_v1, 0.0  ;;  %v6916_v24 = vpop.eup %6915 }
 0x1e5   :  { %15279 = vst [vmem:[#allocation55_spill] sm:$0xff] %v10042_v49  ;;  %v962_v35 = vsel %vm961_vm14, %v15278_v1, %v15281_v19  ;;  %v974_v38 = vsel %vm973_vm2, %v15280_v25, %v15283_v58  ;;  %v10074_v19 = vadd.f32 1.0, %v6914_v50  ;;  %v10078_v21 = vadd.f32 %v15284_v13, %v9579_v33  ;;  %v10084_v47 = vpop.permute.xlu1 %3405  ;;  %v2371_v58 = vpop.f32.mrf.mxu2  ;;  %6045 = vrot.lane.b32.xlu2 %v9795_v32, %s7355_s23 }
 0x1e6   :  { %v2715_v30 = vpack.c.bf16 %v2651_v59, %v2651_v59  ;;  %15282 = vst [vmem:[#allocation72_spill] sm:$0xff] %v10064_v7  ;;  %v6918_v59 = vpop.eup %6917  ;;  %v1236_v7 = vadd.f32 1e-08, %v941_v9  ;;  %v1601_v41 = vpack.c.bf16 %v1557_v42, %v1556_v57  ;;  %v1237_v50 = vadd.f32 1e-08, %v953_v20  ;;  %v15287_v9 = vld [vmem:[#allocation44_spill] sm:$0xff] }
 0x1e7   :  { %15285 = vst [vmem:[#allocation89_spill] sm:$0xff] %v10078_v21  ;;  %v965_v13 = vsel %vm963_vm4, %v964_v11, %v962_v35  ;;  %v2588_v57 = vmul.f32 %v2371_v58, %v2083_v28  ;;  %v977_v49 = vsel %vm975_vm5, %v976_v22, %v974_v38  ;;  %v15288_v20 = vsub.f32 1.5, %v9777_v45  ;;  %v15295_v58 = vld [vmem:[#allocation99_spill] sm:$0xff] }
 0x1e8   :  { %2780 = vst.msk [vmem:[%s14891_s8 + $0x10] sm:$0xf] %vm2775_vm3, %v2715_v30  ;;  %v7227_v30 = vld [vmem:[%s14887_s3 + $0x28] sm:$0xff]  ;;  %v15289_v25 = vsub.f32 1.5, %v9899_v2  ;;  %6923 = vpow2.f32 %v6604_v27  ;;  %6469 = vmatmul.msk.bf16.gmra.mxu0 %vm162_vm0, %v1601_v41  ;;  %6501 = vmatmul.msk.bf16.gmra.mxu1 %vm162_vm0, %v1601_v41  ;;  %v15290_v45 = vsub.f32 1.5, %v9901_v36  ;;  %v10121_v2 = vpop.f32.mrf.mxu0  ;;  %v7231_v41 = vld [vmem:[%s14887_s3 + $0x30] sm:$0xff]  ;;  %vm4950_vm4 = vweird.f32 %v9747_v5 }
 0x1e9   :  { %15286 = vst [vmem:[#allocation101_spill] sm:$0xff] %v10084_v47  ;;  %v2524_v42 = vmul.f32 %v7227_v30, %v15287_v9  ;;  %v7228_v47 = vld [vmem:[%s14883_s0 + $0x140] sm:$0xff]  ;;  %v10103_v1 = vmul.f32 %v9653_v10, %v15288_v20  ;;  %6925 = vrcp.f32 %v10074_v19  ;;  %v1238_v35 = vadd.f32 1e-08, %v965_v13  ;;  %v2084_v30 = vld [vmem:[%s14890_s2 + $0x30] sm:$0xff] }
 0x1ea   :  { %4629 = vst.msk [vmem:[%s14892_s10 + $0x10] sm:$0xf] %vm2775_vm3, %v4442_v51  ;;  %v1362_v6 = vmul.f32 %v7228_v47, %v6916_v24  ;;  %v10108_v11 = vmul.f32 %v9694_v48, %v15289_v25  ;;  %v7229_v47 = vld [vmem:[%s14883_s0 + $0x148] sm:$0xff]  ;;  %v10118_v10 = vmul.f32 %v9745_v31, %v15290_v45  ;;  %v10123_v24 = vpop.eup %6919  ;;  %v6605_v27 = vmul.f32 -1.442695, %v10078_v21  ;;  %v10149_v13 = vpop.permute.xlu0 %3401 }
 0x1eb   :  { %v1363_v22 = vmul.f32 %v7229_v47, %v6918_v59  ;;  %15291 = vst [vmem:[#allocation90_spill] sm:$0xff] %v10121_v2  ;;  %v2652_v48 = vadd.f32 %v2588_v57, %v2524_v42  ;;  %6927 = vrcp.f32 %v1236_v7  ;;  %v1239_v31 = vadd.f32 1e-08, %v977_v49  ;;  %v10131_v36 = vpop.eup %6921  ;;  %6047 = vrot.lane.b32.xlu1 %v9816_v34, %s7355_s23  ;;  %v10138_v51 = vld [vmem:[%s14884_s4] ss:$0 sm:$0xff]  ;;  %v15294_v59 = vld [vmem:[#allocation64_spill] sm:$0xff]  ;;  %v4448_v42 = vpop.permute.xlu2 %4447 }
 0x1ec   :  { %15292 = vst [vmem:[#allocation136_spill] sm:$0xff] %v10123_v24  ;;  %6043 = vrot.lane.b32.xlu0 %v9762_v61, %s7355_s23  ;;  %v1430_v38 = vmul.f32 %v10138_v51, %v1362_v6  ;;  %6929 = vrcp.f32 %v1237_v50  ;;  %vm997_vm6 = vcmp.eq.f32.partialorder %v15294_v59, inf  ;;  %v10144_v7 = vadd.f32 %v15295_v58, %v9579_v33  ;;  %v15299_v6 = vld [vmem:[#allocation69_spill] sm:$0xff]  ;;  %v1975_v50 = vpop.f32.mrf.mxu1 }
 0x1ed   :  { %15293 = vst [vmem:[#allocation137_spill] sm:$0xff] %v10131_v36  ;;  %v2716_v28 = vpack.c.bf16 %v2652_v48, %v2652_v48  ;;  %v10147_v49 = vadd.f32 %v1973_v4, %v8509_v43  ;;  %v1431_v57 = vmul.f32 %v10138_v51, %v1363_v22  ;;  %vm985_vm7 = vcmp.eq.f32.partialorder %v15299_v6, inf  ;;  %v15300_v4 = vld [vmem:[#allocation96_spill] sm:$0xff]  ;;  %v2885_v22 = vpop.permute.xlu1 %2884  ;;  %v2374_v48 = vpop.f32.mrf.mxu2 }
 0x1ee   :  { %15296 = vst [vmem:[#allocation64_spill] sm:$0xff] %v10144_v7  ;;  %6931 = vrcp.f32 %v1238_v35  ;;  %v986_v20 = vsel %vm985_vm7, %v15299_v6, %v15300_v4  ;;  %vm987_vm8 = vcmp.eq.f32.partialorder %v15299_v6, 0.0  ;;  %v988_v25 = vand.u32 2147483648, %v15299_v6  ;;  %v6924_v47 = vpop.eup %6923  ;;  %v1494_v35 = vld [vmem:[%s14886_s1 + $0x140] sm:$0xff]  ;;  %6566 = vmatmul.msk.bf16.gmra.mxu3 %vm162_vm0, %v2885_v22  ;;  %v15304_v6 = vld [vmem:[#allocation104_spill] sm:$0xff] }
 0x1ef   :  { %15297 = vst [vmem:[#allocation99_spill] sm:$0xff] %v10147_v49  ;;  %v10165_v45 = vadd.f32 %v1975_v50, %v8509_v43  ;;  %6933 = vrcp.f32 %v1239_v31  ;;  %v1000_v50 = vand.u32 2147483648, %v15294_v59  ;;  %v10179_v4 = vpop.eup %6925  ;;  %v2589_v2 = vmul.f32 %v2374_v48, %v2084_v30  ;;  %v1495_v31 = vld [vmem:[%s14886_s1 + $0x148] sm:$0xff] }
 0x1f0   :  { %15298 = vst [vmem:[#allocation138_spill] sm:$0xff] %v10149_v13  ;;  %v15303_v13 = vld [vmem:[#allocation56_spill] sm:$0xff]  ;;  %vm999_vm9 = vcmp.eq.f32.partialorder %v15294_v59, 0.0  ;;  %v4327_v9 = vpack.c.bf16 %v10147_v49, %v10147_v49  ;;  %v989_v30 = vsel %vm987_vm8, %v988_v25, %v986_v20  ;;  %6935 = vpow2.f32 %v6605_v27 }
 0x1f1   :  { %2781 = vst.msk [vmem:[%s14891_s8 + $0x14] sm:$0xf] %vm2775_vm3, %v2716_v28  ;;  %v15302_v28 = vld [vmem:[#allocation94_spill] sm:$0xff]  ;;  %v4328_v34 = vpack.c.bf16 %v10165_v45, %v10165_v45  ;;  %v1559_v61 = vadd.f32 %v1495_v31, %v1431_v57  ;;  %v1010_v24 = vsel %vm1009_vm10, %v9215_v18, %v9584_v63  ;;  %v10207_v20 = vadd.f32 %v15304_v6, %v9579_v33 }
 0x1f2   :  { %15301 = vst [vmem:[#allocation69_spill] sm:$0xff] %v10165_v45  ;;  %v998_v58 = vsel %vm997_vm6, %v15294_v59, %v15302_v28  ;;  %v6928_v28 = vpop.eup %6927  ;;  %v1012_v59 = vand.u32 2147483648, %v9215_v18  ;;  %4477 = vrot.lane.b32.xlu2 %v4327_v9, %s7355_s23  ;;  %v1240_v27 = vadd.f32 1e-08, %v989_v30  ;;  %v10215_v63 = vadd.f32 1.0, %v6924_v47 }
 0x1f3   :  { %4632 = vst.msk [vmem:[%s14892_s10 + $0x1c] sm:$0xf] %vm2775_vm3, %v4448_v42  ;;  %v2525_v42 = vmul.f32 %v7231_v41, %v15303_v13  ;;  %v2217_v41 = vpack.c.bf16 %v10165_v45, %v10147_v49  ;;  %v6930_v22 = vpop.eup %6929  ;;  %v1558_v13 = vadd.f32 %v1494_v35, %v1430_v38  ;;  %v1001_v36 = vsel %vm999_vm9, %v1000_v50, %v998_v58  ;;  %v10218_v35 = vpop.permute.xlu0 %3407  ;;  %v2085_v58 = vld [vmem:[%s14890_s2 + $0x38] sm:$0xff] }
 0x1f4   :  { %v6932_v45 = vpop.eup %6931  ;;  %15305 = vst [vmem:[#allocation96_spill] sm:$0xff] %v10207_v20  ;;  %4479 = vrot.lane.b32.xlu1 %v4328_v34, %s7355_s23  ;;  %v1022_v38 = vsel %vm1021_vm11, %v9206_v0, %v9559_v17  ;;  %v6606_v25 = vmul.f32 -1.442695, %v10144_v7  ;;  %v10223_v50 = vpop.permute.xlu2 %2888  ;;  %v1024_v34 = vand.u32 2147483648, %v9206_v0  ;;  %v7232_v17 = vld [vmem:[%s14883_s0 + $0x150] sm:$0xff]  ;;  %v7234_v0 = vld [vmem:[%s14887_s3 + $0x38] sm:$0xff]  ;;  %6937 = vrcp.f32 %v1240_v27 }
 0x1f5   :  { %v2653_v48 = vadd.f32 %v2589_v2, %v2525_v42  ;;  %2898 = vrot.lane.b32.xlu0 %v2217_v41, %s7354_s15  ;;  %v10209_v2 = vpop.f32.mrf.mxu0  ;;  %6533 = vmatmul.msk.bf16.gmra.mxu2 %vm162_vm0, %v2217_v41  ;;  %v6934_v57 = vpop.eup %6933  ;;  %15307 = vst [vmem:[#allocation104_spill] sm:$0xff] %v10218_v35  ;;  %v1364_v47 = vmul.f32 %v7232_v17, %v6928_v28  ;;  %v1241_v31 = vadd.f32 1e-08, %v1001_v36  ;;  %v7233_v35 = vld [vmem:[%s14883_s0 + $0x158] sm:$0xff]  ;;  %v6607_v32 = vmul.f32 -1.442695, %v10207_v20 }
 0x1f6   :  { %15306 = vst [vmem:[#allocation94_spill] sm:$0xff] %v10209_v2  ;;  %v1978_v42 = vpop.f32.mrf.mxu1  ;;  %v1013_v41 = vsel %vm1011_vm12, %v1012_v59, %v1010_v24  ;;  %v1602_v18 = vpack.c.bf16 %v1559_v61, %v1558_v13  ;;  %v2376_v6 = vpop.f32.mrf.mxu2  ;;  %v1025_v2 = vsel %vm1023_vm13, %v1024_v34, %v1022_v38  ;;  %v15309_v61 = vld [vmem:[#allocation58_spill] sm:$0xff]  ;;  %6939 = vrcp.f32 %v10215_v63  ;;  %v7236_v27 = vld [vmem:[%s14883_s0 + $0x168] sm:$0xff] }
 0x1f7   :  { %v2717_v9 = vpack.c.bf16 %v2653_v48, %v2653_v48  ;;  %v10236_v30 = vadd.f32 %v1978_v42, %v8509_v43  ;;  %v4438_v48 = vpop.permute.xlu1 %4437  ;;  %v6936_v49 = vpop.eup %6935  ;;  %v2526_v24 = vmul.f32 %v7234_v0, %v15309_v61  ;;  %v2590_v36 = vmul.f32 %v2376_v6, %v2085_v58  ;;  %v7235_v28 = vld [vmem:[%s14883_s0 + $0x160] sm:$0xff] }
 0x1f8   :  { %4627 = vst.msk [vmem:[%s14892_s10 + $0x8] sm:$0xf] %vm2775_vm3, %v4438_v48  ;;  %6470 = vmatmul.msk.bf16.gmra.mxu0 %vm162_vm0, %v1602_v18  ;;  %6502 = vmatmul.msk.bf16.gmra.mxu1 %vm162_vm0, %v1602_v18  ;;  %v1242_v59 = vadd.f32 1e-08, %v1013_v41  ;;  %6941 = vrcp.f32 %v1241_v31  ;;  %v1243_v58 = vadd.f32 1e-08, %v1025_v2  ;;  %v10272_v41 = vmul.f32 %v9733_v54, %v9498_v15 }
 0x1f9   :  { %2782 = vst.msk [vmem:[%s14891_s8 + $0x18] sm:$0xf] %vm2775_vm3, %v2717_v9  ;;  %v1365_v9 = vmul.f32 %v7233_v35, %v6930_v22  ;;  %v4329_v13 = vpack.c.bf16 %v10236_v30, %v10236_v30  ;;  %v1366_v22 = vmul.f32 %v7235_v28, %v6932_v45  ;;  %v2654_v38 = vadd.f32 %v2590_v36, %v2526_v24  ;;  %v1497_v31 = vld [vmem:[%s14886_s1 + $0x158] sm:$0xff]  ;;  %v1498_v28 = vld [vmem:[%s14886_s1 + $0x160] sm:$0xff] }
 0x1fa   :  { %15308 = vst [vmem:[#allocation139_spill] sm:$0xff] %v10236_v30  ;;  %v1367_v35 = vmul.f32 %v7236_v27, %v6934_v57  ;;  %v15310_v34 = vsub.f32 1.5, %v9983_v26  ;;  %v10264_v17 = vadd.f32 1.0, %v6936_v49  ;;  %6943 = vpow2.f32 %v6606_v25  ;;  %6051 = vrot.lane.b32.xlu2 %v9914_v60, %s7355_s23  ;;  %v1496_v49 = vld [vmem:[%s14886_s1 + $0x150] sm:$0xff]  ;;  %v2086_v25 = vld [vmem:[%s14890_s2 + $0x40] sm:$0xff]  ;;  %v15316_v27 = vld [vmem:[#allocation73_spill] sm:$0xff] }
 0x1fb   :  { %v1432_v45 = vmul.f32 %v10138_v51, %v1364_v47  ;;  %6945 = vpow2.f32 %v6607_v32  ;;  %v2718_v26 = vpack.c.bf16 %v2654_v38, %v2654_v38  ;;  %v10282_v2 = vmul.f32 %v10103_v1, %v9574_v56  ;;  %v2887_v32 = vpop.permute.xlu0 %2886  ;;  %v6938_v1 = vpop.eup %6937  ;;  %v7237_v38 = vld [vmem:[%s14887_s3 + $0x40] sm:$0xff] }
 0x1fc   :  { %v1187_v42 = vmul.f32 %v9827_v8, %v15310_v34  ;;  %6053 = vrot.lane.b32.xlu1 %v9996_v29, %s7355_s23  ;;  %v1433_v8 = vmul.f32 %v10138_v51, %v1365_v9  ;;  %v10286_v57 = vmul.f32 %v10108_v11, %v9622_v40  ;;  %v10290_v54 = vadd.f32 %v9598_v39, %v9579_v33  ;;  %v4454_v47 = vpop.permute.xlu2 %4453  ;;  %v10310_v9 = vpop.eup %6939 }
 0x1fd   :  { %4481 = vrot.lane.b32.xlu0 %v4329_v13, %s7355_s23  ;;  %15311 = vst [vmem:[#allocation140_spill] sm:$0xff] %v10282_v2  ;;  %6947 = vrcp.f32 %v1242_v59  ;;  %v10300_v11 = vmul.f32 %v10118_v10, %v9635_v55  ;;  %v10302_v18 = vpop.f32.mrf.mxu0  ;;  %v1434_v48 = vmul.f32 %v10138_v51, %v1366_v22  ;;  %v1435_v6 = vmul.f32 %v10138_v51, %v1367_v35  ;;  %v1499_v22 = vld [vmem:[%s14886_s1 + $0x168] sm:$0xff] }
 0x1fe   :  { %15312 = vst [vmem:[#allocation141_spill] sm:$0xff] %v10290_v54  ;;  %v1980_v39 = vpop.f32.mrf.mxu1  ;;  %6949 = vrcp.f32 %v1243_v58  ;;  %v10313_v0 = vmul.f32 %v1187_v42, %v9708_v46  ;;  %v2379_v36 = vpop.f32.mrf.mxu2  ;;  %v1560_v13 = vadd.f32 %v1496_v49, %v1432_v45  ;;  %v2527_v35 = vmul.f32 %v7237_v38, %v15316_v27  ;;  %6567 = vmatmul.msk.bf16.gmra.mxu3 %vm162_vm0, %v2887_v32  ;;  %v15317_v42 = vld [vmem:[#allocation76_spill] sm:$0xff]  ;;  %v7239_v38 = vld [vmem:[%s14883_s0 + $0x178] sm:$0xff] }
 0x1ff   :  { %15313 = vst [vmem:[#allocation142_spill] sm:$0xff] %v10302_v18  ;;  %6951 = vrcp.f32 %v10264_v17  ;;  %v10317_v10 = vadd.f32 %v1980_v39, %v8509_v43  ;;  %v4444_v24 = vpop.permute.xlu1 %4443  ;;  %v6942_v59 = vpop.eup %6941  ;;  %v2591_v58 = vmul.f32 %v2379_v36, %v2086_v25  ;;  %v1561_v34 = vadd.f32 %v1497_v31, %v1433_v8 }
 0x200   :  { %2783 = vst.msk [vmem:[%s14891_s8 + $0x1c] sm:$0xf] %vm2775_vm3, %v2718_v26  ;;  %vm1033_vm14 = vcmp.eq.f32.partialorder %v15317_v42, inf  ;;  %v6944_v45 = vpop.eup %6943  ;;  %v6608_v26 = vmul.f32 -1.442695, %v10290_v54  ;;  %v1562_v36 = vadd.f32 %v1498_v28, %v1434_v48  ;;  %v1563_v32 = vadd.f32 %v1499_v22, %v1435_v6 }
 0x201   :  { %15314 = vst [vmem:[#allocation143_spill] sm:$0xff] %v10313_v0  ;;  %v2218_v49 = vpack.c.bf16 %v10317_v10, %v10236_v30  ;;  %v2655_v25 = vadd.f32 %v2591_v58, %v2527_v35  ;;  %v1036_v8 = vand.u32 2147483648, %v15317_v42  ;;  %v1369_v18 = vmul.f32 %v7239_v38, %v6942_v59  ;;  %v15335_v0 = vld [vmem:[#allocation112_spill] sm:$0xff] }
 0x202   :  { %15315 = vst [vmem:[#allocation144_spill] sm:$0xff] %v10317_v10  ;;  %vm1035_vm1 = vcmp.eq.f32.partialorder %v15317_v42, 0.0  ;;  %v1048_v48 = vand.u32 2147483648, %v9317_v23  ;;  %v10359_v28 = vadd.f32 1.0, %v6944_v45  ;;  %v10363_v22 = vadd.f32 %v9670_v37, %v9579_v33  ;;  %v2087_v37 = vld [vmem:[%s14890_s2 + $0x48] sm:$0xff] }
 0x203   :  { %4635 = vst.msk [vmem:[%s14892_s10 + $0x28] sm:$0xf] %vm2775_vm3, %v4454_v47  ;;  %v7238_v47 = vld [vmem:[%s14883_s0 + $0x170] sm:$0xff]  ;;  %2900 = vrot.lane.b32.xlu2 %v2218_v49, %s7354_s15  ;;  %v2719_v59 = vpack.c.bf16 %v2655_v25, %v2655_v25  ;;  %v1046_v58 = vsel %vm1045_vm15, %v9317_v23, %v9631_v44  ;;  %6953 = vpow2.f32 %v6608_v26  ;;  %v1603_v45 = vpack.c.bf16 %v1561_v34, %v1560_v13 }
 0x204   :  { %4630 = vst.msk [vmem:[%s14892_s10 + $0x14] sm:$0xf] %vm2775_vm3, %v4444_v24  ;;  %v1368_v39 = vmul.f32 %v7238_v47, %v6938_v1  ;;  %v6946_v24 = vpop.eup %6945  ;;  %v15318_v1 = vld [vmem:[#allocation9_spill] sm:$0xff]  ;;  %6059 = vrot.lane.b32.xlu1 %v10207_v20, %s7355_s23  ;;  %v4460_v44 = vpop.permute.xlu2 %4459  ;;  %v10384_v25 = vpack.c.bf16 %v1563_v32, %v1562_v36  ;;  %v4946_v26 = vmul.f32 %v9832_v3, %v9747_v5  ;;  %vm1047_vm2 = vcmp.eq.f32.partialorder %v9317_v23, 0.0  ;;  %v7240_v36 = vld [vmem:[%s14883_s0 + $0x180] sm:$0xff] }
 0x205   :  { %v6948_v31 = vpop.eup %6947  ;;  %6049 = vrot.lane.b32.xlu0 %v9845_v52, %s7355_s23  ;;  %v1034_v35 = vsel %vm1033_vm14, %v15317_v42, %v15318_v1  ;;  %15319 = vst [vmem:[#allocation76_spill] sm:$0xff] %v10363_v22  ;;  %6534 = vmatmul.msk.bf16.gmra.mxu2 %vm162_vm0, %v2218_v49  ;;  %v10374_v38 = vadd.f32 1.0, %v6946_v24  ;;  %v4434_v1 = vpop.permute.xlu0 %4433  ;;  %v7241_v42 = vld [vmem:[%s14883_s0 + $0x188] sm:$0xff]  ;;  %v1437_v61 = vmul.f32 %v10138_v51, %v1369_v18  ;;  %6955 = vrcp.f32 %v10359_v28  ;;  %v1500_v18 = vld [vmem:[%s14886_s1 + $0x170] sm:$0xff] }
 0x206   :  { %v6950_v6 = vpop.eup %6949  ;;  %v1436_v27 = vmul.f32 %v10138_v51, %v1368_v39  ;;  %v1983_v49 = vpop.f32.mrf.mxu1  ;;  %2784 = vst.msk [vmem:[%s14891_s8 + $0x20] sm:$0xf] %vm2775_vm3, %v2719_v59  ;;  %v1037_v13 = vsel %vm1035_vm1, %v1036_v8, %v1034_v35  ;;  %v1370_v32 = vmul.f32 %v7240_v36, %v6948_v31  ;;  %v1049_v8 = vsel %vm1047_vm2, %v1048_v48, %v1046_v58  ;;  %v15323_v31 = vld [vmem:[#allocation74_spill] sm:$0xff] }
 0x207   :  { %v10372_v47 = vpop.eup %6951  ;;  %v10392_v34 = vadd.f32 %v1983_v49, %v8509_v43  ;;  %v4450_v39 = vpop.permute.xlu1 %4449  ;;  %4625 = vst.msk [vmem:[%s14892_s10] sm:$0xf] %vm2775_vm3, %v4434_v1  ;;  %v1371_v23 = vmul.f32 %v7241_v42, %v6950_v6  ;;  %v6609_v35 = vmul.f32 -1.442695, %v10363_v22  ;;  %v7242_v1 = vld [vmem:[%s14887_s3 + $0x48] sm:$0xff]  ;;  %v4330_v48 = vpack.c.bf16 %v10317_v10, %v10317_v10 }
 0x208   :  { %15320 = vst [vmem:[#allocation9_spill] sm:$0xff] %v10372_v47  ;;  %v2381_v24 = vpop.f32.mrf.mxu2  ;;  %v10405_v59 = vpop.f32.mrf.mxu0  ;;  %v2528_v49 = vmul.f32 %v7242_v1, %v15323_v31  ;;  %6471 = vmatmul.msk.bf16.gmra.mxu0 %vm162_vm0, %v1603_v45  ;;  %6503 = vmatmul.msk.bf16.gmra.mxu1 %vm162_vm0, %v1603_v45  ;;  %v1244_v58 = vadd.f32 1e-08, %v1037_v13  ;;  %v4954_v45 = vand.u32 2147483647, %v9747_v5  ;;  %6957 = vrcp.f32 %v10374_v38 }
 0x209   :  { %15321 = vst [vmem:[#allocation145_spill] sm:$0xff] %v10392_v34  ;;  %v2592_v36 = vmul.f32 %v2381_v24, %v2087_v37  ;;  %v4331_v6 = vpack.c.bf16 %v10392_v34, %v10392_v34  ;;  %v1501_v24 = vld [vmem:[%s14886_s1 + $0x178] sm:$0xff]  ;;  %v1245_v42 = vadd.f32 1e-08, %v1049_v8  ;;  %v6954_v1 = vpop.eup %6953  ;;  %v1438_v13 = vmul.f32 %v10138_v51, %v1370_v32 }
 0x20a   :  { %15322 = vst [vmem:[#allocation146_spill] sm:$0xff] %v10405_v59  ;;  %6959 = vpow2.f32 %v6609_v35  ;;  %v1564_v8 = vadd.f32 %v1500_v18, %v1436_v27  ;;  %vm1057_vm5 = vcmp.eq.f32.partialorder %v9301_v12, inf  ;;  %v1565_v35 = vadd.f32 %v1501_v24, %v1437_v61 }
 0x20b   :  { %4633 = vst.msk [vmem:[%s14892_s10 + $0x20] sm:$0xf] %vm2775_vm3, %v4450_v39  ;;  %v2656_v37 = vadd.f32 %v2592_v36, %v2528_v49  ;;  %v4947_v39 = vsub.f32 1.0, %v4946_v26  ;;  %4483 = vrot.lane.b32.xlu2 %v4330_v48, %s7355_s23  ;;  %v1439_v26 = vmul.f32 %v10138_v51, %v1371_v23  ;;  %v1502_v36 = vld [vmem:[%s14886_s1 + $0x180] sm:$0xff]  ;;  %v1503_v48 = vld [vmem:[%s14886_s1 + $0x188] sm:$0xff]  ;;  %6961 = vrcp.f32 %v1244_v58  ;;  %v10464_v61 = vpop.eup %6955 }
 0x20c   :  { %4638 = vst.msk [vmem:[%s14892_s10 + $0x34] sm:$0xf] %vm2775_vm3, %v4460_v44  ;;  %v4956_v44 = vand.u32 2147483648, %v9747_v5  ;;  %4485 = vrot.lane.b32.xlu1 %v4331_v6, %s7355_s23  ;;  %v2088_v23 = vld [vmem:[%s14890_s2 + $0x50] sm:$0xff]  ;;  %v1058_v27 = vsel %vm1057_vm5, %v9301_v12, %v9628_v53  ;;  %vm1059_vm6 = vcmp.eq.f32.partialorder %v9301_v12, 0.0  ;;  %v10456_v6 = vadd.f32 1.0, %v6954_v1 }
 0x20d   :  { %6055 = vrot.lane.b32.xlu0 %v10078_v21, %s7355_s23  ;;  %v2720_v49 = vpack.c.bf16 %v2656_v37, %v2656_v37  ;;  %v4440_v32 = vpop.permute.xlu0 %4439  ;;  %v4948_v37 = vmul.f32 %v9832_v3, %v4947_v39  ;;  %6963 = vrcp.f32 %v1245_v42  ;;  %v1060_v59 = vand.u32 2147483648, %v9301_v12  ;;  %v7243_v39 = vld [vmem:[%s14887_s3 + $0x50] sm:$0xff]  ;;  %v15327_v42 = vld [vmem:[#allocation86_spill] sm:$0xff] }
 0x20e   :  { %15324 = vst [vmem:[#allocation147_spill] sm:$0xff] %v10456_v6  ;;  %v1985_v18 = vpop.f32.mrf.mxu1  ;;  %v1566_v1 = vadd.f32 %v1502_v36, %v1438_v13  ;;  %v1567_v31 = vadd.f32 %v1503_v48, %v1439_v26  ;;  %6568 = vmatmul.msk.bf16.gmra.mxu3 %vm162_vm0, %v10223_v50  ;;  %vm4951_vm8 = vweird.f32 %v9832_v3  ;;  %vm10485_vm9 = vcmp.eq.f32.partialorder %v4954_v45, 8.507059e+37  ;;  %v10491_v36 = vpop.eup %6957  ;;  %v15330_v50 = vld [vmem:[#allocation6_spill] sm:$0xff] }
 0x20f   :  { %2785 = vst.msk [vmem:[%s14891_s8 + $0x24] sm:$0xf] %vm2775_vm3, %v2720_v49  ;;  %v10467_v58 = vadd.f32 %v1985_v18, %v8509_v43  ;;  %v4456_v53 = vpop.permute.xlu1 %4455  ;;  %v15326_v49 = vld [vmem:[#allocation2_spill] sm:$0xff]  ;;  %v2529_v18 = vmul.f32 %v7243_v39, %v15327_v42  ;;  %v1061_v26 = vsel %vm1059_vm6, %v1060_v59, %v1058_v27  ;;  %vm1081_vm10 = vcmp.eq.f32.partialorder %v15330_v50, inf  ;;  %vm10530_vm12 = vmor %vm4950_vm4, %vm4951_vm8 }
 0x210   :  { %4628 = vst.msk [vmem:[%s14892_s10 + $0xc] sm:$0xf] %vm2775_vm3, %v4440_v32  ;;  %v2384_v24 = vpop.f32.mrf.mxu2  ;;  %vm1069_vm7 = vcmp.eq.f32.partialorder %v15326_v49, inf  ;;  %v10499_v45 = vpop.f32.mrf.mxu0  ;;  %v4949_v39 = vadd.f32 %v9832_v3, %v4948_v37  ;;  %v15332_v12 = vld [vmem:[#allocation106_spill] sm:$0xff]  ;;  %vm1071_vm11 = vcmp.eq.f32.partialorder %v15326_v49, 0.0  ;;  %6965 = vrcp.f32 %v10456_v6  ;;  %v15334_v37 = vld [vmem:[#allocation128_spill] sm:$0xff] }
 0x211   :  { %15325 = vst [vmem:[#allocation148_spill] sm:$0xff] %v10467_v58  ;;  %v2593_v10 = vmul.f32 %v2384_v24, %v2088_v23  ;;  %v2219_v48 = vpack.c.bf16 %v10467_v58, %v10392_v34  ;;  %v4332_v32 = vpack.c.bf16 %v10467_v58, %v10467_v58  ;;  %v1072_v23 = vand.u32 2147483648, %v15326_v49 }
 0x212   :  { %4636 = vst.msk [vmem:[%s14892_s10 + $0x2c] sm:$0xf] %vm2775_vm3, %v4456_v53  ;;  %v6960_v53 = vpop.eup %6959  ;;  %v1070_v59 = vsel %vm1069_vm7, %v15326_v49, %v15332_v12  ;;  %v4957_v42 = vor.u32 1.1754944e-38, %v4956_v44  ;;  %v10517_v34 = vpack.c.bf16 %v1567_v31, %v1566_v1  ;;  %v1246_v30 = vadd.f32 1e-08, %v1061_v26  ;;  %v4466_v44 = vpop.permute.xlu2 %4465  ;;  %v15338_v1 = vld [vmem:[#allocation8_spill] sm:$0xff] }
 0x213   :  { %15331 = vst [vmem:[#allocation2_spill] sm:$0xff] %v10499_v45  ;;  %v2657_v24 = vadd.f32 %v2593_v10, %v2529_v18  ;;  %v6962_v27 = vpop.eup %6961  ;;  %6057 = vrot.lane.b32.xlu2 %v10144_v7, %s7355_s23  ;;  %v10511_v45 = vpack.c.bf16 %v1565_v35, %v1564_v8  ;;  %v15333_v10 = vld [vmem:[#allocation121_spill] sm:$0xff]  ;;  %v1073_v31 = vsel %vm1071_vm11, %v1072_v23, %v1070_v59  ;;  %vm1083_vm13 = vcmp.eq.f32.partialorder %v15330_v50, 0.0  ;;  %v7244_v49 = vld [vmem:[%s14883_s0 + $0x190] sm:$0xff] }
 0x214   :  { %v4961_v18 = vmul.f32 %v15334_v37, %v15333_v10  ;;  %v6964_v58 = vpop.eup %6963  ;;  %2902 = vrot.lane.b32.xlu1 %v2219_v48, %s7354_s15  ;;  %v2089_v35 = vld [vmem:[%s14890_s2 + $0x58] sm:$0xff]  ;;  %vm1093_vm14 = vcmp.eq.f32.partialorder %v15338_v1, inf  ;;  %v4953_v5 = vsel %vm10530_vm12, %v9832_v3, %v4949_v39  ;;  %v1372_v23 = vmul.f32 %v7244_v49, %v6962_v27  ;;  %4641 = vst.msk [vmem:[%s14892_s10 + $0x40] sm:$0xf] %vm2775_vm3, %v4466_v44  ;;  %v15342_v44 = vld [vmem:[#allocation87_spill] sm:$0xff] }
 0x215   :  { %4487 = vrot.lane.b32.xlu0 %v4332_v32, %s7355_s23  ;;  %6535 = vmatmul.msk.bf16.gmra.mxu2 %vm162_vm0, %v2219_v48  ;;  %v2721_v12 = vpack.c.bf16 %v2657_v24, %v2657_v24  ;;  %v1082_v32 = vsel %vm1081_vm10, %v15330_v50, %v15335_v0  ;;  %v4446_v8 = vpop.permute.xlu0 %4445  ;;  %v1084_v0 = vand.u32 2147483648, %v15330_v50  ;;  %v15339_v26 = vld [vmem:[#allocation117_spill] sm:$0xff]  ;;  %vm1095_vm15 = vcmp.eq.f32.partialorder %v15338_v1, 0.0  ;;  %v15341_v48 = vld [vmem:[#allocation111_spill] sm:$0xff]  ;;  %v1504_v50 = vld [vmem:[%s14886_s1 + $0x190] sm:$0xff] }
 0x216   :  { %v10541_v24 = vadd.f32 %v15339_v26, %v9579_v33  ;;  %v1988_v2 = vpop.f32.mrf.mxu1  ;;  %v10554_v59 = vadd.f32 1.0, %v6960_v53  ;;  %v4962_v46 = vsub.f32 1.0, %v4961_v18  ;;  %v7245_v3 = vld [vmem:[%s14883_s0 + $0x198] sm:$0xff]  ;;  %v1094_v27 = vsel %vm1093_vm14, %v15338_v1, %v15341_v48  ;;  %v10574_v6 = vpop.eup %6965  ;;  %4631 = vst.msk [vmem:[%s14892_s10 + $0x18] sm:$0xf] %vm2775_vm3, %v4446_v8  ;;  %v15345_v8 = vld [vmem:[#allocation16_spill] sm:$0xff] }
 0x217   :  { %2786 = vst.msk [vmem:[%s14891_s8 + $0x28] sm:$0xf] %vm2775_vm3, %v2721_v12  ;;  %v4462_v26 = vpop.permute.xlu1 %4461  ;;  %v1373_v39 = vmul.f32 %v7245_v3, %v6964_v58  ;;  %v7246_v53 = vld [vmem:[%s14887_s3 + $0x58] sm:$0xff]  ;;  %v1247_v56 = vadd.f32 1e-08, %v1073_v31  ;;  %v1096_v21 = vand.u32 2147483648, %v15338_v1  ;;  %v4958_v58 = vsel %vm10485_vm9, %v4957_v42, %v4953_v5 }
 0x218   :  { %15340 = vst [vmem:[#allocation6_spill] sm:$0xff] %v10541_v24  ;;  %v2386_v12 = vpop.f32.mrf.mxu2  ;;  %v2530_v49 = vmul.f32 %v7246_v53, %v15342_v44  ;;  %6472 = vmatmul.msk.bf16.gmra.mxu0 %vm162_vm0, %v10384_v25  ;;  %6504 = vmatmul.msk.bf16.gmra.mxu1 %vm162_vm0, %v10384_v25  ;;  %vm4965_vm1 = vweird.f32 %v15333_v10  ;;  %6967 = vrcp.f32 %v1246_v30  ;;  %v1085_v31 = vsel %vm1083_vm13, %v1084_v0, %v1082_v32  ;;  %v10605_v32 = vpop.f32.mrf.mxu0  ;;  %v2090_v48 = vld [vmem:[%s14890_s2 + $0x60] sm:$0xff]  ;;  %v15347_v53 = vld [vmem:[#allocation4_spill] sm:$0xff] }
 0x219   :  { %4639 = vst.msk [vmem:[%s14892_s10 + $0x38] sm:$0xf] %vm2775_vm3, %v4462_v26  ;;  %v2594_v18 = vmul.f32 %v2386_v12, %v2089_v35  ;;  %v6610_v26 = vmul.f32 -1.442695, %v10541_v24  ;;  %v1440_v25 = vmul.f32 %v10138_v51, %v1372_v23  ;;  %v1097_v3 = vsel %vm1095_vm15, %v1096_v21, %v1094_v27 }
 0x21a   :  { %15343 = vst [vmem:[#allocation106_spill] sm:$0xff] %v10574_v6  ;;  %6969 = vrcp.f32 %v10554_v59  ;;  %v4963_v30 = vmul.f32 %v15334_v37, %v4962_v46  ;;  %v1441_v13 = vmul.f32 %v10138_v51, %v1373_v39  ;;  %v5905_v0 = vmul.f32 %v4958_v58, %v15345_v8  ;;  %v1505_v46 = vld [vmem:[%s14886_s1 + $0x198] sm:$0xff]  ;;  %v6034_v23 = vpop.permute.xlu2 %6033 }
 0x21b   :  { %v2658_v12 = vadd.f32 %v2594_v18, %v2530_v49  ;;  %6063 = vrot.lane.b32.xlu2 %v10363_v22, %s7355_s23  ;;  %15344 = vst [vmem:[#allocation121_spill] sm:$0xff] %v10605_v32  ;;  %6971 = vrcp.f32 %v1247_v56  ;;  %v1248_v1 = vadd.f32 1e-08, %v1085_v31  ;;  %v10614_v5 = vadd.f32 %v1988_v2, %v8509_v43  ;;  %v15348_v49 = vld [vmem:[#allocation123_spill] sm:$0xff] }
 0x21c   :  { %6065 = vrot.lane.b32.xlu1 %v10541_v24, %s7355_s23  ;;  %vm4966_vm2 = vweird.f32 %v15334_v37  ;;  %v1249_v27 = vadd.f32 1e-08, %v1097_v3  ;;  %vm1105_vm4 = vcmp.eq.f32.partialorder %v15347_v53, inf  ;;  %6973 = vpow2.f32 %v6610_v26 }
 0x21d   :  { %6061 = vrot.lane.b32.xlu0 %v10290_v54, %s7355_s23  ;;  %v2722_v21 = vpack.c.bf16 %v2658_v12, %v2658_v12  ;;  %15346 = vst [vmem:[#allocation128_spill] sm:$0xff] %v10614_v5  ;;  %v4452_v39 = vpop.permute.xlu0 %4451  ;;  %v10623_v18 = vadd.f32 %v15348_v49, %v9579_v33  ;;  %v6225_v2 = vmul.f32 %v6034_v23, %v5905_v0  ;;  %vm6353_vm5 = vcmask 519168   ;;  %vm10659_vm6 = vmor %vm4965_vm1, %vm4966_vm2  ;;  %v15365_v54 = vld [vmem:[#allocation82_spill] sm:$0xff] }
 0x21e   :  { %v1990_v56 = vpop.f32.mrf.mxu1  ;;  %v1568_v58 = vadd.f32 %v1504_v50, %v1440_v25  ;;  %v6968_v31 = vpop.eup %6967  ;;  %4634 = vst.msk [vmem:[%s14892_s10 + $0x24] sm:$0xf] %vm2775_vm3, %v4452_v39  ;;  %v4964_v8 = vadd.f32 %v15334_v37, %v4963_v30  ;;  %v1569_v49 = vadd.f32 %v1505_v46, %v1441_v13  ;;  %v7247_v25 = vld [vmem:[%s14887_s3 + $0x60] sm:$0xff]  ;;  %v15350_v50 = vld [vmem:[#allocation24_spill] sm:$0xff]  ;;  %6975 = vrcp.f32 %v1248_v1 }
 0x21f   :  { %2787 = vst.msk [vmem:[%s14891_s8 + $0x2c] sm:$0xf] %vm2775_vm3, %v2722_v21  ;;  %v10630_v12 = vadd.f32 %v1990_v56, %v8509_v43  ;;  %v2891_v3 = vpop.permute.xlu1 %2890  ;;  %v6289_v42 = vpack.c.bf16 %v6225_v2, %v6225_v2  ;;  %v2531_v21 = vmul.f32 %v7247_v25, %v15350_v50  ;;  %v4333_v39 = vpack.c.bf16 %v10614_v5, %v10614_v5  ;;  %v15353_v2 = vld [vmem:[#allocation122_spill] sm:$0xff] }
 0x220   :  { %v2389_v26 = vpop.f32.mrf.mxu2  ;;  %6569 = vmatmul.msk.bf16.gmra.mxu3 %vm162_vm0, %v2891_v3  ;;  %v10642_v23 = vpop.eup %6969  ;;  %6977 = vrcp.f32 %v1249_v27  ;;  %v6611_v56 = vmul.f32 -1.442695, %v10623_v18  ;;  %v4986_v3 = vand.u32 2147483648, %v15353_v2  ;;  %v1108_v27 = vand.u32 2147483648, %v15347_v53 }
 0x221   :  { %15349 = vst [vmem:[#allocation112_spill] sm:$0xff] %v10630_v12  ;;  %v2595_v0 = vmul.f32 %v2389_v26, %v2090_v48  ;;  %v4334_v30 = vpack.c.bf16 %v10630_v12, %v10630_v12  ;;  %v2220_v13 = vpack.c.bf16 %v10630_v12, %v10614_v5  ;;  %v6972_v46 = vpop.eup %6971  ;;  %v7248_v26 = vld [vmem:[%s14883_s0 + $0x1a0] sm:$0xff]  ;;  %vm1107_vm7 = vcmp.eq.f32.partialorder %v15347_v53, 0.0  ;;  %v10701_v5 = vpop.f32.mrf.mxu0 }
 0x222   :  { %6354 = vst.msk [vmem:[%s14893_s11] sm:$0xf] %vm6353_vm5, %v6289_v42  ;;  %v4968_v42 = vsel %vm10659_vm6, %v15334_v37, %v4964_v8  ;;  %v1374_v25 = vmul.f32 %v7248_v26, %v6968_v31  ;;  %v6974_v35 = vpop.eup %6973  ;;  %v15355_v37 = vand.u32 2147483647, %v15333_v10  ;;  %v15358_v31 = vld [vmem:[#allocation129_spill] sm:$0xff]  ;;  %v10695_v50 = vpack.c.bf16 %v1569_v49, %v1568_v58 }
 0x223   :  { %v2659_v1 = vadd.f32 %v2595_v0, %v2531_v21  ;;  %4489 = vrot.lane.b32.xlu2 %v4333_v39, %s7355_s23  ;;  %v15354_v21 = vld [vmem:[#allocation14_spill] sm:$0xff]  ;;  %v4991_v48 = vmul.f32 %v9968_v62, %v15358_v31  ;;  %v15359_v26 = vld [vmem:[#allocation77_spill] sm:$0xff]  ;;  %vm1117_vm9 = vcmp.eq.f32.partialorder %v9498_v15, inf  ;;  %6979 = vpow2.f32 %v6611_v56  ;;  %15361 = vst [vmem:[#allocation8_spill] sm:$0xff] %v10701_v5 }
 0x224   :  { %v1106_v0 = vsel %vm1105_vm4, %v15347_v53, %v15354_v21  ;;  %4491 = vrot.lane.b32.xlu1 %v4334_v30, %s7355_s23  ;;  %vm10682_vm8 = vcmp.eq.f32.partialorder %v15355_v37, 8.507059e+37  ;;  %v4976_v21 = vmul.f32 %v15359_v26, %v15353_v2  ;;  %v2091_v30 = vld [vmem:[%s14890_s2 + $0x68] sm:$0xff]  ;;  %v6976_v12 = vpop.eup %6975  ;;  %v10708_v58 = vor.u32 1.1754944e-38, %v4986_v3 }
 0x225   :  { %2904 = vrot.lane.b32.xlu0 %v2220_v13, %s7354_s15  ;;  %6536 = vmatmul.msk.bf16.gmra.mxu2 %vm162_vm0, %v2220_v13  ;;  %v2723_v39 = vpack.c.bf16 %v2659_v1, %v2659_v1  ;;  %v4458_v32 = vpop.permute.xlu0 %4457  ;;  %v15360_v13 = vand.u32 2147483648, %v15333_v10  ;;  %v7249_v37 = vld [vmem:[%s14883_s0 + $0x1a8] sm:$0xff]  ;;  %v4984_v10 = vand.u32 2147483647, %v15353_v2  ;;  %v10712_v49 = vsel %vm1107_vm7, %v1108_v27, %v1106_v0 }
 0x226   :  { %v1375_v44 = vmul.f32 %v7249_v37, %v6972_v46  ;;  %v1993_v24 = vpop.f32.mrf.mxu1  ;;  %vm1119_vm10 = vcmp.eq.f32.partialorder %v9498_v15, 0.0  ;;  %v6978_v46 = vpop.eup %6977  ;;  %v10715_v56 = vadd.f32 1.0, %v6974_v35  ;;  %4637 = vst.msk [vmem:[%s14892_s10 + $0x30] sm:$0xf] %vm2775_vm3, %v4458_v32  ;;  %v1442_v53 = vmul.f32 %v10138_v51, %v1374_v25  ;;  %v7250_v27 = vld [vmem:[%s14887_s3 + $0x68] sm:$0xff]  ;;  %v15364_v35 = vld [vmem:[#allocation97_spill] sm:$0xff] }
 0x227   :  { %v4972_v1 = vor.u32 1.1754944e-38, %v15360_v13  ;;  %2788 = vst.msk [vmem:[%s14891_s8 + $0x30] sm:$0xf] %vm2775_vm3, %v2723_v39  ;;  %v10718_v13 = vadd.f32 %v1993_v24, %v8509_v43  ;;  %v2532_v0 = vmul.f32 %v7250_v27, %v15364_v35  ;;  %v4992_v24 = vsub.f32 1.0, %v4991_v48  ;;  %v7251_v48 = vld [vmem:[%s14883_s0 + $0x1b0] sm:$0xff] }
 0x228   :  { %15362 = vst [vmem:[#allocation117_spill] sm:$0xff] %v10715_v56  ;;  %v2391_v39 = vpop.f32.mrf.mxu2  ;;  %v4977_v5 = vsub.f32 1.0, %v4976_v21  ;;  %v10733_v6 = vadd.f32 %v15365_v54, %v9579_v33  ;;  %6473 = vmatmul.msk.bf16.gmra.mxu0 %vm162_vm0, %v10511_v45  ;;  %6505 = vmatmul.msk.bf16.gmra.mxu1 %vm162_vm0, %v10511_v45  ;;  %vm4980_vm11 = vweird.f32 %v15353_v2  ;;  %v1443_v25 = vmul.f32 %v10138_v51, %v1375_v44  ;;  %v1506_v45 = vld [vmem:[%s14886_s1 + $0x1a0] sm:$0xff]  ;;  %v7252_v44 = vld [vmem:[%s14883_s0 + $0x1b8] sm:$0xff]  ;;  %v15371_v35 = vld [vmem:[#allocation132_spill] sm:$0xff] }
 0x229   :  { %15363 = vst [vmem:[#allocation111_spill] sm:$0xff] %v10718_v13  ;;  %v4973_v3 = vsel %vm10682_vm8, %v4972_v1, %v4968_v42  ;;  %v2596_v37 = vmul.f32 %v2391_v39, %v2091_v30  ;;  %v4335_v32 = vpack.c.bf16 %v10718_v13, %v10718_v13  ;;  %v4999_v42 = vand.u32 2147483647, %v15358_v31 }
 0x22a   :  { %15366 = vst [vmem:[#allocation16_spill] sm:$0xff] %v10733_v6  ;;  %v10746_v8 = vadd.f32 %v10024_v16, %v9579_v33  ;;  %vm4995_vm12 = vweird.f32 %v15358_v31  ;;  %v1376_v21 = vmul.f32 %v7251_v48, %v6976_v12  ;;  %v1377_v30 = vmul.f32 %v7252_v44, %v6978_v46  ;;  %v15367_v16 = vld [vmem:[#allocation13_spill] sm:$0xff]  ;;  %v1507_v12 = vld [vmem:[%s14886_s1 + $0x1a8] sm:$0xff]  ;;  %v10779_v44 = vpop.permute.xlu2 %2894  ;;  %v15368_v33 = vld [vmem:[#allocation92_spill] sm:$0xff] }
 0x22b   :  { %v2660_v54 = vadd.f32 %v2596_v37, %v2532_v0  ;;  %6981 = vrcp.f32 %v10715_v56  ;;  %6069 = vrot.lane.b32.xlu2 %v10733_v6, %s7355_s23  ;;  %v10763_v1 = vmul.f32 %v4973_v3, %v15367_v16  ;;  %v5001_v39 = vand.u32 2147483648, %v15358_v31  ;;  %v6980_v0 = vpop.eup %6979  ;;  %v2092_v16 = vld [vmem:[%s14890_s2 + $0x70] sm:$0xff] }
 0x22c   :  { %v1120_v27 = vand.u32 2147483648, %v9498_v15  ;;  %6071 = vrot.lane.b32.xlu1 %v10746_v8, %s7355_s23  ;;  %v4993_v37 = vmul.f32 %v9968_v62, %v4992_v24  ;;  %v1118_v3 = vsel %vm1117_vm9, %v9498_v15, %v10272_v41  ;;  %v6612_v48 = vmul.f32 -1.442695, %v10733_v6  ;;  %v15372_v6 = vld [vmem:[#allocation55_spill] sm:$0xff]  ;;  %v7254_v41 = vld [vmem:[%s14887_s3 + $0x78] sm:$0xff] }
 0x22d   :  { %4493 = vrot.lane.b32.xlu0 %v4335_v32, %s7355_s23  ;;  %v2724_v46 = vpack.c.bf16 %v2660_v54, %v2660_v54  ;;  %v4978_v32 = vmul.f32 %v15359_v26, %v4977_v5  ;;  %v5006_v54 = vmul.f32 %v15368_v33, %v9928_v14  ;;  %vm4981_vm13 = vweird.f32 %v15359_v26 }
 0x22e   :  { %v1570_v24 = vadd.f32 %v1506_v45, %v1442_v53  ;;  %v1995_v5 = vpop.f32.mrf.mxu1  ;;  %vm10791_vm14 = vcmp.eq.f32.partialorder %v4999_v42, 8.507059e+37  ;;  %v5036_v56 = vmul.f32 %v15372_v6, %v15371_v35  ;;  %vm10797_vm15 = vcmp.eq.f32.partialorder %v4984_v10, 8.507059e+37  ;;  %v10811_v10 = vpop.f32.mrf.mxu0  ;;  %vm10831_vm2 = vmor %vm4980_vm11, %vm4981_vm13 }
 0x22f   :  { %2789 = vst.msk [vmem:[%s14891_s8 + $0x34] sm:$0xf] %vm2775_vm3, %v2724_v46  ;;  %v1571_v22 = vadd.f32 %v1507_v12, %v1443_v25  ;;  %v1444_v53 = vmul.f32 %v10138_v51, %v1376_v21  ;;  %v1445_v45 = vmul.f32 %v10138_v51, %v1377_v30  ;;  %v10803_v52 = vadd.f32 1.0, %v6980_v0  ;;  %v7253_v25 = vld [vmem:[%s14887_s3 + $0x70] sm:$0xff]  ;;  %v15377_v21 = vld [vmem:[#allocation102_spill] sm:$0xff] }
 0x230   :  { %v10806_v46 = vadd.f32 %v1995_v5, %v8509_v43  ;;  %v2394_v42 = vpop.f32.mrf.mxu2  ;;  %vm4996_vm1 = vweird.f32 %v9968_v62  ;;  %v1121_v7 = vsel %vm1119_vm10, %v1120_v27, %v1118_v3  ;;  %15376 = vst [vmem:[#allocation123_spill] sm:$0xff] %v10811_v10  ;;  %v2533_v12 = vmul.f32 %v7253_v25, %v15377_v21  ;;  %v10824_v27 = vpop.f32.mrf.mxu3 }
 0x231   :  { %v2597_v51 = vmul.f32 %v2394_v42, %v2092_v16  ;;  %v4994_v30 = vadd.f32 %v9968_v62, %v4993_v37  ;;  %v4979_v0 = vadd.f32 %v15359_v26, %v4978_v32  ;;  %v10819_v5 = vpop.eup %6981  ;;  %6983 = vpow2.f32 %v6612_v48  ;;  %v1508_v32 = vld [vmem:[%s14886_s1 + $0x1b0] sm:$0xff]  ;;  %vm10846_vm4 = vmor %vm4995_vm12, %vm4996_vm1 }
 0x232   :  { %15375 = vst [vmem:[#allocation4_spill] sm:$0xff] %v10806_v46  ;;  %v6613_v29 = vmul.f32 -1.442695, %v10746_v8  ;;  %v2221_v15 = vpack.c.bf16 %v10806_v46, %v10718_v13  ;;  %v5007_v3 = vsub.f32 1.0, %v5006_v54  ;;  %v5016_v47 = vand.u32 2147483648, %v9928_v14 }
 0x233   :  { %v2661_v10 = vadd.f32 %v2597_v51, %v2533_v12  ;;  %v5037_v25 = vsub.f32 1.0, %v5036_v56  ;;  %v1251_v48 = vadd.f32 1e-08, %v1121_v7  ;;  %6985 = vrcp.f32 %v10803_v52  ;;  %v1509_v7 = vld [vmem:[%s14886_s1 + $0x1b8] sm:$0xff] }
 0x234   :  { %2906 = vrot.lane.b32.xlu2 %v2221_v15, %s7354_s15  ;;  %v5002_v56 = vor.u32 1.1754944e-38, %v5001_v39  ;;  %v5014_v16 = vand.u32 2147483647, %v9928_v14  ;;  %v10851_v54 = vpack.c.bf16 %v1571_v22, %v1570_v24  ;;  %v4998_v31 = vsel %vm10846_vm4, %v9968_v62, %v4994_v30  ;;  %v4472_v22 = vpop.permute.xlu2 %4471  ;;  %v2893_v24 = vpop.permute.xlu0 %2892  ;;  %v2093_v51 = vld [vmem:[%s14890_s2 + $0x78] sm:$0xff] }
 0x235   :  { %6067 = vrot.lane.b32.xlu0 %v10623_v18, %s7355_s23  ;;  %6537 = vmatmul.msk.bf16.gmra.mxu2 %vm162_vm0, %v2221_v15  ;;  %v2725_v42 = vpack.c.bf16 %v2661_v10, %v2661_v10  ;;  %v4983_v12 = vsel %vm10831_vm2, %v15359_v26, %v4979_v0  ;;  %v1250_v39 = vadd.f32 1e-08, %v10712_v49  ;;  %6987 = vpow2.f32 %v6613_v29  ;;  %v4468_v62 = vpop.permute.xlu1 %4467  ;;  %4644 = vst.msk [vmem:[%s14892_s10 + $0x4c] sm:$0xf] %vm2775_vm3, %v4472_v22 }
 0x236   :  { %v5008_v15 = vmul.f32 %v15368_v33, %v5007_v3  ;;  %vm5010_vm6 = vweird.f32 %v9928_v14  ;;  %v10869_v10 = vadd.f32 %v1508_v32, %v1444_v53  ;;  %6570 = vmatmul.msk.bf16.gmra.mxu3 %vm162_vm0, %v2893_v24  ;;  %v10876_v29 = vor.u32 1.1754944e-38, %v5016_v47  ;;  %4642 = vst.msk [vmem:[%s14892_s10 + $0x44] sm:$0xf] %vm2775_vm3, %v4468_v62  ;;  %v1998_v53 = vpop.f32.mrf.mxu1  ;;  %v15386_v32 = vld [vmem:[#allocation35_spill] sm:$0xff] }
 0x237   :  { %v5038_v26 = vmul.f32 %v15372_v6, %v5037_v25  ;;  %v10879_v49 = vadd.f32 %v1509_v7, %v1445_v45  ;;  %6989 = vrcp.f32 %v1251_v48  ;;  %v6984_v30 = vpop.eup %6983  ;;  %v5003_v0 = vsel %vm10791_vm14, %v5002_v56, %v4998_v31  ;;  %v15384_v25 = vld [vmem:[#allocation11_spill] sm:$0xff]  ;;  %2790 = vst.msk [vmem:[%s14891_s8 + $0x38] sm:$0xf] %vm2775_vm3, %v2725_v42 }
 0x238   :  { %v2396_v3 = vpop.f32.mrf.mxu2  ;;  %vm5011_vm7 = vweird.f32 %v15368_v33  ;;  %vm10888_vm8 = vcmp.eq.f32.partialorder %v5014_v16, 8.507059e+37  ;;  %v10895_v45 = vsel %vm10797_vm15, %v10708_v58, %v4983_v12  ;;  %vm1129_vm9 = vcmp.eq.f32.partialorder %v15384_v25, inf  ;;  %6474 = vmatmul.msk.bf16.gmra.mxu0 %vm162_vm0, %v10517_v34  ;;  %6506 = vmatmul.msk.bf16.gmra.mxu1 %vm162_vm0, %v10517_v34  ;;  %v10917_v56 = vpop.f32.mrf.mxu3  ;;  %v15387_v7 = vld [vmem:[#allocation119_spill] sm:$0xff] }
 0x239   :  { %v10899_v37 = vadd.f32 %v1998_v53, %v8509_v43  ;;  %v2534_v48 = vmul.f32 %v7254_v41, %v15386_v32  ;;  %v2598_v2 = vmul.f32 %v2396_v3, %v2093_v51  ;;  %6991 = vrcp.f32 %v1250_v39  ;;  %v10909_v20 = vpop.eup %6985  ;;  %v15388_v31 = vld [vmem:[#allocation7_spill] sm:$0xff]  ;;  %v10923_v12 = vpop.f32.mrf.mxu0  ;;  %vm10940_vm12 = vmor %vm5010_vm6, %vm5011_vm7 }
 0x23a   :  { %v4336_v58 = vpack.c.bf16 %v10806_v46, %v10806_v46  ;;  %v5009_v16 = vadd.f32 %v15368_v33, %v5008_v15  ;;  %v1130_v42 = vsel %vm1129_vm9, %v15384_v25, %v15387_v7  ;;  %vm1141_vm10 = vcmp.eq.f32.partialorder %v15388_v31, inf  ;;  %15389 = vst [vmem:[#allocation14_spill] sm:$0xff] %v10923_v12  ;;  %v15390_v15 = vld [vmem:[#allocation32_spill] sm:$0xff]  ;;  %v15397_v12 = vld [vmem:[#allocation81_spill] sm:$0xff] }
 0x23b   :  { %15385 = vst [vmem:[#allocation122_spill] sm:$0xff] %v10899_v37  ;;  %v4337_v39 = vpack.c.bf16 %v10899_v37, %v10899_v37  ;;  %v2662_v22 = vadd.f32 %v2598_v2, %v2534_v48  ;;  %v5039_v34 = vadd.f32 %v15372_v6, %v5038_v26  ;;  %vm5041_vm11 = vweird.f32 %v15372_v6  ;;  %v6988_v24 = vpop.eup %6987 }
 0x23c   :  { %v10929_v51 = vadd.f32 1.0, %v6984_v30  ;;  %4495 = vrot.lane.b32.xlu2 %v4336_v58, %s7355_s23  ;;  %v5908_v62 = vmul.f32 %v5003_v0, %v15390_v15  ;;  %v5046_v53 = vand.u32 2147483648, %v15371_v35  ;;  %v1132_v3 = vand.u32 2147483648, %v15384_v25  ;;  %v6040_v0 = vpop.permute.xlu2 %6039  ;;  %v4464_v48 = vpop.permute.xlu0 %4463 }
 0x23d   :  { %v6990_v41 = vpop.eup %6989  ;;  %4497 = vrot.lane.b32.xlu1 %v4337_v39, %s7355_s23  ;;  %v2726_v7 = vpack.c.bf16 %v2662_v22, %v2662_v22  ;;  %vm5040_vm13 = vweird.f32 %v15371_v35  ;;  %v5044_v30 = vand.u32 2147483647, %v15371_v35  ;;  %vm1131_vm14 = vcmp.eq.f32.partialorder %v15384_v25, 0.0  ;;  %v15395_v39 = vld [vmem:[#allocation113_spill] sm:$0xff]  ;;  %v6036_v22 = vpop.permute.xlu1 %6035  ;;  %4640 = vst.msk [vmem:[%s14892_s10 + $0x3c] sm:$0xf] %vm2775_vm3, %v4464_v48 }
 0x23e   :  { %v5013_v2 = vsel %vm10940_vm12, %v15368_v33, %v5009_v16  ;;  %vm10952_vm15 = vmor %vm5040_vm13, %vm5041_vm11  ;;  %v1133_v58 = vsel %vm1131_vm14, %v1132_v3, %v1130_v42  ;;  %v1142_v35 = vsel %vm1141_vm10, %v15388_v31, %v15395_v39  ;;  %vm1143_vm1 = vcmp.eq.f32.partialorder %v15388_v31, 0.0  ;;  %v2000_v39 = vpop.f32.mrf.mxu1 }
 0x23f   :  { %v6992_v25 = vpop.eup %6991  ;;  %v6228_v15 = vmul.f32 %v6040_v0, %v5908_v62  ;;  %v5043_v33 = vsel %vm10952_vm15, %v15372_v6, %v5039_v34  ;;  %v5081_v16 = vmul.f32 %v10179_v4, %v10074_v19  ;;  %v1144_v42 = vand.u32 2147483648, %v15388_v31  ;;  %2791 = vst.msk [vmem:[%s14891_s8 + $0x3c] sm:$0xf] %vm2775_vm3, %v2726_v7  ;;  %v7255_v6 = vld [vmem:[%s14883_s0 + $0x1c8] sm:$0xff] }
 0x240   :  { %v10971_v3 = vadd.f32 1.0, %v6988_v24  ;;  %v6226_v26 = vmul.f32 %v6036_v22, %v10763_v1  ;;  %v5047_v62 = vor.u32 1.1754944e-38, %v5046_v53  ;;  %v1379_v34 = vmul.f32 %v7255_v6, %v6990_v41  ;;  %v7256_v24 = vld [vmem:[%s14890_s2] sm:$0xff]  ;;  %v3062_v22 = vpop.f32.mrf.mxu3  ;;  %v15398_v41 = vld [vmem:[#allocation135_spill] sm:$0xff] }
 0x241   :  { %v6292_v0 = vpack.c.bf16 %v6228_v15, %v6228_v15  ;;  %v10982_v48 = vadd.f32 %v2000_v39, %v8509_v43  ;;  %v5018_v1 = vsel %vm10888_vm8, %v10876_v29, %v5013_v2  ;;  %vm5045_vm2 = vcmp.eq.f32.partialorder %v5044_v30, 8.507059e+37  ;;  %v11023_v39 = vpop.f32.mrf.mxu0 }
 0x242   :  { %v3537_v53 = vmul.f32 %v7256_v24, %v10824_v27  ;;  %v6290_v7 = vpack.c.bf16 %v6226_v26, %v6226_v26  ;;  %v5048_v14 = vsel %vm5045_vm2, %v5047_v62, %v5043_v33  ;;  %v5021_v15 = vmul.f32 %v15398_v41, %v15397_v12  ;;  %v7257_v27 = vld [vmem:[%s14883_s0 + $0x1c0] sm:$0xff]  ;;  %15399 = vst [vmem:[#allocation77_spill] sm:$0xff] %v11023_v39  ;;  %v15401_v62 = vld [vmem:[#allocation27_spill] sm:$0xff]  ;;  %v15404_v39 = vld [vmem:[#allocation136_spill] sm:$0xff] }
 0x243   :  { %15396 = vst [vmem:[#allocation129_spill] sm:$0xff] %v10982_v48  ;;  %v2222_v29 = vpack.c.bf16 %v10982_v48, %v10899_v37  ;;  %v4338_v47 = vpack.c.bf16 %v10982_v48, %v10982_v48  ;;  %v5082_v30 = vsub.f32 1.0, %v5081_v16  ;;  %v1378_v2 = vmul.f32 %v7257_v27, %v6992_v25  ;;  %v11017_v16 = vld [vmem:[%s14884_s4] ss:$0 sm:$0xff] }
 0x244   :  { %6357 = vst.msk [vmem:[%s14893_s11 + $0xc] sm:$0xf] %vm6353_vm5, %v6292_v0  ;;  %6993 = vrcp.f32 %v10929_v51  ;;  %3665 = vrot.lane.b32.xlu2 %v3537_v53, %s7353_s21  ;;  %v11012_v33 = vpack.c.bf16 %v10879_v49, %v10869_v10  ;;  %v1447_v25 = vmul.f32 %v11017_v16, %v1379_v34  ;;  %v1145_v26 = vsel %vm1143_vm1, %v1144_v42, %v1142_v35  ;;  %v15400_v10 = vld [vmem:[#allocation48_spill] sm:$0xff]  ;;  %v1511_v34 = vld [vmem:[%s14886_s1 + $0x1c8] sm:$0xff]  ;;  %v15402_v35 = vld [vmem:[#allocation38_spill] sm:$0xff]  ;;  %v6046_v0 = vpop.permute.xlu2 %6045  ;;  %v4470_v24 = vpop.permute.xlu0 %4469 }
 0x245   :  { %6355 = vst.msk [vmem:[%s14893_s11 + $0x4] sm:$0xf] %vm6353_vm5, %v6290_v7  ;;  %6995 = vrcp.f32 %v10971_v3  ;;  %2908 = vrot.lane.b32.xlu1 %v2222_v29, %s7354_s15  ;;  %6538 = vmatmul.msk.bf16.gmra.mxu2 %vm162_vm0, %v2222_v29  ;;  %v5911_v49 = vmul.f32 %v5048_v14, %v15400_v10  ;;  %v11030_v6 = vmul.f32 %v10895_v45, %v15401_v62  ;;  %v1252_v31 = vadd.f32 1e-08, %v1133_v58  ;;  %v2094_v53 = vld [vmem:[%s14890_s2 + $0x80] sm:$0xff]  ;;  %v6042_v29 = vpop.permute.xlu1 %6041  ;;  %v2399_v62 = vpop.f32.mrf.mxu2 }
 0x246   :  { %4499 = vrot.lane.b32.xlu0 %v4338_v47, %s7355_s23  ;;  %v5909_v42 = vmul.f32 %v5018_v1, %v15402_v35  ;;  %v5022_v7 = vsub.f32 1.0, %v5021_v15  ;;  %v5029_v14 = vand.u32 2147483647, %v15397_v12  ;;  %v5031_v45 = vand.u32 2147483648, %v15397_v12  ;;  %4643 = vst.msk [vmem:[%s14892_s10 + $0x48] sm:$0xf] %vm2775_vm3, %v4470_v24  ;;  %6571 = vmatmul.msk.bf16.gmra.mxu3 %vm162_vm0, %v10779_v44  ;;  %v2003_v10 = vpop.f32.mrf.mxu1 }
 0x247   :  { %v6231_v27 = vmul.f32 %v6046_v0, %v5911_v49  ;;  %v5083_v58 = vmul.f32 %v10179_v4, %v5082_v30  ;;  %v1446_v1 = vmul.f32 %v11017_v16, %v1378_v2  ;;  %v1253_v47 = vadd.f32 1e-08, %v1145_v26  ;;  %v15403_v35 = vld [vmem:[#allocation61_spill] sm:$0xff]  ;;  %v7259_v44 = vld [vmem:[%s14887_s3 + $0x80] sm:$0xff] }
 0x248   :  { %v6229_v15 = vmul.f32 %v6042_v29, %v5909_v42  ;;  %v5051_v21 = vmul.f32 %v15404_v39, %v15403_v35  ;;  %v1575_v49 = vadd.f32 %v1511_v34, %v1447_v25  ;;  %vm1153_vm4 = vcmp.eq.f32.partialorder %v9635_v55, inf  ;;  %v15406_v30 = vld [vmem:[#allocation109_spill] sm:$0xff]  ;;  %v1510_v42 = vld [vmem:[%s14886_s1 + $0x1c0] sm:$0xff]  ;;  %6475 = vmatmul.msk.bf16.gmra.mxu0 %vm162_vm0, %v10695_v50  ;;  %6507 = vmatmul.msk.bf16.gmra.mxu1 %vm162_vm0, %v10695_v50  ;;  %v7260_v29 = vld [vmem:[%s14890_s2 + $0x10] sm:$0xff] }
 0x249   :  { %v6295_v0 = vpack.c.bf16 %v6231_v27, %v6231_v27  ;;  %v11054_v24 = vadd.f32 %v2003_v10, %v8509_v43  ;;  %v2535_v2 = vmul.f32 %v7259_v44, %v15406_v30  ;;  %v2599_v26 = vmul.f32 %v2399_v62, %v2094_v53  ;;  %v3064_v27 = vpop.f32.mrf.mxu3 }
 0x24a   :  { %vm5025_vm6 = vweird.f32 %v15397_v12  ;;  %v11064_v25 = vpop.eup %6993  ;;  %v6293_v34 = vpack.c.bf16 %v6229_v15, %v6229_v15  ;;  %v3539_v53 = vmul.f32 %v7260_v29, %v3062_v22  ;;  %vm5086_vm7 = vweird.f32 %v10179_v4  ;;  %v7261_v15 = vld [vmem:[%s14890_s2 + $0x8] sm:$0xff] }
 0x24b   :  { %15405 = vst [vmem:[#allocation82_spill] sm:$0xff] %v11054_v24  ;;  %v5023_v10 = vmul.f32 %v15398_v41, %v5022_v7  ;;  %v11075_v62 = vpop.eup %6995  ;;  %v3538_v44 = vmul.f32 %v7261_v15, %v10917_v56  ;;  %v2663_v50 = vadd.f32 %v2599_v26, %v2535_v2  ;;  %v4339_v22 = vpack.c.bf16 %v11054_v24, %v11054_v24  ;;  %v2095_v26 = vld [vmem:[%s14890_s2 + $0x88] sm:$0xff] }
 0x24c   :  { %6360 = vst.msk [vmem:[%s14893_s11 + $0x18] sm:$0xf] %vm6353_vm5, %v6295_v0  ;;  %v5084_v29 = vadd.f32 %v10179_v4, %v5083_v58  ;;  %v5089_v7 = vand.u32 2147483647, %v10074_v19  ;;  %v5091_v56 = vand.u32 2147483648, %v10074_v19  ;;  %v5052_v15 = vsub.f32 1.0, %v5051_v21  ;;  %v4478_v58 = vpop.permute.xlu2 %4477  ;;  %v6038_v2 = vpop.permute.xlu0 %6037 }
 0x24d   :  { %6358 = vst.msk [vmem:[%s14893_s11 + $0x10] sm:$0xf] %vm6353_vm5, %v6293_v34  ;;  %v1574_v30 = vadd.f32 %v1510_v42, %v1446_v1  ;;  %v2727_v32 = vpack.c.bf16 %v2663_v50, %v2663_v50  ;;  %4501 = vrot.lane.b32.xlu2 %v4339_v22, %s7355_s23  ;;  %3667 = vrot.lane.b32.xlu1 %v3538_v44, %s7353_s21  ;;  %vm5085_vm8 = vweird.f32 %v10074_v19  ;;  %v11097_v0 = vor.u32 1.1754944e-38, %v5031_v45  ;;  %v11120_v1 = vpop.f32.mrf.mxu0  ;;  %v4474_v42 = vpop.permute.xlu1 %4473  ;;  %v7262_v44 = vld [vmem:[%s14887_s3 + $0x88] sm:$0xff]  ;;  %v15413_v50 = vld [vmem:[#allocation116_spill] sm:$0xff]  ;;  %v15416_v21 = vld [vmem:[#allocation133_spill] sm:$0xff] }
 0x24e   :  { %6997 = vrcp.f32 %v1252_v31  ;;  %3669 = vrot.lane.b32.xlu0 %v3539_v53, %s7353_s21  ;;  %vm11105_vm9 = vmor %vm5085_vm8, %vm5086_vm7  ;;  %vm5026_vm10 = vweird.f32 %v15398_v41  ;;  %vm11110_vm11 = vcmp.eq.f32.partialorder %v5029_v14, 8.507059e+37  ;;  %v1154_v45 = vsel %vm1153_vm4, %v9635_v55, %v10300_v11  ;;  %15411 = vst [vmem:[#allocation13_spill] sm:$0xff] %v11120_v1  ;;  %v2005_v11 = vpop.f32.mrf.mxu1  ;;  %v2401_v34 = vpop.f32.mrf.mxu2 }
 0x24f   :  { %v11114_v31 = vpack.c.bf16 %v1575_v49, %v1574_v30  ;;  %6999 = vrcp.f32 %v1253_v47  ;;  %2792 = vst.msk [vmem:[%s14891_s8 + $0x40] sm:$0xf] %vm2775_vm3, %v2727_v32  ;;  %v6227_v14 = vmul.f32 %v6038_v2, %v11030_v6  ;;  %v5088_v49 = vsel %vm11105_vm9, %v10179_v4, %v5084_v29  ;;  %vm11157_vm13 = vmor %vm5025_vm6, %vm5026_vm10 }
 0x250   :  { %v5024_v47 = vadd.f32 %v15398_v41, %v5023_v10  ;;  %v1156_v30 = vand.u32 2147483648, %v9635_v55  ;;  %4647 = vst.msk [vmem:[%s14892_s10 + $0x58] sm:$0xf] %vm2775_vm3, %v4478_v58  ;;  %vm5090_vm12 = vcmp.eq.f32.partialorder %v5089_v7, 8.507059e+37  ;;  %v5092_v32 = vor.u32 1.1754944e-38, %v5091_v56  ;;  %v7263_v7 = vld [vmem:[%s14890_s2 + $0x18] sm:$0xff] }
 0x251   :  { %v5053_v53 = vmul.f32 %v15404_v39, %v5052_v15  ;;  %v5096_v6 = vmul.f32 %v10310_v9, %v10215_v63  ;;  %4645 = vst.msk [vmem:[%s14892_s10 + $0x50] sm:$0xf] %vm2775_vm3, %v4474_v42  ;;  %v6291_v4 = vpack.c.bf16 %v6227_v14, %v6227_v14  ;;  %v11144_v10 = vadd.f32 %v2005_v11, %v8509_v43  ;;  %v3067_v58 = vpop.f32.mrf.mxu3  ;;  %v15417_v42 = vld [vmem:[#allocation137_spill] sm:$0xff] }
 0x252   :  { %v2536_v22 = vmul.f32 %v7262_v44, %v15413_v50  ;;  %v2600_v29 = vmul.f32 %v2401_v34, %v2095_v26  ;;  %v3540_v56 = vmul.f32 %v7263_v7, %v3064_v27  ;;  %v5093_v15 = vsel %vm5090_vm12, %v5092_v32, %v5088_v49 }
 0x253   :  { %15412 = vst [vmem:[#allocation92_spill] sm:$0xff] %v11144_v10  ;;  %v5066_v14 = vmul.f32 %v15417_v42, %v15416_v21  ;;  %vm1155_vm14 = vcmp.eq.f32.partialorder %v9635_v55, 0.0  ;;  %v4340_v49 = vpack.c.bf16 %v11144_v10, %v11144_v10  ;;  %v2223_v12 = vpack.c.bf16 %v11144_v10, %v11054_v24 }
 0x254   :  { %v6998_v26 = vpop.eup %6997  ;;  %6356 = vst.msk [vmem:[%s14893_s11 + $0x8] sm:$0xf] %vm6353_vm5, %v6291_v4  ;;  %v2664_v27 = vadd.f32 %v2600_v29, %v2536_v22  ;;  %v5028_v11 = vsel %vm11157_vm13, %v15398_v41, %v5024_v47  ;;  %v5054_v32 = vadd.f32 %v15404_v39, %v5053_v53  ;;  %vm5056_vm15 = vweird.f32 %v15404_v39  ;;  %v6052_v41 = vpop.permute.xlu2 %6051  ;;  %v2096_v53 = vld [vmem:[%s14890_s2 + $0x90] sm:$0xff] }
 0x255   :  { %v11175_v34 = vpop.eup %6999  ;;  %v5061_v44 = vand.u32 2147483648, %v15403_v35  ;;  %v5097_v4 = vsub.f32 1.0, %v5096_v6  ;;  %4503 = vrot.lane.b32.xlu1 %v4340_v49, %s7355_s23  ;;  %6539 = vmatmul.msk.bf16.gmra.mxu2 %vm162_vm0, %v2223_v12  ;;  %v5914_v29 = vmul.f32 %v5093_v15, %v9914_v60  ;;  %v11185_v7 = vsel %vm1155_vm14, %v1156_v30, %v1154_v45  ;;  %v2897_v30 = vpop.permute.xlu1 %2896  ;;  %v15420_v49 = vld [vmem:[#allocation124_spill] sm:$0xff] }
 0x256   :  { %v2728_v22 = vpack.c.bf16 %v2664_v27, %v2664_v27  ;;  %vm1165_vm1 = vcmp.eq.f32.partialorder %v9622_v40, inf  ;;  %3671 = vrot.lane.b32.xlu2 %v3540_v56, %s7353_s21  ;;  %2910 = vrot.lane.b32.xlu0 %v2223_v12, %s7354_s15  ;;  %v4476_v47 = vpop.permute.xlu0 %4475  ;;  %vm5055_vm2 = vweird.f32 %v15403_v35  ;;  %v5059_v60 = vand.u32 2147483647, %v15403_v35  ;;  %v2008_v2 = vpop.f32.mrf.mxu1  ;;  %v7264_v27 = vld [vmem:[%s14887_s3 + $0x90] sm:$0xff] }
 0x257   :  { %v5067_v6 = vsub.f32 1.0, %v5066_v14  ;;  %v11197_v55 = vsel %vm1165_vm1, %v9622_v40, %v10286_v57  ;;  %v6234_v45 = vmul.f32 %v6052_v41, %v5914_v29  ;;  %vm11205_vm4 = vmor %vm5055_vm2, %vm5056_vm15  ;;  %v5033_v35 = vsel %vm11110_vm11, %v11097_v0, %v5028_v11  ;;  %4646 = vst.msk [vmem:[%s14892_s10 + $0x54] sm:$0xf] %vm2775_vm3, %v4476_v47  ;;  %v2404_v14 = vpop.f32.mrf.mxu2  ;;  %6572 = vmatmul.msk.bf16.gmra.mxu3 %vm162_vm0, %v2897_v30 }
 0x258   :  { %2793 = vst.msk [vmem:[%s14891_s8 + $0x44] sm:$0xf] %vm2775_vm3, %v2728_v22  ;;  %v5126_v57 = vmul.f32 %v10464_v61, %v10359_v28  ;;  %v2537_v12 = vmul.f32 %v7264_v27, %v15420_v49  ;;  %v5058_v0 = vsel %vm11205_vm4, %v15404_v39, %v5054_v32  ;;  %v5062_v19 = vor.u32 1.1754944e-38, %v5061_v44  ;;  %v11228_v22 = vpop.f32.mrf.mxu0  ;;  %v7265_v27 = vld [vmem:[%s14890_s2 + $0x20] sm:$0xff]  ;;  %6476 = vmatmul.msk.bf16.gmra.mxu0 %vm162_vm0, %v10851_v54 }
 0x259   :  { %v5098_v11 = vmul.f32 %v10310_v9, %v5097_v4  ;;  %15421 = vst [vmem:[#allocation132_spill] sm:$0xff] %v11228_v22  ;;  %v6298_v29 = vpack.c.bf16 %v6234_v45, %v6234_v45  ;;  %v11231_v41 = vadd.f32 %v2008_v2, %v8509_v43  ;;  %v2601_v47 = vmul.f32 %v2404_v14, %v2096_v53  ;;  %v15423_v39 = vld [vmem:[#allocation42_spill] sm:$0xff]  ;;  %v3069_v44 = vpop.f32.mrf.mxu3  ;;  %v7266_v53 = vld [vmem:[%s14883_s0 + $0x1d0] sm:$0xff] }
 0x25a   :  { %v3541_v15 = vmul.f32 %v7265_v27, %v3067_v58  ;;  %6508 = vmatmul.msk.bf16.gmra.mxu1 %vm162_vm0, %v10851_v54  ;;  %vm5060_vm6 = vcmp.eq.f32.partialorder %v5059_v60, 8.507059e+37  ;;  %v5910_v32 = vmul.f32 %v5033_v35, %v15423_v39  ;;  %v5068_v4 = vmul.f32 %v15417_v42, %v5067_v6  ;;  %v7268_v27 = vld [vmem:[%s14890_s2 + $0x28] sm:$0xff] }
 0x25b   :  { %15422 = vst [vmem:[#allocation55_spill] sm:$0xff] %v11231_v41  ;;  %v11245_v45 = vmul.f32 %v7266_v53, %v6998_v26  ;;  %v2665_v58 = vadd.f32 %v2601_v47, %v2537_v12  ;;  %v4341_v54 = vpack.c.bf16 %v11231_v41, %v11231_v41  ;;  %v5063_v60 = vsel %vm5060_vm6, %v5062_v19, %v5058_v0  ;;  %v2097_v19 = vld [vmem:[%s14890_s2 + $0x98] sm:$0xff] }
 0x25c   :  { %6363 = vst.msk [vmem:[%s14893_s11 + $0x24] sm:$0xf] %vm6353_vm5, %v6298_v29  ;;  %v5127_v30 = vsub.f32 1.0, %v5126_v57  ;;  %v5099_v56 = vadd.f32 %v10310_v9, %v5098_v11  ;;  %vm5101_vm7 = vweird.f32 %v10310_v9  ;;  %v5106_v6 = vand.u32 2147483648, %v10215_v63  ;;  %v15424_v57 = vld [vmem:[#allocation57_spill] sm:$0xff] }
 0x25d   :  { %vm5070_vm8 = vweird.f32 %v15416_v21  ;;  %v2729_v26 = vpack.c.bf16 %v2665_v58, %v2665_v58  ;;  %3673 = vrot.lane.b32.xlu1 %v3541_v15, %s7353_s21  ;;  %vm5071_vm9 = vweird.f32 %v15417_v42  ;;  %v5074_v35 = vand.u32 2147483647, %v15416_v21  ;;  %v11264_v12 = vpop.permute.xlu2 %2900  ;;  %v6048_v29 = vpop.permute.xlu1 %6047 }
 0x25e   :  { %v5076_v2 = vand.u32 2147483648, %v15416_v21  ;;  %vm1167_vm10 = vcmp.eq.f32.partialorder %v9622_v40, 0.0  ;;  %4505 = vrot.lane.b32.xlu0 %v4341_v54, %s7355_s23  ;;  %v5912_v14 = vmul.f32 %v5063_v60, %v15424_v57  ;;  %v6044_v0 = vpop.permute.xlu0 %6043  ;;  %vm5100_vm11 = vweird.f32 %v10215_v63  ;;  %v2010_v54 = vpop.f32.mrf.mxu1  ;;  %vm11317_vm14 = vmor %vm5070_vm8, %vm5071_vm9 }
 0x25f   :  { %v5141_v15 = vmul.f32 %v10491_v36, %v10374_v38  ;;  %v5069_v11 = vadd.f32 %v15417_v42, %v5068_v4  ;;  %2794 = vst.msk [vmem:[%s14891_s8 + $0x48] sm:$0xf] %vm2775_vm3, %v2729_v26  ;;  %v6230_v47 = vmul.f32 %v6044_v0, %v5910_v32  ;;  %vm11279_vm12 = vmor %vm5100_vm11, %vm5101_vm7  ;;  %v5104_v39 = vand.u32 2147483647, %v10215_v63  ;;  %v2406_v60 = vpop.f32.mrf.mxu2  ;;  %v7267_v63 = vld [vmem:[%s14887_s3 + $0x98] sm:$0xff] }
 0x260   :  { %v5128_v53 = vmul.f32 %v10464_v61, %v5127_v30  ;;  %v5171_v4 = vmul.f32 %v10642_v23, %v10554_v59  ;;  %v6232_v58 = vmul.f32 %v6048_v29, %v5912_v14  ;;  %v5103_v32 = vsel %vm11279_vm12, %v10310_v9, %v5099_v56  ;;  %v15428_v30 = vld [vmem:[#allocation126_spill] sm:$0xff] }
 0x261   :  { %v5107_v26 = vor.u32 1.1754944e-38, %v5106_v6  ;;  %v5134_v57 = vand.u32 2147483647, %v10359_v28  ;;  %v6294_v0 = vpack.c.bf16 %v6230_v47, %v6230_v47  ;;  %v11292_v22 = vadd.f32 %v2010_v54, %v8509_v43  ;;  %v11301_v56 = vpop.f32.mrf.mxu3  ;;  %v11304_v47 = vpop.f32.mrf.mxu0 }
 0x262   :  { %v2538_v1 = vmul.f32 %v7267_v63, %v15428_v30  ;;  %v2602_v14 = vmul.f32 %v2406_v60, %v2097_v19  ;;  %v6296_v29 = vpack.c.bf16 %v6232_v58, %v6232_v58  ;;  %v3542_v9 = vmul.f32 %v7268_v27, %v3069_v44  ;;  %15429 = vst [vmem:[#allocation119_spill] sm:$0xff] %v11304_v47  ;;  %v7270_v44 = vld [vmem:[%s14887_s3 + $0xa0] sm:$0xff]  ;;  %v15509_v47 = vld [vmem:[#allocation44_spill] sm:$0xff] }
 0x263   :  { %15427 = vst [vmem:[#allocation11_spill] sm:$0xff] %v11292_v22  ;;  %vm5131_vm13 = vweird.f32 %v10464_v61  ;;  %v5142_v6 = vsub.f32 1.0, %v5141_v15  ;;  %v2224_v19 = vpack.c.bf16 %v11292_v22, %v11231_v41  ;;  %v5129_v58 = vadd.f32 %v10464_v61, %v5128_v53  ;;  %v15432_v53 = vld [vmem:[#allocation9_spill] sm:$0xff] }
 0x264   :  { %6359 = vst.msk [vmem:[%s14893_s11 + $0x14] sm:$0xf] %vm6353_vm5, %v6294_v0  ;;  %v2666_v54 = vadd.f32 %v2602_v14, %v2538_v1  ;;  %v5172_v60 = vsub.f32 1.0, %v5171_v4  ;;  %vm5105_vm15 = vcmp.eq.f32.partialorder %v5104_v39, 8.507059e+37  ;;  %v5136_v1 = vand.u32 2147483648, %v10359_v28 }
 0x265   :  { %6361 = vst.msk [vmem:[%s14893_s11 + $0x1c] sm:$0xf] %vm6353_vm5, %v6296_v29  ;;  %v5073_v15 = vsel %vm11317_vm14, %v15417_v42, %v5069_v11  ;;  %v5111_v4 = vmul.f32 %v15432_v53, %v10264_v17  ;;  %2912 = vrot.lane.b32.xlu2 %v2224_v19, %s7354_s15  ;;  %6540 = vmatmul.msk.bf16.gmra.mxu2 %vm162_vm0, %v2224_v19  ;;  %vm5130_vm1 = vweird.f32 %v10359_v28  ;;  %v5077_v63 = vor.u32 1.1754944e-38, %v5076_v2  ;;  %v4484_v39 = vpop.permute.xlu2 %4483  ;;  %v2098_v42 = vld [vmem:[%s14890_s2 + $0xa0] sm:$0xff]  ;;  %v7269_v28 = vld [vmem:[%s14883_s0 + $0x1d8] sm:$0xff] }
 0x266   :  { %v2730_v21 = vpack.c.bf16 %v2666_v54, %v2666_v54  ;;  %v5108_v0 = vsel %vm5105_vm15, %v5107_v26, %v5103_v32  ;;  %3675 = vrot.lane.b32.xlu0 %v3542_v9, %s7353_s21  ;;  %vm11340_vm2 = vmor %vm5130_vm1, %vm5131_vm13  ;;  %v5143_v29 = vmul.f32 %v10491_v36, %v5142_v6  ;;  %vm5075_vm4 = vcmp.eq.f32.partialorder %v5074_v35, 8.507059e+37  ;;  %v4480_v35 = vpop.permute.xlu1 %4479  ;;  %v15438_v54 = vld [vmem:[#allocation85_spill] sm:$0xff]  ;;  %4650 = vst.msk [vmem:[%s14892_s10 + $0x64] sm:$0xf] %vm2775_vm3, %v4484_v39 }
 0x267   :  { %v2899_v14 = vpop.permute.xlu0 %2898  ;;  %v11349_v2 = vmul.f32 %v7269_v28, %v11175_v34  ;;  %v15435_v32 = vand.u32 2147483648, %v9622_v40  ;;  %v5133_v27 = vsel %vm11340_vm2, %v10464_v61, %v5129_v58  ;;  %vm11365_vm6 = vcmp.eq.f32.partialorder %v5134_v57, 8.507059e+37  ;;  %4648 = vst.msk [vmem:[%s14892_s10 + $0x5c] sm:$0xf] %vm2775_vm3, %v4480_v35  ;;  %v2013_v40 = vpop.f32.mrf.mxu1  ;;  %v15442_v34 = vld [vmem:[#allocation64_spill] sm:$0xff] }
 0x268   :  { %2795 = vst.msk [vmem:[%s14891_s8 + $0x4c] sm:$0xf] %vm2775_vm3, %v2730_v21  ;;  %v5173_v9 = vmul.f32 %v10642_v23, %v5172_v60  ;;  %v11370_v6 = vsel %vm5075_vm4, %v5077_v63, %v5073_v15  ;;  %6573 = vmatmul.msk.bf16.gmra.mxu3 %vm162_vm0, %v2899_v14  ;;  %v5915_v19 = vmul.f32 %v5108_v0, %v15438_v54  ;;  %v5137_v61 = vor.u32 1.1754944e-38, %v5136_v1  ;;  %v15440_v15 = vld [vmem:[#allocation130_spill] sm:$0xff]  ;;  %v2099_v54 = vld [vmem:[%s14890_s2 + $0xa8] sm:$0xff] }
 0x269   :  { %v11356_v26 = vsel %vm1167_vm10, %v15435_v32, %v11197_v55  ;;  %v2409_v55 = vpop.f32.mrf.mxu2  ;;  %v5149_v57 = vand.u32 2147483647, %v10374_v38  ;;  %v5112_v58 = vsub.f32 1.0, %v5111_v4  ;;  %v11384_v60 = vadd.f32 %v2013_v40, %v8509_v43  ;;  %6477 = vmatmul.msk.bf16.gmra.mxu0 %vm162_vm0, %v11012_v33  ;;  %v11397_v0 = vpop.f32.mrf.mxu3 }
 0x26a   :  { %v2539_v21 = vmul.f32 %v7270_v44, %v15440_v15  ;;  %v2603_v63 = vmul.f32 %v2409_v55, %v2098_v42  ;;  %v5151_v1 = vand.u32 2147483648, %v10374_v38  ;;  %6509 = vmatmul.msk.bf16.gmra.mxu1 %vm162_vm0, %v11012_v33  ;;  %v5138_v4 = vsel %vm11365_vm6, %v5137_v61, %v5133_v27  ;;  %v11411_v35 = vpop.f32.mrf.mxu0  ;;  %v7272_v61 = vld [vmem:[%s14890_s2 + $0x30] sm:$0xff] }
 0x26b   :  { %15439 = vst [vmem:[#allocation7_spill] sm:$0xff] %v11384_v60  ;;  %v5144_v39 = vadd.f32 %v10491_v36, %v5143_v29  ;;  %vm5146_vm7 = vweird.f32 %v10491_v36  ;;  %vm5176_vm8 = vweird.f32 %v10642_v23  ;;  %v4342_v42 = vpack.c.bf16 %v11292_v22, %v11292_v22 }
 0x26c   :  { %v2667_v14 = vadd.f32 %v2603_v63, %v2539_v21  ;;  %v4343_v11 = vpack.c.bf16 %v11384_v60, %v11384_v60  ;;  %v5174_v33 = vadd.f32 %v10642_v23, %v5173_v9  ;;  %vm5145_vm9 = vweird.f32 %v10374_v38  ;;  %15441 = vst [vmem:[#allocation32_spill] sm:$0xff] %v11411_v35 }
 0x26d   :  { %v5179_v28 = vand.u32 2147483647, %v10554_v59  ;;  %v5181_v32 = vand.u32 2147483648, %v10554_v59  ;;  %v5113_v29 = vmul.f32 %v15432_v53, %v5112_v58  ;;  %4507 = vrot.lane.b32.xlu2 %v4342_v42, %s7355_s23  ;;  %v5917_v40 = vmul.f32 %v5138_v4, %v15442_v34  ;;  %vm11418_vm10 = vmor %vm5145_vm9, %vm5146_vm7  ;;  %v6058_v38 = vpop.permute.xlu2 %6057 }
 0x26e   :  { %v2731_v27 = vpack.c.bf16 %v2667_v14, %v2667_v14  ;;  %4509 = vrot.lane.b32.xlu1 %v4343_v11, %s7355_s23  ;;  %vm5175_vm11 = vweird.f32 %v10554_v59  ;;  %vm5115_vm12 = vweird.f32 %v10264_v17  ;;  %vm11427_vm13 = vcmp.eq.f32.partialorder %v5149_v57, 8.507059e+37  ;;  %v6054_v57 = vpop.permute.xlu1 %6053 }
 0x26f   :  { %v4482_v55 = vpop.permute.xlu0 %4481  ;;  %v5152_v58 = vor.u32 1.1754944e-38, %v5151_v1  ;;  %vm11433_vm14 = vmor %vm5175_vm11, %vm5176_vm8  ;;  %vm5116_vm15 = vweird.f32 %v15432_v53  ;;  %v5119_v59 = vand.u32 2147483647, %v10264_v17  ;;  %v6237_v21 = vmul.f32 %v6058_v38, %v5917_v40  ;;  %v2015_v42 = vpop.f32.mrf.mxu1 }
 0x270   :  { %2796 = vst.msk [vmem:[%s14891_s8 + $0x50] sm:$0xf] %vm2775_vm3, %v2731_v27  ;;  %v5148_v63 = vsel %vm11418_vm10, %v10491_v36, %v5144_v39  ;;  %v5178_v1 = vsel %vm11433_vm14, %v10642_v23, %v5174_v33  ;;  %v5216_v4 = vmul.f32 %v11064_v25, %v10929_v51  ;;  %v6235_v14 = vmul.f32 %v6054_v57, %v5915_v19  ;;  %v7271_v23 = vld [vmem:[%s14887_s3 + $0xa8] sm:$0xff]  ;;  %v15450_v19 = vld [vmem:[#allocation93_spill] sm:$0xff]  ;;  %v15451_v57 = vld [vmem:[#allocation68_spill] sm:$0xff] }
 0x271   :  { %4649 = vst.msk [vmem:[%s14892_s10 + $0x60] sm:$0xf] %vm2775_vm3, %v4482_v55  ;;  %v2411_v11 = vpop.f32.mrf.mxu2  ;;  %vm5180_vm1 = vcmp.eq.f32.partialorder %v5179_v28, 8.507059e+37  ;;  %v5182_v27 = vor.u32 1.1754944e-38, %v5181_v32  ;;  %v5114_v34 = vadd.f32 %v15432_v53, %v5113_v29  ;;  %v6301_v36 = vpack.c.bf16 %v6237_v21, %v6237_v21  ;;  %vm11488_vm2 = vmor %vm5115_vm12, %vm5116_vm15 }
 0x272   :  { %v11457_v39 = vadd.f32 %v2015_v42, %v8509_v43  ;;  %v2540_v33 = vmul.f32 %v7271_v23, %v15450_v19  ;;  %v2604_v40 = vmul.f32 %v2411_v11, %v2099_v54  ;;  %v6299_v9 = vpack.c.bf16 %v6235_v14, %v6235_v14  ;;  %v11511_v23 = vld [vmem:[%s14890_s2 + $0xb0] sm:$0xff] }
 0x273   :  { %v5153_v38 = vsel %vm11427_vm13, %v5152_v58, %v5148_v63  ;;  %v5183_v55 = vsel %vm5180_vm1, %v5182_v27, %v5178_v1  ;;  %v5121_v28 = vand.u32 2147483648, %v10264_v17  ;;  %6366 = vst.msk [vmem:[%s14893_s11 + $0x30] sm:$0xf] %vm6353_vm5, %v6301_v36  ;;  %v5217_v54 = vsub.f32 1.0, %v5216_v4  ;;  %v3077_v63 = vpop.f32.mrf.mxu3 }
 0x274   :  { %15449 = vst [vmem:[#allocation113_spill] sm:$0xff] %v11457_v39  ;;  %v2668_v32 = vadd.f32 %v2604_v40, %v2540_v33  ;;  %v2225_v29 = vpack.c.bf16 %v11457_v39, %v11384_v60  ;;  %v4344_v44 = vpack.c.bf16 %v11457_v39, %v11457_v39  ;;  %v3543_v58 = vmul.f32 %v7272_v61, %v11301_v56  ;;  %v15456_v40 = vld [vmem:[#allocation147_spill] sm:$0xff] }
 0x275   :  { %6364 = vst.msk [vmem:[%s14893_s11 + $0x28] sm:$0xf] %vm6353_vm5, %v6299_v9  ;;  %v5913_v21 = vmul.f32 %v11370_v6, %v15451_v57  ;;  %v1448_v56 = vmul.f32 %v11017_v16, %v11245_v45  ;;  %v11496_v4 = vmul.f32 %v11017_v16, %v11349_v2  ;;  %v15454_v6 = vld [vmem:[#allocation76_spill] sm:$0xff]  ;;  %v5118_v17 = vsel %vm11488_vm2, %v15432_v53, %v5114_v34  ;;  %v6064_v27 = vpop.permute.xlu2 %6063  ;;  %v15457_v9 = vld [vmem:[#allocation106_spill] sm:$0xff]  ;;  %v11518_v53 = vpop.f32.mrf.mxu0 }
 0x276   :  { %v2732_v14 = vpack.c.bf16 %v2668_v32, %v2668_v32  ;;  %6541 = vmatmul.msk.bf16.gmra.mxu2 %vm162_vm0, %v2225_v29  ;;  %2914 = vrot.lane.b32.xlu1 %v2225_v29, %s7354_s15  ;;  %v5920_v42 = vmul.f32 %v5183_v55, %v15454_v6  ;;  %v1254_v11 = vadd.f32 1e-08, %v11185_v7  ;;  %v15455_v45 = vld [vmem:[#allocation96_spill] sm:$0xff]  ;;  %v5122_v33 = vor.u32 1.1754944e-38, %v5121_v28  ;;  %15458 = vst [vmem:[#allocation81_spill] sm:$0xff] %v11518_v53  ;;  %v6060_v34 = vpop.permute.xlu1 %6059 }
 0x277   :  { %4511 = vrot.lane.b32.xlu0 %v4344_v44, %s7355_s23  ;;  %3677 = vrot.lane.b32.xlu2 %v3543_v58, %s7353_s21  ;;  %v5918_v2 = vmul.f32 %v5153_v38, %v15455_v45  ;;  %v6050_v36 = vpop.permute.xlu0 %6049  ;;  %v11515_v55 = vmul.f32 %v15457_v9, %v15456_v40  ;;  %v1255_v7 = vadd.f32 1e-08, %v11356_v26  ;;  %vm5120_vm4 = vcmp.eq.f32.partialorder %v5119_v59, 8.507059e+37  ;;  %v2018_v44 = vpop.f32.mrf.mxu1  ;;  %v7273_v26 = vld [vmem:[%s14887_s3 + $0xb0] sm:$0xff]  ;;  %v15459_v58 = vld [vmem:[#allocation99_spill] sm:$0xff] }
 0x278   :  { %2797 = vst.msk [vmem:[%s14891_s8 + $0x54] sm:$0xf] %vm2775_vm3, %v2732_v14  ;;  %v6240_v38 = vmul.f32 %v6064_v27, %v5920_v42  ;;  %v6233_v32 = vmul.f32 %v6050_v36, %v5913_v21  ;;  %v5218_v29 = vmul.f32 %v11064_v25, %v5217_v54  ;;  %v2541_v57 = vmul.f32 %v7273_v26, %v15459_v58  ;;  %v15460_v14 = vld [vmem:[#allocation117_spill] sm:$0xff]  ;;  %v1512_v45 = vld [vmem:[%s14886_s1 + $0x1d0] sm:$0xff] }
 0x279   :  { %v6238_v28 = vmul.f32 %v6060_v34, %v5918_v2  ;;  %v2414_v61 = vpop.f32.mrf.mxu2  ;;  %6574 = vmatmul.msk.bf16.gmra.mxu3 %vm162_vm0, %v11264_v12  ;;  %v5123_v1 = vsel %vm5120_vm4, %v5122_v33, %v5118_v17  ;;  %v5186_v6 = vmul.f32 %v10819_v5, %v15460_v14  ;;  %v11534_v54 = vadd.f32 %v2018_v44, %v8509_v43  ;;  %v7274_v12 = vld [vmem:[%s14890_s2 + $0x40] sm:$0xff]  ;;  %v7275_v36 = vld [vmem:[%s14890_s2 + $0x38] sm:$0xff] }
 0x27a   :  { %v6304_v21 = vpack.c.bf16 %v6240_v38, %v6240_v38  ;;  %v6297_v59 = vpack.c.bf16 %v6233_v32, %v6233_v32  ;;  %v2605_v42 = vmul.f32 %v2414_v61, %v11511_v23  ;;  %6478 = vmatmul.msk.bf16.gmra.mxu0 %vm162_vm0, %v11114_v31  ;;  %6510 = vmatmul.msk.bf16.gmra.mxu1 %vm162_vm0, %v11114_v31  ;;  %vm5221_vm6 = vweird.f32 %v11064_v25  ;;  %v15462_v61 = vld [vmem:[#allocation89_spill] sm:$0xff] }
 0x27b   :  { %15461 = vst [vmem:[#allocation135_spill] sm:$0xff] %v11534_v54  ;;  %v6302_v2 = vpack.c.bf16 %v6238_v28, %v6238_v28  ;;  %v3545_v17 = vmul.f32 %v7274_v12, %v3077_v63  ;;  %v5157_v27 = vsub.f32 1.0, %v11515_v55  ;;  %v3544_v33 = vmul.f32 %v7275_v36, %v11397_v0  ;;  %v1513_v55 = vld [vmem:[%s14886_s1 + $0x1d8] sm:$0xff]  ;;  %v3079_v0 = vpop.f32.mrf.mxu3 }
 0x27c   :  { %6369 = vst.msk [vmem:[%s14893_s11 + $0x3c] sm:$0xf] %vm6353_vm5, %v6304_v21  ;;  %v2669_v31 = vadd.f32 %v2605_v42, %v2541_v57  ;;  %v4345_v34 = vpack.c.bf16 %v11534_v54, %v11534_v54  ;;  %v5219_v63 = vadd.f32 %v11064_v25, %v5218_v29  ;;  %v5224_v38 = vand.u32 2147483647, %v10929_v51 }
 0x27d   :  { %6367 = vst.msk [vmem:[%s14893_s11 + $0x34] sm:$0xf] %vm6353_vm5, %v6302_v2  ;;  %v5226_v32 = vand.u32 2147483648, %v10929_v51  ;;  %v1576_v28 = vadd.f32 %v1512_v45, %v1448_v56  ;;  %v5187_v44 = vsub.f32 1.0, %v5186_v6  ;;  %v5916_v26 = vmul.f32 %v5123_v1, %v15462_v61  ;;  %v4490_v57 = vpop.permute.xlu2 %4489  ;;  %v11581_v6 = vld [vmem:[%s14890_s2 + $0xb8] sm:$0xff] }
 0x27e   :  { %6362 = vst.msk [vmem:[%s14893_s11 + $0x20] sm:$0xf] %vm6353_vm5, %v6297_v59  ;;  %v2733_v29 = vpack.c.bf16 %v2669_v31, %v2669_v31  ;;  %3679 = vrot.lane.b32.xlu1 %v3544_v33, %s7353_s21  ;;  %vm5220_vm7 = vweird.f32 %v10929_v51  ;;  %7001 = vrcp.f32 %v1254_v11  ;;  %v1577_v51 = vadd.f32 %v1513_v55, %v11496_v4  ;;  %v15465_v11 = vld [vmem:[#allocation67_spill] sm:$0xff]  ;;  %v4486_v59 = vpop.permute.xlu1 %4485  ;;  %v15466_v4 = vld [vmem:[#allocation17_spill] sm:$0xff] }
 0x27f   :  { %4513 = vrot.lane.b32.xlu2 %v4345_v34, %s7355_s23  ;;  %3681 = vrot.lane.b32.xlu0 %v3545_v17, %s7353_s21  ;;  %v6056_v56 = vpop.permute.xlu0 %6055  ;;  %vm11585_vm8 = vmor %vm5220_vm7, %vm5221_vm6  ;;  %7003 = vrcp.f32 %v1255_v7  ;;  %vm1177_vm9 = vcmp.eq.f32.partialorder %v15465_v11, inf  ;;  %v5158_v2 = vmul.f32 %v15457_v9, %v5157_v27  ;;  %vm1179_vm10 = vcmp.eq.f32.partialorder %v15465_v11, 0.0  ;;  %4653 = vst.msk [vmem:[%s14892_s10 + $0x70] sm:$0xf] %vm2775_vm3, %v4490_v57  ;;  %v2020_v7 = vpop.f32.mrf.mxu1  ;;  %v7276_v34 = vld [vmem:[%s14887_s3 + $0xb8] sm:$0xff] }
 0x280   :  { %2798 = vst.msk [vmem:[%s14891_s8 + $0x58] sm:$0xf] %vm2775_vm3, %v2733_v29  ;;  %v6236_v42 = vmul.f32 %v6056_v56, %v5916_v26  ;;  %v5223_v45 = vsel %vm11585_vm8, %v11064_v25, %v5219_v63  ;;  %vm1189_vm11 = vcmp.eq.f32.partialorder %v15466_v4, inf  ;;  %vm5225_vm12 = vcmp.eq.f32.partialorder %v5224_v38, 8.507059e+37  ;;  %v11608_v25 = vpop.f32.mrf.mxu0  ;;  %v15469_v63 = vld [vmem:[#allocation69_spill] sm:$0xff] }
 0x281   :  { %v2416_v12 = vpop.f32.mrf.mxu2  ;;  %v5227_v17 = vor.u32 1.1754944e-38, %v5226_v32  ;;  %v5188_v36 = vmul.f32 %v10819_v5, %v5187_v44  ;;  %v5164_v33 = vand.u32 2147483647, %v15456_v40  ;;  %15467 = vst [vmem:[#allocation48_spill] sm:$0xff] %v11608_v25  ;;  %v11615_v31 = vadd.f32 %v2020_v7, %v8509_v43  ;;  %v7277_v32 = vld [vmem:[%s14890_s2 + $0x48] sm:$0xff] }
 0x282   :  { %4651 = vst.msk [vmem:[%s14892_s10 + $0x68] sm:$0xf] %vm2775_vm3, %v4486_v59  ;;  %v6300_v27 = vpack.c.bf16 %v6236_v42, %v6236_v42  ;;  %v2542_v55 = vmul.f32 %v7276_v34, %v15469_v63  ;;  %v2606_v38 = vmul.f32 %v2416_v12, %v11581_v6  ;;  %v3546_v44 = vmul.f32 %v7277_v32, %v3079_v0  ;;  %v15474_v32 = vld [vmem:[#allocation143_spill] sm:$0xff] }
 0x283   :  { %15468 = vst [vmem:[#allocation27_spill] sm:$0xff] %v11615_v31  ;;  %v5228_v29 = vsel %vm5225_vm12, %v5227_v17, %v5223_v45  ;;  %vm5161_vm13 = vweird.f32 %v15457_v9  ;;  %v5166_v61 = vand.u32 2147483648, %v15456_v40  ;;  %v2226_v56 = vpack.c.bf16 %v11615_v31, %v11534_v54  ;;  %v3082_v45 = vpop.f32.mrf.mxu3 }
 0x284   :  { %v7002_v26 = vpop.eup %7001  ;;  %6365 = vst.msk [vmem:[%s14893_s11 + $0x2c] sm:$0xf] %vm6353_vm5, %v6300_v27  ;;  %v2670_v57 = vadd.f32 %v2606_v38, %v2542_v55  ;;  %v4346_v21 = vpack.c.bf16 %v11615_v31, %v11615_v31  ;;  %v5159_v0 = vadd.f32 %v15457_v9, %v5158_v2  ;;  %v1611_v42 = vpack.c.bf16 %v1577_v51, %v1576_v28  ;;  %v15470_v27 = vld [vmem:[#allocation16_spill] sm:$0xff] }
 0x285   :  { %v7004_v59 = vpop.eup %7003  ;;  %v5189_v7 = vadd.f32 %v10819_v5, %v5188_v36  ;;  %vm5191_vm14 = vweird.f32 %v10819_v5  ;;  %v5196_v12 = vand.u32 2147483648, %v15460_v14  ;;  %v5923_v34 = vmul.f32 %v5228_v29, %v15470_v27  ;;  %v15471_v55 = vld [vmem:[#allocation140_spill] sm:$0xff]  ;;  %v6070_v51 = vpop.permute.xlu2 %6069  ;;  %v11652_v36 = vld [vmem:[%s14890_s2 + $0xc0] sm:$0xff] }
 0x286   :  { %v2734_v17 = vpack.c.bf16 %v2670_v57, %v2670_v57  ;;  %6542 = vmatmul.msk.bf16.gmra.mxu2 %vm162_vm0, %v2226_v56  ;;  %4515 = vrot.lane.b32.xlu1 %v4346_v21, %s7355_s23  ;;  %vm5160_vm15 = vweird.f32 %v15456_v40  ;;  %v1178_v28 = vsel %vm1177_vm9, %v15465_v11, %v15471_v55  ;;  %vm5190_vm1 = vweird.f32 %v15460_v14 }
 0x287   :  { %2916 = vrot.lane.b32.xlu0 %v2226_v56, %s7354_s15  ;;  %3683 = vrot.lane.b32.xlu2 %v3546_v44, %s7353_s21  ;;  %v4488_v2 = vpop.permute.xlu0 %4487  ;;  %v5194_v40 = vand.u32 2147483647, %v15460_v14  ;;  %vm11658_vm2 = vmor %vm5160_vm15, %vm5161_vm13  ;;  %v1190_v44 = vsel %vm1189_vm11, %v15466_v4, %v15474_v32  ;;  %v1192_v29 = vand.u32 2147483648, %v15466_v4  ;;  %v6243_v57 = vmul.f32 %v6070_v51, %v5923_v34  ;;  %v2903_v14 = vpop.permute.xlu1 %2902  ;;  %v7278_v51 = vld [vmem:[%s14887_s3 + $0xc0] sm:$0xff]  ;;  %v15479_v32 = vld [vmem:[#allocation139_spill] sm:$0xff] }
 0x288   :  { %2799 = vst.msk [vmem:[%s14891_s8 + $0x5c] sm:$0xf] %vm2775_vm3, %v2734_v17  ;;  %vm11673_vm4 = vmor %vm5190_vm1, %vm5191_vm14  ;;  %v5163_v21 = vsel %vm11658_vm2, %v15457_v9, %v5159_v0  ;;  %vm11680_vm6 = vcmp.eq.f32.partialorder %v5164_v33, 8.507059e+37  ;;  %v5167_v55 = vor.u32 1.1754944e-38, %v5166_v61  ;;  %v2023_v17 = vpop.f32.mrf.mxu1  ;;  %v2543_v1 = vmul.f32 %v7278_v51, %v15479_v32  ;;  %v7279_v51 = vld [vmem:[%s14890_s2 + $0x50] sm:$0xff]  ;;  %v7281_v56 = vld [vmem:[%s14883_s0 + $0x1e8] sm:$0xff] }
 0x289   :  { %4652 = vst.msk [vmem:[%s14892_s10 + $0x6c] sm:$0xf] %vm2775_vm3, %v4488_v2  ;;  %v2419_v34 = vpop.f32.mrf.mxu2  ;;  %6575 = vmatmul.msk.bf16.gmra.mxu3 %vm162_vm0, %v2903_v14  ;;  %v5193_v9 = vsel %vm11673_vm4, %v10819_v5, %v5189_v7  ;;  %v5197_v33 = vor.u32 1.1754944e-38, %v5196_v12  ;;  %v5231_v61 = vmul.f32 %v11075_v62, %v10971_v3  ;;  %v6307_v0 = vpack.c.bf16 %v6243_v57, %v6243_v57  ;;  %v11713_v57 = vpop.f32.mrf.mxu0 }
 0x28a   :  { %v11699_v2 = vadd.f32 %v2023_v17, %v8509_v43  ;;  %v2607_v38 = vmul.f32 %v2419_v34, %v11652_v36  ;;  %v3547_v25 = vmul.f32 %v7279_v51, %v3082_v45  ;;  %6479 = vmatmul.msk.bf16.gmra.mxu0 %vm162_vm0, %v1611_v42  ;;  %6511 = vmatmul.msk.bf16.gmra.mxu1 %vm162_vm0, %v1611_v42  ;;  %vm5195_vm7 = vcmp.eq.f32.partialorder %v5194_v40, 8.507059e+37  ;;  %v15483_v17 = vld [vmem:[#allocation141_spill] sm:$0xff] }
 0x28b   :  { %v5168_v5 = vsel %vm11680_vm6, %v5167_v55, %v5163_v21  ;;  %v15481_v7 = vand.u32 2147483648, %v15465_v11  ;;  %15482 = vst [vmem:[#allocation61_spill] sm:$0xff] %v11713_v57  ;;  %v5198_v40 = vsel %vm5195_vm7, %v5197_v33, %v5193_v9  ;;  %vm1191_vm8 = vcmp.eq.f32.partialorder %v15466_v4, 0.0  ;;  %v3084_v14 = vpop.f32.mrf.mxu3  ;;  %v7280_v11 = vld [vmem:[%s14883_s0 + $0x1e0] sm:$0xff]  ;;  %v15504_v57 = vld [vmem:[#allocation28_spill] sm:$0xff] }
 0x28c   :  { %15480 = vst [vmem:[#allocation38_spill] sm:$0xff] %v11699_v2  ;;  %v2671_v45 = vadd.f32 %v2607_v38, %v2543_v1  ;;  %v4347_v42 = vpack.c.bf16 %v11699_v2, %v11699_v2  ;;  %v1383_v21 = vmul.f32 %v7281_v56, %v7004_v59  ;;  %v5232_v27 = vsub.f32 1.0, %v5231_v61  ;;  %v15484_v4 = vld [vmem:[#allocation6_spill] sm:$0xff]  ;;  %v7282_v56 = vld [vmem:[%s14887_s3 + $0xc8] sm:$0xff] }
 0x28d   :  { %v1181_v12 = vsel %vm1179_vm10, %v15481_v7, %v1178_v28  ;;  %6372 = vst.msk [vmem:[%s14893_s11 + $0x48] sm:$0xf] %vm6353_vm5, %v6307_v0  ;;  %v1382_v28 = vmul.f32 %v7280_v11, %v7002_v26  ;;  %v1193_v55 = vsel %vm1191_vm8, %v1192_v29, %v1190_v44  ;;  %v5919_v34 = vmul.f32 %v5168_v5, %v15483_v17  ;;  %v11737_v26 = vld [vmem:[%s14890_s2 + $0xc8] sm:$0xff] }
 0x28e   :  { %v2735_v1 = vpack.c.bf16 %v2671_v45, %v2671_v45  ;;  %3685 = vrot.lane.b32.xlu1 %v3547_v25, %s7353_s21  ;;  %v5921_v9 = vmul.f32 %v5198_v40, %v15484_v4  ;;  %v11732_v33 = vpop.permute.xlu2 %2906  ;;  %v5201_v59 = vmul.f32 %v10909_v20, %v10803_v52  ;;  %v1256_v29 = vadd.f32 1e-08, %v1181_v12 }
 0x28f   :  { %4517 = vrot.lane.b32.xlu0 %v4347_v42, %s7355_s23  ;;  %v6062_v0 = vpop.permute.xlu0 %6061  ;;  %v6066_v25 = vpop.permute.xlu1 %6065  ;;  %v1257_v61 = vadd.f32 1e-08, %v1193_v55  ;;  %v1450_v7 = vmul.f32 %v11017_v16, %v1382_v28  ;;  %v1451_v45 = vmul.f32 %v11017_v16, %v1383_v21  ;;  %v5233_v42 = vmul.f32 %v11075_v62, %v5232_v27  ;;  %v1514_v28 = vld [vmem:[%s14886_s1 + $0x1e0] sm:$0xff]  ;;  %v1515_v16 = vld [vmem:[%s14886_s1 + $0x1e8] sm:$0xff]  ;;  %v7283_v27 = vld [vmem:[%s14890_s2 + $0x58] sm:$0xff] }
 0x290   :  { %2800 = vst.msk [vmem:[%s14891_s8 + $0x60] sm:$0xf] %vm2775_vm3, %v2735_v1  ;;  %v6239_v44 = vmul.f32 %v6062_v0, %v5919_v34  ;;  %v6241_v38 = vmul.f32 %v6066_v25, %v5921_v9  ;;  %v2025_v51 = vpop.f32.mrf.mxu1  ;;  %v15486_v1 = vld [vmem:[#allocation144_spill] sm:$0xff]  ;;  %v3548_v17 = vmul.f32 %v7283_v27, %v3084_v14  ;;  %v5202_v34 = vsub.f32 1.0, %v5201_v59  ;;  %v15491_v27 = vld [vmem:[#allocation145_spill] sm:$0xff] }
 0x291   :  { %v2421_v5 = vpop.f32.mrf.mxu2  ;;  %v11749_v11 = vadd.f32 %v2025_v51, %v8509_v43  ;;  %v2544_v12 = vmul.f32 %v7282_v56, %v15486_v1  ;;  %7005 = vrcp.f32 %v1257_v61  ;;  %v1578_v0 = vadd.f32 %v1514_v28, %v1450_v7  ;;  %v11779_v59 = vpop.f32.mrf.mxu0  ;;  %v11788_v7 = vld [vmem:[%s14890_s2 + $0xd0] sm:$0xff] }
 0x292   :  { %v6303_v40 = vpack.c.bf16 %v6239_v44, %v6239_v44  ;;  %v2608_v55 = vmul.f32 %v2421_v5, %v11737_v26  ;;  %v6305_v21 = vpack.c.bf16 %v6241_v38, %v6241_v38  ;;  %v1579_v25 = vadd.f32 %v1515_v16, %v1451_v45  ;;  %15487 = vst [vmem:[#allocation116_spill] sm:$0xff] %v11779_v59 }
 0x293   :  { %15485 = vst [vmem:[#allocation136_spill] sm:$0xff] %v11749_v11  ;;  %v2227_v9 = vpack.c.bf16 %v11749_v11, %v11699_v2  ;;  %v11775_v44 = vpop.f32.mrf.mxu3  ;;  %v5234_v14 = vadd.f32 %v11075_v62, %v5233_v42  ;;  %vm5236_vm9 = vweird.f32 %v11075_v62  ;;  %v5241_v61 = vand.u32 2147483648, %v10971_v3 }
 0x294   :  { %6368 = vst.msk [vmem:[%s14893_s11 + $0x38] sm:$0xf] %vm6353_vm5, %v6303_v40  ;;  %v2672_v4 = vadd.f32 %v2608_v55, %v2544_v12  ;;  %7007 = vrcp.f32 %v1256_v29  ;;  %vm5235_vm10 = vweird.f32 %v10971_v3  ;;  %v5239_v45 = vand.u32 2147483647, %v10971_v3 }
 0x295   :  { %6370 = vst.msk [vmem:[%s14893_s11 + $0x40] sm:$0xf] %vm6353_vm5, %v6305_v21  ;;  %2918 = vrot.lane.b32.xlu2 %v2227_v9, %s7354_s15  ;;  %v5203_v42 = vmul.f32 %v10909_v20, %v5202_v34  ;;  %vm11799_vm11 = vmor %vm5235_vm10, %vm5236_vm9  ;;  %v1612_v12 = vpack.c.bf16 %v1579_v25, %v1578_v0  ;;  %v7284_v21 = vld [vmem:[%s14887_s3 + $0xd0] sm:$0xff]  ;;  %vm5206_vm13 = vweird.f32 %v10909_v20  ;;  %v4348_v25 = vpack.c.bf16 %v11749_v11, %v11749_v11 }
 0x296   :  { %v2736_v38 = vpack.c.bf16 %v2672_v4, %v2672_v4  ;;  %6543 = vmatmul.msk.bf16.gmra.mxu2 %vm162_vm0, %v2227_v9  ;;  %v4496_v51 = vpop.permute.xlu2 %4495  ;;  %v5238_v55 = vsel %vm11799_vm11, %v11075_v62, %v5234_v14  ;;  %v5242_v4 = vor.u32 1.1754944e-38, %v5241_v61  ;;  %vm5240_vm12 = vcmp.eq.f32.partialorder %v5239_v45, 8.507059e+37 }
 0x297   :  { %3687 = vrot.lane.b32.xlu0 %v3548_v17, %s7353_s21  ;;  %v2905_v5 = vpop.permute.xlu0 %2904  ;;  %v4492_v29 = vpop.permute.xlu1 %4491  ;;  %4656 = vst.msk [vmem:[%s14892_s10 + $0x7c] sm:$0xf] %vm2775_vm3, %v4496_v51  ;;  %v2545_v17 = vmul.f32 %v7284_v21, %v15491_v27  ;;  %v5204_v62 = vadd.f32 %v10909_v20, %v5203_v42  ;;  %v5211_v61 = vand.u32 2147483648, %v10803_v52  ;;  %vm5205_vm14 = vweird.f32 %v10803_v52 }
 0x298   :  { %2801 = vst.msk [vmem:[%s14891_s8 + $0x64] sm:$0xf] %vm2775_vm3, %v2736_v38  ;;  %v2028_v3 = vpop.f32.mrf.mxu1  ;;  %v7006_v28 = vpop.eup %7005  ;;  %v5243_v38 = vsel %vm5240_vm12, %v5242_v4, %v5238_v55  ;;  %vm11851_vm15 = vmor %vm5205_vm14, %vm5206_vm13 }
 0x299   :  { %4654 = vst.msk [vmem:[%s14892_s10 + $0x74] sm:$0xf] %vm2775_vm3, %v4492_v29  ;;  %v2424_v56 = vpop.f32.mrf.mxu2  ;;  %6576 = vmatmul.msk.bf16.gmra.mxu3 %vm162_vm0, %v2905_v5  ;;  %v11816_v16 = vadd.f32 %v2028_v3, %v8509_v43  ;;  %v7285_v5 = vld [vmem:[%s14883_s0 + $0x1f8] sm:$0xff]  ;;  %v5209_v29 = vand.u32 2147483647, %v10803_v52  ;;  %v5924_v40 = vmul.f32 %v5243_v38, %v10746_v8  ;;  %v7286_v52 = vld [vmem:[%s14883_s0 + $0x1f0] sm:$0xff]  ;;  %v11858_v8 = vpop.f32.mrf.mxu0 }
 0x29a   :  { %v2609_v34 = vmul.f32 %v2424_v56, %v11788_v7  ;;  %6480 = vmatmul.msk.bf16.gmra.mxu0 %vm162_vm0, %v1612_v12  ;;  %6512 = vmatmul.msk.bf16.gmra.mxu1 %vm162_vm0, %v1612_v12  ;;  %v7008_v9 = vpop.eup %7007  ;;  %v1385_v45 = vmul.f32 %v7285_v5, %v7006_v28  ;;  %v11847_v12 = vld [vmem:[%s14890_s2 + $0xd8] sm:$0xff]  ;;  %15494 = vst [vmem:[#allocation137_spill] sm:$0xff] %v11858_v8 }
 0x29b   :  { %15490 = vst [vmem:[#allocation133_spill] sm:$0xff] %v11816_v16  ;;  %v4349_v14 = vpack.c.bf16 %v11816_v16, %v11816_v16  ;;  %v11831_v51 = vpop.f32.mrf.mxu3  ;;  %v1384_v28 = vmul.f32 %v7286_v52, %v7008_v9  ;;  %vm5210_vm1 = vcmp.eq.f32.partialorder %v5209_v29, 8.507059e+37  ;;  %v7289_v29 = vld [vmem:[%s14890_s2 + $0x60] sm:$0xff] }
 0x29c   :  { %v2673_v0 = vadd.f32 %v2609_v34, %v2545_v17  ;;  %v5208_v17 = vsel %vm11851_vm15, %v10909_v20, %v5204_v62  ;;  %v7288_v20 = vld [vmem:[%s14887_s3 + $0xd8] sm:$0xff]  ;;  %v15495_v62 = vld [vmem:[#allocation148_spill] sm:$0xff] }
 0x29d   :  { %4519 = vrot.lane.b32.xlu2 %v4348_v25, %s7355_s23  ;;  %4521 = vrot.lane.b32.xlu1 %v4349_v14, %s7355_s23  ;;  %v7287_v25 = vld [vmem:[%s14884_s4] ss:$0 sm:$0xff]  ;;  %v2546_v5 = vmul.f32 %v7288_v20, %v15495_v62 }
 0x29e   :  { %v2737_v42 = vpack.c.bf16 %v2673_v0, %v2673_v0  ;;  %v11842_v3 = vpop.permute.xlu2 %3665  ;;  %v5212_v0 = vor.u32 1.1754944e-38, %v5211_v61  ;;  %v1453_v14 = vmul.f32 %v7287_v25, %v1385_v45  ;;  %v1517_v61 = vld [vmem:[%s14886_s1 + $0x1f8] sm:$0xff]  ;;  %v1452_v55 = vmul.f32 %v7287_v25, %v1384_v28 }
 0x29f   :  { %v4494_v56 = vpop.permute.xlu0 %4493  ;;  %v6072_v21 = vpop.permute.xlu1 %6071 }
 0x2a0   :  { %2802 = vst.msk [vmem:[%s14891_s8 + $0x68] sm:$0xf] %vm2775_vm3, %v2737_v42  ;;  %v6244_v34 = vmul.f32 %v6072_v21, %v5924_v40  ;;  %v2030_v4 = vpop.f32.mrf.mxu1  ;;  %v1581_v28 = vadd.f32 %v1517_v61, %v1453_v14 }
 0x2a1   :  { %4655 = vst.msk [vmem:[%s14892_s10 + $0x78] sm:$0xf] %vm2775_vm3, %v4494_v56  ;;  %v2426_v9 = vpop.f32.mrf.mxu2  ;;  %v11875_v38 = vadd.f32 %v2030_v4, %v8509_v43  ;;  %v5213_v56 = vsel %vm5210_vm1, %v5212_v0, %v5208_v17  ;;  %v1516_v4 = vld [vmem:[%s14886_s1 + $0x1f0] sm:$0xff] }
 0x2a2   :  { %v2610_v42 = vmul.f32 %v2426_v9, %v11847_v12  ;;  %v6308_v40 = vpack.c.bf16 %v6244_v34, %v6244_v34  ;;  %v3549_v9 = vmul.f32 %v7289_v29, %v11775_v44  ;;  %v5922_v34 = vmul.f32 %v5213_v56, %v10623_v18  ;;  %v11908_v44 = vld [vmem:[%s14890_s2 + $0xe0] sm:$0xff] }
 0x2a3   :  { %v2228_v52 = vpack.c.bf16 %v11875_v38, %v11816_v16  ;;  %v4350_v21 = vpack.c.bf16 %v11875_v38, %v11875_v38  ;;  %v1580_v25 = vadd.f32 %v1516_v4, %v1452_v55  ;;  %v3092_v20 = vpop.f32.mrf.mxu3  ;;  %v7290_v55 = vld [vmem:[%s14887_s3 + $0xe0] sm:$0xff]  ;;  %v11928_v4 = vpop.f32.mrf.mxu0 }
 0x2a4   :  { %v2674_v45 = vadd.f32 %v2610_v42, %v2546_v5  ;;  %6373 = vst.msk [vmem:[%s14893_s11 + $0x4c] sm:$0xf] %vm6353_vm5, %v6308_v40 }
 0x2a5   :  { %2920 = vrot.lane.b32.xlu1 %v2228_v52, %s7354_s15  ;;  %4523 = vrot.lane.b32.xlu0 %v4350_v21, %s7355_s23  ;;  %v1613_v61 = vpack.c.bf16 %v1581_v28, %v1580_v25  ;;  %15497 = vst [vmem:[#allocation124_spill] sm:$0xff] %v11928_v4  ;;  %v15499_v25 = vld [vmem:[#allocation23_spill] sm:$0xff] }
 0x2a6   :  { %v2738_v17 = vpack.c.bf16 %v2674_v45, %v2674_v45  ;;  %6544 = vmatmul.msk.bf16.gmra.mxu2 %vm162_vm0, %v2228_v52  ;;  %3689 = vrot.lane.b32.xlu2 %v3549_v9, %s7353_s21  ;;  %v15496_v45 = vld [vmem:[#allocation128_spill] sm:$0xff]  ;;  %v7292_v9 = vld [vmem:[%s14890_s2 + $0x68] sm:$0xff] }
 0x2a7   :  { %v6068_v0 = vpop.permute.xlu0 %6067  ;;  %v4502_v14 = vpop.permute.xlu2 %4501  ;;  %v2547_v52 = vmul.f32 %v7290_v55, %v15496_v45  ;;  %v3550_v28 = vmul.f32 %v7292_v9, %v11831_v51  ;;  %v11953_v51 = vld [vmem:[%s14890_s2 + $0xe8] sm:$0xff]  ;;  %v15500_v55 = vld [vmem:[#allocation112_spill] sm:$0xff]  ;;  %v15514_v45 = vld [vmem:[#allocation18_spill] sm:$0xff] }
 0x2a8   :  { %2803 = vst.msk [vmem:[%s14891_s8 + $0x6c] sm:$0xf] %vm2775_vm3, %v2738_v17  ;;  %v6242_v5 = vmul.f32 %v6068_v0, %v5922_v34  ;;  %v2033_v18 = vpop.f32.mrf.mxu1  ;;  %v15498_v0 = vld [vmem:[#allocation20_spill] sm:$0xff] }
 0x2a9   :  { %4659 = vst.msk [vmem:[%s14892_s10 + $0x88] sm:$0xf] %vm2775_vm3, %v4502_v14  ;;  %v2429_v42 = vpop.f32.mrf.mxu2  ;;  %6577 = vmatmul.msk.bf16.gmra.mxu3 %vm162_vm0, %v11732_v33  ;;  %v11921_v56 = vadd.f32 %v2033_v18, %v8509_v43  ;;  %v7291_v33 = vld [vmem:[%s14890_s2 + $0x70] sm:$0xff]  ;;  %v3473_v14 = vmul.f32 %v15499_v25, %v15498_v0 }
 0x2aa   :  { %v6306_v40 = vpack.c.bf16 %v6242_v5, %v6242_v5  ;;  %v2611_v21 = vmul.f32 %v2429_v42, %v11908_v44  ;;  %6481 = vmatmul.msk.bf16.gmra.mxu0 %vm162_vm0, %v1613_v61  ;;  %6513 = vmatmul.msk.bf16.gmra.mxu1 %vm162_vm0, %v1613_v61  ;;  %v3551_v29 = vmul.f32 %v7291_v33, %v3092_v20  ;;  %v11983_v25 = vld [vmem:[%s14890_s2 + $0xf0] sm:$0xff] }
 0x2ab   :  { %v4351_v34 = vpack.c.bf16 %v11921_v56, %v11921_v56  ;;  %v3857_v20 = vadd.f32 %v11842_v3, %v3473_v14  ;;  %v3094_v61 = vpop.f32.mrf.mxu3 }
 0x2ac   :  { %6371 = vst.msk [vmem:[%s14893_s11 + $0x44] sm:$0xf] %vm6353_vm5, %v6306_v40  ;;  %v2675_v17 = vadd.f32 %v2611_v21, %v2547_v52  ;;  %v7293_v40 = vld [vmem:[%s14887_s3 + $0xe8] sm:$0xff] }
 0x2ad   :  { %3691 = vrot.lane.b32.xlu1 %v3550_v28, %s7353_s21  ;;  %3693 = vrot.lane.b32.xlu0 %v3551_v29, %s7353_s21  ;;  %v2548_v52 = vmul.f32 %v7293_v40, %v15500_v55  ;;  %v3921_v29 = vpack.c.bf16 %v3857_v20, %v3857_v20  ;;  %v7294_v28 = vld [vmem:[%s14890_s2 + $0x78] sm:$0xff] }
 0x2ae   :  { %v2739_v5 = vpack.c.bf16 %v2675_v17, %v2675_v17  ;;  %4525 = vrot.lane.b32.xlu2 %v4351_v34, %s7355_s23  ;;  %v3552_v17 = vmul.f32 %v7294_v28, %v3094_v61  ;;  %v7295_v61 = vld [vmem:[%s14887_s3 + $0xf0] sm:$0xff]  ;;  %v15501_v28 = vld [vmem:[#allocation22_spill] sm:$0xff] }
 0x2af   :  { %v4498_v18 = vpop.permute.xlu1 %4497  ;;  %v2549_v40 = vmul.f32 %v7295_v61, %v10718_v13 }
 0x2b0   :  { %2804 = vst.msk [vmem:[%s14891_s8 + $0x70] sm:$0xf] %vm2775_vm3, %v2739_v5  ;;  %v2035_v21 = vpop.f32.mrf.mxu1  ;;  %v3672_v14 = vpop.permute.xlu2 %3671 }
 0x2b1   :  { %4657 = vst.msk [vmem:[%s14892_s10 + $0x80] sm:$0xf] %vm2775_vm3, %v4498_v18  ;;  %v2431_v42 = vpop.f32.mrf.mxu2  ;;  %v11970_v33 = vadd.f32 %v2035_v21, %v8509_v43 }
 0x2b2   :  { %v2612_v3 = vmul.f32 %v2431_v42, %v11953_v51 }
 0x2b3   :  { %v2229_v34 = vpack.c.bf16 %v11970_v33, %v11921_v56 }
 0x2b4   :  { %v2676_v9 = vadd.f32 %v2612_v3, %v2548_v52 }
 0x2b5   :  { %4049 = vrot.lane.b32.xlu1 %v3921_v29, %s7354_s15  ;;  %2922 = vrot.lane.b32.xlu0 %v2229_v34, %s7354_s15  ;;  %v4352_v29 = vpack.c.bf16 %v11970_v33, %v11970_v33 }
 0x2b6   :  { %v2740_v0 = vpack.c.bf16 %v2676_v9, %v2676_v9  ;;  %6545 = vmatmul.msk.bf16.gmra.mxu2 %vm162_vm0, %v2229_v34  ;;  %3695 = vrot.lane.b32.xlu2 %v3552_v17, %s7353_s21  ;;  %v15502_v17 = vld [vmem:[#allocation12_spill] sm:$0xff] }
 0x2b7   :  { %v2909_v5 = vpop.permute.xlu1 %2908  ;;  %v3474_v34 = vmul.f32 %v15502_v17, %v15501_v28 }
 0x2b8   :  { %2805 = vst.msk [vmem:[%s14891_s8 + $0x74] sm:$0xf] %vm2775_vm3, %v2740_v0  ;;  %v4500_v20 = vpop.permute.xlu0 %4499  ;;  %v2038_v42 = vpop.f32.mrf.mxu1  ;;  %v12008_v0 = vld [vmem:[%s14890_s2 + $0xf8] sm:$0xff] }
 0x2b9   :  { %v2434_v18 = vpop.f32.mrf.mxu2  ;;  %6578 = vmatmul.msk.bf16.gmra.mxu3 %vm162_vm0, %v2909_v5  ;;  %4658 = vst.msk [vmem:[%s14892_s10 + $0x84] sm:$0xf] %vm2775_vm3, %v4500_v20  ;;  %v3097_v3 = vpop.f32.mrf.mxu3  ;;  %v12022_v17 = vadd.f32 %v2038_v42, %v8509_v43 }
 0x2ba   :  { %v2613_v52 = vmul.f32 %v2434_v18, %v11983_v25 }
 0x2bc   :  { %v2677_v21 = vadd.f32 %v2613_v52, %v2549_v40  ;;  %v7296_v52 = vld [vmem:[%s14887_s3 + $0xf8] sm:$0xff] }
 0x2bd   :  { %4527 = vrot.lane.b32.xlu1 %v4352_v29, %s7355_s23 }
 0x2be   :  { %v2741_v9 = vpack.c.bf16 %v2677_v21, %v2677_v21  ;;  %v2550_v21 = vmul.f32 %v7296_v52, %v10806_v46  ;;  %v15503_v52 = vld [vmem:[#allocation33_spill] sm:$0xff] }
 0x2bf   :  { %v3668_v5 = vpop.permute.xlu1 %3667  ;;  %v12014_v20 = vpop.permute.xlu2 %2912  ;;  %v3476_v42 = vmul.f32 %v15504_v57, %v15503_v52 }
 0x2c0   :  { %2806 = vst.msk [vmem:[%s14891_s8 + $0x78] sm:$0xf] %vm2775_vm3, %v2741_v9  ;;  %v3858_v18 = vadd.f32 %v3668_v5, %v3474_v34  ;;  %v2040_v40 = vpop.f32.mrf.mxu1  ;;  %v3670_v28 = vpop.permute.xlu0 %3669  ;;  %v7297_v34 = vld [vmem:[%s14890_s2 + $0x80] sm:$0xff] }
 0x2c1   :  { %v2436_v61 = vpop.f32.mrf.mxu2  ;;  %v12025_v9 = vadd.f32 %v2040_v40, %v8509_v43  ;;  %v3099_v4 = vpop.f32.mrf.mxu3  ;;  %v3553_v5 = vmul.f32 %v7297_v34, %v3097_v3  ;;  %v15506_v40 = vld [vmem:[#allocation19_spill] sm:$0xff]  ;;  %v3860_v3 = vadd.f32 %v3672_v14, %v3476_v42  ;;  %v7298_v34 = vld [vmem:[%s14887_s3 + $0x100] sm:$0xff] }
 0x2c2   :  { %v2614_v29 = vmul.f32 %v2436_v61, %v12008_v0  ;;  %v3922_v8 = vpack.c.bf16 %v3858_v18, %v3858_v18  ;;  %v15505_v18 = vld [vmem:[#allocation31_spill] sm:$0xff] }
 0x2c3   :  { %v2230_v61 = vpack.c.bf16 %v12025_v9, %v12022_v17  ;;  %v3475_v13 = vmul.f32 %v15506_v40, %v15505_v18  ;;  %v3924_v52 = vpack.c.bf16 %v3860_v3, %v3860_v3  ;;  %v12078_v3 = vld [vmem:[%s14890_s2 + $0x108] sm:$0xff] }
 0x2c4   :  { %v2678_v59 = vadd.f32 %v2614_v29, %v2550_v21  ;;  %4051 = vrot.lane.b32.xlu0 %v3922_v8, %s7354_s15  ;;  %v12043_v8 = vld [vmem:[%s14890_s2 + $0x100] sm:$0xff] }
 0x2c5   :  { %3697 = vrot.lane.b32.xlu1 %v3553_v5, %s7353_s21  ;;  %2924 = vrot.lane.b32.xlu2 %v2230_v61, %s7354_s15  ;;  %v3859_v21 = vadd.f32 %v3670_v28, %v3475_v13 }
 0x2c6   :  { %v2742_v46 = vpack.c.bf16 %v2678_v59, %v2678_v59  ;;  %6546 = vmatmul.msk.bf16.gmra.mxu2 %vm162_vm0, %v2230_v61  ;;  %v4353_v61 = vpack.c.bf16 %v12022_v17, %v12022_v17 }
 0x2c7   :  { %v4504_v57 = vpop.permute.xlu1 %4503  ;;  %v4508_v59 = vpop.permute.xlu2 %4507  ;;  %v3923_v18 = vpack.c.bf16 %v3859_v21, %v3859_v21 }
 0x2c8   :  { %2807 = vst.msk [vmem:[%s14891_s8 + $0x7c] sm:$0xf] %vm2775_vm3, %v2742_v46  ;;  %v2043_v14 = vpop.f32.mrf.mxu1  ;;  %v2551_v46 = vmul.f32 %v7298_v34, %v10899_v37  ;;  %v2911_v28 = vpop.permute.xlu0 %2910  ;;  %v7299_v34 = vld [vmem:[%s14890_s2 + $0x88] sm:$0xff] }
 0x2c9   :  { %4660 = vst.msk [vmem:[%s14892_s10 + $0x8c] sm:$0xf] %vm2775_vm3, %v4504_v57  ;;  %v2439_v29 = vpop.f32.mrf.mxu2  ;;  %6579 = vmatmul.msk.bf16.gmra.mxu3 %vm162_vm0, %v2911_v28  ;;  %v3102_v5 = vpop.f32.mrf.mxu3  ;;  %v12069_v57 = vadd.f32 %v2043_v14, %v8509_v43  ;;  %v3554_v14 = vmul.f32 %v7299_v34, %v3099_v4  ;;  %v15508_v34 = vld [vmem:[#allocation15_spill] sm:$0xff] }
 0x2ca   :  { %4662 = vst.msk [vmem:[%s14892_s10 + $0x94] sm:$0xf] %vm2775_vm3, %v4508_v59  ;;  %v2615_v13 = vmul.f32 %v2439_v29, %v12043_v8 }
 0x2cb   :  { %v4355_v4 = vpack.c.bf16 %v12069_v57, %v12069_v57 }
 0x2cc   :  { %v2679_v42 = vadd.f32 %v2615_v13, %v2551_v46  ;;  %4529 = vrot.lane.b32.xlu0 %v4353_v61, %s7355_s23  ;;  %v7300_v13 = vld [vmem:[%s14887_s3 + $0x108] sm:$0xff] }
 0x2cd   :  { %4055 = vrot.lane.b32.xlu1 %v3924_v52, %s7354_s15  ;;  %4053 = vrot.lane.b32.xlu2 %v3923_v18, %s7354_s15  ;;  %v2552_v28 = vmul.f32 %v7300_v13, %v10982_v48  ;;  %v4354_v13 = vpack.c.bf16 %v12025_v9, %v12025_v9 }
 0x2ce   :  { %v2743_v40 = vpack.c.bf16 %v2679_v42, %v2679_v42 }
 0x2cf   :  { %v3674_v18 = vpop.permute.xlu1 %3673 }
 0x2d0   :  { %2808 = vst.msk [vmem:[%s14891_s8 + $0x80] sm:$0xf] %vm2775_vm3, %v2743_v40  ;;  %v2045_v21 = vpop.f32.mrf.mxu1  ;;  %v4506_v52 = vpop.permute.xlu0 %4505 }
 0x2d1   :  { %v12080_v59 = vpop.permute.xlu2 %3677  ;;  %v2441_v29 = vpop.f32.mrf.mxu2  ;;  %v12086_v46 = vadd.f32 %v2045_v21, %v8509_v43  ;;  %4661 = vst.msk [vmem:[%s14892_s10 + $0x90] sm:$0xf] %vm2775_vm3, %v4506_v52  ;;  %v15507_v21 = vld [vmem:[#allocation43_spill] sm:$0xff] }
 0x2d2   :  { %v2616_v61 = vmul.f32 %v2441_v29, %v12078_v3  ;;  %v3104_v42 = vpop.f32.mrf.mxu3  ;;  %v3477_v37 = vmul.f32 %v15508_v34, %v15507_v21  ;;  %v7302_v21 = vld [vmem:[%s14890_s2 + $0x90] sm:$0xff] }
 0x2d3   :  { %v2231_v29 = vpack.c.bf16 %v12086_v46, %v12069_v57  ;;  %v3555_v34 = vmul.f32 %v7302_v21, %v3102_v5 }
 0x2d4   :  { %v2680_v40 = vadd.f32 %v2616_v61, %v2552_v28  ;;  %3699 = vrot.lane.b32.xlu0 %v3554_v14, %s7353_s21  ;;  %v3861_v53 = vadd.f32 %v3674_v18, %v3477_v37  ;;  %v12112_v28 = vld [vmem:[%s14890_s2 + $0x110] sm:$0xff] }
 0x2d5   :  { %4533 = vrot.lane.b32.xlu1 %v4355_v4, %s7355_s23  ;;  %4531 = vrot.lane.b32.xlu2 %v4354_v13, %s7355_s23  ;;  %v7301_v18 = vld [vmem:[%s14887_s3 + $0x110] sm:$0xff] }
 0x2d6   :  { %v2744_v48 = vpack.c.bf16 %v2680_v40, %v2680_v40  ;;  %6547 = vmatmul.msk.bf16.gmra.mxu2 %vm162_vm0, %v2231_v29  ;;  %v3925_v52 = vpack.c.bf16 %v3861_v53, %v3861_v53  ;;  %v2553_v4 = vmul.f32 %v7301_v18, %v11054_v24  ;;  %v15510_v18 = vld [vmem:[#allocation26_spill] sm:$0xff] }
 0x2d7   :  { %v3478_v24 = vmul.f32 %v15510_v18, %v15509_v47 }
 0x2d8   :  { %2809 = vst.msk [vmem:[%s14891_s8 + $0x84] sm:$0xf] %vm2775_vm3, %v2744_v48  ;;  %v2048_v37 = vpop.f32.mrf.mxu1  ;;  %v3676_v53 = vpop.permute.xlu0 %3675 }
 0x2d9   :  { %v4514_v14 = vpop.permute.xlu2 %4513  ;;  %v2444_v61 = vpop.f32.mrf.mxu2  ;;  %6580 = vmatmul.msk.bf16.gmra.mxu3 %vm162_vm0, %v12014_v20  ;;  %v12140_v20 = vld [vmem:[%s14890_s2 + $0x118] sm:$0xff]  ;;  %v3862_v5 = vadd.f32 %v3676_v53, %v3478_v24 }
 0x2da   :  { %4665 = vst.msk [vmem:[%s14892_s10 + $0xa0] sm:$0xf] %vm2775_vm3, %v4514_v14  ;;  %v2617_v40 = vmul.f32 %v2444_v61, %v12112_v28  ;;  %v3107_v48 = vpop.f32.mrf.mxu3 }
 0x2db   :  { %v3926_v18 = vpack.c.bf16 %v3862_v5, %v3862_v5 }
 0x2dc   :  { %v2681_v13 = vadd.f32 %v2617_v40, %v2553_v4  ;;  %4057 = vrot.lane.b32.xlu0 %v3925_v52, %s7354_s15  ;;  %v7303_v52 = vld [vmem:[%s14887_s3 + $0x118] sm:$0xff]  ;;  %v12155_v40 = vadd.f32 %v2048_v37, %v8509_v43 }
 0x2dd   :  { %2926 = vrot.lane.b32.xlu1 %v2231_v29, %s7354_s15  ;;  %3701 = vrot.lane.b32.xlu2 %v3555_v34, %s7353_s21  ;;  %v2554_v4 = vmul.f32 %v7303_v52, %v11144_v10  ;;  %v4356_v34 = vpack.c.bf16 %v12086_v46, %v12086_v46  ;;  %v15512_v52 = vld [vmem:[#allocation34_spill] sm:$0xff] }
 0x2de   :  { %v2745_v14 = vpack.c.bf16 %v2681_v13, %v2681_v13  ;;  %v7304_v13 = vld [vmem:[%s14890_s2 + $0x98] sm:$0xff]  ;;  %v4357_v55 = vpack.c.bf16 %v12155_v40, %v12155_v40 }
 0x2df   :  { %v3556_v53 = vmul.f32 %v7304_v13, %v3104_v42 }
 0x2e0   :  { %v4510_v61 = vpop.permute.xlu1 %4509  ;;  %2810 = vst.msk [vmem:[%s14891_s8 + $0x88] sm:$0xf] %vm2775_vm3, %v2745_v14  ;;  %v2050_v47 = vpop.f32.mrf.mxu1 }
 0x2e1   :  { %4663 = vst.msk [vmem:[%s14892_s10 + $0x98] sm:$0xf] %vm2775_vm3, %v4510_v61  ;;  %v2446_v29 = vpop.f32.mrf.mxu2  ;;  %v12158_v21 = vadd.f32 %v2050_v47, %v8509_v43  ;;  %v15511_v47 = vld [vmem:[#allocation56_spill] sm:$0xff]  ;;  %v12175_v13 = vpop.permute.xlu2 %3683 }
 0x2e2   :  { %v2618_v24 = vmul.f32 %v2446_v29, %v12140_v20  ;;  %v3109_v14 = vpop.f32.mrf.mxu3  ;;  %v3479_v10 = vmul.f32 %v15512_v52, %v15511_v47 }
 0x2e3   :  { %v2232_v37 = vpack.c.bf16 %v12158_v21, %v12155_v40 }
 0x2e4   :  { %v2682_v61 = vadd.f32 %v2618_v24, %v2554_v4  ;;  %4535 = vrot.lane.b32.xlu0 %v4356_v34, %s7355_s23  ;;  %v3863_v42 = vadd.f32 %v12080_v59, %v3479_v10  ;;  %v12180_v4 = vld [vmem:[%s14890_s2 + $0x120] sm:$0xff] }
 0x2e5   :  { %3703 = vrot.lane.b32.xlu1 %v3556_v53, %s7353_s21  ;;  %4059 = vrot.lane.b32.xlu2 %v3926_v18, %s7354_s15  ;;  %v7305_v34 = vld [vmem:[%s14890_s2 + $0xa0] sm:$0xff] }
 0x2e6   :  { %v2746_v29 = vpack.c.bf16 %v2682_v61, %v2682_v61  ;;  %6548 = vmatmul.msk.bf16.gmra.mxu2 %vm162_vm0, %v2232_v37  ;;  %v3557_v53 = vmul.f32 %v7305_v34, %v3107_v48  ;;  %v7306_v18 = vld [vmem:[%s14887_s3 + $0x120] sm:$0xff]  ;;  %v3927_v52 = vpack.c.bf16 %v3863_v42, %v3863_v42 }
 0x2e7   :  { %v2555_v61 = vmul.f32 %v7306_v18, %v11231_v41 }
 0x2e8   :  { %v2915_v5 = vpop.permute.xlu1 %2914  ;;  %2811 = vst.msk [vmem:[%s14891_s8 + $0x8c] sm:$0xf] %vm2775_vm3, %v2746_v29  ;;  %v2053_v10 = vpop.f32.mrf.mxu1 }
 0x2e9   :  { %v4512_v24 = vpop.permute.xlu0 %4511  ;;  %v2449_v59 = vpop.f32.mrf.mxu2  ;;  %6581 = vmatmul.msk.bf16.gmra.mxu3 %vm162_vm0, %v2915_v5  ;;  %v12209_v5 = vld [vmem:[%s14890_s2 + $0x128] sm:$0xff]  ;;  %v12216_v18 = vadd.f32 %v2053_v10, %v8509_v43 }
 0x2ea   :  { %4664 = vst.msk [vmem:[%s14892_s10 + $0x9c] sm:$0xf] %vm2775_vm3, %v4512_v24  ;;  %v2619_v47 = vmul.f32 %v2449_v59, %v12180_v4  ;;  %v7308_v10 = vld [vmem:[%s14890_s2 + $0xa8] sm:$0xff] }
 0x2eb   :  { %v3112_v29 = vpop.f32.mrf.mxu3  ;;  %v3558_v41 = vmul.f32 %v7308_v10, %v3109_v14  ;;  %v15516_v10 = vld [vmem:[#allocation39_spill] sm:$0xff] }
 0x2ec   :  { %v2683_v24 = vadd.f32 %v2619_v47, %v2555_v61  ;;  %3705 = vrot.lane.b32.xlu0 %v3557_v53, %s7353_s21  ;;  %v7307_v61 = vld [vmem:[%s14887_s3 + $0x128] sm:$0xff] }
 0x2ed   :  { %4061 = vrot.lane.b32.xlu1 %v3927_v52, %s7354_s15  ;;  %4537 = vrot.lane.b32.xlu2 %v4357_v55, %s7355_s23  ;;  %v2556_v47 = vmul.f32 %v7307_v61, %v11292_v22 }
 0x2ee   :  { %v2747_v48 = vpack.c.bf16 %v2683_v24, %v2683_v24 }
 0x2ef   :  { %v12204_v35 = vpop.permute.xlu2 %2918 }
 0x2f0   :  { %v3680_v34 = vpop.permute.xlu1 %3679  ;;  %2812 = vst.msk [vmem:[%s14891_s8 + $0x90] sm:$0xf] %vm2775_vm3, %v2747_v48  ;;  %v2055_v59 = vpop.f32.mrf.mxu1  ;;  %v4358_v48 = vpack.c.bf16 %v12158_v21, %v12158_v21 }
 0x2f1   :  { %v3682_v42 = vpop.permute.xlu0 %3681  ;;  %v2451_v53 = vpop.f32.mrf.mxu2  ;;  %v12219_v55 = vadd.f32 %v2055_v59, %v8509_v43  ;;  %v15513_v59 = vld [vmem:[#allocation58_spill] sm:$0xff] }
 0x2f2   :  { %v2620_v52 = vmul.f32 %v2451_v53, %v12209_v5  ;;  %v3480_v62 = vmul.f32 %v15514_v45, %v15513_v59  ;;  %v12244_v45 = vld [vmem:[%s14890_s2 + $0x130] sm:$0xff]  ;;  %v15517_v59 = vld [vmem:[#allocation73_spill] sm:$0xff] }
 0x2f3   :  { %v12226_v24 = vpop.f32.mrf.mxu3  ;;  %v2233_v61 = vpack.c.bf16 %v12219_v55, %v12216_v18 }
 0x2f4   :  { %v2684_v27 = vadd.f32 %v2620_v52, %v2556_v47  ;;  %2928 = vrot.lane.b32.xlu0 %v2232_v37, %s7354_s15  ;;  %v3864_v53 = vadd.f32 %v3680_v34, %v3480_v62  ;;  %v7309_v37 = vld [vmem:[%s14887_s3 + $0x130] sm:$0xff] }
 0x2f5   :  { %4539 = vrot.lane.b32.xlu1 %v4358_v48, %s7355_s23  ;;  %3707 = vrot.lane.b32.xlu2 %v3558_v41, %s7353_s21  ;;  %v15515_v48 = vld [vmem:[#allocation74_spill] sm:$0xff] }
 0x2f6   :  { %v2748_v22 = vpack.c.bf16 %v2684_v27, %v2684_v27  ;;  %6549 = vmatmul.msk.bf16.gmra.mxu2 %vm162_vm0, %v2233_v61  ;;  %v3928_v62 = vpack.c.bf16 %v3864_v53, %v3864_v53  ;;  %v15518_v53 = vld [vmem:[#allocation30_spill] sm:$0xff] }
 0x2f7   :  { %v4520_v32 = vpop.permute.xlu2 %4519  ;;  %v3481_v63 = vmul.f32 %v15518_v53, %v15517_v59 }
 0x2f8   :  { %v4516_v1 = vpop.permute.xlu1 %4515  ;;  %2813 = vst.msk [vmem:[%s14891_s8 + $0x94] sm:$0xf] %vm2775_vm3, %v2748_v22  ;;  %v2058_v27 = vpop.f32.mrf.mxu1  ;;  %v2557_v22 = vmul.f32 %v7309_v37, %v11384_v60  ;;  %v15527_v60 = vld [vmem:[#allocation45_spill] sm:$0xff] }
 0x2f9   :  { %v2917_v14 = vpop.permute.xlu0 %2916  ;;  %4666 = vst.msk [vmem:[%s14892_s10 + $0xa4] sm:$0xf] %vm2775_vm3, %v4516_v1  ;;  %v2454_v41 = vpop.f32.mrf.mxu2  ;;  %v3559_v1 = vmul.f32 %v3112_v29, %v11511_v23  ;;  %v12278_v23 = vld [vmem:[%s14890_s2 + $0x138] sm:$0xff]  ;;  %v3865_v29 = vadd.f32 %v3682_v42, %v3481_v63 }
 0x2fa   :  { %4668 = vst.msk [vmem:[%s14892_s10 + $0xac] sm:$0xf] %vm2775_vm3, %v4520_v32  ;;  %v2621_v34 = vmul.f32 %v2454_v41, %v12244_v45  ;;  %6582 = vmatmul.msk.bf16.gmra.mxu3 %vm162_vm0, %v2917_v14  ;;  %v3482_v32 = vmul.f32 %v15516_v10, %v15515_v48 }
 0x2fc   :  { %v12265_v47 = vpop.f32.mrf.mxu3  ;;  %v2685_v52 = vadd.f32 %v2621_v34, %v2557_v22  ;;  %4063 = vrot.lane.b32.xlu0 %v3928_v62, %s7354_s15  ;;  %v3866_v14 = vadd.f32 %v12175_v13, %v3482_v32  ;;  %v12291_v34 = vadd.f32 %v2058_v27, %v8509_v43  ;;  %v3929_v32 = vpack.c.bf16 %v3865_v29, %v3865_v29 }
 0x2fd   :  { %3709 = vrot.lane.b32.xlu1 %v3559_v1, %s7353_s21  ;;  %2930 = vrot.lane.b32.xlu2 %v2233_v61, %s7354_s15  ;;  %v7310_v61 = vld [vmem:[%s14887_s3 + $0x138] sm:$0xff] }
 0x2fe   :  { %v2749_v37 = vpack.c.bf16 %v2685_v52, %v2685_v52  ;;  %v2558_v13 = vmul.f32 %v7310_v61, %v11457_v39  ;;  %15519 = vst [vmem:[#allocation42_spill] sm:$0xff] %v12291_v34  ;;  %v4359_v52 = vpack.c.bf16 %v12216_v18, %v12216_v18  ;;  %v3930_v48 = vpack.c.bf16 %v3866_v14, %v3866_v14  ;;  %v12314_v14 = vld [vmem:[%s14890_s2 + $0x140] sm:$0xff] }
 0x2ff   :  { %v3560_v61 = vmul.f32 %v12226_v24, %v11581_v6  ;;  %v4360_v6 = vpack.c.bf16 %v12219_v55, %v12219_v55 }
 0x300   :  { %2814 = vst.msk [vmem:[%s14891_s8 + $0x98] sm:$0xf] %vm2775_vm3, %v2749_v37  ;;  %v12284_v41 = vpop.permute.xlu2 %3689  ;;  %v2060_v62 = vpop.f32.mrf.mxu1 }
 0x301   :  { %v2456_v22 = vpop.f32.mrf.mxu2  ;;  %v12294_v63 = vadd.f32 %v2060_v62, %v8509_v43  ;;  %v4518_v1 = vpop.permute.xlu0 %4517 }
 0x302   :  { %v2622_v42 = vmul.f32 %v2456_v22, %v12278_v23  ;;  %4667 = vst.msk [vmem:[%s14892_s10 + $0xa8] sm:$0xf] %vm2775_vm3, %v4518_v1  ;;  %v3686_v37 = vpop.permute.xlu1 %3685 }
 0x303   :  { %v2234_v59 = vpack.c.bf16 %v12294_v63, %v12291_v34 }
 0x304   :  { %v12303_v10 = vpop.f32.mrf.mxu3  ;;  %v2686_v27 = vadd.f32 %v2622_v42, %v2558_v13  ;;  %4541 = vrot.lane.b32.xlu0 %v4359_v52, %s7355_s23  ;;  %v7311_v13 = vld [vmem:[%s14887_s3 + $0x140] sm:$0xff] }
 0x305   :  { %4067 = vrot.lane.b32.xlu1 %v3930_v48, %s7354_s15  ;;  %4065 = vrot.lane.b32.xlu2 %v3929_v32, %s7354_s15  ;;  %v2559_v42 = vmul.f32 %v7311_v13, %v11534_v54  ;;  %v4361_v48 = vpack.c.bf16 %v12291_v34, %v12291_v34  ;;  %v15520_v32 = vld [vmem:[#allocation86_spill] sm:$0xff]  ;;  %v12345_v13 = vld [vmem:[%s14890_s2 + $0x148] sm:$0xff]  ;;  %v15526_v54 = vld [vmem:[#allocation24_spill] sm:$0xff] }
 0x306   :  { %v2750_v53 = vpack.c.bf16 %v2686_v27, %v2686_v27  ;;  %6550 = vmatmul.msk.bf16.gmra.mxu2 %vm162_vm0, %v2234_v59  ;;  %v15521_v27 = vld [vmem:[#allocation25_spill] sm:$0xff]  ;;  %v3485_v39 = vmul.f32 %v15527_v60, %v15526_v54 }
 0x308   :  { %2815 = vst.msk [vmem:[%s14891_s8 + $0x9c] sm:$0xf] %vm2775_vm3, %v2750_v53  ;;  %v4526_v29 = vpop.permute.xlu2 %4525  ;;  %v2063_v62 = vpop.f32.mrf.mxu1  ;;  %v3483_v53 = vmul.f32 %v15521_v27, %v15520_v32 }
 0x309   :  { %4671 = vst.msk [vmem:[%s14892_s10 + $0xb8] sm:$0xf] %vm2775_vm3, %v4526_v29  ;;  %v2459_v22 = vpop.f32.mrf.mxu2  ;;  %v12360_v27 = vadd.f32 %v2063_v62, %v8509_v43  ;;  %v15524_v62 = vld [vmem:[#allocation87_spill] sm:$0xff] }
 0x30a   :  { %v2623_v1 = vmul.f32 %v2459_v22, %v12314_v14  ;;  %6583 = vmatmul.msk.bf16.gmra.mxu3 %vm162_vm0, %v12204_v35  ;;  %v3867_v24 = vadd.f32 %v3686_v37, %v3483_v53 }
 0x30b   :  { %15522 = vst [vmem:[#allocation57_spill] sm:$0xff] %v12360_v27 }
 0x30c   :  { %v3122_v52 = vpop.f32.mrf.mxu3  ;;  %v2687_v29 = vadd.f32 %v2623_v1, %v2559_v42  ;;  %3711 = vrot.lane.b32.xlu0 %v3560_v61, %s7353_s21  ;;  %v3688_v61 = vpop.permute.xlu0 %3687  ;;  %v7312_v1 = vld [vmem:[%s14887_s3 + $0x148] sm:$0xff]  ;;  %v3931_v32 = vpack.c.bf16 %v3867_v24, %v3867_v24  ;;  %v15525_v24 = vld [vmem:[#allocation37_spill] sm:$0xff] }
 0x30d   :  { %4545 = vrot.lane.b32.xlu1 %v4361_v48, %s7355_s23  ;;  %4543 = vrot.lane.b32.xlu2 %v4360_v6, %s7355_s23  ;;  %v2560_v48 = vmul.f32 %v7312_v1, %v11615_v31  ;;  %v3563_v60 = vmul.f32 %v3122_v52, %v11788_v7 }
 0x30e   :  { %v2751_v22 = vpack.c.bf16 %v2687_v29, %v2687_v29 }
 0x30f   :  { %v4522_v35 = vpop.permute.xlu1 %4521 }
 0x310   :  { %2816 = vst.msk [vmem:[%s14891_s8 + $0xa0] sm:$0xf] %vm2775_vm3, %v2751_v22  ;;  %v2065_v37 = vpop.f32.mrf.mxu1  ;;  %v3561_v22 = vmul.f32 %v12265_v47, %v11652_v36  ;;  %v12384_v36 = vld [vmem:[%s14890_s2 + $0x150] sm:$0xff] }
 0x311   :  { %4669 = vst.msk [vmem:[%s14892_s10 + $0xb0] sm:$0xf] %vm2775_vm3, %v4522_v35  ;;  %v2461_v42 = vpop.f32.mrf.mxu2  ;;  %v12363_v53 = vadd.f32 %v2065_v37, %v8509_v43  ;;  %v3484_v37 = vmul.f32 %v15525_v24, %v15524_v62  ;;  %v3562_v62 = vmul.f32 %v12303_v10, %v11737_v26  ;;  %v12417_v26 = vld [vmem:[%s14890_s2 + $0x158] sm:$0xff] }
 0x312   :  { %v2624_v29 = vmul.f32 %v2461_v42, %v12345_v13  ;;  %15528 = vst [vmem:[#allocation9_spill] sm:$0xff] %v12417_v26 }
 0x313   :  { %15523 = vst [vmem:[#allocation126_spill] sm:$0xff] %v12363_v53  ;;  %v12373_v1 = vpack.c.bf16 %v12363_v53, %v12360_v27  ;;  %v3868_v47 = vadd.f32 %v3688_v61, %v3484_v37 }
 0x314   :  { %v12366_v6 = vpop.f32.mrf.mxu3  ;;  %v2688_v35 = vadd.f32 %v2624_v29, %v2560_v48  ;;  %4069 = vrot.lane.b32.xlu0 %v3931_v32, %s7354_s15 }
 0x315   :  { %2932 = vrot.lane.b32.xlu1 %v2234_v59, %s7354_s15  ;;  %3713 = vrot.lane.b32.xlu2 %v3561_v22, %s7353_s21  ;;  %v12390_v59 = vpop.permute.xlu2 %3695  ;;  %v7313_v22 = vld [vmem:[%s14887_s3 + $0x150] sm:$0xff]  ;;  %v3932_v37 = vpack.c.bf16 %v3868_v47, %v3868_v47 }
 0x316   :  { %v2752_v31 = vpack.c.bf16 %v2688_v35, %v2688_v35  ;;  %6551 = vmatmul.msk.bf16.gmra.mxu2 %vm162_vm0, %v12373_v1  ;;  %v2561_v61 = vmul.f32 %v7313_v22, %v11699_v2 }
 0x317   :  { %v2921_v42 = vpop.permute.xlu1 %2920  ;;  %v4524_v48 = vpop.permute.xlu0 %4523 }
 0x318   :  { %2817 = vst.msk [vmem:[%s14891_s8 + $0xa4] sm:$0xf] %vm2775_vm3, %v2752_v31  ;;  %v2068_v32 = vpop.f32.mrf.mxu1  ;;  %v4362_v31 = vpack.c.bf16 %v12294_v63, %v12294_v63 }
 0x319   :  { %4670 = vst.msk [vmem:[%s14892_s10 + $0xb4] sm:$0xf] %vm2775_vm3, %v4524_v48  ;;  %v2464_v29 = vpop.f32.mrf.mxu2 }
 0x31a   :  { %v2625_v35 = vmul.f32 %v2464_v29, %v12384_v36  ;;  %6584 = vmatmul.msk.bf16.gmra.mxu3 %vm162_vm0, %v2921_v42  ;;  %v3869_v42 = vadd.f32 %v12284_v41, %v3485_v39  ;;  %v7314_v41 = vld [vmem:[%s14887_s3 + $0x158] sm:$0xff] }
 0x31c   :  { %v12406_v24 = vpop.f32.mrf.mxu3  ;;  %v2689_v48 = vadd.f32 %v2625_v35, %v2561_v61  ;;  %4547 = vrot.lane.b32.xlu0 %v4362_v31, %s7355_s23  ;;  %v12427_v61 = vadd.f32 %v2068_v32, %v8509_v43  ;;  %v2562_v35 = vmul.f32 %v7314_v41, %v11749_v11  ;;  %v15532_v11 = vld [vmem:[#allocation29_spill] sm:$0xff] }
 0x31d   :  { %3715 = vrot.lane.b32.xlu1 %v3562_v62, %s7353_s21  ;;  %4071 = vrot.lane.b32.xlu2 %v3932_v37, %s7354_s15  ;;  %v3933_v37 = vpack.c.bf16 %v3869_v42, %v3869_v42  ;;  %v12452_v42 = vld [vmem:[%s14890_s2 + $0x160] sm:$0xff] }
 0x31e   :  { %v2753_v29 = vpack.c.bf16 %v2689_v48, %v2689_v48  ;;  %15529 = vst [vmem:[#allocation85_spill] sm:$0xff] %v12427_v61  ;;  %v4363_v48 = vpack.c.bf16 %v12360_v27, %v12360_v27 }
 0x31f   :  { %v3692_v22 = vpop.permute.xlu1 %3691  ;;  %v12423_v10 = vpop.permute.xlu2 %2924 }
 0x320   :  { %2818 = vst.msk [vmem:[%s14891_s8 + $0xa8] sm:$0xf] %vm2775_vm3, %v2753_v29  ;;  %v2070_v54 = vpop.f32.mrf.mxu1  ;;  %v12437_v62 = vpop.permute.xlu0 %3693 }
 0x321   :  { %v2466_v47 = vpop.f32.mrf.mxu2  ;;  %v12430_v39 = vadd.f32 %v2070_v54, %v8509_v43 }
 0x322   :  { %v2626_v31 = vmul.f32 %v2466_v47, %v12417_v26 }
 0x323   :  { %15530 = vst [vmem:[#allocation130_spill] sm:$0xff] %v12430_v39  ;;  %v2236_v32 = vpack.c.bf16 %v12430_v39, %v12427_v61 }
 0x324   :  { %v12439_v7 = vpop.f32.mrf.mxu3  ;;  %v2690_v52 = vadd.f32 %v2626_v31, %v2562_v35  ;;  %3717 = vrot.lane.b32.xlu0 %v3563_v60, %s7353_s21  ;;  %v7315_v35 = vld [vmem:[%s14887_s3 + $0x160] sm:$0xff] }
 0x325   :  { %4073 = vrot.lane.b32.xlu1 %v3933_v37, %s7354_s15  ;;  %4549 = vrot.lane.b32.xlu2 %v4363_v48, %s7355_s23  ;;  %v2563_v31 = vmul.f32 %v7315_v35, %v11816_v16  ;;  %v12487_v16 = vld [vmem:[%s14890_s2 + $0x168] sm:$0xff] }
 0x326   :  { %v2754_v29 = vpack.c.bf16 %v2690_v52, %v2690_v52  ;;  %6552 = vmatmul.msk.bf16.gmra.mxu2 %vm162_vm0, %v2236_v32 }
 0x327   :  { %v4050_v54 = vpop.permute.xlu1 %4049  ;;  %v4054_v60 = vpop.permute.xlu2 %4053 }
 0x328   :  { %2819 = vst.msk [vmem:[%s14891_s8 + $0xac] sm:$0xf] %vm2775_vm3, %v2754_v29  ;;  %v2073_v47 = vpop.f32.mrf.mxu1  ;;  %v2923_v52 = vpop.permute.xlu0 %2922  ;;  %v4364_v29 = vpack.c.bf16 %v12363_v53, %v12363_v53 }
 0x329   :  { %4241 = vst.msk [vmem:[%s14894_s9] sm:$0xf] %vm2775_vm3, %v4050_v54  ;;  %v2469_v41 = vpop.f32.mrf.mxu2  ;;  %v3564_v54 = vmul.f32 %v12366_v6, %v11847_v12  ;;  %v7316_v6 = vld [vmem:[%s14887_s3 + $0x168] sm:$0xff] }
 0x32a   :  { %4243 = vst.msk [vmem:[%s14894_s9 + $0x8] sm:$0xf] %vm2775_vm3, %v4054_v60  ;;  %v2627_v37 = vmul.f32 %v2469_v41, %v12452_v42  ;;  %6585 = vmatmul.msk.bf16.gmra.mxu3 %vm162_vm0, %v2923_v52  ;;  %v15531_v60 = vld [vmem:[#allocation97_spill] sm:$0xff] }
 0x32b   :  { %v3486_v2 = vmul.f32 %v15532_v11, %v15531_v60 }
 0x32c   :  { %v12472_v48 = vpop.f32.mrf.mxu3  ;;  %v2691_v26 = vadd.f32 %v2627_v37, %v2563_v31  ;;  %2934 = vrot.lane.b32.xlu0 %v12373_v1, %s7354_s15  ;;  %v2564_v1 = vmul.f32 %v7316_v6, %v11875_v38 }
 0x32d   :  { %4551 = vrot.lane.b32.xlu1 %v4364_v29, %s7355_s23  ;;  %v3870_v41 = vadd.f32 %v3692_v22, %v3486_v2  ;;  %3719 = vrot.lane.b32.xlu2 %v3564_v54, %s7353_s21  ;;  %v3565_v29 = vmul.f32 %v12406_v24, %v11908_v44 }
 0x32e   :  { %v2755_v35 = vpack.c.bf16 %v2691_v26, %v2691_v26  ;;  %v12502_v26 = vadd.f32 %v2073_v47, %v8509_v43 }
 0x32f   :  { %v4528_v52 = vpop.permute.xlu1 %4527  ;;  %v4532_v11 = vpop.permute.xlu2 %4531  ;;  %v3934_v22 = vpack.c.bf16 %v3870_v41, %v3870_v41  ;;  %v15534_v41 = vld [vmem:[#allocation35_spill] sm:$0xff] }
 0x330   :  { %2820 = vst.msk [vmem:[%s14891_s8 + $0xb0] sm:$0xf] %vm2775_vm3, %v2755_v35  ;;  %v2075_v2 = vpop.f32.mrf.mxu1  ;;  %v15535_v35 = vld [vmem:[#allocation51_spill] sm:$0xff] }
 0x331   :  { %4672 = vst.msk [vmem:[%s14892_s10 + $0xbc] sm:$0xf] %vm2775_vm3, %v4528_v52  ;;  %v2471_v12 = vpop.f32.mrf.mxu2  ;;  %v12509_v31 = vadd.f32 %v2075_v2, %v8509_v43  ;;  %v3488_v52 = vmul.f32 %v15535_v35, %v15534_v41  ;;  %v15536_v43 = vld [vmem:[#allocation102_spill] sm:$0xff]  ;;  %v4365_v41 = vpack.c.bf16 %v12427_v61, %v12427_v61 }
 0x332   :  { %15533 = vst [vmem:[#allocation64_spill] sm:$0xff] %v12502_v26  ;;  %v2628_v37 = vmul.f32 %v2471_v12, %v12487_v16 }
 0x333   :  { %4674 = vst.msk [vmem:[%s14892_s10 + $0xc4] sm:$0xf] %vm2775_vm3, %v4532_v11  ;;  %v12519_v47 = vpack.c.bf16 %v12509_v31, %v12502_v26  ;;  %v15537_v11 = vld [vmem:[#allocation41_spill] sm:$0xff]  ;;  %v3872_v24 = vadd.f32 %v12390_v59, %v3488_v52 }
 0x334   :  { %v12514_v54 = vpop.f32.mrf.mxu3  ;;  %v2692_v60 = vadd.f32 %v2628_v37, %v2564_v1  ;;  %4075 = vrot.lane.b32.xlu0 %v3934_v22, %s7354_s15  ;;  %v3487_v2 = vmul.f32 %v15537_v11, %v15536_v43  ;;  %v12537_v1 = vld [vmem:[%s14890_s2 + $0x170] sm:$0xff] }
 0x335   :  { %3721 = vrot.lane.b32.xlu1 %v3565_v29, %s7353_s21  ;;  %2936 = vrot.lane.b32.xlu2 %v2236_v32, %s7354_s15  ;;  %v7317_v37 = vld [vmem:[%s14887_s3 + $0x170] sm:$0xff] }
 0x336   :  { %v2756_v12 = vpack.c.bf16 %v2692_v60, %v2692_v60  ;;  %6553 = vmatmul.msk.bf16.gmra.mxu2 %vm162_vm0, %v12519_v47  ;;  %v4052_v44 = vpop.permute.xlu0 %4051  ;;  %v3871_v22 = vadd.f32 %v12437_v62, %v3487_v2  ;;  %v2565_v29 = vmul.f32 %v7317_v37, %v11921_v56  ;;  %v3936_v62 = vpack.c.bf16 %v3872_v24, %v3872_v24 }
 0x337   :  { %4242 = vst.msk [vmem:[%s14894_s9 + $0x4] sm:$0xf] %vm2775_vm3, %v4052_v44  ;;  %v3698_v6 = vpop.permute.xlu1 %3697  ;;  %v12544_v32 = vpop.permute.xlu2 %3701 }
 0x338   :  { %2821 = vst.msk [vmem:[%s14891_s8 + $0xb4] sm:$0xf] %vm2775_vm3, %v2756_v12  ;;  %v3935_v52 = vpack.c.bf16 %v3871_v22, %v3871_v22  ;;  %v3566_v22 = vmul.f32 %v12439_v7, %v11953_v51 }
 0x339   :  { %v2474_v59 = vpop.f32.mrf.mxu2 }
 0x33a   :  { %v2629_v60 = vmul.f32 %v2474_v59, %v12537_v1  ;;  %6586 = vmatmul.msk.bf16.gmra.mxu3 %vm162_vm0, %v12423_v10  ;;  %v2125_v10 = vld [vmem:[%s14890_s2 + $0x178] sm:$0xff] }
 0x33b   :  { %v7318_v59 = vld [vmem:[%s14887_s3 + $0x178] sm:$0xff] }
 0x33c   :  { %v12555_v35 = vpop.f32.mrf.mxu3  ;;  %v2693_v43 = vadd.f32 %v2629_v60, %v2565_v29  ;;  %4553 = vrot.lane.b32.xlu0 %v4365_v41, %s7355_s23  ;;  %v2566_v37 = vmul.f32 %v7318_v59, %v11970_v33  ;;  %v4367_v41 = vpack.c.bf16 %v12502_v26, %v12502_v26  ;;  %v7319_v59 = vld [vmem:[%s14887_s3 + $0x180] sm:$0xff] }
 0x33d   :  { %4079 = vrot.lane.b32.xlu1 %v3936_v62, %s7354_s15  ;;  %4077 = vrot.lane.b32.xlu2 %v3935_v52, %s7354_s15  ;;  %v15538_v62 = vld [vmem:[#allocation109_spill] sm:$0xff]  ;;  %v15539_v52 = vld [vmem:[#allocation36_spill] sm:$0xff] }
 0x33e   :  { %v2757_v11 = vpack.c.bf16 %v2693_v43, %v2693_v43  ;;  %v4530_v2 = vpop.permute.xlu0 %4529  ;;  %v3489_v51 = vmul.f32 %v15539_v52, %v15538_v62  ;;  %v4366_v43 = vpack.c.bf16 %v12430_v39, %v12430_v39 }
 0x33f   :  { %4673 = vst.msk [vmem:[%s14892_s10 + $0xc0] sm:$0xf] %vm2775_vm3, %v4530_v2  ;;  %v4056_v12 = vpop.permute.xlu1 %4055  ;;  %v4060_v44 = vpop.permute.xlu2 %4059 }
 0x340   :  { %2822 = vst.msk [vmem:[%s14891_s8 + $0xb8] sm:$0xf] %vm2775_vm3, %v2757_v11  ;;  %v3873_v11 = vadd.f32 %v3698_v6, %v3489_v51 }
 0x341   :  { %4244 = vst.msk [vmem:[%s14894_s9 + $0xc] sm:$0xf] %vm2775_vm3, %v4056_v12  ;;  %v2476_v24 = vpop.f32.mrf.mxu2 }
 0x342   :  { %4246 = vst.msk [vmem:[%s14894_s9 + $0x14] sm:$0xf] %vm2775_vm3, %v4060_v44  ;;  %v2630_v29 = vmul.f32 %v2476_v24, %v2125_v10  ;;  %v2126_v44 = vld [vmem:[%s14890_s2 + $0x180] sm:$0xff] }
 0x344   :  { %v12585_v60 = vpop.f32.mrf.mxu3  ;;  %v2694_v7 = vadd.f32 %v2630_v29, %v2566_v37  ;;  %3723 = vrot.lane.b32.xlu0 %v3566_v22, %s7353_s21  ;;  %v3937_v22 = vpack.c.bf16 %v3873_v11, %v3873_v11  ;;  %v2567_v37 = vmul.f32 %v7319_v59, %v12022_v17  ;;  %v7320_v11 = vld [vmem:[%s14887_s3 + $0x188] sm:$0xff] }
 0x345   :  { %4557 = vrot.lane.b32.xlu1 %v4367_v41, %s7355_s23  ;;  %4555 = vrot.lane.b32.xlu2 %v4366_v43, %s7355_s23  ;;  %v3567_v41 = vmul.f32 %v12472_v48, %v11983_v25  ;;  %v2127_v25 = vld [vmem:[%s14890_s2 + $0x188] sm:$0xff] }
 0x346   :  { %v2758_v2 = vpack.c.bf16 %v2694_v7, %v2694_v7  ;;  %v3700_v12 = vpop.permute.xlu0 %3699 }
 0x347   :  { %v4534_v10 = vpop.permute.xlu1 %4533  ;;  %v4538_v24 = vpop.permute.xlu2 %4537 }
 0x348   :  { %2823 = vst.msk [vmem:[%s14891_s8 + $0xbc] sm:$0xf] %vm2775_vm3, %v2758_v2  ;;  %v2568_v2 = vmul.f32 %v7320_v11, %v12025_v9 }
 0x349   :  { %4675 = vst.msk [vmem:[%s14892_s10 + $0xc8] sm:$0xf] %vm2775_vm3, %v4534_v10  ;;  %v2479_v6 = vpop.f32.mrf.mxu2 }
 0x34a   :  { %4677 = vst.msk [vmem:[%s14892_s10 + $0xd0] sm:$0xf] %vm2775_vm3, %v4538_v24  ;;  %v2631_v29 = vmul.f32 %v2479_v6, %v2126_v44  ;;  %v4368_v44 = vpack.c.bf16 %v12509_v31, %v12509_v31  ;;  %v3568_v24 = vmul.f32 %v12514_v54, %v12008_v0  ;;  %v15540_v6 = vld [vmem:[#allocation66_spill] sm:$0xff]  ;;  %v2128_v54 = vld [vmem:[%s14890_s2 + $0x190] sm:$0xff] }
 0x34c   :  { %v2695_v62 = vadd.f32 %v2631_v29, %v2567_v37  ;;  %4081 = vrot.lane.b32.xlu0 %v3937_v22, %s7354_s15  ;;  %v12618_v52 = vpop.f32.mrf.mxu3  ;;  %v15541_v22 = vld [vmem:[#allocation94_spill] sm:$0xff] }
 0x34d   :  { %2938 = vrot.lane.b32.xlu1 %v12519_v47, %s7354_s15  ;;  %3725 = vrot.lane.b32.xlu2 %v3567_v41, %s7353_s21  ;;  %v12647_v59 = vadd.f32 %v15541_v22, %v15540_v6  ;;  %v15542_v41 = vld [vmem:[#allocation47_spill] sm:$0xff] }
 0x34e   :  { %v2759_v51 = vpack.c.bf16 %v2695_v62, %v2695_v62  ;;  %v4058_v7 = vpop.permute.xlu0 %4057  ;;  %v3490_v62 = vmul.f32 %v15542_v41, %v15413_v50  ;;  %v15545_v41 = vld [vmem:[#allocation59_spill] sm:$0xff] }
 0x34f   :  { %4245 = vst.msk [vmem:[%s14894_s9 + $0x10] sm:$0xf] %vm2775_vm3, %v4058_v7  ;;  %v2927_v43 = vpop.permute.xlu1 %2926  ;;  %v12634_v48 = vpop.permute.xlu2 %3707 }
 0x350   :  { %2824 = vst.msk [vmem:[%s14891_s8 + $0xc0] sm:$0xf] %vm2775_vm3, %v2759_v51  ;;  %6587 = vmatmul.msk.bf16.gmra.mxu3 %vm162_vm0, %v2927_v43  ;;  %v3874_v43 = vadd.f32 %v3700_v12, %v3490_v62  ;;  %v15544_v12 = vld [vmem:[#allocation142_spill] sm:$0xff]  ;;  %v3491_v62 = vmul.f32 %v15545_v41, %v15420_v49  ;;  %v15546_v41 = vld [vmem:[#allocation40_spill] sm:$0xff] }
 0x351   :  { %v2481_v47 = vpop.f32.mrf.mxu2 }
 0x352   :  { %v2632_v10 = vmul.f32 %v2481_v47, %v2127_v25  ;;  %v15543_v47 = vld [vmem:[#allocation90_spill] sm:$0xff]  ;;  %v3938_v22 = vpack.c.bf16 %v3874_v43, %v3874_v43  ;;  %v2129_v43 = vld [vmem:[%s14890_s2 + $0x198] sm:$0xff] }
 0x353   :  { %v12672_v11 = vadd.f32 %v15543_v47, %v15540_v6 }
 0x354   :  { %v2696_v37 = vadd.f32 %v2632_v10, %v2568_v2  ;;  %4559 = vrot.lane.b32.xlu0 %v4368_v44, %s7355_s23  ;;  %v12650_v29 = vpop.f32.mrf.mxu3  ;;  %v7321_v2 = vld [vmem:[%s14887_s3 + $0x190] sm:$0xff] }
 0x355   :  { %3727 = vrot.lane.b32.xlu1 %v3568_v24, %s7353_s21  ;;  %6075 = vrot.lane.b32.xlu2 %v12647_v59, %s7355_s23  ;;  %v2569_v10 = vmul.f32 %v7321_v2, %v12069_v57  ;;  %v12680_v24 = vadd.f32 %v15544_v12, %v15540_v6 }
 0x356   :  { %v2760_v51 = vpack.c.bf16 %v2696_v37, %v2696_v37  ;;  %v4536_v7 = vpop.permute.xlu0 %4535 }
 0x357   :  { %4676 = vst.msk [vmem:[%s14892_s10 + $0xcc] sm:$0xf] %vm2775_vm3, %v4536_v7  ;;  %v3704_v0 = vpop.permute.xlu1 %3703  ;;  %v12668_v50 = vpop.permute.xlu2 %2930 }
 0x358   :  { %2825 = vst.msk [vmem:[%s14891_s8 + $0xc4] sm:$0xf] %vm2775_vm3, %v2760_v51 }
 0x359   :  { %v2484_v25 = vpop.f32.mrf.mxu2 }
 0x35a   :  { %v2633_v44 = vmul.f32 %v2484_v25, %v2128_v54  ;;  %v3875_v25 = vadd.f32 %v12544_v32, %v3491_v62  ;;  %v3569_v32 = vmul.f32 %v12555_v35, %v12043_v8  ;;  %v3492_v62 = vmul.f32 %v15546_v41, %v15428_v30  ;;  %v15548_v41 = vld [vmem:[#allocation54_spill] sm:$0xff] }
 0x35c   :  { %v2697_v37 = vadd.f32 %v2633_v44, %v2569_v10  ;;  %6073 = vrot.lane.b32.xlu0 %v12672_v11, %s7355_s23  ;;  %v12686_v51 = vpop.f32.mrf.mxu3  ;;  %v7322_v10 = vld [vmem:[%s14887_s3 + $0x198] sm:$0xff] }
 0x35d   :  { %6077 = vrot.lane.b32.xlu1 %v12680_v24, %s7355_s23  ;;  %4083 = vrot.lane.b32.xlu2 %v3938_v22, %s7354_s15  ;;  %v2570_v44 = vmul.f32 %v7322_v10, %v12086_v46  ;;  %v3939_v22 = vpack.c.bf16 %v3875_v25, %v3875_v25  ;;  %v7323_v25 = vld [vmem:[%s14887_s3 + $0x1a0] sm:$0xff]  ;;  %v3571_v10 = vmul.f32 %v12618_v52, %v12112_v28  ;;  %v2131_v52 = vld [vmem:[%s14890_s2 + $0x1a8] sm:$0xff] }
 0x35e   :  { %v2761_v7 = vpack.c.bf16 %v2697_v37, %v2697_v37  ;;  %v3706_v54 = vpop.permute.xlu0 %3705  ;;  %v3570_v37 = vmul.f32 %v12585_v60, %v12078_v3  ;;  %v2130_v3 = vld [vmem:[%s14890_s2 + $0x1a0] sm:$0xff] }
 0x35f   :  { %v4062_v47 = vpop.permute.xlu1 %4061  ;;  %v4066_v49 = vpop.permute.xlu2 %4065 }
 0x360   :  { %2826 = vst.msk [vmem:[%s14891_s8 + $0xc8] sm:$0xf] %vm2775_vm3, %v2761_v7  ;;  %v3876_v7 = vadd.f32 %v3704_v0, %v3492_v62  ;;  %v3493_v62 = vmul.f32 %v15548_v41, %v15440_v15 }
 0x361   :  { %4247 = vst.msk [vmem:[%s14894_s9 + $0x18] sm:$0xf] %vm2775_vm3, %v4062_v47  ;;  %v2486_v2 = vpop.f32.mrf.mxu2 }
 0x362   :  { %4249 = vst.msk [vmem:[%s14894_s9 + $0x20] sm:$0xf] %vm2775_vm3, %v4066_v49  ;;  %v2634_v12 = vmul.f32 %v2486_v2, %v2129_v43  ;;  %v3940_v0 = vpack.c.bf16 %v3876_v7, %v3876_v7  ;;  %v2571_v2 = vmul.f32 %v7323_v25, %v12155_v40 }
 0x364   :  { %v2698_v8 = vadd.f32 %v2634_v12, %v2570_v44  ;;  %3729 = vrot.lane.b32.xlu0 %v3569_v32, %s7353_s21  ;;  %v12718_v35 = vpop.f32.mrf.mxu3  ;;  %v15547_v44 = vld [vmem:[#allocation2_spill] sm:$0xff] }
 0x365   :  { %4085 = vrot.lane.b32.xlu1 %v3939_v22, %s7354_s15  ;;  %3731 = vrot.lane.b32.xlu2 %v3570_v37, %s7353_s21  ;;  %v12746_v12 = vadd.f32 %v15547_v44, %v15540_v6 }
 0x366   :  { %v2762_v47 = vpack.c.bf16 %v2698_v8, %v2698_v8  ;;  %v2929_v49 = vpop.permute.xlu0 %2928 }
 0x367   :  { %v4540_v43 = vpop.permute.xlu1 %4539  ;;  %6588 = vmatmul.msk.bf16.gmra.mxu3 %vm162_vm0, %v2929_v49  ;;  %v4544_v30 = vpop.permute.xlu2 %4543 }
 0x368   :  { %2827 = vst.msk [vmem:[%s14891_s8 + $0xcc] sm:$0xf] %vm2775_vm3, %v2762_v47  ;;  %v3877_v47 = vadd.f32 %v3706_v54, %v3493_v62  ;;  %v15550_v54 = vld [vmem:[#allocation121_spill] sm:$0xff] }
 0x369   :  { %4678 = vst.msk [vmem:[%s14892_s10 + $0xd4] sm:$0xf] %vm2775_vm3, %v4540_v43  ;;  %v2489_v60 = vpop.f32.mrf.mxu2  ;;  %v15549_v43 = vld [vmem:[#allocation146_spill] sm:$0xff]  ;;  %v12779_v25 = vadd.f32 %v15550_v54, %v15540_v6 }
 0x36a   :  { %4680 = vst.msk [vmem:[%s14892_s10 + $0xdc] sm:$0xf] %vm2775_vm3, %v4544_v30  ;;  %v2635_v32 = vmul.f32 %v2489_v60, %v2130_v3  ;;  %v12771_v3 = vadd.f32 %v15549_v43, %v15540_v6  ;;  %v7324_v30 = vld [vmem:[%s14887_s3 + $0x1a8] sm:$0xff] }
 0x36b   :  { %v2572_v60 = vmul.f32 %v7324_v30, %v12158_v21 }
 0x36c   :  { %v2699_v22 = vadd.f32 %v2635_v32, %v2571_v2  ;;  %4087 = vrot.lane.b32.xlu0 %v3940_v0, %s7354_s15  ;;  %v12749_v37 = vpop.f32.mrf.mxu3  ;;  %v3941_v2 = vpack.c.bf16 %v3877_v47, %v3877_v47  ;;  %v3572_v47 = vmul.f32 %v12650_v29, %v12140_v20 }
 0x36d   :  { %3733 = vrot.lane.b32.xlu1 %v3571_v10, %s7353_s21  ;;  %6081 = vrot.lane.b32.xlu2 %v12746_v12, %s7355_s23  ;;  %v15551_v10 = vld [vmem:[#allocation65_spill] sm:$0xff] }
 0x36e   :  { %v2763_v8 = vpack.c.bf16 %v2699_v22, %v2699_v22  ;;  %v4064_v7 = vpop.permute.xlu0 %4063  ;;  %v3494_v44 = vmul.f32 %v15551_v10, %v15450_v19  ;;  %v2132_v19 = vld [vmem:[%s14890_s2 + $0x1b0] sm:$0xff] }
 0x36f   :  { %4248 = vst.msk [vmem:[%s14894_s9 + $0x1c] sm:$0xf] %vm2775_vm3, %v4064_v7  ;;  %v3710_v28 = vpop.permute.xlu1 %3709  ;;  %v12767_v15 = vpop.permute.xlu2 %3713 }
 0x370   :  { %2828 = vst.msk [vmem:[%s14891_s8 + $0xd0] sm:$0xf] %vm2775_vm3, %v2763_v8  ;;  %v3878_v8 = vadd.f32 %v12634_v48, %v3494_v44  ;;  %v6615_v44 = vmul.f32 -1.442695, %v12647_v59 }
 0x371   :  { %v2491_v49 = vpop.f32.mrf.mxu2 }
 0x372   :  { %v2636_v0 = vmul.f32 %v2491_v49, %v2131_v52  ;;  %v3942_v30 = vpack.c.bf16 %v3878_v8, %v3878_v8  ;;  %7009 = vpow2.f32 %v6615_v44  ;;  %v15556_v44 = vld [vmem:[#allocation8_spill] sm:$0xff] }
 0x374   :  { %v2700_v32 = vadd.f32 %v2636_v0, %v2572_v60  ;;  %6079 = vrot.lane.b32.xlu0 %v12771_v3, %s7355_s23  ;;  %v12785_v22 = vpop.f32.mrf.mxu3  ;;  %v3573_v60 = vmul.f32 %v12686_v51, %v12180_v4  ;;  %v15552_v0 = vld [vmem:[#allocation46_spill] sm:$0xff]  ;;  %v2133_v4 = vld [vmem:[%s14890_s2 + $0x1b8] sm:$0xff] }
 0x375   :  { %6083 = vrot.lane.b32.xlu1 %v12779_v25, %s7355_s23  ;;  %4089 = vrot.lane.b32.xlu2 %v3941_v2, %s7354_s15  ;;  %v3495_v54 = vmul.f32 %v15552_v0, %v15459_v58 }
 0x376   :  { %v2764_v41 = vpack.c.bf16 %v2700_v32, %v2700_v32  ;;  %v4542_v62 = vpop.permute.xlu0 %4541 }
 0x377   :  { %4679 = vst.msk [vmem:[%s14892_s10 + $0xd8] sm:$0xf] %vm2775_vm3, %v4542_v62  ;;  %v4068_v7 = vpop.permute.xlu1 %4067  ;;  %6589 = vmatmul.msk.bf16.gmra.mxu3 %vm162_vm0, %v12668_v50  ;;  %v4072_v52 = vpop.permute.xlu2 %4071  ;;  %v7325_v50 = vld [vmem:[%s14887_s3 + $0x1b0] sm:$0xff]  ;;  %v3879_v2 = vadd.f32 %v3710_v28, %v3495_v54  ;;  %v7326_v62 = vld [vmem:[%s14887_s3 + $0x1b8] sm:$0xff] }
 0x378   :  { %2829 = vst.msk [vmem:[%s14891_s8 + $0xd4] sm:$0xf] %vm2775_vm3, %v2764_v41  ;;  %v2573_v49 = vmul.f32 %v7325_v50, %v12216_v18  ;;  %v2574_v8 = vmul.f32 %v7326_v62, %v12219_v55 }
 0x379   :  { %4250 = vst.msk [vmem:[%s14894_s9 + $0x24] sm:$0xf] %vm2775_vm3, %v4068_v7  ;;  %v2494_v48 = vpop.f32.mrf.mxu2  ;;  %v3943_v28 = vpack.c.bf16 %v3879_v2, %v3879_v2  ;;  %v7010_v2 = vpop.eup %7009 }
 0x37a   :  { %4252 = vst.msk [vmem:[%s14894_s9 + $0x2c] sm:$0xf] %vm2775_vm3, %v4072_v52  ;;  %v2637_v43 = vmul.f32 %v2494_v48, %v2132_v19  ;;  %v3574_v19 = vmul.f32 %v12718_v35, %v12209_v5  ;;  %v15553_v52 = vld [vmem:[#allocation123_spill] sm:$0xff]  ;;  %v2134_v35 = vld [vmem:[%s14890_s2 + $0x1c0] sm:$0xff]  ;;  %v12887_v62 = vadd.f32 1.0, %v7010_v2 }
 0x37b   :  { %v12851_v48 = vadd.f32 %v15553_v52, %v15540_v6  ;;  %v15559_v52 = vld [vmem:[#allocation75_spill] sm:$0xff] }
 0x37c   :  { %v2701_v20 = vadd.f32 %v2637_v43, %v2573_v49  ;;  %3735 = vrot.lane.b32.xlu0 %v3572_v47, %s7353_s21  ;;  %v15554_v49 = vld [vmem:[#allocation69_spill] sm:$0xff]  ;;  %v15555_v43 = vld [vmem:[#allocation63_spill] sm:$0xff]  ;;  %7011 = vrcp.f32 %v12887_v62  ;;  %vm5265_vm4 = vweird.f32 %v12887_v62 }
 0x37d   :  { %v12823_v29 = vpop.f32.mrf.mxu3  ;;  %4091 = vrot.lane.b32.xlu1 %v3942_v30, %s7354_s15  ;;  %3737 = vrot.lane.b32.xlu2 %v3573_v60, %s7353_s21  ;;  %v3496_v30 = vmul.f32 %v15555_v43, %v15554_v49  ;;  %v7328_v2 = vld [vmem:[%s14887_s3 + $0x1c8] sm:$0xff] }
 0x37e   :  { %v2765_v32 = vpack.c.bf16 %v2701_v20, %v2701_v20  ;;  %v3712_v10 = vpop.permute.xlu0 %3711 }
 0x37f   :  { %v4546_v41 = vpop.permute.xlu1 %4545  ;;  %v4550_v58 = vpop.permute.xlu2 %4549  ;;  %v3880_v54 = vadd.f32 %v3712_v10, %v3496_v30 }
 0x380   :  { %2830 = vst.msk [vmem:[%s14891_s8 + $0xd8] sm:$0xf] %vm2775_vm3, %v2765_v32 }
 0x381   :  { %4681 = vst.msk [vmem:[%s14892_s10 + $0xe0] sm:$0xf] %vm2775_vm3, %v4546_v41  ;;  %v2496_v51 = vpop.f32.mrf.mxu2  ;;  %v12877_v41 = vadd.f32 %v15556_v44, %v15540_v6 }
 0x382   :  { %4683 = vst.msk [vmem:[%s14892_s10 + $0xe8] sm:$0xf] %vm2775_vm3, %v4550_v58  ;;  %v2638_v7 = vmul.f32 %v2496_v51, %v2133_v4  ;;  %v7327_v4 = vld [vmem:[%s14887_s3 + $0x1c0] sm:$0xff] }
 0x383   :  { %v2575_v10 = vmul.f32 %v7327_v4, %v12291_v34  ;;  %v15557_v51 = vld [vmem:[#allocation14_spill] sm:$0xff]  ;;  %v15580_v34 = vld [vmem:[#allocation88_spill] sm:$0xff] }
 0x384   :  { %v2702_v47 = vadd.f32 %v2638_v7, %v2574_v8  ;;  %4093 = vrot.lane.b32.xlu0 %v3943_v28, %s7354_s15  ;;  %v12885_v28 = vadd.f32 %v15557_v51, %v15540_v6  ;;  %v3944_v8 = vpack.c.bf16 %v3880_v54, %v3880_v54  ;;  %v3575_v54 = vmul.f32 %v12749_v37, %v12244_v45  ;;  %v15561_v51 = vld [vmem:[#allocation53_spill] sm:$0xff]  ;;  %v12927_v45 = vpop.eup %7011 }
 0x385   :  { %v12854_v50 = vpop.f32.mrf.mxu3  ;;  %3739 = vrot.lane.b32.xlu1 %v3574_v19, %s7353_s21  ;;  %6087 = vrot.lane.b32.xlu2 %v12851_v48, %s7355_s23  ;;  %v15558_v19 = vld [vmem:[#allocation139_spill] sm:$0xff]  ;;  %vm5266_vm2 = vweird.f32 %v12927_v45 }
 0x386   :  { %v2766_v60 = vpack.c.bf16 %v2702_v47, %v2702_v47  ;;  %v4070_v0 = vpop.permute.xlu0 %4069  ;;  %v3497_v47 = vmul.f32 %v15559_v52, %v15558_v19  ;;  %vm13030_vm6 = vmor %vm5265_vm4, %vm5266_vm2 }
 0x387   :  { %4251 = vst.msk [vmem:[%s14894_s9 + $0x28] sm:$0xf] %vm2775_vm3, %v4070_v0  ;;  %v2933_v5 = vpop.permute.xlu1 %2932  ;;  %v12872_v20 = vpop.permute.xlu2 %3719 }
 0x388   :  { %2831 = vst.msk [vmem:[%s14891_s8 + $0xdc] sm:$0xf] %vm2775_vm3, %v2766_v60  ;;  %6590 = vmatmul.msk.bf16.gmra.mxu3 %vm162_vm0, %v2933_v5  ;;  %v3881_v60 = vadd.f32 %v12767_v15, %v3497_v47  ;;  %v2135_v5 = vld [vmem:[%s14890_s2 + $0x1c8] sm:$0xff] }
 0x389   :  { %v2499_v32 = vpop.f32.mrf.mxu2 }
 0x38a   :  { %v2639_v58 = vmul.f32 %v2499_v32, %v2134_v35  ;;  %v2576_v32 = vmul.f32 %v7328_v2, %v12294_v63  ;;  %v3945_v4 = vpack.c.bf16 %v3881_v60, %v3881_v60 }
 0x38c   :  { %v2703_v7 = vadd.f32 %v2639_v58, %v2575_v10  ;;  %6085 = vrot.lane.b32.xlu0 %v12877_v41, %s7355_s23  ;;  %v3576_v10 = vmul.f32 %v12785_v22, %v12278_v23  ;;  %v15560_v58 = vld [vmem:[#allocation144_spill] sm:$0xff] }
 0x38d   :  { %v12893_v49 = vpop.f32.mrf.mxu3  ;;  %6089 = vrot.lane.b32.xlu1 %v12885_v28, %s7355_s23  ;;  %4095 = vrot.lane.b32.xlu2 %v3944_v8, %s7354_s15  ;;  %v3498_v8 = vmul.f32 %v15561_v51, %v15560_v58  ;;  %v2136_v22 = vld [vmem:[%s14890_s2 + $0x1d0] sm:$0xff] }
 0x38e   :  { %v2767_v43 = vpack.c.bf16 %v2703_v7, %v2703_v7  ;;  %v4548_v30 = vpop.permute.xlu0 %4547 }
 0x38f   :  { %4682 = vst.msk [vmem:[%s14892_s10 + $0xe4] sm:$0xf] %vm2775_vm3, %v4548_v30  ;;  %v3716_v0 = vpop.permute.xlu1 %3715  ;;  %v12911_v35 = vpop.permute.xlu2 %2936 }
 0x390   :  { %2832 = vst.msk [vmem:[%s14891_s8 + $0xe0] sm:$0xf] %vm2775_vm3, %v2767_v43  ;;  %v3882_v37 = vadd.f32 %v3716_v0, %v3498_v8  ;;  %v6618_v43 = vmul.f32 -1.442695, %v12746_v12  ;;  %v5261_v0 = vmul.f32 %v12927_v45, %v12887_v62  ;;  %v6616_v8 = vmul.f32 -1.442695, %v12680_v24 }
 0x391   :  { %v2501_v15 = vpop.f32.mrf.mxu2 }
 0x392   :  { %v2640_v44 = vmul.f32 %v2501_v15, %v2135_v5  ;;  %v3946_v5 = vpack.c.bf16 %v3882_v37, %v3882_v37  ;;  %v7329_v15 = vld [vmem:[%s14887_s3 + $0x1d0] sm:$0xff]  ;;  %7013 = vpow2.f32 %v6618_v43  ;;  %v5262_v51 = vsub.f32 1.0, %v5261_v0  ;;  %v15564_v37 = vld [vmem:[#allocation71_spill] sm:$0xff] }
 0x394   :  { %v2704_v7 = vadd.f32 %v2640_v44, %v2576_v32  ;;  %3741 = vrot.lane.b32.xlu0 %v3575_v54, %s7353_s21  ;;  %v2577_v54 = vmul.f32 %v7329_v15, %v12360_v27  ;;  %v3577_v32 = vmul.f32 %v12823_v29, %v12314_v14  ;;  %v6614_v44 = vmul.f32 -1.442695, %v12672_v11 }
 0x395   :  { %v12924_v19 = vpop.f32.mrf.mxu3  ;;  %4097 = vrot.lane.b32.xlu1 %v3945_v4, %s7354_s15  ;;  %3743 = vrot.lane.b32.xlu2 %v3576_v10, %s7353_s21  ;;  %v15562_v4 = vld [vmem:[#allocation13_spill] sm:$0xff]  ;;  %v5263_v15 = vmul.f32 %v12927_v45, %v5262_v51 }
 0x396   :  { %v2768_v52 = vpack.c.bf16 %v2704_v7, %v2704_v7  ;;  %v3718_v47 = vpop.permute.xlu0 %3717  ;;  %v12957_v10 = vadd.f32 %v15562_v4, %v15540_v6  ;;  %v15563_v7 = vld [vmem:[#allocation145_spill] sm:$0xff]  ;;  %7015 = vpow2.f32 %v6614_v44  ;;  %v15566_v4 = vld [vmem:[#allocation132_spill] sm:$0xff] }
 0x397   :  { %v4074_v23 = vpop.permute.xlu1 %4073  ;;  %v4078_v30 = vpop.permute.xlu2 %4077  ;;  %7017 = vpow2.f32 %v6616_v8 }
 0x398   :  { %2833 = vst.msk [vmem:[%s14891_s8 + $0xe4] sm:$0xf] %vm2775_vm3, %v2768_v52  ;;  %v3499_v52 = vmul.f32 %v15564_v37, %v15563_v7  ;;  %v7014_v0 = vpop.eup %7013  ;;  %v15567_v37 = vld [vmem:[#allocation148_spill] sm:$0xff] }
 0x399   :  { %4253 = vst.msk [vmem:[%s14894_s9 + $0x30] sm:$0xf] %vm2775_vm3, %v4074_v23  ;;  %v2504_v60 = vpop.f32.mrf.mxu2  ;;  %v12997_v51 = vadd.f32 1.0, %v7014_v0 }
 0x39a   :  { %4255 = vst.msk [vmem:[%s14894_s9 + $0x38] sm:$0xf] %vm2775_vm3, %v4078_v30  ;;  %v2641_v2 = vmul.f32 %v2504_v60, %v2136_v22  ;;  %v2137_v22 = vld [vmem:[%s14890_s2 + $0x1d8] sm:$0xff]  ;;  %v3883_v30 = vadd.f32 %v3718_v47, %v3499_v52  ;;  %v15568_v52 = vld [vmem:[#allocation80_spill] sm:$0xff] }
 0x39b   :  { %v7330_v47 = vld [vmem:[%s14887_s3 + $0x1d8] sm:$0xff]  ;;  %7019 = vrcp.f32 %v12997_v51  ;;  %vm5310_vm9 = vweird.f32 %v12997_v51 }
 0x39c   :  { %v2705_v58 = vadd.f32 %v2641_v2, %v2577_v54  ;;  %4099 = vrot.lane.b32.xlu0 %v3946_v5, %s7354_s15  ;;  %v15565_v54 = vld [vmem:[#allocation77_spill] sm:$0xff]  ;;  %v3947_v8 = vpack.c.bf16 %v3883_v30, %v3883_v30  ;;  %v5271_v30 = vand.u32 2147483648, %v12887_v62 }
 0x39d   :  { %3745 = vrot.lane.b32.xlu1 %v3577_v32, %s7353_s21  ;;  %v12964_v23 = vpop.f32.mrf.mxu3  ;;  %6093 = vrot.lane.b32.xlu2 %v12957_v10, %s7355_s23  ;;  %v12983_v2 = vadd.f32 %v15565_v54, %v15540_v6  ;;  %v2578_v32 = vmul.f32 %v7330_v47, %v12363_v53  ;;  %v5269_v54 = vand.u32 2147483647, %v12887_v62 }
 0x39e   :  { %v2769_v43 = vpack.c.bf16 %v2705_v58, %v2705_v58  ;;  %v2935_v14 = vpop.permute.xlu0 %2934  ;;  %v12995_v58 = vadd.f32 %v15566_v4, %v15540_v6 }
 0x39f   :  { %v4552_v29 = vpop.permute.xlu1 %4551  ;;  %6591 = vmatmul.msk.bf16.gmra.mxu3 %vm162_vm0, %v2935_v14  ;;  %v4556_v60 = vpop.permute.xlu2 %4555  ;;  %v5264_v14 = vadd.f32 %v12927_v45, %v5263_v15  ;;  %v2138_v15 = vld [vmem:[%s14890_s2 + $0x1e0] sm:$0xff]  ;;  %vm5270_vm7 = vcmp.eq.f32.partialorder %v5269_v54, 8.507059e+37 }
 0x3a0   :  { %2834 = vst.msk [vmem:[%s14891_s8 + $0xe8] sm:$0xf] %vm2775_vm3, %v2769_v43  ;;  %v3500_v43 = vmul.f32 %v15568_v52, %v15567_v37  ;;  %v7331_v37 = vld [vmem:[%s14887_s3 + $0x1e0] sm:$0xff] }
 0x3a1   :  { %4684 = vst.msk [vmem:[%s14892_s10 + $0xec] sm:$0xf] %vm2775_vm3, %v4552_v29  ;;  %v2506_v5 = vpop.f32.mrf.mxu2  ;;  %v7016_v29 = vpop.eup %7015  ;;  %v2579_v52 = vmul.f32 %v7331_v37, %v12427_v61  ;;  %v15579_v61 = vld [vmem:[#allocation111_spill] sm:$0xff] }
 0x3a2   :  { %4686 = vst.msk [vmem:[%s14892_s10 + $0xf4] sm:$0xf] %vm2775_vm3, %v4556_v60  ;;  %v2642_v44 = vmul.f32 %v2506_v5, %v2137_v22  ;;  %v3884_v0 = vadd.f32 %v12872_v20, %v3500_v43  ;;  %v7018_v47 = vpop.eup %7017  ;;  %v13034_v4 = vadd.f32 1.0, %v7016_v29  ;;  %v13047_v29 = vpop.f32.mrf.mxu0 }
 0x3a4   :  { %v2706_v7 = vadd.f32 %v2642_v44, %v2578_v32  ;;  %6091 = vrot.lane.b32.xlu0 %v12983_v2, %s7355_s23  ;;  %v3948_v53 = vpack.c.bf16 %v3884_v0, %v3884_v0  ;;  %v15572_v44 = vld [vmem:[#allocation62_spill] sm:$0xff]  ;;  %7021 = vrcp.f32 %v13034_v4  ;;  %vm5250_vm13 = vweird.f32 %v13034_v4 }
 0x3a5   :  { %6095 = vrot.lane.b32.xlu1 %v12995_v58, %s7355_s23  ;;  %4101 = vrot.lane.b32.xlu2 %v3947_v8, %s7354_s15  ;;  %v13024_v20 = vpop.f32.mrf.mxu3  ;;  %v5268_v8 = vsel %vm13030_vm6, %v12927_v45, %v5264_v14  ;;  %v3579_v45 = vmul.f32 %v12893_v49, %v12384_v36  ;;  %v15571_v14 = vld [vmem:[#allocation128_spill] sm:$0xff]  ;;  %v6621_v36 = vmul.f32 -1.442695, %v12851_v48 }
 0x3a6   :  { %v2770_v22 = vpack.c.bf16 %v2706_v7, %v2706_v7  ;;  %v4076_v60 = vpop.permute.xlu0 %4075  ;;  %v3578_v7 = vmul.f32 %v12854_v50, %v12345_v13  ;;  %v3501_v13 = vmul.f32 %v15572_v44, %v15571_v14 }
 0x3a7   :  { %4254 = vst.msk [vmem:[%s14894_s9 + $0x34] sm:$0xf] %vm2775_vm3, %v4076_v60  ;;  %v3722_v5 = vpop.permute.xlu1 %3721  ;;  %v13026_v32 = vpop.permute.xlu2 %3725  ;;  %v13045_v60 = vadd.f32 1.0, %v7018_v47 }
 0x3a8   :  { %2835 = vst.msk [vmem:[%s14891_s8 + $0xec] sm:$0xf] %vm2775_vm3, %v2770_v22  ;;  %v5272_v22 = vor.u32 1.1754944e-38, %v5271_v30  ;;  %v3885_v30 = vadd.f32 %v3722_v5, %v3501_v13  ;;  %v2139_v5 = vld [vmem:[%s14890_s2 + $0x1e8] sm:$0xff]  ;;  %v6619_v13 = vmul.f32 -1.442695, %v12779_v25 }
 0x3a9   :  { %v2509_v62 = vpop.f32.mrf.mxu2  ;;  %7023 = vrcp.f32 %v13045_v60  ;;  %vm5280_vm15 = vweird.f32 %v13045_v60 }
 0x3aa   :  { %v2643_v43 = vmul.f32 %v2509_v62, %v2138_v15  ;;  %v5273_v27 = vsel %vm5270_vm7, %v5272_v22, %v5268_v8  ;;  %v13055_v15 = vpop.eup %7019  ;;  %7025 = vpow2.f32 %v6621_v36  ;;  %v15573_v22 = vld [vmem:[#allocation9_spill] sm:$0xff] }
 0x3ab   :  { %v13090_v44 = vpop.eup %7021  ;;  %vm5311_vm8 = vweird.f32 %v13055_v15 }
 0x3ac   :  { %v2707_v50 = vadd.f32 %v2643_v43, %v2579_v52  ;;  %3747 = vrot.lane.b32.xlu0 %v3578_v7, %s7353_s21  ;;  %v7332_v7 = vld [vmem:[%s14887_s3 + $0x1e8] sm:$0xff]  ;;  %v6617_v43 = vmul.f32 -1.442695, %v12771_v3  ;;  %vm13182_vm10 = vmor %vm5310_vm9, %vm5311_vm8  ;;  %vm5251_vm11 = vweird.f32 %v13090_v44 }
 0x3ad   :  { %4103 = vrot.lane.b32.xlu1 %v3948_v53, %s7354_s15  ;;  %3749 = vrot.lane.b32.xlu2 %v3579_v45, %s7353_s21  ;;  %v5926_v53 = vmul.f32 %v5273_v27, %v12647_v59  ;;  %v5306_v59 = vmul.f32 %v13055_v15, %v12997_v51  ;;  %v13081_v8 = vpop.f32.mrf.mxu3  ;;  %v2580_v37 = vmul.f32 %v7332_v7, %v12430_v39  ;;  %vm13220_vm14 = vmor %vm5250_vm13, %vm5251_vm11 }
 0x3ae   :  { %v2771_v47 = vpack.c.bf16 %v2707_v50, %v2707_v50  ;;  %v4554_v0 = vpop.permute.xlu0 %4553  ;;  %v3580_v45 = vmul.f32 %v12924_v19, %v15573_v22  ;;  %v15574_v50 = vld [vmem:[#allocation32_spill] sm:$0xff]  ;;  %7027 = vpow2.f32 %v6617_v43  ;;  %v5246_v7 = vmul.f32 %v13090_v44, %v13034_v4 }
 0x3af   :  { %4685 = vst.msk [vmem:[%s14892_s10 + $0xf0] sm:$0xf] %vm2775_vm3, %v4554_v0  ;;  %v4080_v49 = vpop.permute.xlu1 %4079  ;;  %6592 = vmatmul.msk.bf16.gmra.mxu3 %vm162_vm0, %v12911_v35  ;;  %v6076_v54 = vpop.permute.xlu2 %6075  ;;  %v3949_v35 = vpack.c.bf16 %v3885_v30, %v3885_v30  ;;  %v13095_v30 = vadd.f32 %v15574_v50, %v15540_v6  ;;  %v5307_v19 = vsub.f32 1.0, %v5306_v59  ;;  %7029 = vpow2.f32 %v6619_v13  ;;  %v7333_v50 = vld [vmem:[%s14887_s3 + $0x1f0] sm:$0xff] }
 0x3b0   :  { %2836 = vst.msk [vmem:[%s14891_s8 + $0xf0] sm:$0xf] %vm2775_vm3, %v2771_v47  ;;  %v6246_v62 = vmul.f32 %v6076_v54, %v5926_v53  ;;  %v13098_v0 = vpop.eup %7023  ;;  %v15575_v53 = vld [vmem:[#allocation112_spill] sm:$0xff] }
 0x3b1   :  { %4256 = vst.msk [vmem:[%s14894_s9 + $0x3c] sm:$0xf] %vm2775_vm3, %v4080_v49  ;;  %v2511_v27 = vpop.f32.mrf.mxu2  ;;  %v13100_v49 = vpop.f32.mrf.mxu0  ;;  %vm5281_vm12 = vweird.f32 %v13098_v0 }
 0x3b2   :  { %v2644_v52 = vmul.f32 %v2511_v27, %v2139_v5  ;;  %v6310_v14 = vpack.c.bf16 %v6246_v62, %v6246_v62  ;;  %v15576_v5 = vld [vmem:[#allocation79_spill] sm:$0xff]  ;;  %v7026_v43 = vpop.eup %7025  ;;  %vm13238_vm1 = vmor %vm5280_vm15, %vm5281_vm12 }
 0x3b3   :  { %v3502_v54 = vmul.f32 %v15576_v5, %v15575_v53  ;;  %v15578_v53 = vld [vmem:[#allocation81_spill] sm:$0xff] }
 0x3b4   :  { %v2708_v47 = vadd.f32 %v2644_v52, %v2580_v37  ;;  %4105 = vrot.lane.b32.xlu0 %v3949_v35, %s7354_s15  ;;  %6375 = vst.msk [vmem:[%s14893_s11 + $0x54] sm:$0xf] %vm6353_vm5, %v6310_v14  ;;  %v2140_v35 = vld [vmem:[%s14890_s2 + $0x1f0] sm:$0xff]  ;;  %v5276_v52 = vmul.f32 %v13098_v0, %v13045_v60  ;;  %v15577_v14 = vld [vmem:[#allocation119_spill] sm:$0xff]  ;;  %v13141_v5 = vadd.f32 %v15578_v53, %v15540_v6  ;;  %v7028_v39 = vpop.eup %7027 }
 0x3b5   :  { %3751 = vrot.lane.b32.xlu1 %v3580_v45, %s7353_s21  ;;  %6099 = vrot.lane.b32.xlu2 %v13095_v30, %s7355_s23  ;;  %v5308_v45 = vmul.f32 %v13055_v15, %v5307_v19  ;;  %v13129_v13 = vadd.f32 %v15577_v14, %v15540_v6  ;;  %v5247_v19 = vsub.f32 1.0, %v5246_v7  ;;  %v7030_v7 = vpop.eup %7029  ;;  %v13170_v53 = vadd.f32 1.0, %v7028_v39 }
 0x3b6   :  { %v2772_v36 = vpack.c.bf16 %v2708_v47, %v2708_v47  ;;  %v3724_v62 = vpop.permute.xlu0 %3723  ;;  %v2581_v47 = vmul.f32 %v7333_v50, %v12502_v26  ;;  %v3503_v50 = vmul.f32 %v15580_v34, %v15579_v61  ;;  %v2141_v61 = vld [vmem:[%s14890_s2 + $0x1f8] sm:$0xff] }
 0x3b7   :  { %v4558_v27 = vpop.permute.xlu1 %4557  ;;  %v3886_v59 = vadd.f32 %v3724_v62, %v3502_v54  ;;  %v4084_v37 = vpop.permute.xlu2 %4083  ;;  %v13143_v54 = vadd.f32 1.0, %v7026_v43 }
 0x3b8   :  { %2837 = vst.msk [vmem:[%s14891_s8 + $0xf4] sm:$0xf] %vm2775_vm3, %v2772_v36  ;;  %v13145_v62 = vpop.f32.mrf.mxu3 }
 0x3b9   :  { %4687 = vst.msk [vmem:[%s14892_s10 + $0xf8] sm:$0xf] %vm2775_vm3, %v4558_v27  ;;  %v2514_v22 = vpop.f32.mrf.mxu2  ;;  %v3950_v27 = vpack.c.bf16 %v3886_v59, %v3886_v59  ;;  %7031 = vrcp.f32 %v13143_v54  ;;  %vm5355_vm7 = vweird.f32 %v13143_v54 }
 0x3ba   :  { %4258 = vst.msk [vmem:[%s14894_s9 + $0x44] sm:$0xf] %vm2775_vm3, %v4084_v37  ;;  %v2645_v36 = vmul.f32 %v2514_v22, %v2140_v35  ;;  %v5277_v37 = vsub.f32 1.0, %v5276_v52  ;;  %v5309_v35 = vadd.f32 %v13055_v15, %v5308_v45  ;;  %v5316_v22 = vand.u32 2147483648, %v12997_v51 }
 0x3bb   :  { %v3887_v52 = vadd.f32 %v13026_v32, %v3503_v50  ;;  %v5314_v45 = vand.u32 2147483647, %v12997_v51  ;;  %v13187_v51 = vadd.f32 1.0, %v7030_v7  ;;  %v5256_v50 = vand.u32 2147483648, %v13034_v4 }
 0x3bc   :  { %v2709_v14 = vadd.f32 %v2645_v36, %v2581_v47  ;;  %6097 = vrot.lane.b32.xlu0 %v13129_v13, %s7355_s23  ;;  %v13157_v47 = vpop.f32.mrf.mxu0  ;;  %v5248_v36 = vmul.f32 %v13090_v44, %v5247_v19  ;;  %v5278_v39 = vmul.f32 %v13098_v0, %v5277_v37  ;;  %7033 = vrcp.f32 %v13170_v53 }
 0x3bd   :  { %6101 = vrot.lane.b32.xlu1 %v13141_v5, %s7355_s23  ;;  %4107 = vrot.lane.b32.xlu2 %v3950_v27, %s7354_s15  ;;  %v3951_v26 = vpack.c.bf16 %v3887_v52, %v3887_v52  ;;  %v5286_v52 = vand.u32 2147483648, %v13045_v60  ;;  %7035 = vrcp.f32 %v13187_v51  ;;  %vm5325_vm13 = vweird.f32 %v13187_v51 }
 0x3be   :  { %v2773_v43 = vpack.c.bf16 %v2709_v14, %v2709_v14  ;;  %v4082_v59 = vpop.permute.xlu0 %4081  ;;  %v5313_v14 = vsel %vm13182_vm10, %v13055_v15, %v5309_v35  ;;  %v5249_v27 = vadd.f32 %v13090_v44, %v5248_v36  ;;  %v3582_v15 = vmul.f32 %v13024_v20, %v12487_v16  ;;  %v15583_v36 = vld [vmem:[#allocation4_spill] sm:$0xff] }
 0x3bf   :  { %4257 = vst.msk [vmem:[%s14894_s9 + $0x40] sm:$0xf] %vm2775_vm3, %v4082_v59  ;;  %v2939_v34 = vpop.permute.xlu1 %2938  ;;  %v13177_v32 = vpop.permute.xlu2 %3731  ;;  %v7334_v59 = vld [vmem:[%s14887_s3 + $0x1f8] sm:$0xff] }
 0x3c0   :  { %2838 = vst.msk [vmem:[%s14891_s8 + $0xf8] sm:$0xf] %vm2775_vm3, %v2773_v43  ;;  %6593 = vmatmul.msk.bf16.gmra.mxu3 %vm162_vm0, %v2939_v34  ;;  %v3581_v43 = vmul.f32 %v12964_v23, %v12452_v42  ;;  %v2582_v37 = vmul.f32 %v7334_v59, %v12509_v31  ;;  %v5317_v34 = vor.u32 1.1754944e-38, %v5316_v22  ;;  %vm5315_vm0 = vcmp.eq.f32.partialorder %v5314_v45, 8.507059e+37  ;;  %v13213_v45 = vpop.f32.mrf.mxu3 }
 0x3c1   :  { %v2516_v19 = vpop.f32.mrf.mxu2  ;;  %v5279_v23 = vadd.f32 %v13098_v0, %v5278_v39  ;;  %v5254_v22 = vand.u32 2147483647, %v13034_v4  ;;  %v15584_v39 = vld [vmem:[#allocation70_spill] sm:$0xff]  ;;  %v5284_v4 = vand.u32 2147483647, %v13045_v60 }
 0x3c2   :  { %v2646_v7 = vmul.f32 %v2516_v19, %v2141_v61  ;;  %v5318_v42 = vsel %vm5315_vm0, %v5317_v34, %v5313_v14  ;;  %v13211_v61 = vpop.eup %7031  ;;  %v3504_v19 = vmul.f32 %v15584_v39, %v15583_v36  ;;  %v6624_v14 = vmul.f32 -1.442695, %v12957_v10 }
 0x3c3   :  { %v5929_v59 = vmul.f32 %v5318_v42, %v12746_v12  ;;  %v5283_v12 = vsel %vm13238_vm1, %v13098_v0, %v5279_v23  ;;  %vm5255_vm2 = vcmp.eq.f32.partialorder %v5254_v22, 8.507059e+37  ;;  %v5351_v42 = vmul.f32 %v13211_v61, %v13143_v54  ;;  %v13253_v39 = vpop.eup %7033  ;;  %v15589_v23 = vld [vmem:[#allocation61_spill] sm:$0xff] }
 0x3c4   :  { %v2710_v35 = vadd.f32 %v2646_v7, %v2582_v37  ;;  %3753 = vrot.lane.b32.xlu0 %v3581_v43, %s7353_s21  ;;  %v5253_v37 = vsel %vm13220_vm14, %v13090_v44, %v5249_v27  ;;  %v5287_v27 = vor.u32 1.1754944e-38, %v5286_v52  ;;  %vm5285_vm4 = vcmp.eq.f32.partialorder %v5284_v4, 8.507059e+37  ;;  %v13263_v52 = vpop.eup %7035 }
 0x3c5   :  { %4109 = vrot.lane.b32.xlu1 %v3951_v26, %s7354_s15  ;;  %3755 = vrot.lane.b32.xlu2 %v3582_v15, %s7353_s21  ;;  %v5257_v15 = vor.u32 1.1754944e-38, %v5256_v50  ;;  %7037 = vpow2.f32 %v6624_v14  ;;  %v3583_v50 = vmul.f32 %v13081_v8, %v12537_v1  ;;  %v6620_v0 = vmul.f32 -1.442695, %v12877_v41 }
 0x3c6   :  { %v2774_v16 = vpack.c.bf16 %v2710_v35, %v2710_v35  ;;  %v4560_v20 = vpop.permute.xlu0 %4559  ;;  %v13249_v35 = vpop.f32.mrf.mxu0  ;;  %v13260_v22 = vadd.f32 %v15589_v23, %v15540_v6  ;;  %v6622_v26 = vmul.f32 -1.442695, %v12885_v28  ;;  %v5352_v8 = vsub.f32 1.0, %v5351_v42  ;;  %v15592_v23 = vld [vmem:[#allocation129_spill] sm:$0xff] }
 0x3c7   :  { %4688 = vst.msk [vmem:[%s14892_s10 + $0xfc] sm:$0xf] %vm2775_vm3, %v4560_v20  ;;  %v3728_v43 = vpop.permute.xlu1 %3727  ;;  %v6082_v34 = vpop.permute.xlu2 %6081  ;;  %v5258_v36 = vsel %vm5255_vm2, %v5257_v15, %v5253_v37  ;;  %7039 = vpow2.f32 %v6620_v0  ;;  %vm5356_vm6 = vweird.f32 %v13211_v61  ;;  %vm5296_vm10 = vweird.f32 %v13253_v39 }
 0x3c8   :  { %2839 = vst.msk [vmem:[%s14891_s8 + $0xfc] sm:$0xf] %vm2775_vm3, %v2774_v16  ;;  %v3888_v7 = vadd.f32 %v3728_v43, %v3504_v19  ;;  %v6249_v44 = vmul.f32 %v6082_v34, %v5929_v59  ;;  %v5288_v19 = vsel %vm5285_vm4, %v5287_v27, %v5283_v12  ;;  %v5925_v1 = vmul.f32 %v5258_v36, %v12672_v11  ;;  %v13277_v60 = vpop.f32.mrf.mxu3  ;;  %v15591_v36 = vld [vmem:[#allocation116_spill] sm:$0xff]  ;;  %vm13332_vm8 = vmor %vm5355_vm7, %vm5356_vm6 }
 0x3c9   :  { %v5927_v14 = vmul.f32 %v5288_v19, %v12680_v24  ;;  %v5291_v43 = vmul.f32 %v13253_v39, %v13170_v53  ;;  %v5321_v11 = vmul.f32 %v13263_v52, %v13187_v51  ;;  %7041 = vpow2.f32 %v6622_v26  ;;  %v15593_v26 = vld [vmem:[#allocation91_spill] sm:$0xff] }
 0x3ca   :  { %v3952_v20 = vpack.c.bf16 %v3888_v7, %v3888_v7  ;;  %v6313_v16 = vpack.c.bf16 %v6249_v44, %v6249_v44  ;;  %v5353_v24 = vmul.f32 %v13211_v61, %v5352_v8  ;;  %v15590_v44 = vld [vmem:[#allocation48_spill] sm:$0xff]  ;;  %v15594_v8 = vld [vmem:[#allocation122_spill] sm:$0xff]  ;;  %vm5326_vm11 = vweird.f32 %v13263_v52 }
 0x3cb   :  { %v7038_v15 = vpop.eup %7037  ;;  %v13288_v27 = vadd.f32 %v15590_v44, %v15540_v6  ;;  %v5322_v0 = vsub.f32 1.0, %v5321_v11  ;;  %vm5295_vm0 = vweird.f32 %v13170_v53  ;;  %vm13384_vm14 = vmor %vm5325_vm13, %vm5326_vm11 }
 0x3cc   :  { %4111 = vrot.lane.b32.xlu0 %v3952_v20, %s7354_s15  ;;  %6378 = vst.msk [vmem:[%s14893_s11 + $0x60] sm:$0xf] %vm6353_vm5, %v6313_v16  ;;  %v5292_v20 = vsub.f32 1.0, %v5291_v43  ;;  %v13300_v19 = vadd.f32 1.0, %v7038_v15  ;;  %v5354_v43 = vadd.f32 %v13211_v61, %v5353_v24  ;;  %vm13366_vm12 = vmor %vm5295_vm0, %vm5296_vm10 }
 0x3cd   :  { %3757 = vrot.lane.b32.xlu1 %v3583_v50, %s7353_s21  ;;  %6105 = vrot.lane.b32.xlu2 %v13260_v22, %s7355_s23  ;;  %v13292_v50 = vadd.f32 %v15591_v36, %v15540_v6 }
 0x3ce   :  { %v6074_v4 = vpop.permute.xlu0 %6073  ;;  %v13294_v16 = vpop.f32.mrf.mxu0  ;;  %7043 = vrcp.f32 %v13300_v19  ;;  %vm5400_vm4 = vweird.f32 %v13300_v19 }
 0x3cf   :  { %v6245_v59 = vmul.f32 %v6074_v4, %v5925_v1  ;;  %v6078_v37 = vpop.permute.xlu1 %6077  ;;  %v4090_v34 = vpop.permute.xlu2 %4089  ;;  %v3506_v1 = vmul.f32 %v15593_v26, %v15592_v23  ;;  %v15595_v4 = vld [vmem:[#allocation84_spill] sm:$0xff]  ;;  %v5358_v26 = vsel %vm13332_vm8, %v13211_v61, %v5354_v43  ;;  %v5301_v43 = vand.u32 2147483648, %v13170_v53 }
 0x3d0   :  { %v6247_v7 = vmul.f32 %v6078_v37, %v5927_v14  ;;  %4261 = vst.msk [vmem:[%s14894_s9 + $0x50] sm:$0xf] %vm2775_vm3, %v4090_v34  ;;  %v3505_v14 = vmul.f32 %v15595_v4, %v15594_v8  ;;  %v5293_v34 = vmul.f32 %v13253_v39, %v5292_v20  ;;  %v5323_v20 = vmul.f32 %v13263_v52, %v5322_v0  ;;  %v7335_v8 = vld [vmem:[%s14890_s2 + $0x178] sm:$0xff] }
 0x3d1   :  { %v6309_v12 = vpack.c.bf16 %v6245_v59, %v6245_v59  ;;  %v7040_v59 = vpop.eup %7039  ;;  %v3890_v15 = vadd.f32 %v13177_v32, %v3506_v1  ;;  %v3584_v4 = vmul.f32 %v7335_v8, %v13145_v62  ;;  %v6623_v32 = vmul.f32 -1.442695, %v12983_v2 }
 0x3d2   :  { %v6311_v42 = vpack.c.bf16 %v6247_v7, %v6247_v7  ;;  %v5361_v7 = vand.u32 2147483648, %v13143_v54  ;;  %v7042_v11 = vpop.eup %7041  ;;  %v5294_v0 = vadd.f32 %v13253_v39, %v5293_v34 }
 0x3d3   :  { %6374 = vst.msk [vmem:[%s14893_s11 + $0x50] sm:$0xf] %vm6353_vm5, %v6309_v12  ;;  %v13322_v24 = vpop.f32.mrf.mxu3  ;;  %v13342_v1 = vadd.f32 1.0, %v7042_v11 }
 0x3d4   :  { %6376 = vst.msk [vmem:[%s14893_s11 + $0x58] sm:$0xf] %vm6353_vm5, %v6311_v42  ;;  %6103 = vrot.lane.b32.xlu0 %v13288_v27, %s7355_s23  ;;  %v5359_v42 = vand.u32 2147483647, %v13143_v54  ;;  %v13337_v54 = vadd.f32 1.0, %v7040_v59  ;;  %v5324_v59 = vadd.f32 %v13263_v52, %v5323_v20  ;;  %v13362_v34 = vpop.eup %7043  ;;  %v5298_v8 = vsel %vm13366_vm12, %v13253_v39, %v5294_v0 }
 0x3d5   :  { %6107 = vrot.lane.b32.xlu1 %v13292_v50, %s7355_s23  ;;  %v5329_v20 = vand.u32 2147483647, %v13187_v51  ;;  %vm5401_vm2 = vweird.f32 %v13362_v34  ;;  %vm5370_vm0 = vweird.f32 %v13342_v1 }
 0x3d6   :  { %v3730_v37 = vpop.permute.xlu0 %3729  ;;  %vm5360_vm9 = vcmp.eq.f32.partialorder %v5359_v42, 8.507059e+37  ;;  %7045 = vrcp.f32 %v13337_v54  ;;  %v13357_v62 = vpop.f32.mrf.mxu0  ;;  %vm13477_vm6 = vmor %vm5400_vm4, %vm5401_vm2  ;;  %vm5340_vm10 = vweird.f32 %v13337_v54 }
 0x3d7   :  { %v3889_v12 = vadd.f32 %v3730_v37, %v3505_v14  ;;  %v4086_v44 = vpop.permute.xlu1 %4085  ;;  %v13328_v36 = vpop.permute.xlu2 %3737  ;;  %v5362_v14 = vor.u32 1.1754944e-38, %v5361_v7  ;;  %v5299_v37 = vand.u32 2147483647, %v13170_v53  ;;  %v5331_v7 = vand.u32 2147483648, %v13187_v51 }
 0x3d8   :  { %4259 = vst.msk [vmem:[%s14894_s9 + $0x48] sm:$0xf] %vm2775_vm3, %v4086_v44  ;;  %v3954_v44 = vpack.c.bf16 %v3890_v15, %v3890_v15  ;;  %v15598_v15 = vld [vmem:[#allocation82_spill] sm:$0xff]  ;;  %7047 = vrcp.f32 %v13342_v1  ;;  %v6627_v53 = vmul.f32 -1.442695, %v13095_v30  ;;  %vm5330_vm1 = vcmp.eq.f32.partialorder %v5329_v20, 8.507059e+37 }
 0x3d9   :  { %v3953_v23 = vpack.c.bf16 %v3889_v12, %v3889_v12  ;;  %v5363_v61 = vsel %vm5360_vm9, %v5362_v14, %v5358_v26  ;;  %v15599_v12 = vld [vmem:[#allocation78_spill] sm:$0xff]  ;;  %vm5300_vm15 = vcmp.eq.f32.partialorder %v5299_v37, 8.507059e+37  ;;  %v6625_v20 = vmul.f32 -1.442695, %v12995_v58 }
 0x3da   :  { %v3507_v42 = vmul.f32 %v15599_v12, %v15598_v15  ;;  %v5932_v26 = vmul.f32 %v5363_v61, %v12851_v48  ;;  %v7336_v48 = vld [vmem:[%s14890_s2 + $0x180] sm:$0xff]  ;;  %v5332_v61 = vor.u32 1.1754944e-38, %v5331_v7  ;;  %v5396_v15 = vmul.f32 %v13362_v34, %v13300_v19 }
 0x3db   :  { %4113 = vrot.lane.b32.xlu2 %v3953_v23, %s7354_s15  ;;  %v3585_v39 = vmul.f32 %v7336_v48, %v13213_v45  ;;  %v13397_v12 = vpop.f32.mrf.mxu3  ;;  %7049 = vpow2.f32 %v6627_v53 }
 0x3dc   :  { %3759 = vrot.lane.b32.xlu0 %v3584_v4, %s7353_s21  ;;  %v5397_v53 = vsub.f32 1.0, %v5396_v15  ;;  %7051 = vpow2.f32 %v6623_v32 }
 0x3dd   :  { %4115 = vrot.lane.b32.xlu1 %v3954_v44, %s7354_s15  ;;  %v5302_v44 = vor.u32 1.1754944e-38, %v5301_v43  ;;  %v13399_v43 = vpop.eup %7045  ;;  %7053 = vpow2.f32 %v6625_v20  ;;  %v15606_v20 = vld [vmem:[#allocation55_spill] sm:$0xff] }
 0x3de   :  { %v4088_v11 = vpop.permute.xlu0 %4087  ;;  %v5336_v51 = vmul.f32 %v13399_v43, %v13337_v54  ;;  %v5398_v15 = vmul.f32 %v13362_v34, %v5397_v53  ;;  %vm5341_vm8 = vweird.f32 %v13399_v43 }
 0x3df   :  { %4260 = vst.msk [vmem:[%s14894_s9 + $0x4c] sm:$0xf] %vm2775_vm3, %v4088_v11  ;;  %v3734_v23 = vpop.permute.xlu1 %3733  ;;  %v6088_v14 = vpop.permute.xlu2 %6087  ;;  %v5328_v11 = vsel %vm13384_vm14, %v13263_v52, %v5324_v59  ;;  %v5303_v37 = vsel %vm5300_vm15, %v5302_v44, %v5298_v8  ;;  %v7337_v52 = vld [vmem:[%s14890_s2 + $0x188] sm:$0xff]  ;;  %vm13513_vm11 = vmor %vm5340_vm10, %vm5341_vm8 }
 0x3e0   :  { %v3891_v4 = vadd.f32 %v3734_v23, %v3507_v42  ;;  %v6252_v0 = vmul.f32 %v6088_v14, %v5932_v26  ;;  %v3586_v59 = vmul.f32 %v7337_v52, %v13277_v60  ;;  %v5333_v7 = vsel %vm5330_vm1, %v5332_v61, %v5328_v11  ;;  %v13408_v23 = vpop.eup %7047 }
 0x3e1   :  { %v5928_v60 = vmul.f32 %v5303_v37, %v12771_v3  ;;  %v5930_v8 = vmul.f32 %v5333_v7, %v12779_v25  ;;  %v15604_v3 = vld [vmem:[#allocation124_spill] sm:$0xff]  ;;  %v13441_v7 = vadd.f32 %v13047_v29, %v15540_v6  ;;  %vm5371_vm9 = vweird.f32 %v13408_v23 }
 0x3e2   :  { %v3955_v42 = vpack.c.bf16 %v3891_v4, %v3891_v4  ;;  %v6316_v45 = vpack.c.bf16 %v6252_v0, %v6252_v0  ;;  %v13420_v4 = vpop.f32.mrf.mxu0  ;;  %v7050_v0 = vpop.eup %7049  ;;  %v13426_v61 = vadd.f32 %v15604_v3, %v15540_v6  ;;  %vm13531_vm12 = vmor %vm5370_vm0, %vm5371_vm9 }
 0x3e3   :  { %3761 = vrot.lane.b32.xlu2 %v3585_v39, %s7353_s21  ;;  %v5366_v39 = vmul.f32 %v13408_v23, %v13342_v1  ;;  %v13449_v32 = vadd.f32 1.0, %v7050_v0 }
 0x3e4   :  { %4117 = vrot.lane.b32.xlu0 %v3955_v42, %s7354_s15  ;;  %6381 = vst.msk [vmem:[%s14893_s11 + $0x6c] sm:$0xf] %vm6353_vm5, %v6316_v45  ;;  %v15605_v42 = vld [vmem:[#allocation137_spill] sm:$0xff]  ;;  %v5337_v45 = vsub.f32 1.0, %v5336_v51 }
 0x3e5   :  { %3763 = vrot.lane.b32.xlu1 %v3586_v59, %s7353_s21  ;;  %v13435_v37 = vadd.f32 %v15605_v42, %v15540_v6  ;;  %v5367_v29 = vsub.f32 1.0, %v5366_v39  ;;  %7055 = vrcp.f32 %v13449_v32  ;;  %vm5445_vm1 = vweird.f32 %v13449_v32 }
 0x3e6   :  { %v6080_v26 = vpop.permute.xlu0 %6079  ;;  %v5338_v0 = vmul.f32 %v13399_v43, %v5337_v45 }
 0x3e7   :  { %v6248_v14 = vmul.f32 %v6080_v26, %v5928_v60  ;;  %v6084_v44 = vpop.permute.xlu1 %6083  ;;  %v4096_v48 = vpop.permute.xlu2 %4095  ;;  %v15607_v60 = vld [vmem:[#allocation52_spill] sm:$0xff] }
 0x3e8   :  { %v6250_v11 = vmul.f32 %v6084_v44, %v5930_v8  ;;  %4264 = vst.msk [vmem:[%s14894_s9 + $0x5c] sm:$0xf] %vm2775_vm3, %v4096_v48  ;;  %v3509_v53 = vmul.f32 %v15607_v60, %v15606_v20  ;;  %v15608_v26 = vld [vmem:[#allocation92_spill] sm:$0xff]  ;;  %v15609_v8 = vld [vmem:[#allocation3_spill] sm:$0xff]  ;;  %v7052_v44 = vpop.eup %7051  ;;  %v5406_v48 = vand.u32 2147483648, %v13300_v19 }
 0x3e9   :  { %v6312_v25 = vpack.c.bf16 %v6248_v14, %v6248_v14  ;;  %v3508_v51 = vmul.f32 %v15609_v8, %v15608_v26  ;;  %v5399_v14 = vadd.f32 %v13362_v34, %v5398_v15  ;;  %v7054_v39 = vpop.eup %7053  ;;  %v13482_v20 = vadd.f32 1.0, %v7052_v44  ;;  %v7338_v8 = vld [vmem:[%s14890_s2 + $0x190] sm:$0xff] }
 0x3ea   :  { %v6314_v52 = vpack.c.bf16 %v6250_v11, %v6250_v11  ;;  %v13437_v59 = vpop.f32.mrf.mxu3  ;;  %v3893_v3 = vadd.f32 %v13328_v36, %v3509_v53  ;;  %v5368_v36 = vmul.f32 %v13408_v23, %v5367_v29  ;;  %v13484_v60 = vpop.f32.mrf.mxu0  ;;  %v13489_v26 = vadd.f32 1.0, %v7054_v39 }
 0x3eb   :  { %6377 = vst.msk [vmem:[%s14893_s11 + $0x5c] sm:$0xf] %vm6353_vm5, %v6312_v25  ;;  %6111 = vrot.lane.b32.xlu2 %v13426_v61, %s7355_s23  ;;  %v5403_v53 = vsel %vm13477_vm6, %v13362_v34, %v5399_v14  ;;  %v5407_v29 = vor.u32 1.1754944e-38, %v5406_v48  ;;  %v5344_v44 = vand.u32 2147483647, %v13337_v54  ;;  %v5346_v14 = vand.u32 2147483648, %v13337_v54 }
 0x3ec   :  { %6379 = vst.msk [vmem:[%s14893_s11 + $0x64] sm:$0xf] %vm6353_vm5, %v6314_v52  ;;  %6109 = vrot.lane.b32.xlu0 %v13435_v37, %s7355_s23  ;;  %v5404_v52 = vand.u32 2147483647, %v13300_v19  ;;  %7057 = vrcp.f32 %v13482_v20  ;;  %v5376_v48 = vand.u32 2147483648, %v13342_v1  ;;  %vm5385_vm8 = vweird.f32 %v13482_v20 }
 0x3ed   :  { %6113 = vrot.lane.b32.xlu1 %v13441_v7, %s7355_s23  ;;  %7059 = vrcp.f32 %v13489_v26  ;;  %v6630_v54 = vmul.f32 -1.442695, %v13260_v22  ;;  %vm5345_vm13 = vcmp.eq.f32.partialorder %v5344_v44, 8.507059e+37  ;;  %vm5415_vm10 = vweird.f32 %v13489_v26 }
 0x3ee   :  { %v3736_v11 = vpop.permute.xlu0 %3735  ;;  %vm5405_vm7 = vcmp.eq.f32.partialorder %v5404_v52, 8.507059e+37  ;;  %v15613_v52 = vld [vmem:[#allocation83_spill] sm:$0xff] }
 0x3ef   :  { %v3892_v25 = vadd.f32 %v3736_v11, %v3508_v51  ;;  %v4092_v42 = vpop.permute.xlu1 %4091  ;;  %v13475_v15 = vpop.permute.xlu2 %3743  ;;  %v3587_v51 = vmul.f32 %v7338_v8, %v13322_v24  ;;  %v5408_v34 = vsel %vm5405_vm7, %v5407_v29, %v5403_v53  ;;  %v5369_v24 = vadd.f32 %v13408_v23, %v5368_v36 }
 0x3f0   :  { %4262 = vst.msk [vmem:[%s14894_s9 + $0x54] sm:$0xf] %vm2775_vm3, %v4092_v42  ;;  %v3957_v42 = vpack.c.bf16 %v3893_v3, %v3893_v3  ;;  %v15612_v3 = vld [vmem:[#allocation11_spill] sm:$0xff]  ;;  %v5374_v36 = vand.u32 2147483647, %v13342_v1  ;;  %v5935_v8 = vmul.f32 %v5408_v34, %v12957_v10  ;;  %v7339_v10 = vld [vmem:[%s14890_s2 + $0x198] sm:$0xff]  ;;  %7061 = vpow2.f32 %v6630_v54 }
 0x3f1   :  { %v3956_v19 = vpack.c.bf16 %v3892_v25, %v3892_v25  ;;  %v5339_v25 = vadd.f32 %v13399_v43, %v5338_v0  ;;  %v13509_v0 = vpop.eup %7055  ;;  %v3510_v45 = vmul.f32 %v15613_v52, %v15612_v3  ;;  %v5347_v3 = vor.u32 1.1754944e-38, %v5346_v14 }
 0x3f2   :  { %v13495_v11 = vpop.f32.mrf.mxu3  ;;  %v5377_v34 = vor.u32 1.1754944e-38, %v5376_v48  ;;  %v5441_v52 = vmul.f32 %v13509_v0, %v13449_v32  ;;  %vm5375_vm14 = vcmp.eq.f32.partialorder %v5374_v36, 8.507059e+37  ;;  %v13544_v44 = vpop.eup %7057  ;;  %v6628_v54 = vmul.f32 -1.442695, %v13141_v5 }
 0x3f3   :  { %4119 = vrot.lane.b32.xlu2 %v3956_v19, %s7354_s15  ;;  %v13546_v14 = vpop.f32.mrf.mxu0  ;;  %v13557_v36 = vpop.eup %7059  ;;  %vm5446_vm15 = vweird.f32 %v13509_v0  ;;  %vm5386_vm6 = vweird.f32 %v13544_v44 }
 0x3f4   :  { %3765 = vrot.lane.b32.xlu0 %v3587_v51, %s7353_s21  ;;  %v5343_v51 = vsel %vm13513_vm11, %v13399_v43, %v5339_v25  ;;  %v3588_v43 = vmul.f32 %v7339_v10, %v13397_v12  ;;  %vm13628_vm2 = vmor %vm5445_vm1, %vm5446_vm15  ;;  %vm5416_vm7 = vweird.f32 %v13557_v36 }
 0x3f5   :  { %4121 = vrot.lane.b32.xlu1 %v3957_v42, %s7354_s15  ;;  %vm13660_vm9 = vmor %vm5385_vm8, %vm5386_vm6 }
 0x3f6   :  { %v4094_v39 = vpop.permute.xlu0 %4093  ;;  %vm13679_vm11 = vmor %vm5415_vm10, %vm5416_vm7 }
 0x3f7   :  { %4263 = vst.msk [vmem:[%s14894_s9 + $0x58] sm:$0xf] %vm2775_vm3, %v4094_v39  ;;  %v3740_v53 = vpop.permute.xlu1 %3739  ;;  %v6094_v42 = vpop.permute.xlu2 %6093  ;;  %v5373_v39 = vsel %vm13531_vm12, %v13408_v23, %v5369_v24  ;;  %v7340_v23 = vld [vmem:[%s14890_s2 + $0x1a0] sm:$0xff] }
 0x3f8   :  { %v3894_v29 = vadd.f32 %v3740_v53, %v3510_v45  ;;  %v6255_v25 = vmul.f32 %v6094_v42, %v5935_v8  ;;  %v5348_v45 = vsel %vm5345_vm13, %v5347_v3, %v5343_v51  ;;  %v3589_v24 = vmul.f32 %v7340_v23, %v13437_v59 }
 0x3f9   :  { %v5378_v48 = vsel %vm5375_vm14, %v5377_v34, %v5373_v39  ;;  %v6626_v53 = vmul.f32 -1.442695, %v13129_v13  ;;  %v5931_v59 = vmul.f32 %v5348_v45, %v12877_v41  ;;  %v5442_v51 = vsub.f32 1.0, %v5441_v52  ;;  %v7062_v34 = vpop.eup %7061 }
 0x3fa   :  { %v3958_v19 = vpack.c.bf16 %v3894_v29, %v3894_v29  ;;  %v6319_v12 = vpack.c.bf16 %v6255_v25, %v6255_v25  ;;  %v13554_v8 = vpop.f32.mrf.mxu3  ;;  %v5933_v29 = vmul.f32 %v5378_v48, %v12885_v28  ;;  %v5381_v42 = vmul.f32 %v13544_v44, %v13482_v20  ;;  %v15619_v48 = vld [vmem:[#allocation105_spill] sm:$0xff] }
 0x3fb   :  { %3767 = vrot.lane.b32.xlu2 %v3588_v43, %s7353_s21  ;;  %7063 = vpow2.f32 %v6626_v53  ;;  %v5411_v25 = vmul.f32 %v13557_v36, %v13489_v26  ;;  %v13573_v41 = vadd.f32 %v13157_v47, %v15540_v6  ;;  %v5443_v28 = vmul.f32 %v13509_v0, %v5442_v51 }
 0x3fc   :  { %4123 = vrot.lane.b32.xlu0 %v3958_v19, %s7354_s15  ;;  %6384 = vst.msk [vmem:[%s14893_s11 + $0x78] sm:$0xf] %vm6353_vm5, %v6319_v12  ;;  %7065 = vpow2.f32 %v6628_v54  ;;  %v13582_v19 = vadd.f32 %v13100_v49, %v15540_v6  ;;  %v5382_v23 = vsub.f32 1.0, %v5381_v42  ;;  %v13594_v47 = vadd.f32 1.0, %v7062_v34  ;;  %v15618_v12 = vld [vmem:[#allocation113_spill] sm:$0xff]  ;;  %v15620_v54 = vld [vmem:[#allocation7_spill] sm:$0xff] }
 0x3fd   :  { %3769 = vrot.lane.b32.xlu1 %v3589_v24, %s7353_s21  ;;  %v13586_v24 = vadd.f32 %v13249_v35, %v15540_v6  ;;  %v5412_v49 = vsub.f32 1.0, %v5411_v25  ;;  %v13602_v35 = vpop.f32.mrf.mxu0  ;;  %v3512_v53 = vmul.f32 %v15619_v48, %v15618_v12 }
 0x3fe   :  { %v6086_v1 = vpop.permute.xlu0 %6085  ;;  %7067 = vrcp.f32 %v13594_v47  ;;  %vm5490_vm14 = vweird.f32 %v13594_v47 }
 0x3ff   :  { %v6251_v3 = vmul.f32 %v6086_v1, %v5931_v59  ;;  %v6090_v39 = vpop.permute.xlu1 %6089  ;;  %v4102_v43 = vpop.permute.xlu2 %4101  ;;  %v15621_v59 = vld [vmem:[#allocation98_spill] sm:$0xff]  ;;  %v5444_v1 = vadd.f32 %v13509_v0, %v5443_v28  ;;  %v3896_v25 = vadd.f32 %v13475_v15, %v3512_v53  ;;  %v5413_v15 = vmul.f32 %v13557_v36, %v5412_v49 }
 0x400   :  { %v6253_v10 = vmul.f32 %v6090_v39, %v5933_v29  ;;  %4267 = vst.msk [vmem:[%s14894_s9 + $0x68] sm:$0xf] %vm2775_vm3, %v4102_v43  ;;  %v3511_v51 = vmul.f32 %v15621_v59, %v15620_v54  ;;  %v5451_v39 = vand.u32 2147483648, %v13449_v32  ;;  %v7341_v54 = vld [vmem:[%s14890_s2 + $0x1a8] sm:$0xff] }
 0x401   :  { %v6315_v52 = vpack.c.bf16 %v6251_v3, %v6251_v3  ;;  %v7064_v29 = vpop.eup %7063  ;;  %v5448_v48 = vsel %vm13628_vm2, %v13509_v0, %v5444_v1  ;;  %v3590_v59 = vmul.f32 %v7341_v54, %v13495_v11  ;;  %v5391_v1 = vand.u32 2147483648, %v13482_v20 }
 0x402   :  { %v6317_v45 = vpack.c.bf16 %v6253_v10, %v6253_v10  ;;  %v13612_v42 = vpop.f32.mrf.mxu3  ;;  %v5383_v10 = vmul.f32 %v13544_v44, %v5382_v23  ;;  %v7066_v43 = vpop.eup %7065  ;;  %v13633_v12 = vadd.f32 1.0, %v7064_v29  ;;  %v5414_v29 = vadd.f32 %v13557_v36, %v5413_v15 }
 0x403   :  { %6380 = vst.msk [vmem:[%s14893_s11 + $0x68] sm:$0xf] %vm6353_vm5, %v6315_v52  ;;  %6117 = vrot.lane.b32.xlu2 %v13573_v41, %s7355_s23  ;;  %v13638_v53 = vadd.f32 1.0, %v7066_v43  ;;  %v5421_v11 = vand.u32 2147483648, %v13489_v26  ;;  %v15624_v43 = vld [vmem:[#allocation135_spill] sm:$0xff] }
 0x404   :  { %6382 = vst.msk [vmem:[%s14893_s11 + $0x70] sm:$0xf] %vm6353_vm5, %v6317_v45  ;;  %6115 = vrot.lane.b32.xlu0 %v13582_v19, %s7355_s23  ;;  %v5449_v45 = vand.u32 2147483647, %v13449_v32  ;;  %v5384_v49 = vadd.f32 %v13544_v44, %v5383_v10  ;;  %7069 = vrcp.f32 %v13633_v12  ;;  %v5419_v23 = vand.u32 2147483647, %v13489_v26 }
 0x405   :  { %6119 = vrot.lane.b32.xlu1 %v13586_v24, %s7355_s23  ;;  %7071 = vrcp.f32 %v13638_v53  ;;  %v13667_v15 = vpop.f32.mrf.mxu0  ;;  %vm5430_vm6 = vweird.f32 %v13633_v12  ;;  %vm5460_vm8 = vweird.f32 %v13638_v53 }
 0x406   :  { %v3742_v3 = vpop.permute.xlu0 %3741  ;;  %vm5450_vm4 = vcmp.eq.f32.partialorder %v5449_v45, 8.507059e+37  ;;  %vm5420_vm12 = vcmp.eq.f32.partialorder %v5419_v23, 8.507059e+37  ;;  %v6631_v23 = vmul.f32 -1.442695, %v13292_v50 }
 0x407   :  { %v3895_v34 = vadd.f32 %v3742_v3, %v3511_v51  ;;  %v4098_v52 = vpop.permute.xlu1 %4097  ;;  %v13624_v28 = vpop.permute.xlu2 %3749  ;;  %v5452_v51 = vor.u32 1.1754944e-38, %v5451_v39  ;;  %v5389_v3 = vand.u32 2147483647, %v13482_v20 }
 0x408   :  { %4265 = vst.msk [vmem:[%s14894_s9 + $0x60] sm:$0xf] %vm2775_vm3, %v4098_v52  ;;  %v3960_v52 = vpack.c.bf16 %v3896_v25, %v3896_v25  ;;  %v13656_v39 = vpop.eup %7067  ;;  %v15625_v25 = vld [vmem:[#allocation5_spill] sm:$0xff] }
 0x409   :  { %v3959_v32 = vpack.c.bf16 %v3895_v34, %v3895_v34  ;;  %v5453_v0 = vsel %vm5450_vm4, %v5452_v51, %v5448_v48  ;;  %v3513_v34 = vmul.f32 %v15625_v25, %v15624_v43  ;;  %v5388_v48 = vsel %vm13660_vm9, %v13544_v44, %v5384_v49  ;;  %v7342_v44 = vld [vmem:[%s14890_s2 + $0x1b0] sm:$0xff] }
 0x40a   :  { %vm5390_vm0 = vcmp.eq.f32.partialorder %v5389_v3, 8.507059e+37  ;;  %v3591_v49 = vmul.f32 %v7342_v44, %v13554_v8  ;;  %v5486_v43 = vmul.f32 %v13656_v39, %v13594_v47  ;;  %v13694_v3 = vpop.eup %7069  ;;  %vm5491_vm13 = vweird.f32 %v13656_v39 }
 0x40b   :  { %4125 = vrot.lane.b32.xlu2 %v3959_v32, %s7354_s15  ;;  %v5938_v32 = vmul.f32 %v5453_v0, %v13095_v30  ;;  %v13683_v54 = vpop.f32.mrf.mxu3  ;;  %v5418_v30 = vsel %vm13679_vm11, %v13557_v36, %v5414_v29  ;;  %v7343_v36 = vld [vmem:[%s14890_s2 + $0x1b8] sm:$0xff]  ;;  %vm13770_vm15 = vmor %vm5490_vm14, %vm5491_vm13  ;;  %vm5431_vm2 = vweird.f32 %v13694_v3 }
 0x40c   :  { %3771 = vrot.lane.b32.xlu0 %v3590_v59, %s7353_s21  ;;  %v3592_v29 = vmul.f32 %v7343_v36, %v13612_v42  ;;  %vm13805_vm7 = vmor %vm5430_vm6, %vm5431_vm2 }
 0x40d   :  { %4127 = vrot.lane.b32.xlu1 %v3960_v52, %s7354_s15  ;;  %v5392_v52 = vor.u32 1.1754944e-38, %v5391_v1  ;;  %v6629_v1 = vmul.f32 -1.442695, %v13288_v27 }
 0x40e   :  { %v4100_v10 = vpop.permute.xlu0 %4099 }
 0x40f   :  { %4266 = vst.msk [vmem:[%s14894_s9 + $0x64] sm:$0xf] %vm2775_vm3, %v4100_v10  ;;  %v3746_v20 = vpop.permute.xlu1 %3745  ;;  %v6100_v51 = vpop.permute.xlu2 %6099  ;;  %v5422_v10 = vor.u32 1.1754944e-38, %v5421_v11  ;;  %v6633_v11 = vmul.f32 -1.442695, %v13426_v61  ;;  %7073 = vpow2.f32 %v6629_v1 }
 0x410   :  { %v3897_v59 = vadd.f32 %v3746_v20, %v3513_v34  ;;  %v6258_v0 = vmul.f32 %v6100_v51, %v5938_v32  ;;  %v5393_v34 = vsel %vm5390_vm0, %v5392_v52, %v5388_v48  ;;  %v13704_v20 = vpop.eup %7071  ;;  %v5487_v32 = vsub.f32 1.0, %v5486_v43 }
 0x411   :  { %v5423_v8 = vsel %vm5420_vm12, %v5422_v10, %v5418_v30  ;;  %v5934_v42 = vmul.f32 %v5393_v34, %v12983_v2  ;;  %7075 = vpow2.f32 %v6633_v11  ;;  %v13720_v2 = vadd.f32 %v13357_v62, %v15540_v6  ;;  %v15633_v11 = vld [vmem:[#allocation103_spill] sm:$0xff] }
 0x412   :  { %v3961_v25 = vpack.c.bf16 %v3897_v59, %v3897_v59  ;;  %v6322_v45 = vpack.c.bf16 %v6258_v0, %v6258_v0  ;;  %v5936_v26 = vmul.f32 %v5423_v8, %v12995_v58  ;;  %v5426_v59 = vmul.f32 %v13694_v3, %v13633_v12  ;;  %v13722_v0 = vpop.f32.mrf.mxu0  ;;  %v15632_v8 = vld [vmem:[#allocation27_spill] sm:$0xff] }
 0x413   :  { %3773 = vrot.lane.b32.xlu2 %v3591_v49, %s7353_s21  ;;  %v5456_v49 = vmul.f32 %v13704_v20, %v13638_v53  ;;  %7077 = vpow2.f32 %v6631_v23  ;;  %v5488_v10 = vmul.f32 %v13656_v39, %v5487_v32  ;;  %v13731_v43 = vadd.f32 %v13294_v16, %v15540_v6 }
 0x414   :  { %4129 = vrot.lane.b32.xlu0 %v3961_v25, %s7354_s15  ;;  %6387 = vst.msk [vmem:[%s14893_s11 + $0x84] sm:$0xf] %vm6353_vm5, %v6322_v45  ;;  %v13733_v25 = vpop.f32.mrf.mxu3  ;;  %v5427_v1 = vsub.f32 1.0, %v5426_v59  ;;  %v13737_v62 = vadd.f32 %v13420_v4, %v15540_v6  ;;  %v15630_v4 = vld [vmem:[#allocation38_spill] sm:$0xff]  ;;  %v3514_v23 = vmul.f32 %v15633_v11, %v15632_v8  ;;  %vm5461_vm4 = vweird.f32 %v13704_v20 }
 0x415   :  { %3775 = vrot.lane.b32.xlu1 %v3592_v29, %s7353_s21  ;;  %v5457_v16 = vsub.f32 1.0, %v5456_v49  ;;  %v7074_v36 = vpop.eup %7073  ;;  %v15631_v29 = vld [vmem:[#allocation107_spill] sm:$0xff]  ;;  %v5494_v49 = vand.u32 2147483647, %v13594_v47  ;;  %vm13822_vm9 = vmor %vm5460_vm8, %vm5461_vm4 }
 0x416   :  { %v6092_v48 = vpop.permute.xlu0 %6091  ;;  %v3515_v45 = vmul.f32 %v15631_v29, %v15630_v4  ;;  %v5428_v59 = vmul.f32 %v13694_v3, %v5427_v1  ;;  %v13780_v4 = vadd.f32 1.0, %v7074_v36 }
 0x417   :  { %v6254_v51 = vmul.f32 %v6092_v48, %v5934_v42  ;;  %v6096_v52 = vpop.permute.xlu1 %6095  ;;  %v4108_v44 = vpop.permute.xlu2 %4107  ;;  %v5489_v42 = vadd.f32 %v13656_v39, %v5488_v10  ;;  %vm5495_vm1 = vcmp.eq.f32.partialorder %v5494_v49, 8.507059e+37  ;;  %v5464_v49 = vand.u32 2147483647, %v13638_v53 }
 0x418   :  { %v6256_v30 = vmul.f32 %v6096_v52, %v5936_v26  ;;  %4270 = vst.msk [vmem:[%s14894_s9 + $0x74] sm:$0xf] %vm2775_vm3, %v4108_v44  ;;  %v7076_v32 = vpop.eup %7075  ;;  %v5496_v26 = vand.u32 2147483648, %v13594_v47  ;;  %v3899_v52 = vadd.f32 %v13624_v28, %v3515_v45  ;;  %v7344_v45 = vld [vmem:[%s14890_s2 + $0x1c0] sm:$0xff] }
 0x419   :  { %v6318_v58 = vpack.c.bf16 %v6254_v51, %v6254_v51  ;;  %v7078_v51 = vpop.eup %7077  ;;  %v13775_v28 = vadd.f32 1.0, %v7076_v32  ;;  %v5493_v47 = vsel %vm13770_vm15, %v13656_v39, %v5489_v42  ;;  %v3593_v8 = vmul.f32 %v7344_v45, %v13683_v54 }
 0x41a   :  { %v6320_v34 = vpack.c.bf16 %v6256_v30, %v6256_v30  ;;  %v13782_v29 = vadd.f32 1.0, %v7078_v51  ;;  %v3963_v32 = vpack.c.bf16 %v3899_v52, %v3899_v52  ;;  %v5429_v39 = vadd.f32 %v13694_v3, %v5428_v59  ;;  %v15636_v51 = vld [vmem:[#allocation136_spill] sm:$0xff]  ;;  %v15637_v52 = vld [vmem:[#allocation95_spill] sm:$0xff] }
 0x41b   :  { %6383 = vst.msk [vmem:[%s14893_s11 + $0x74] sm:$0xf] %vm6353_vm5, %v6318_v58  ;;  %6123 = vrot.lane.b32.xlu2 %v13720_v2, %s7355_s23  ;;  %v5436_v42 = vand.u32 2147483648, %v13633_v12  ;;  %7079 = vrcp.f32 %v13775_v28  ;;  %v5434_v54 = vand.u32 2147483647, %v13633_v12  ;;  %vm5465_vm11 = vcmp.eq.f32.partialorder %v5464_v49, 8.507059e+37 }
 0x41c   :  { %6385 = vst.msk [vmem:[%s14893_s11 + $0x7c] sm:$0xf] %vm6353_vm5, %v6320_v34  ;;  %6121 = vrot.lane.b32.xlu0 %v13731_v43, %s7355_s23  ;;  %v5458_v34 = vmul.f32 %v13704_v20, %v5457_v16  ;;  %v13788_v16 = vpop.f32.mrf.mxu0  ;;  %7081 = vrcp.f32 %v13780_v4  ;;  %vm5535_vm13 = vweird.f32 %v13775_v28  ;;  %vm5505_vm4 = vweird.f32 %v13782_v29 }
 0x41d   :  { %6125 = vrot.lane.b32.xlu1 %v13737_v62, %s7355_s23  ;;  %7083 = vrcp.f32 %v13782_v29  ;;  %vm5435_vm10 = vcmp.eq.f32.partialorder %v5434_v54, 8.507059e+37  ;;  %v6636_v54 = vmul.f32 -1.442695, %v13573_v41 }
 0x41e   :  { %v3748_v48 = vpop.permute.xlu0 %3747 }
 0x41f   :  { %v3898_v30 = vadd.f32 %v3748_v48, %v3514_v23  ;;  %v4104_v44 = vpop.permute.xlu1 %4103  ;;  %v13768_v58 = vpop.permute.xlu2 %3755  ;;  %v5497_v23 = vor.u32 1.1754944e-38, %v5496_v26  ;;  %v5459_v48 = vadd.f32 %v13704_v20, %v5458_v34  ;;  %v5466_v26 = vand.u32 2147483648, %v13638_v53 }
 0x420   :  { %4268 = vst.msk [vmem:[%s14894_s9 + $0x6c] sm:$0xf] %vm2775_vm3, %v4104_v44  ;;  %v5433_v34 = vsel %vm13805_vm7, %v13694_v3, %v5429_v39  ;;  %v6632_v53 = vmul.f32 -1.442695, %v13435_v37 }
 0x421   :  { %v3962_v1 = vpack.c.bf16 %v3898_v30, %v3898_v30  ;;  %v5498_v36 = vsel %vm5495_vm1, %v5497_v23, %v5493_v47  ;;  %v3516_v30 = vmul.f32 %v15637_v52, %v15636_v51  ;;  %v5463_v23 = vsel %vm13822_vm9, %v13704_v20, %v5459_v48  ;;  %v13834_v51 = vpop.eup %7079  ;;  %v7346_v20 = vld [vmem:[%s14890_s2 + $0x1d0] sm:$0xff] }
 0x422   :  { %v3202_v11 = vpop.f32.mrf.mxu3  ;;  %v5941_v10 = vmul.f32 %v5498_v36, %v13260_v22  ;;  %v7345_v22 = vld [vmem:[%s14890_s2 + $0x1c8] sm:$0xff]  ;;  %v5467_v39 = vor.u32 1.1754944e-38, %v5466_v26  ;;  %7085 = vpow2.f32 %v6632_v53  ;;  %vm5536_vm0 = vweird.f32 %v13834_v51 }
 0x423   :  { %4131 = vrot.lane.b32.xlu2 %v3962_v1, %s7354_s15  ;;  %v3594_v3 = vmul.f32 %v7345_v22, %v13733_v25  ;;  %v3595_v48 = vmul.f32 %v7346_v20, %v3202_v11  ;;  %v13841_v25 = vpop.eup %7081  ;;  %v13868_v22 = vadd.f32 %v13484_v60, %v15540_v6  ;;  %vm13934_vm15 = vmor %vm5535_vm13, %vm5536_vm0  ;;  %vm5475_vm1 = vweird.f32 %v13780_v4 }
 0x424   :  { %3777 = vrot.lane.b32.xlu0 %v3593_v8, %s7353_s21  ;;  %v5437_v8 = vor.u32 1.1754944e-38, %v5436_v42  ;;  %v6634_v42 = vmul.f32 -1.442695, %v13441_v7  ;;  %v13845_v44 = vpop.eup %7083  ;;  %v13847_v49 = vpop.f32.mrf.mxu0  ;;  %vm5476_vm12 = vweird.f32 %v13841_v25 }
 0x425   :  { %4133 = vrot.lane.b32.xlu1 %v3963_v32, %s7354_s15  ;;  %vm5506_vm14 = vweird.f32 %v13845_v44  ;;  %vm13948_vm2 = vmor %vm5475_vm1, %vm5476_vm12 }
 0x426   :  { %v4106_v59 = vpop.permute.xlu0 %4105  ;;  %7087 = vpow2.f32 %v6634_v42  ;;  %vm13967_vm6 = vmor %vm5505_vm4, %vm5506_vm14 }
 0x427   :  { %4269 = vst.msk [vmem:[%s14894_s9 + $0x70] sm:$0xf] %vm2775_vm3, %v4106_v59  ;;  %v3752_v12 = vpop.permute.xlu1 %3751  ;;  %v6106_v45 = vpop.permute.xlu2 %6105  ;;  %v5438_v59 = vsel %vm5435_vm10, %v5437_v8, %v5433_v34  ;;  %v5531_v34 = vmul.f32 %v13834_v51, %v13775_v28  ;;  %7089 = vpow2.f32 %v6636_v54  ;;  %v5501_v8 = vmul.f32 %v13845_v44, %v13782_v29 }
 0x428   :  { %v3900_v47 = vadd.f32 %v3752_v12, %v3516_v30  ;;  %v6261_v32 = vmul.f32 %v6106_v45, %v5941_v10  ;;  %v5468_v30 = vsel %vm5465_vm11, %v5467_v39, %v5463_v23  ;;  %v5937_v11 = vmul.f32 %v5438_v59, %v13129_v13  ;;  %v15642_v59 = vld [vmem:[#allocation110_spill] sm:$0xff] }
 0x429   :  { %v5939_v10 = vmul.f32 %v5468_v30, %v13141_v5  ;;  %v13864_v13 = vadd.f32 %v13546_v14, %v15540_v6  ;;  %v7086_v5 = vpop.eup %7085  ;;  %v13872_v39 = vadd.f32 %v13602_v35, %v15540_v6  ;;  %v5502_v60 = vsub.f32 1.0, %v5501_v8 }
 0x42a   :  { %v3964_v36 = vpack.c.bf16 %v3900_v47, %v3900_v47  ;;  %v6325_v52 = vpack.c.bf16 %v6261_v32, %v6261_v32  ;;  %v3204_v26 = vpop.f32.mrf.mxu3  ;;  %v5471_v47 = vmul.f32 %v13841_v25, %v13780_v4  ;;  %v5532_v32 = vsub.f32 1.0, %v5531_v34 }
 0x42b   :  { %3779 = vrot.lane.b32.xlu2 %v3594_v3, %s7353_s21  ;;  %v3518_v42 = vmul.f32 %v15642_v59, %v11875_v38 }
 0x42c   :  { %4135 = vrot.lane.b32.xlu0 %v3964_v36, %s7354_s15  ;;  %6390 = vst.msk [vmem:[%s14893_s11 + $0x90] sm:$0xf] %vm6353_vm5, %v6325_v52  ;;  %v5472_v14 = vsub.f32 1.0, %v5471_v47  ;;  %v7088_v35 = vpop.eup %7087  ;;  %v13886_v36 = vadd.f32 1.0, %v7086_v5  ;;  %v15644_v52 = vld [vmem:[#allocation21_spill] sm:$0xff]  ;;  %v13899_v34 = vpop.f32.mrf.mxu0 }
 0x42d   :  { %3781 = vrot.lane.b32.xlu1 %v3595_v48, %s7353_s21  ;;  %v15643_v48 = vld [vmem:[#allocation133_spill] sm:$0xff]  ;;  %v7090_v54 = vpop.eup %7089  ;;  %v3902_v38 = vadd.f32 %v13768_v58, %v3518_v42  ;;  %v13909_v8 = vadd.f32 1.0, %v7088_v35 }
 0x42e   :  { %v6098_v12 = vpop.permute.xlu0 %6097  ;;  %v3517_v30 = vmul.f32 %v15644_v52, %v15643_v48  ;;  %v5473_v47 = vmul.f32 %v13841_v25, %v5472_v14  ;;  %7091 = vrcp.f32 %v13886_v36  ;;  %v7347_v58 = vld [vmem:[%s14890_s2 + $0x1d8] sm:$0xff]  ;;  %v5481_v14 = vand.u32 2147483648, %v13780_v4 }
 0x42f   :  { %v6257_v1 = vmul.f32 %v6098_v12, %v5937_v11  ;;  %v6102_v53 = vpop.permute.xlu1 %6101  ;;  %v3966_v59 = vpack.c.bf16 %v3902_v38, %v3902_v38  ;;  %v5511_v52 = vand.u32 2147483648, %v13782_v29  ;;  %vm5520_vm14 = vweird.f32 %v13886_v36 }
 0x430   :  { %v6259_v45 = vmul.f32 %v6102_v53, %v5939_v10  ;;  %v5533_v10 = vmul.f32 %v13834_v51, %v5532_v32  ;;  %v5474_v35 = vadd.f32 %v13841_v25, %v5473_v47  ;;  %vm5550_vm1 = vweird.f32 %v13909_v8 }
 0x431   :  { %v6321_v23 = vpack.c.bf16 %v6257_v1, %v6257_v1 }
 0x432   :  { %v6323_v3 = vpack.c.bf16 %v6259_v45, %v6259_v45  ;;  %v3207_v11 = vpop.f32.mrf.mxu3  ;;  %v5503_v45 = vmul.f32 %v13845_v44, %v5502_v60  ;;  %v5534_v32 = vadd.f32 %v13834_v51, %v5533_v10  ;;  %v5541_v60 = vand.u32 2147483648, %v13775_v28 }
 0x433   :  { %6386 = vst.msk [vmem:[%s14893_s11 + $0x80] sm:$0xf] %vm6353_vm5, %v6321_v23  ;;  %6129 = vrot.lane.b32.xlu2 %v13864_v13, %s7355_s23  ;;  %v13911_v23 = vadd.f32 1.0, %v7090_v54  ;;  %v15647_v54 = vld [vmem:[#allocation100_spill] sm:$0xff]  ;;  %v5478_v47 = vsel %vm13948_vm2, %v13841_v25, %v5474_v35  ;;  %v7348_v25 = vld [vmem:[%s14890_s2 + $0x1e0] sm:$0xff]  ;;  %v5512_v35 = vor.u32 1.1754944e-38, %v5511_v52 }
 0x434   :  { %6388 = vst.msk [vmem:[%s14893_s11 + $0x88] sm:$0xf] %vm6353_vm5, %v6323_v3  ;;  %6127 = vrot.lane.b32.xlu0 %v13868_v22, %s7355_s23  ;;  %v3596_v3 = vmul.f32 %v7347_v58, %v3204_v26  ;;  %v5539_v26 = vand.u32 2147483647, %v13775_v28  ;;  %v5504_v42 = vadd.f32 %v13845_v44, %v5503_v45  ;;  %v5479_v28 = vand.u32 2147483647, %v13780_v4 }
 0x435   :  { %6131 = vrot.lane.b32.xlu1 %v13872_v39, %s7355_s23  ;;  %v4114_v20 = vpop.permute.xlu2 %4113  ;;  %7093 = vrcp.f32 %v13911_v23  ;;  %v5538_v10 = vsel %vm13934_vm15, %v13834_v51, %v5534_v32  ;;  %v5509_v4 = vand.u32 2147483647, %v13782_v29  ;;  %v5482_v58 = vor.u32 1.1754944e-38, %v5481_v14  ;;  %v13974_v32 = vpop.f32.mrf.mxu0 }
 0x436   :  { %4273 = vst.msk [vmem:[%s14894_s9 + $0x80] sm:$0xf] %vm2775_vm3, %v4114_v20  ;;  %v3754_v12 = vpop.permute.xlu0 %3753  ;;  %7095 = vrcp.f32 %v13909_v8  ;;  %vm5540_vm7 = vcmp.eq.f32.partialorder %v5539_v26, 8.507059e+37  ;;  %vm5480_vm8 = vcmp.eq.f32.partialorder %v5479_v28, 8.507059e+37  ;;  %v6637_v14 = vmul.f32 -1.442695, %v13586_v24 }
 0x437   :  { %v3901_v1 = vadd.f32 %v3754_v12, %v3517_v30  ;;  %v4110_v53 = vpop.permute.xlu1 %4109  ;;  %v3519_v12 = vmul.f32 %v15647_v54, %v11921_v56  ;;  %v6635_v56 = vmul.f32 -1.442695, %v13582_v19  ;;  %vm5510_vm9 = vcmp.eq.f32.partialorder %v5509_v4, 8.507059e+37 }
 0x438   :  { %4271 = vst.msk [vmem:[%s14894_s9 + $0x78] sm:$0xf] %vm2775_vm3, %v4110_v53  ;;  %v5542_v53 = vor.u32 1.1754944e-38, %v5541_v60  ;;  %vm5580_vm0 = vweird.f32 %v13911_v23 }
 0x439   :  { %v3965_v5 = vpack.c.bf16 %v3901_v1, %v3901_v1  ;;  %v13954_v1 = vpop.eup %7091  ;;  %7097 = vpow2.f32 %v6635_v56 }
 0x43a   :  { %v3209_v45 = vpop.f32.mrf.mxu3  ;;  %v5543_v60 = vsel %vm5540_vm7, %v5542_v53, %v5538_v10  ;;  %7099 = vpow2.f32 %v6637_v14  ;;  %v15652_v14 = vld [vmem:[#allocation118_spill] sm:$0xff]  ;;  %vm5521_vm11 = vweird.f32 %v13954_v1 }
 0x43b   :  { %4137 = vrot.lane.b32.xlu2 %v3965_v5, %s7354_s15  ;;  %v13979_v54 = vpop.eup %7093  ;;  %v5944_v28 = vmul.f32 %v5543_v60, %v13426_v61  ;;  %v5516_v61 = vmul.f32 %v13954_v1, %v13886_v36  ;;  %v14014_v60 = vadd.f32 %v13788_v16, %v15540_v6  ;;  %vm14096_vm15 = vmor %vm5520_vm14, %vm5521_vm11 }
 0x43c   :  { %3783 = vrot.lane.b32.xlu0 %v3596_v3, %s7353_s21  ;;  %v5508_v3 = vsel %vm13967_vm6, %v13845_v44, %v5504_v42  ;;  %v7349_v44 = vld [vmem:[%s14890_s2 + $0x1e8] sm:$0xff]  ;;  %v13989_v52 = vpop.eup %7095  ;;  %vm5581_vm10 = vweird.f32 %v13979_v54 }
 0x43d   :  { %4139 = vrot.lane.b32.xlu1 %v3966_v59, %s7354_s15  ;;  %v13930_v20 = vpop.permute.xlu2 %3761  ;;  %v3597_v59 = vmul.f32 %v7348_v25, %v3207_v11  ;;  %v3598_v26 = vmul.f32 %v7349_v44, %v3209_v45  ;;  %v5513_v42 = vsel %vm5510_vm9, %v5512_v35, %v5508_v3  ;;  %v6639_v11 = vmul.f32 -1.442695, %v13720_v2  ;;  %v14016_v35 = vpop.f32.mrf.mxu0  ;;  %vm14080_vm13 = vmor %vm5580_vm0, %vm5581_vm10 }
 0x43e   :  { %v4112_v30 = vpop.permute.xlu0 %4111  ;;  %v5942_v56 = vmul.f32 %v5513_v42, %v13292_v50  ;;  %v14006_v3 = vadd.f32 %v13667_v15, %v15540_v6  ;;  %v5517_v15 = vsub.f32 1.0, %v5516_v61  ;;  %v3521_v44 = vmul.f32 %v15652_v14, %v12022_v17  ;;  %v15653_v42 = vld [vmem:[#allocation114_spill] sm:$0xff] }
 0x43f   :  { %4272 = vst.msk [vmem:[%s14894_s9 + $0x7c] sm:$0xf] %vm2775_vm3, %v4112_v30  ;;  %v3758_v51 = vpop.permute.xlu1 %3757  ;;  %v5483_v30 = vsel %vm5480_vm8, %v5482_v58, %v5478_v47  ;;  %7101 = vpow2.f32 %v6639_v11  ;;  %v14002_v58 = vadd.f32 %v13722_v0, %v15540_v6  ;;  %v3520_v11 = vmul.f32 %v15653_v42, %v11970_v33 }
 0x440   :  { %v3903_v5 = vadd.f32 %v3758_v51, %v3519_v12  ;;  %v5940_v10 = vmul.f32 %v5483_v30, %v13288_v27  ;;  %v5576_v51 = vmul.f32 %v13979_v54, %v13911_v23  ;;  %v7098_v27 = vpop.eup %7097  ;;  %vm5551_vm12 = vweird.f32 %v13989_v52 }
 0x441   :  { %v14024_v0 = vadd.f32 1.0, %v7098_v27  ;;  %v7100_v30 = vpop.eup %7099  ;;  %v5526_v27 = vand.u32 2147483648, %v13886_v36  ;;  %vm14113_vm2 = vmor %vm5550_vm1, %vm5551_vm12 }
 0x442   :  { %v3967_v48 = vpack.c.bf16 %v3903_v5, %v3903_v5  ;;  %v5546_v5 = vmul.f32 %v13989_v52, %v13909_v8 }
 0x443   :  { %3785 = vrot.lane.b32.xlu2 %v3597_v59, %s7353_s21  ;;  %v5577_v59 = vsub.f32 1.0, %v5576_v51  ;;  %7103 = vrcp.f32 %v14024_v0  ;;  %v6638_v51 = vmul.f32 -1.442695, %v13731_v43  ;;  %vm5565_vm12 = vweird.f32 %v14024_v0 }
 0x444   :  { %4141 = vrot.lane.b32.xlu0 %v3967_v48, %s7354_s15  ;;  %v3212_v48 = vpop.f32.mrf.mxu3  ;;  %v5547_v16 = vsub.f32 1.0, %v5546_v5 }
 0x445   :  { %3787 = vrot.lane.b32.xlu1 %v3598_v26, %s7353_s21  ;;  %v6112_v12 = vpop.permute.xlu2 %6111 }
 0x446   :  { %v6264_v38 = vmul.f32 %v6112_v12, %v5944_v28  ;;  %v6104_v4 = vpop.permute.xlu0 %6103  ;;  %v7102_v28 = vpop.eup %7101  ;;  %v5548_v33 = vmul.f32 %v13989_v52, %v5547_v16 }
 0x447   :  { %v6260_v53 = vmul.f32 %v6104_v4, %v5940_v10  ;;  %v6108_v47 = vpop.permute.xlu1 %6107  ;;  %v5578_v10 = vmul.f32 %v13979_v54, %v5577_v59  ;;  %v14073_v16 = vpop.f32.mrf.mxu0 }
 0x448   :  { %v6328_v29 = vpack.c.bf16 %v6264_v38, %v6264_v38  ;;  %v6262_v45 = vmul.f32 %v6108_v47, %v5942_v56  ;;  %v3905_v38 = vadd.f32 %v13930_v20, %v3521_v44  ;;  %v5518_v56 = vmul.f32 %v13954_v1, %v5517_v15 }
 0x449   :  { %v6324_v50 = vpack.c.bf16 %v6260_v53, %v6260_v53  ;;  %v14052_v53 = vadd.f32 1.0, %v7100_v30  ;;  %v14054_v47 = vadd.f32 1.0, %v7102_v28  ;;  %v6640_v20 = vmul.f32 -1.442695, %v13737_v62  ;;  %v15656_v28 = vld [vmem:[#allocation10_spill] sm:$0xff] }
 0x44a   :  { %6393 = vst.msk [vmem:[%s14893_s11 + $0x9c] sm:$0xf] %vm6353_vm5, %v6328_v29  ;;  %v6326_v25 = vpack.c.bf16 %v6262_v45, %v6262_v45  ;;  %v7350_v29 = vld [vmem:[%s14890_s2 + $0x1f0] sm:$0xff]  ;;  %v5579_v5 = vadd.f32 %v13979_v54, %v5578_v10  ;;  %v5519_v59 = vadd.f32 %v13954_v1, %v5518_v56  ;;  %v5584_v15 = vand.u32 2147483647, %v13911_v23 }
 0x44b   :  { %6389 = vst.msk [vmem:[%s14893_s11 + $0x8c] sm:$0xf] %vm6353_vm5, %v6324_v50  ;;  %6135 = vrot.lane.b32.xlu2 %v14002_v58, %s7355_s23  ;;  %v3599_v45 = vmul.f32 %v7350_v29, %v3212_v48  ;;  %v3969_v50 = vpack.c.bf16 %v3905_v38, %v3905_v38  ;;  %v5549_v48 = vadd.f32 %v13989_v52, %v5548_v33  ;;  %7105 = vrcp.f32 %v14054_v47  ;;  %v7351_v29 = vld [vmem:[%s14890_s2 + $0x1f8] sm:$0xff] }
 0x44c   :  { %6391 = vst.msk [vmem:[%s14893_s11 + $0x94] sm:$0xf] %vm6353_vm5, %v6326_v25  ;;  %6133 = vrot.lane.b32.xlu0 %v14006_v3, %s7355_s23  ;;  %v5586_v25 = vand.u32 2147483648, %v13911_v23  ;;  %v5524_v23 = vand.u32 2147483647, %v13886_v36  ;;  %v5556_v44 = vand.u32 2147483648, %v13909_v8  ;;  %v3214_v42 = vpop.f32.mrf.mxu3  ;;  %v5583_v10 = vsel %vm14080_vm13, %v13979_v54, %v5579_v5 }
 0x44d   :  { %6137 = vrot.lane.b32.xlu1 %v14014_v60, %s7355_s23  ;;  %v4120_v26 = vpop.permute.xlu2 %4119  ;;  %v5554_v36 = vand.u32 2147483647, %v13909_v8  ;;  %7107 = vrcp.f32 %v14052_v53  ;;  %vm5585_vm4 = vcmp.eq.f32.partialorder %v5584_v15, 8.507059e+37  ;;  %v5527_v33 = vor.u32 1.1754944e-38, %v5526_v27 }
 0x44e   :  { %4276 = vst.msk [vmem:[%s14894_s9 + $0x8c] sm:$0xf] %vm2775_vm3, %v4120_v26  ;;  %v3760_v12 = vpop.permute.xlu0 %3759  ;;  %v14087_v26 = vpop.eup %7103  ;;  %v5587_v54 = vor.u32 1.1754944e-38, %v5586_v25  ;;  %vm5525_vm6 = vcmp.eq.f32.partialorder %v5524_v23, 8.507059e+37  ;;  %7109 = vpow2.f32 %v6638_v51  ;;  %v14127_v27 = vadd.f32 %v13974_v32, %v15540_v6 }
 0x44f   :  { %v3904_v4 = vadd.f32 %v3760_v12, %v3520_v11  ;;  %v4116_v17 = vpop.permute.xlu1 %4115  ;;  %v3522_v12 = vmul.f32 %v15656_v28, %v12025_v9  ;;  %vm5555_vm7 = vcmp.eq.f32.partialorder %v5554_v36, 8.507059e+37  ;;  %7111 = vpow2.f32 %v6640_v20 }
 0x450   :  { %4274 = vst.msk [vmem:[%s14894_s9 + $0x84] sm:$0xf] %vm2775_vm3, %v4116_v17  ;;  %v5523_v17 = vsel %vm14096_vm15, %v13954_v1, %v5519_v59  ;;  %v5588_v5 = vsel %vm5585_vm4, %v5587_v54, %v5583_v10  ;;  %v5557_v1 = vor.u32 1.1754944e-38, %v5556_v44  ;;  %v14150_v54 = vadd.f32 %v13847_v49, %v15540_v6 }
 0x451   :  { %v3968_v61 = vpack.c.bf16 %v3904_v4, %v3904_v4  ;;  %v6642_v4 = vmul.f32 -1.442695, %v13864_v13  ;;  %v5528_v25 = vsel %vm5525_vm6, %v5527_v33, %v5523_v17  ;;  %v14123_v59 = vpop.eup %7105  ;;  %v5947_v15 = vmul.f32 %v5588_v5, %v13573_v41 }
 0x452   :  { %v5943_v20 = vmul.f32 %v5528_v25, %v13435_v37  ;;  %v5621_v44 = vmul.f32 %v14123_v59, %v14054_v47  ;;  %v5561_v41 = vmul.f32 %v14087_v26, %v14024_v0  ;;  %vm5626_vm8 = vweird.f32 %v14123_v59 }
 0x453   :  { %4143 = vrot.lane.b32.xlu2 %v3968_v61, %s7354_s15  ;;  %v5553_v61 = vsel %vm14113_vm2, %v13989_v52, %v5549_v48  ;;  %7113 = vpow2.f32 %v6642_v4  ;;  %v14132_v48 = vpop.eup %7107  ;;  %v14146_v4 = vadd.f32 %v13899_v34, %v15540_v6  ;;  %vm5566_vm9 = vweird.f32 %v14087_v26 }
 0x454   :  { %3789 = vrot.lane.b32.xlu0 %v3599_v45, %s7353_s21  ;;  %v3600_v45 = vmul.f32 %v7351_v29, %v3214_v42  ;;  %v5558_v52 = vsel %vm5555_vm7, %v5557_v1, %v5553_v61  ;;  %v7110_v28 = vpop.eup %7109  ;;  %v5591_v36 = vmul.f32 %v14132_v48, %v14052_v53  ;;  %v5622_v56 = vsub.f32 1.0, %v5621_v44  ;;  %vm14242_vm13 = vmor %vm5565_vm12, %vm5566_vm9 }
 0x455   :  { %4145 = vrot.lane.b32.xlu1 %v3969_v50, %s7354_s15  ;;  %v14076_v30 = vpop.permute.xlu2 %3767  ;;  %v5945_v32 = vmul.f32 %v5558_v52, %v13441_v7  ;;  %v7112_v37 = vpop.eup %7111  ;;  %v5562_v49 = vsub.f32 1.0, %v5561_v41  ;;  %v14202_v44 = vadd.f32 %v14016_v35, %v15540_v6  ;;  %vm5625_vm10 = vweird.f32 %v14054_v47 }
 0x456   :  { %v4118_v11 = vpop.permute.xlu0 %4117  ;;  %v14167_v34 = vadd.f32 1.0, %v7112_v37  ;;  %v5592_v61 = vsub.f32 1.0, %v5591_v36  ;;  %v5629_v35 = vand.u32 2147483647, %v14054_v47  ;;  %vm5596_vm11 = vweird.f32 %v14132_v48  ;;  %v15663_v37 = vld [vmem:[#allocation134_spill] sm:$0xff]  ;;  %vm14226_vm0 = vmor %vm5625_vm10, %vm5626_vm8 }
 0x457   :  { %4275 = vst.msk [vmem:[%s14894_s9 + $0x88] sm:$0xf] %vm2775_vm3, %v4118_v11  ;;  %v3764_v9 = vpop.permute.xlu1 %3763  ;;  %vm5595_vm14 = vweird.f32 %v14052_v53 }
 0x458   :  { %v3906_v8 = vadd.f32 %v3764_v9, %v3522_v12  ;;  %v1894_v12 = vpop.f32.mrf.mxu0  ;;  %vm14260_vm15 = vmor %vm5595_vm14, %vm5596_vm11  ;;  %vm5630_vm1 = vcmp.eq.f32.partialorder %v5629_v35, 8.507059e+37 }
 0x459   :  { %v7114_v9 = vpop.eup %7113  ;;  %v14159_v33 = vadd.f32 %v1894_v12, %v15540_v6 }
 0x45a   :  { %v3970_v50 = vpack.c.bf16 %v3906_v8, %v3906_v8  ;;  %v14156_v8 = vadd.f32 1.0, %v7110_v28  ;;  %v14175_v29 = vadd.f32 1.0, %v7114_v9  ;;  %v5631_v28 = vand.u32 2147483648, %v14054_v47 }
 0x45b   :  { %3791 = vrot.lane.b32.xlu2 %v3600_v45, %s7353_s21  ;;  %v15661_v45 = vld [vmem:[#allocation49_spill] sm:$0xff]  ;;  %v5569_v47 = vand.u32 2147483647, %v14024_v0 }
 0x45c   :  { %4147 = vrot.lane.b32.xlu0 %v3970_v50, %s7354_s15  ;;  %v3524_v5 = vmul.f32 %v15661_v45, %v12086_v46  ;;  %v15662_v50 = vld [vmem:[#allocation120_spill] sm:$0xff]  ;;  %7115 = vrcp.f32 %v14156_v8  ;;  %vm5670_vm9 = vweird.f32 %v14175_v29  ;;  %vm5610_vm11 = vweird.f32 %v14156_v8 }
 0x45d   :  { %6143 = vrot.lane.b32.xlu1 %v14127_v27, %s7355_s23  ;;  %v6118_v51 = vpop.permute.xlu2 %6117  ;;  %v3523_v25 = vmul.f32 %v15662_v50, %v12069_v57  ;;  %7117 = vrcp.f32 %v14167_v34  ;;  %v5593_v57 = vmul.f32 %v14132_v48, %v5592_v61  ;;  %v15666_v45 = vld [vmem:[#allocation108_spill] sm:$0xff]  ;;  %vm5570_vm2 = vcmp.eq.f32.partialorder %v5569_v47, 8.507059e+37 }
 0x45e   :  { %v6267_v14 = vmul.f32 %v6118_v51, %v5947_v15  ;;  %v6110_v23 = vpop.permute.xlu0 %6109  ;;  %v5623_v15 = vmul.f32 %v14123_v59, %v5622_v56  ;;  %v3908_v51 = vadd.f32 %v14076_v30, %v3524_v5  ;;  %7119 = vrcp.f32 %v14175_v29 }
 0x45f   :  { %v6263_v42 = vmul.f32 %v6110_v23, %v5943_v20  ;;  %v6114_v11 = vpop.permute.xlu1 %6113  ;;  %v6641_v23 = vmul.f32 -1.442695, %v13868_v22  ;;  %v5601_v56 = vand.u32 2147483648, %v14052_v53  ;;  %v3525_v5 = vmul.f32 %v15666_v45, %v12155_v40 }
 0x460   :  { %v6331_v10 = vpack.c.bf16 %v6267_v14, %v6267_v14  ;;  %v6265_v38 = vmul.f32 %v6114_v11, %v5945_v32  ;;  %v5563_v14 = vmul.f32 %v14087_v26, %v5562_v49  ;;  %v6643_v32 = vmul.f32 -1.442695, %v13872_v39 }
 0x461   :  { %v6327_v7 = vpack.c.bf16 %v6263_v42, %v6263_v42  ;;  %v5624_v42 = vadd.f32 %v14123_v59, %v5623_v15  ;;  %v5571_v11 = vand.u32 2147483648, %v14024_v0  ;;  %v3972_v41 = vpack.c.bf16 %v3908_v51, %v3908_v51 }
 0x462   :  { %6396 = vst.msk [vmem:[%s14893_s11 + $0xa8] sm:$0xf] %vm6353_vm5, %v6331_v10  ;;  %v6329_v17 = vpack.c.bf16 %v6265_v38, %v6265_v38  ;;  %v5564_v12 = vadd.f32 %v14087_v26, %v5563_v14  ;;  %v14211_v10 = vpop.f32.mrf.mxu0  ;;  %v5594_v38 = vadd.f32 %v14132_v48, %v5593_v57  ;;  %v14219_v36 = vpop.eup %7115  ;;  %v5599_v0 = vand.u32 2147483647, %v14052_v53 }
 0x463   :  { %6392 = vst.msk [vmem:[%s14893_s11 + $0x98] sm:$0xf] %vm6353_vm5, %v6327_v7  ;;  %6141 = vrot.lane.b32.xlu2 %v14146_v4, %s7355_s23  ;;  %v3527_v7 = vmul.f32 %v15663_v37, %v12216_v18  ;;  %v14233_v49 = vpop.eup %7117  ;;  %v5628_v18 = vsel %vm14226_vm0, %v14123_v59, %v5624_v42  ;;  %v5632_v59 = vor.u32 1.1754944e-38, %v5631_v28  ;;  %v14269_v14 = vadd.f32 %v14073_v16, %v15540_v6 }
 0x464   :  { %6394 = vst.msk [vmem:[%s14893_s11 + $0xa0] sm:$0xf] %vm6353_vm5, %v6329_v17  ;;  %6139 = vrot.lane.b32.xlu0 %v14150_v54, %s7355_s23  ;;  %v14248_v50 = vpop.eup %7119  ;;  %v5568_v15 = vsel %vm14242_vm13, %v14087_v26, %v5564_v12  ;;  %v5602_v26 = vor.u32 1.1754944e-38, %v5601_v56  ;;  %vm5600_vm4 = vcmp.eq.f32.partialorder %v5599_v0, 8.507059e+37  ;;  %7121 = vpow2.f32 %v6641_v23 }
 0x465   :  { %6149 = vrot.lane.b32.xlu1 %v14159_v33, %s7355_s23  ;;  %v4126_v1 = vpop.permute.xlu2 %4125  ;;  %v5633_v57 = vsel %vm5630_vm1, %v5632_v59, %v5628_v18  ;;  %7123 = vpow2.f32 %v6643_v32  ;;  %v5666_v37 = vmul.f32 %v14248_v50, %v14175_v29  ;;  %v5636_v47 = vmul.f32 %v14233_v49, %v14167_v34  ;;  %v15671_v59 = vld [vmem:[#allocation127_spill] sm:$0xff] }
 0x466   :  { %4279 = vst.msk [vmem:[%s14894_s9 + $0x98] sm:$0xf] %vm2775_vm3, %v4126_v1  ;;  %v3766_v52 = vpop.permute.xlu0 %3765  ;;  %vm5671_vm6 = vweird.f32 %v14248_v50  ;;  %vm5611_vm7 = vweird.f32 %v14219_v36  ;;  %vm5641_vm8 = vweird.f32 %v14233_v49  ;;  %vm5640_vm0 = vweird.f32 %v14167_v34 }
 0x467   :  { %v3907_v46 = vadd.f32 %v3766_v52, %v3523_v25  ;;  %v4122_v20 = vpop.permute.xlu1 %4121  ;;  %v6645_v25 = vmul.f32 -1.442695, %v14002_v58  ;;  %v5667_v18 = vsub.f32 1.0, %v5666_v37  ;;  %vm14344_vm10 = vmor %vm5670_vm9, %vm5671_vm6 }
 0x468   :  { %4277 = vst.msk [vmem:[%s14894_s9 + $0x90] sm:$0xf] %vm2775_vm3, %v4122_v20  ;;  %v5598_v20 = vsel %vm14260_vm15, %v14132_v48, %v5594_v38  ;;  %v5950_v48 = vmul.f32 %v5633_v57, %v13720_v2  ;;  %vm14361_vm12 = vmor %vm5610_vm11, %vm5611_vm7 }
 0x469   :  { %v3971_v30 = vpack.c.bf16 %v3907_v46, %v3907_v46  ;;  %v5572_v46 = vor.u32 1.1754944e-38, %v5571_v11  ;;  %v5603_v11 = vsel %vm5600_vm4, %v5602_v26, %v5598_v20  ;;  %7125 = vpow2.f32 %v6645_v25  ;;  %vm14380_vm13 = vmor %vm5640_vm0, %vm5641_vm8 }
 0x46a   :  { %v1899_v12 = vpop.f32.mrf.mxu0  ;;  %v5948_v23 = vmul.f32 %v5603_v11, %v13586_v24  ;;  %v7122_v56 = vpop.eup %7121  ;;  %v14289_v24 = vadd.f32 %v14211_v10, %v15540_v6  ;;  %v5637_v10 = vsub.f32 1.0, %v5636_v47 }
 0x46b   :  { %4149 = vrot.lane.b32.xlu2 %v3971_v30, %s7354_s15  ;;  %v5573_v42 = vsel %vm5570_vm2, %v5572_v46, %v5568_v15  ;;  %v7124_v45 = vpop.eup %7123  ;;  %v14301_v25 = vadd.f32 1.0, %v7122_v56  ;;  %v3526_v15 = vmul.f32 %v15671_v59, %v12158_v21  ;;  %v5668_v46 = vmul.f32 %v14248_v50, %v5667_v18 }
 0x46c   :  { %6145 = vrot.lane.b32.xlu0 %v14202_v44, %s7355_s23  ;;  %v5946_v28 = vmul.f32 %v5573_v42, %v13582_v19  ;;  %v14285_v19 = vadd.f32 %v1899_v12, %v15540_v6  ;;  %v5638_v21 = vmul.f32 %v14233_v49, %v5637_v10  ;;  %v6646_v42 = vmul.f32 -1.442695, %v14014_v60  ;;  %v15672_v12 = vld [vmem:[#allocation72_spill] sm:$0xff] }
 0x46d   :  { %4151 = vrot.lane.b32.xlu1 %v3972_v41, %s7354_s15  ;;  %v3774_v9 = vpop.permute.xlu2 %3773  ;;  %7127 = vrcp.f32 %v14301_v25  ;;  %v5669_v11 = vadd.f32 %v14248_v50, %v5668_v46  ;;  %vm5655_vm9 = vweird.f32 %v14301_v25 }
 0x46e   :  { %v4124_v61 = vpop.permute.xlu0 %4123  ;;  %v3911_v52 = vadd.f32 %v3774_v9, %v3527_v7  ;;  %v5606_v9 = vmul.f32 %v14219_v36, %v14156_v8 }
 0x46f   :  { %4278 = vst.msk [vmem:[%s14894_s9 + $0x94] sm:$0xf] %vm2775_vm3, %v4124_v61  ;;  %v3770_v40 = vpop.permute.xlu1 %3769  ;;  %v7126_v1 = vpop.eup %7125  ;;  %v5673_v56 = vsel %vm14344_vm10, %v14248_v50, %v5669_v11 }
 0x470   :  { %v3909_v51 = vadd.f32 %v3770_v40, %v3525_v5  ;;  %v3975_v41 = vpack.c.bf16 %v3911_v52, %v3911_v52  ;;  %v5607_v0 = vsub.f32 1.0, %v5606_v9  ;;  %v14309_v52 = vadd.f32 1.0, %v7124_v45 }
 0x471   :  { %v14313_v53 = vadd.f32 1.0, %v7126_v1  ;;  %v5646_v9 = vand.u32 2147483648, %v14167_v34 }
 0x472   :  { %v3973_v30 = vpack.c.bf16 %v3909_v51, %v3909_v51  ;;  %v5608_v26 = vmul.f32 %v14219_v36, %v5607_v0  ;;  %7129 = vrcp.f32 %v14309_v52  ;;  %vm5685_vm10 = vweird.f32 %v14309_v52 }
 0x473   :  { %6147 = vrot.lane.b32.xlu2 %v14269_v14, %s7355_s23  ;;  %7131 = vrcp.f32 %v14313_v53  ;;  %vm5715_vm7 = vweird.f32 %v14313_v53 }
 0x474   :  { %4153 = vrot.lane.b32.xlu0 %v3973_v30, %s7354_s15  ;;  %v6644_v30 = vmul.f32 -1.442695, %v14006_v3 }
 0x475   :  { %4157 = vrot.lane.b32.xlu1 %v3975_v41, %s7354_s15  ;;  %v6124_v16 = vpop.permute.xlu2 %6123 }
 0x476   :  { %v6270_v35 = vmul.f32 %v6124_v16, %v5950_v48  ;;  %v6116_v38 = vpop.permute.xlu0 %6115  ;;  %v5616_v48 = vand.u32 2147483648, %v14156_v8  ;;  %v5676_v16 = vand.u32 2147483648, %v14175_v29  ;;  %7133 = vpow2.f32 %v6644_v30 }
 0x477   :  { %v6266_v7 = vmul.f32 %v6116_v38, %v5946_v28  ;;  %v6120_v32 = vpop.permute.xlu1 %6119  ;;  %v5609_v28 = vadd.f32 %v14219_v36, %v5608_v26  ;;  %v5674_v38 = vand.u32 2147483647, %v14175_v29  ;;  %v15675_v29 = vld [vmem:[#allocation115_spill] sm:$0xff]  ;;  %7135 = vpow2.f32 %v6646_v42 }
 0x478   :  { %v6334_v2 = vpack.c.bf16 %v6270_v35, %v6270_v35  ;;  %v6268_v17 = vmul.f32 %v6120_v32, %v5948_v23  ;;  %v3530_v35 = vmul.f32 %v15672_v12, %v12294_v63  ;;  %v5639_v23 = vadd.f32 %v14233_v49, %v5638_v21  ;;  %v14352_v63 = vpop.eup %7127 }
 0x479   :  { %v6330_v61 = vpack.c.bf16 %v6266_v7, %v6266_v7  ;;  %v5614_v32 = vand.u32 2147483647, %v14156_v8  ;;  %v3528_v47 = vmul.f32 %v15675_v29, %v12219_v55  ;;  %v5644_v8 = vand.u32 2147483647, %v14167_v34  ;;  %v14366_v45 = vpop.eup %7129 }
 0x47a   :  { %6399 = vst.msk [vmem:[%s14893_s11 + $0xb4] sm:$0xf] %vm6353_vm5, %v6334_v2  ;;  %v6332_v5 = vpack.c.bf16 %v6268_v17, %v6268_v17  ;;  %v5677_v18 = vor.u32 1.1754944e-38, %v5676_v16  ;;  %v5613_v50 = vsel %vm14361_vm12, %v14219_v36, %v5609_v28  ;;  %v5617_v1 = vor.u32 1.1754944e-38, %v5616_v48  ;;  %v14384_v10 = vpop.eup %7131 }
 0x47b   :  { %6395 = vst.msk [vmem:[%s14893_s11 + $0xa4] sm:$0xf] %vm6353_vm5, %v6330_v61  ;;  %6153 = vrot.lane.b32.xlu2 %v14285_v19, %s7355_s23  ;;  %vm5675_vm14 = vcmp.eq.f32.partialorder %v5674_v38, 8.507059e+37  ;;  %vm5615_vm15 = vcmp.eq.f32.partialorder %v5614_v32, 8.507059e+37  ;;  %vm5645_vm1 = vcmp.eq.f32.partialorder %v5644_v8, 8.507059e+37  ;;  %v5711_v42 = vmul.f32 %v14384_v10, %v14313_v53  ;;  %v15681_v61 = vld [vmem:[#allocation131_spill] sm:$0xff] }
 0x47c   :  { %6397 = vst.msk [vmem:[%s14893_s11 + $0xac] sm:$0xf] %vm6353_vm5, %v6332_v5  ;;  %6151 = vrot.lane.b32.xlu0 %v14289_v24, %s7355_s23  ;;  %v6648_v5 = vmul.f32 -1.442695, %v14146_v4  ;;  %v5678_v36 = vsel %vm5675_vm14, %v5677_v18, %v5673_v56  ;;  %v5618_v34 = vsel %vm5615_vm15, %v5617_v1, %v5613_v50  ;;  %v7134_v11 = vpop.eup %7133  ;;  %v5651_v28 = vmul.f32 %v14352_v63, %v14301_v25  ;;  %v15680_v56 = vld [vmem:[#allocation42_spill] sm:$0xff] }
 0x47d   :  { %v4132_v40 = vpop.permute.xlu2 %4131  ;;  %v5949_v21 = vmul.f32 %v5618_v34, %v13731_v43  ;;  %v7136_v12 = vpop.eup %7135  ;;  %v5712_v7 = vsub.f32 1.0, %v5711_v42  ;;  %v6651_v29 = vmul.f32 -1.442695, %v14269_v14  ;;  %v3529_v8 = vmul.f32 %v15681_v61, %v15680_v56 }
 0x47e   :  { %4282 = vst.msk [vmem:[%s14894_s9 + $0xa4] sm:$0xf] %vm2775_vm3, %v4132_v40  ;;  %v3772_v51 = vpop.permute.xlu0 %3771  ;;  %7137 = vpow2.f32 %v6648_v5  ;;  %v14406_v32 = vadd.f32 1.0, %v7136_v12  ;;  %vm5716_vm2 = vweird.f32 %v14384_v10  ;;  %v5721_v34 = vand.u32 2147483648, %v14313_v53 }
 0x47f   :  { %v3910_v20 = vadd.f32 %v3772_v51, %v3526_v15  ;;  %v4128_v57 = vpop.permute.xlu1 %4127  ;;  %v5643_v15 = vsel %vm14380_vm13, %v14233_v49, %v5639_v23  ;;  %v5647_v51 = vor.u32 1.1754944e-38, %v5646_v9  ;;  %v5652_v9 = vsub.f32 1.0, %v5651_v28  ;;  %vm14455_vm8 = vmor %vm5715_vm7, %vm5716_vm2 }
 0x480   :  { %4280 = vst.msk [vmem:[%s14894_s9 + $0x9c] sm:$0xf] %vm2775_vm3, %v4128_v57  ;;  %v5953_v57 = vmul.f32 %v5678_v36, %v13864_v13  ;;  %v5681_v13 = vmul.f32 %v14366_v45, %v14309_v52  ;;  %v6652_v36 = vmul.f32 -1.442695, %v14159_v33  ;;  %vm5656_vm4 = vweird.f32 %v14352_v63 }
 0x481   :  { %v3974_v41 = vpack.c.bf16 %v3910_v20, %v3910_v20  ;;  %v5648_v20 = vsel %vm5645_vm1, %v5647_v51, %v5643_v15  ;;  %v5653_v1 = vmul.f32 %v14352_v63, %v5652_v9  ;;  %vm5686_vm6 = vweird.f32 %v14366_v45  ;;  %vm14472_vm11 = vmor %vm5655_vm9, %vm5656_vm4 }
 0x482   :  { %v5691_v28 = vand.u32 2147483648, %v14309_v52  ;;  %v6654_v9 = vmul.f32 -1.442695, %v14285_v19  ;;  %vm14489_vm0 = vmor %vm5685_vm10, %vm5686_vm6 }
 0x483   :  { %4155 = vrot.lane.b32.xlu2 %v3974_v41, %s7354_s15  ;;  %v5951_v41 = vmul.f32 %v5648_v20, %v13737_v62  ;;  %v5654_v20 = vadd.f32 %v14352_v63, %v5653_v1  ;;  %v6650_v1 = vmul.f32 -1.442695, %v14202_v44 }
 0x484   :  { %v7138_v43 = vpop.eup %7137 }
 0x485   :  { %v3780_v37 = vpop.permute.xlu2 %3779 }
 0x486   :  { %v3914_v2 = vadd.f32 %v3780_v37, %v3530_v35  ;;  %v4130_v17 = vpop.permute.xlu0 %4129  ;;  %v14400_v37 = vadd.f32 1.0, %v7134_v11 }
 0x487   :  { %4281 = vst.msk [vmem:[%s14894_s9 + $0xa0] sm:$0xf] %vm2775_vm3, %v4130_v17  ;;  %v3776_v55 = vpop.permute.xlu1 %3775  ;;  %v5682_v17 = vsub.f32 1.0, %v5681_v13  ;;  %v15687_v13 = vld [vmem:[#allocation125_spill] sm:$0xff] }
 0x488   :  { %v3978_v40 = vpack.c.bf16 %v3914_v2, %v3914_v2  ;;  %v3912_v59 = vadd.f32 %v3776_v55, %v3528_v47  ;;  %v14412_v2 = vadd.f32 1.0, %v7138_v43  ;;  %7139 = vrcp.f32 %v14400_v37 }
 0x489   :  { %v5713_v55 = vmul.f32 %v14384_v10, %v5712_v7  ;;  %7141 = vrcp.f32 %v14406_v32  ;;  %v5683_v0 = vmul.f32 %v14366_v45, %v5682_v17  ;;  %vm5700_vm1 = vweird.f32 %v14400_v37 }
 0x48a   :  { %v3976_v46 = vpack.c.bf16 %v3912_v59, %v3912_v59  ;;  %4163 = vrot.lane.b32.xlu1 %v3978_v40, %s7354_s15  ;;  %7143 = vrcp.f32 %v14412_v2  ;;  %v6647_v40 = vmul.f32 -1.442695, %v14150_v54  ;;  %v6649_v59 = vmul.f32 -1.442695, %v14127_v27 }
 0x48b   :  { %7145 = vpow2.f32 %v6651_v29  ;;  %v5714_v51 = vadd.f32 %v14384_v10, %v5713_v55  ;;  %v5722_v29 = vor.u32 1.1754944e-38, %v5721_v34  ;;  %vm5760_vm6 = vweird.f32 %v14412_v2 }
 0x48c   :  { %4159 = vrot.lane.b32.xlu0 %v3976_v46, %s7354_s15  ;;  %v5661_v46 = vand.u32 2147483648, %v14301_v25  ;;  %7147 = vpow2.f32 %v6649_v59 }
 0x48d   :  { %v6130_v26 = vpop.permute.xlu2 %6129  ;;  %7149 = vpow2.f32 %v6647_v40 }
 0x48e   :  { %v6273_v49 = vmul.f32 %v6130_v26, %v5953_v57  ;;  %v6122_v30 = vpop.permute.xlu0 %6121  ;;  %v14446_v57 = vpop.eup %7139  ;;  %v15682_v26 = vld [vmem:[#allocation85_spill] sm:$0xff]  ;;  %7151 = vpow2.f32 %v6652_v36 }
 0x48f   :  { %v6269_v48 = vmul.f32 %v6122_v30, %v5949_v21  ;;  %v6126_v16 = vpop.permute.xlu1 %6125  ;;  %v15683_v21 = vld [vmem:[#allocation138_spill] sm:$0xff]  ;;  %v5719_v30 = vand.u32 2147483647, %v14313_v53  ;;  %v14453_v42 = vpop.eup %7141  ;;  %7153 = vpow2.f32 %v6654_v9  ;;  %vm5701_vm2 = vweird.f32 %v14446_v57 }
 0x490   :  { %v6337_v35 = vpack.c.bf16 %v6273_v49, %v6273_v49  ;;  %v6271_v38 = vmul.f32 %v6126_v16, %v5951_v41  ;;  %v3533_v49 = vmul.f32 %v15683_v21, %v15682_v26  ;;  %v5684_v41 = vadd.f32 %v14366_v45, %v5683_v0  ;;  %v14463_v12 = vpop.eup %7143  ;;  %vm14592_vm9 = vmor %vm5700_vm1, %vm5701_vm2 }
 0x491   :  { %v6333_v23 = vpack.c.bf16 %v6269_v48, %v6269_v48  ;;  %v5659_v16 = vand.u32 2147483647, %v14301_v25  ;;  %v5689_v25 = vand.u32 2147483647, %v14309_v52  ;;  %v7146_v7 = vpop.eup %7145  ;;  %vm5720_vm12 = vcmp.eq.f32.partialorder %v5719_v30, 8.507059e+37 }
 0x492   :  { %6402 = vst.msk [vmem:[%s14893_s11 + $0xc0] sm:$0xf] %vm6353_vm5, %v6337_v35  ;;  %v6335_v62 = vpack.c.bf16 %v6271_v38, %v6271_v38  ;;  %v15686_v38 = vld [vmem:[#allocation57_spill] sm:$0xff]  ;;  %v7148_v34 = vpop.eup %7147  ;;  %v5696_v26 = vmul.f32 %v14446_v57, %v14400_v37  ;;  %7155 = vpow2.f32 %v6650_v1  ;;  %vm5761_vm15 = vweird.f32 %v14463_v12 }
 0x493   :  { %6398 = vst.msk [vmem:[%s14893_s11 + $0xb0] sm:$0xf] %vm6353_vm5, %v6333_v23  ;;  %v3531_v43 = vmul.f32 %v15687_v13, %v15686_v38  ;;  %v5718_v23 = vsel %vm14455_vm8, %v14384_v10, %v5714_v51  ;;  %v5658_v10 = vsel %vm14472_vm11, %v14352_v63, %v5654_v20  ;;  %vm5660_vm13 = vcmp.eq.f32.partialorder %v5659_v16, 8.507059e+37  ;;  %v7150_v21 = vpop.eup %7149  ;;  %vm14573_vm7 = vmor %vm5760_vm6, %vm5761_vm15 }
 0x494   :  { %6400 = vst.msk [vmem:[%s14893_s11 + $0xb8] sm:$0xf] %vm6353_vm5, %v6335_v62  ;;  %v5723_v55 = vsel %vm5720_vm12, %v5722_v29, %v5718_v23  ;;  %v5692_v63 = vor.u32 1.1754944e-38, %v5691_v28  ;;  %vm5690_vm14 = vcmp.eq.f32.partialorder %v5689_v25, 8.507059e+37  ;;  %v7152_v30 = vpop.eup %7151  ;;  %v14510_v48 = vadd.f32 1.0, %v7148_v34  ;;  %v15692_v62 = vld [vmem:[#allocation126_spill] sm:$0xff] }
 0x495   :  { %v4138_v47 = vpop.permute.xlu2 %4137  ;;  %v5956_v0 = vmul.f32 %v5723_v55, %v14002_v58  ;;  %v14522_v38 = vadd.f32 1.0, %v7152_v30  ;;  %v15693_v25 = vld [vmem:[#allocation60_spill] sm:$0xff]  ;;  %vm5731_vm4 = vweird.f32 %v14453_v42  ;;  %vm5730_vm8 = vweird.f32 %v14406_v32 }
 0x496   :  { %4285 = vst.msk [vmem:[%s14894_s9 + $0xb0] sm:$0xf] %vm2775_vm3, %v4138_v47  ;;  %v3778_v5 = vpop.permute.xlu0 %3777  ;;  %v5662_v47 = vor.u32 1.1754944e-38, %v5661_v46  ;;  %v5756_v46 = vmul.f32 %v14463_v12, %v14412_v2  ;;  %vm14611_vm10 = vmor %vm5730_vm8, %vm5731_vm4  ;;  %vm5775_vm2 = vweird.f32 %v14510_v48 }
 0x497   :  { %v3913_v18 = vadd.f32 %v3778_v5, %v3529_v8  ;;  %v4134_v50 = vpop.permute.xlu1 %4133  ;;  %v5688_v5 = vsel %vm14489_vm0, %v14366_v45, %v5684_v41  ;;  %v14508_v41 = vadd.f32 1.0, %v7146_v7  ;;  %v3532_v7 = vmul.f32 %v15693_v25, %v15692_v62 }
 0x498   :  { %4283 = vst.msk [vmem:[%s14894_s9 + $0xa8] sm:$0xf] %vm2775_vm3, %v4134_v50  ;;  %v5663_v52 = vsel %vm5660_vm13, %v5662_v47, %v5658_v10  ;;  %v5693_v50 = vsel %vm5690_vm14, %v5692_v63, %v5688_v5  ;;  %v5757_v28 = vsub.f32 1.0, %v5756_v46  ;;  %v6653_v5 = vmul.f32 -1.442695, %v14289_v24 }
 0x499   :  { %v3977_v15 = vpack.c.bf16 %v3913_v18, %v3913_v18  ;;  %v5952_v59 = vmul.f32 %v5663_v52, %v13868_v22  ;;  %v5954_v40 = vmul.f32 %v5693_v50, %v13872_v39  ;;  %v5726_v22 = vmul.f32 %v14453_v42, %v14406_v32 }
 0x49a   :  { %7157 = vrcp.f32 %v14508_v41  ;;  %v5758_v29 = vmul.f32 %v14463_v12, %v5757_v28  ;;  %v5766_v50 = vand.u32 2147483648, %v14412_v2  ;;  %vm5805_vm15 = vweird.f32 %v14508_v41 }
 0x49b   :  { %4161 = vrot.lane.b32.xlu2 %v3977_v15, %s7354_s15  ;;  %v5727_v13 = vsub.f32 1.0, %v5726_v22  ;;  %7159 = vrcp.f32 %v14510_v48  ;;  %v15698_v22 = vld [vmem:[#allocation50_spill] sm:$0xff] }
 0x49c   :  { %v5759_v63 = vadd.f32 %v14463_v12, %v5758_v29 }
 0x49d   :  { %v3786_v11 = vpop.permute.xlu2 %3785 }
 0x49e   :  { %v3917_v53 = vadd.f32 %v3786_v11, %v3533_v49  ;;  %v4136_v35 = vpop.permute.xlu0 %4135  ;;  %v7154_v11 = vpop.eup %7153 }
 0x49f   :  { %4284 = vst.msk [vmem:[%s14894_s9 + $0xac] sm:$0xf] %vm2775_vm3, %v4136_v35  ;;  %v3782_v17 = vpop.permute.xlu1 %3781  ;;  %v5697_v35 = vsub.f32 1.0, %v5696_v26  ;;  %v7156_v9 = vpop.eup %7155  ;;  %v5736_v26 = vand.u32 2147483648, %v14406_v32 }
 0x4a0   :  { %v3981_v61 = vpack.c.bf16 %v3917_v53, %v3917_v53  ;;  %v3915_v8 = vadd.f32 %v3782_v17, %v3531_v43  ;;  %v14516_v53 = vadd.f32 1.0, %v7150_v21  ;;  %v14529_v43 = vadd.f32 1.0, %v7154_v11  ;;  %v14555_v52 = vpop.eup %7157 }
 0x4a1   :  { %v5698_v56 = vmul.f32 %v14446_v57, %v5697_v35  ;;  %vm5806_vm13 = vweird.f32 %v14555_v52 }
 0x4a2   :  { %v3979_v18 = vpack.c.bf16 %v3915_v8, %v3915_v8  ;;  %4169 = vrot.lane.b32.xlu1 %v3981_v61, %s7354_s15  ;;  %7161 = vrcp.f32 %v14516_v53  ;;  %v5728_v61 = vmul.f32 %v14453_v42, %v5727_v13  ;;  %v14547_v8 = vadd.f32 1.0, %v7156_v9  ;;  %vm14672_vm1 = vmor %vm5805_vm15, %vm5806_vm13 }
 0x4a3   :  { %7163 = vrcp.f32 %v14522_v38  ;;  %v5699_v1 = vadd.f32 %v14446_v57, %v5698_v56 }
 0x4a4   :  { %4165 = vrot.lane.b32.xlu0 %v3979_v18, %s7354_s15  ;;  %7165 = vrcp.f32 %v14529_v43  ;;  %v5706_v18 = vand.u32 2147483648, %v14400_v37 }
 0x4a5   :  { %v6136_v45 = vpop.permute.xlu2 %6135  ;;  %7167 = vpow2.f32 %v6653_v5 }
 0x4a6   :  { %v6276_v15 = vmul.f32 %v6136_v45, %v5956_v0  ;;  %v6128_v51 = vpop.permute.xlu0 %6127  ;;  %v14562_v0 = vpop.eup %7159  ;;  %v5707_v13 = vor.u32 1.1754944e-38, %v5706_v18  ;;  %7169 = vrcp.f32 %v14547_v8 }
 0x4a7   :  { %v6272_v36 = vmul.f32 %v6128_v51, %v5952_v59  ;;  %v6132_v20 = vpop.permute.xlu1 %6131  ;;  %v1901_v45 = vpop.f32.mrf.mxu0  ;;  %v15694_v59 = vld [vmem:[#allocation104_spill] sm:$0xff]  ;;  %v5764_v51 = vand.u32 2147483647, %v14412_v2  ;;  %v5771_v62 = vmul.f32 %v14562_v0, %v14510_v48  ;;  %vm5776_vm14 = vweird.f32 %v14562_v0 }
 0x4a8   :  { %v6340_v49 = vpack.c.bf16 %v6276_v15, %v6276_v15  ;;  %v6274_v58 = vmul.f32 %v6132_v20, %v5954_v40  ;;  %v3536_v15 = vmul.f32 %v15694_v59, %v12509_v31  ;;  %v5729_v40 = vadd.f32 %v14453_v42, %v5728_v61  ;;  %v14569_v46 = vpop.eup %7161  ;;  %vm14687_vm4 = vmor %vm5775_vm2, %vm5776_vm14 }
 0x4a9   :  { %v6336_v39 = vpack.c.bf16 %v6272_v36, %v6272_v36  ;;  %v5704_v20 = vand.u32 2147483647, %v14400_v37  ;;  %v5734_v31 = vand.u32 2147483647, %v14406_v32  ;;  %v14581_v2 = vpop.eup %7163  ;;  %v5703_v37 = vsel %vm14592_vm9, %v14446_v57, %v5699_v1 }
 0x4aa   :  { %6405 = vst.msk [vmem:[%s14893_s11 + $0xcc] sm:$0xf] %vm6353_vm5, %v6340_v49  ;;  %v6338_v16 = vpack.c.bf16 %v6274_v58, %v6274_v58  ;;  %v15697_v58 = vld [vmem:[#allocation130_spill] sm:$0xff]  ;;  %v14598_v28 = vpop.eup %7165  ;;  %vm5765_vm11 = vcmp.eq.f32.partialorder %v5764_v51, 8.507059e+37  ;;  %v5733_v9 = vsel %vm14611_vm10, %v14453_v42, %v5729_v40  ;;  %v5772_v56 = vsub.f32 1.0, %v5771_v62 }
 0x4ab   :  { %6401 = vst.msk [vmem:[%s14893_s11 + $0xbc] sm:$0xf] %vm6353_vm5, %v6336_v39  ;;  %v3534_v30 = vmul.f32 %v15698_v22, %v15697_v58  ;;  %v5763_v39 = vsel %vm14573_vm7, %v14463_v12, %v5759_v63  ;;  %v5767_v12 = vor.u32 1.1754944e-38, %v5766_v50  ;;  %vm5705_vm0 = vcmp.eq.f32.partialorder %v5704_v20, 8.507059e+37  ;;  %v7168_v51 = vpop.eup %7167 }
 0x4ac   :  { %6403 = vst.msk [vmem:[%s14893_s11 + $0xc4] sm:$0xf] %vm6353_vm5, %v6338_v16  ;;  %v5801_v16 = vmul.f32 %v14555_v52, %v14508_v41  ;;  %v5708_v32 = vsel %vm5705_vm0, %v5707_v13, %v5703_v37  ;;  %vm5735_vm12 = vcmp.eq.f32.partialorder %v5734_v31, 8.507059e+37  ;;  %v5741_v5 = vmul.f32 %v14569_v46, %v14516_v53  ;;  %v14648_v22 = vpop.eup %7169  ;;  %v15703_v13 = vld [vmem:[#allocation64_spill] sm:$0xff] }
 0x4ad   :  { %v4144_v23 = vpop.permute.xlu2 %4143  ;;  %v5768_v57 = vsel %vm5765_vm11, %v5767_v12, %v5763_v39  ;;  %v5955_v42 = vmul.f32 %v5708_v32, %v14006_v3  ;;  %v14633_v3 = vadd.f32 %v1901_v45, %v15540_v6  ;;  %v5816_v31 = vmul.f32 %v14581_v2, %v14522_v38 }
 0x4ae   :  { %4288 = vst.msk [vmem:[%s14894_s9 + $0xbc] sm:$0xf] %vm2775_vm3, %v4144_v23  ;;  %v3784_v17 = vpop.permute.xlu0 %3783  ;;  %v5959_v61 = vmul.f32 %v5768_v57, %v14146_v4  ;;  %v5811_v39 = vand.u32 2147483648, %v14508_v41  ;;  %v15704_v23 = vld [vmem:[#allocation101_spill] sm:$0xff]  ;;  %vm5851_vm8 = vweird.f32 %v14598_v28  ;;  %vm5746_vm9 = vweird.f32 %v14569_v46 }
 0x4af   :  { %v3916_v10 = vadd.f32 %v3784_v17, %v3532_v7  ;;  %v4140_v47 = vpop.permute.xlu1 %4139  ;;  %v5737_v17 = vor.u32 1.1754944e-38, %v5736_v26  ;;  %v1904_v63 = vpop.f32.mrf.mxu0  ;;  %v5817_v12 = vsub.f32 1.0, %v5816_v31  ;;  %v3535_v62 = vmul.f32 %v15704_v23, %v15703_v13 }
 0x4b0   :  { %4286 = vst.msk [vmem:[%s14894_s9 + $0xb4] sm:$0xf] %vm2775_vm3, %v4140_v47  ;;  %vm5821_vm10 = vweird.f32 %v14581_v2  ;;  %vm5850_vm11 = vweird.f32 %v14529_v43  ;;  %vm5820_vm14 = vweird.f32 %v14522_v38 }
 0x4b1   :  { %v3980_v55 = vpack.c.bf16 %v3916_v10, %v3916_v10  ;;  %v5802_v10 = vsub.f32 1.0, %v5801_v16  ;;  %v5738_v47 = vsel %vm5735_vm12, %v5737_v17, %v5733_v9  ;;  %v5809_v16 = vand.u32 2147483647, %v14508_v41  ;;  %vm14717_vm0 = vmor %vm5850_vm11, %vm5851_vm8 }
 0x4b2   :  { %v5957_v1 = vmul.f32 %v5738_v47, %v14014_v60  ;;  %v14638_v60 = vadd.f32 %v1904_v63, %v15540_v6  ;;  %vm5745_vm12 = vweird.f32 %v14516_v53  ;;  %vm14746_vm15 = vmor %vm5820_vm14, %vm5821_vm10 }
 0x4b3   :  { %4167 = vrot.lane.b32.xlu2 %v3980_v55, %s7354_s15  ;;  %v5803_v59 = vmul.f32 %v14555_v52, %v5802_v10  ;;  %v5812_v10 = vor.u32 1.1754944e-38, %v5811_v39  ;;  %vm5810_vm6 = vcmp.eq.f32.partialorder %v5809_v16, 8.507059e+37  ;;  %vm14731_vm13 = vmor %vm5745_vm12, %vm5746_vm9 }
 0x4b5   :  { %v3792_v34 = vpop.permute.xlu2 %3791  ;;  %v5804_v45 = vadd.f32 %v14555_v52, %v5803_v59 }
 0x4b6   :  { %v3920_v21 = vadd.f32 %v3792_v34, %v3536_v15  ;;  %v4142_v49 = vpop.permute.xlu0 %4141  ;;  %v5846_v15 = vmul.f32 %v14598_v28, %v14529_v43  ;;  %v5773_v34 = vmul.f32 %v14562_v0, %v5772_v56 }
 0x4b7   :  { %4287 = vst.msk [vmem:[%s14894_s9 + $0xb8] sm:$0xf] %vm2775_vm3, %v4142_v49  ;;  %v3788_v35 = vpop.permute.xlu1 %3787  ;;  %v5808_v9 = vsel %vm14672_vm1, %v14555_v52, %v5804_v45  ;;  %v5786_v52 = vmul.f32 %v14648_v22, %v14547_v8  ;;  %v1906_v31 = vpop.f32.mrf.mxu0 }
 0x4b8   :  { %v3984_v25 = vpack.c.bf16 %v3920_v21, %v3920_v21  ;;  %v3918_v7 = vadd.f32 %v3788_v35, %v3534_v30  ;;  %v5742_v21 = vsub.f32 1.0, %v5741_v5  ;;  %v5847_v58 = vsub.f32 1.0, %v5846_v15 }
 0x4b9   :  { %v14650_v30 = vadd.f32 1.0, %v7168_v51  ;;  %v5774_v11 = vadd.f32 %v14562_v0, %v5773_v34  ;;  %v5781_v35 = vand.u32 2147483648, %v14510_v48  ;;  %v5751_v5 = vand.u32 2147483648, %v14516_v53 }
 0x4ba   :  { %v3982_v29 = vpack.c.bf16 %v3918_v7, %v3918_v7  ;;  %4175 = vrot.lane.b32.xlu1 %v3984_v25, %s7354_s15  ;;  %v5779_v7 = vand.u32 2147483647, %v14510_v48  ;;  %v5848_v17 = vmul.f32 %v14598_v28, %v5847_v58  ;;  %v5743_v48 = vmul.f32 %v14569_v46, %v5742_v21 }
 0x4bb   :  { %v5778_v47 = vsel %vm14687_vm4, %v14562_v0, %v5774_v11  ;;  %7171 = vrcp.f32 %v14650_v30  ;;  %v5782_v56 = vor.u32 1.1754944e-38, %v5781_v35  ;;  %v5854_v15 = vand.u32 2147483647, %v14529_v43 }
 0x4bc   :  { %4171 = vrot.lane.b32.xlu0 %v3982_v29, %s7354_s15  ;;  %vm5780_vm7 = vcmp.eq.f32.partialorder %v5779_v7, 8.507059e+37  ;;  %v5849_v63 = vadd.f32 %v14598_v28, %v5848_v17  ;;  %v5752_v58 = vor.u32 1.1754944e-38, %v5751_v5  ;;  %v5796_v25 = vand.u32 2147483648, %v14547_v8 }
 0x4bd   :  { %v6142_v55 = vpop.permute.xlu2 %6141  ;;  %v5783_v0 = vsel %vm5780_vm7, %v5782_v56, %v5778_v47  ;;  %vm5855_vm1 = vcmp.eq.f32.partialorder %v5854_v15, 8.507059e+37  ;;  %vm5790_vm7 = vweird.f32 %v14547_v8  ;;  %vm5835_vm11 = vweird.f32 %v14650_v30 }
 0x4be   :  { %v6279_v18 = vmul.f32 %v6142_v55, %v5959_v61  ;;  %v6134_v50 = vpop.permute.xlu0 %6133  ;;  %v5818_v61 = vmul.f32 %v14581_v2, %v5817_v12  ;;  %v5853_v21 = vsel %vm14717_vm0, %v14598_v28, %v5849_v63  ;;  %v14755_v12 = vadd.f32 %v1906_v31, %v15540_v6 }
 0x4bf   :  { %v6275_v4 = vmul.f32 %v6134_v50, %v5955_v42  ;;  %v6138_v40 = vpop.permute.xlu1 %6137  ;;  %v5813_v42 = vsel %vm5810_vm6, %v5812_v10, %v5808_v9  ;;  %v5744_v50 = vadd.f32 %v14569_v46, %v5743_v48  ;;  %vm5791_vm6 = vweird.f32 %v14648_v22 }
 0x4c0   :  { %v6343_v36 = vpack.c.bf16 %v6279_v18, %v6279_v18  ;;  %v6277_v20 = vmul.f32 %v6138_v40, %v5957_v1  ;;  %v5856_v18 = vand.u32 2147483648, %v14529_v43  ;;  %v5787_v1 = vsub.f32 1.0, %v5786_v52  ;;  %vm5792_vm8 = vmor %vm5790_vm7, %vm5791_vm6 }
 0x4c1   :  { %v6339_v26 = vpack.c.bf16 %v6275_v4, %v6275_v4  ;;  %v5962_v59 = vmul.f32 %v5813_v42, %v14269_v14  ;;  %v5819_v51 = vadd.f32 %v14581_v2, %v5818_v61  ;;  %v5960_v40 = vmul.f32 %v5783_v0, %v14127_v27  ;;  %v14724_v14 = vpop.eup %7171 }
 0x4c2   :  { %6408 = vst.msk [vmem:[%s14893_s11 + $0xd8] sm:$0xf] %vm6353_vm5, %v6343_v36  ;;  %v6341_v49 = vpack.c.bf16 %v6277_v20, %v6277_v20  ;;  %6155 = vrot.lane.b32.xlu1 %v14633_v3, %s7355_s23  ;;  %v5749_v36 = vand.u32 2147483647, %v14516_v53  ;;  %v5826_v20 = vand.u32 2147483648, %v14522_v38  ;;  %v5857_v45 = vor.u32 1.1754944e-38, %v5856_v18 }
 0x4c3   :  { %6404 = vst.msk [vmem:[%s14893_s11 + $0xc8] sm:$0xf] %vm6353_vm5, %v6339_v26  ;;  %v5824_v53 = vand.u32 2147483647, %v14522_v38  ;;  %v5748_v28 = vsel %vm14731_vm13, %v14569_v46, %v5744_v50  ;;  %v5788_v38 = vmul.f32 %v14648_v22, %v5787_v1  ;;  %v5823_v35 = vsel %vm14746_vm15, %v14581_v2, %v5819_v51 }
 0x4c4   :  { %6406 = vst.msk [vmem:[%s14893_s11 + $0xd0] sm:$0xf] %vm6353_vm5, %v6341_v49  ;;  %6157 = vrot.lane.b32.xlu0 %v14638_v60, %s7355_s23  ;;  %v5858_v46 = vsel %vm5855_vm1, %v5857_v45, %v5853_v21  ;;  %vm5750_vm2 = vcmp.eq.f32.partialorder %v5749_v36, 8.507059e+37  ;;  %v5794_v9 = vand.u32 2147483647, %v14547_v8  ;;  %v5797_v56 = vor.u32 1.1754944e-38, %v5796_v25 }
 0x4c5   :  { %v4150_v37 = vpop.permute.xlu2 %4149  ;;  %v5753_v23 = vsel %vm5750_vm2, %v5752_v58, %v5748_v28  ;;  %vm5825_vm4 = vcmp.eq.f32.partialorder %v5824_v53, 8.507059e+37  ;;  %v5789_v2 = vadd.f32 %v14648_v22, %v5788_v38  ;;  %v5965_v6 = vmul.f32 %v5858_v46, %v14285_v19 }
 0x4c6   :  { %4291 = vst.msk [vmem:[%s14894_s9 + $0xc8] sm:$0xf] %vm2775_vm3, %v4150_v37  ;;  %v3790_v41 = vpop.permute.xlu0 %3789  ;;  %v5827_v37 = vor.u32 1.1754944e-38, %v5826_v20  ;;  %v5831_v19 = vmul.f32 %v14724_v14, %v14650_v30  ;;  %vm5795_vm9 = vcmp.eq.f32.partialorder %v5794_v9, 8.507059e+37  ;;  %vm5836_vm10 = vweird.f32 %v14724_v14 }
 0x4c7   :  { %v3919_v29 = vadd.f32 %v3790_v41, %v3535_v62  ;;  %v4146_v32 = vpop.permute.xlu1 %4145  ;;  %v5958_v41 = vmul.f32 %v5753_v23, %v14150_v54  ;;  %v5793_v10 = vsel %vm5792_vm8, %v14648_v22, %v5789_v2  ;;  %v5841_v50 = vand.u32 2147483648, %v14650_v30  ;;  %vm5837_vm0 = vmor %vm5835_vm11, %vm5836_vm10 }
 0x4c8   :  { %4289 = vst.msk [vmem:[%s14894_s9 + $0xc0] sm:$0xf] %vm2775_vm3, %v4146_v32  ;;  %v5828_v62 = vsel %vm5825_vm4, %v5827_v37, %v5823_v35  ;;  %v5832_v22 = vsub.f32 1.0, %v5831_v19  ;;  %v5839_v1 = vand.u32 2147483647, %v14650_v30 }
 0x4c9   :  { %v3983_v55 = vpack.c.bf16 %v3919_v29, %v3919_v29  ;;  %v5963_v48 = vmul.f32 %v5828_v62, %v14159_v33  ;;  %v5798_v33 = vsel %vm5795_vm9, %v5797_v56, %v5793_v10  ;;  %v6656_v21 = vmul.f32 -1.442695, %v14638_v60 }
 0x4ca   :  { %v5833_v63 = vmul.f32 %v14724_v14, %v5832_v22  ;;  %vm5840_vm12 = vcmp.eq.f32.partialorder %v5839_v1, 8.507059e+37 }
 0x4cb   :  { %4173 = vrot.lane.b32.xlu2 %v3983_v55, %s7354_s15  ;;  %v5961_v55 = vmul.f32 %v5798_v33, %v14202_v44 }
 0x4cc   :  { %v5834_v44 = vadd.f32 %v14724_v14, %v5833_v63 }
 0x4cd   :  { %v6148_v4 = vpop.permute.xlu2 %6147 }
 0x4ce   :  { %v6282_v26 = vmul.f32 %v6148_v4, %v5962_v59  ;;  %v4148_v43 = vpop.permute.xlu0 %4147  ;;  %v5838_v51 = vsel %vm5837_vm0, %v14724_v14, %v5834_v44  ;;  %v5842_v4 = vor.u32 1.1754944e-38, %v5841_v50  ;;  %v6657_v14 = vmul.f32 -1.442695, %v14755_v12 }
 0x4cf   :  { %4290 = vst.msk [vmem:[%s14894_s9 + $0xc4] sm:$0xf] %vm2775_vm3, %v4148_v43  ;;  %v6144_v49 = vpop.permute.xlu1 %6143  ;;  %v6655_v43 = vmul.f32 -1.442695, %v14633_v3 }
 0x4d0   :  { %v6346_v11 = vpack.c.bf16 %v6282_v26, %v6282_v26  ;;  %v6280_v16 = vmul.f32 %v6144_v49, %v5960_v40  ;;  %v5843_v40 = vsel %vm5840_vm12, %v5842_v4, %v5838_v51  ;;  %7173 = vpow2.f32 %v6657_v14 }
 0x4d1   :  { %v5964_v30 = vmul.f32 %v5843_v40, %v14289_v24  ;;  %7175 = vpow2.f32 %v6655_v43 }
 0x4d2   :  { %6411 = vst.msk [vmem:[%s14893_s11 + $0xe4] sm:$0xf] %vm6353_vm5, %v6346_v11  ;;  %v6344_v13 = vpack.c.bf16 %v6280_v16, %v6280_v16  ;;  %7177 = vpow2.f32 %v6656_v21 }
 0x4d3   :  { %6159 = vrot.lane.b32.xlu2 %v14755_v12, %s7355_s23 }
 0x4d4   :  { %6409 = vst.msk [vmem:[%s14893_s11 + $0xdc] sm:$0xf] %vm6353_vm5, %v6344_v13 }
 0x4d5   :  { %v6154_v7 = vpop.permute.xlu2 %6153 }
 0x4d6   :  { %v6285_v57 = vmul.f32 %v6154_v7, %v5965_v6  ;;  %v6140_v17 = vpop.permute.xlu0 %6139  ;;  %v7174_v27 = vpop.eup %7173 }
 0x4d7   :  { %v6278_v29 = vmul.f32 %v6140_v17, %v5958_v41  ;;  %v6150_v32 = vpop.permute.xlu1 %6149  ;;  %v4944_v53 = vadd.f32 1.0, %v7174_v27  ;;  %v7176_v49 = vpop.eup %7175 }
 0x4d8   :  { %v6349_v47 = vpack.c.bf16 %v6285_v57, %v6285_v57  ;;  %v6283_v52 = vmul.f32 %v6150_v32, %v5963_v48  ;;  %v7178_v28 = vpop.eup %7177  ;;  %v4942_v58 = vadd.f32 1.0, %v7176_v49 }
 0x4d9   :  { %v6342_v54 = vpack.c.bf16 %v6278_v29, %v6278_v29  ;;  %7179 = vrcp.f32 %v4944_v53  ;;  %v4943_v39 = vadd.f32 1.0, %v7178_v28  ;;  %v5901_v7 = vand.u32 2147483648, %v4944_v53 }
 0x4da   :  { %6414 = vst.msk [vmem:[%s14893_s11 + $0xf0] sm:$0xf] %vm6353_vm5, %v6349_v47  ;;  %v6347_v8 = vpack.c.bf16 %v6283_v52, %v6283_v52  ;;  %7181 = vrcp.f32 %v4942_v58  ;;  %vm5895_vm14 = vweird.f32 %v4944_v53  ;;  %v5899_v9 = vand.u32 2147483647, %v4944_v53 }
 0x4db   :  { %6407 = vst.msk [vmem:[%s14893_s11 + $0xd4] sm:$0xf] %vm6353_vm5, %v6342_v54  ;;  %7183 = vrcp.f32 %v4943_v39  ;;  %v5902_v29 = vor.u32 1.1754944e-38, %v5901_v7  ;;  %v5871_v47 = vand.u32 2147483648, %v4942_v58  ;;  %vm5865_vm4 = vweird.f32 %v4942_v58 }
 0x4dc   :  { %6412 = vst.msk [vmem:[%s14893_s11 + $0xe8] sm:$0xf] %vm6353_vm5, %v6347_v8  ;;  %vm5900_vm1 = vcmp.eq.f32.partialorder %v5899_v9, 8.507059e+37  ;;  %v5869_v52 = vand.u32 2147483647, %v4942_v58  ;;  %v5886_v22 = vand.u32 2147483648, %v4943_v39  ;;  %vm5880_vm8 = vweird.f32 %v4943_v39 }
 0x4dd   :  { %v4156_v61 = vpop.permute.xlu2 %4155  ;;  %v5872_v63 = vor.u32 1.1754944e-38, %v5871_v47 }
 0x4de   :  { %4294 = vst.msk [vmem:[%s14894_s9 + $0xd4] sm:$0xf] %vm2775_vm3, %v4156_v61  ;;  %v6146_v42 = vpop.permute.xlu0 %6145  ;;  %vm5870_vm10 = vcmp.eq.f32.partialorder %v5869_v52, 8.507059e+37  ;;  %v5887_v50 = vor.u32 1.1754944e-38, %v5886_v22 }
 0x4df   :  { %v6281_v5 = vmul.f32 %v6146_v42, %v5961_v55  ;;  %v4152_v0 = vpop.permute.xlu1 %4151  ;;  %v7180_v38 = vpop.eup %7179  ;;  %v5884_v42 = vand.u32 2147483647, %v4943_v39 }
 0x4e0   :  { %4292 = vst.msk [vmem:[%s14894_s9 + $0xcc] sm:$0xf] %vm2775_vm3, %v4152_v0  ;;  %v5891_v35 = vmul.f32 %v7180_v38, %v4944_v53  ;;  %v7182_v46 = vpop.eup %7181  ;;  %vm5896_vm13 = vweird.f32 %v7180_v38 }
 0x4e1   :  { %v6345_v18 = vpack.c.bf16 %v6281_v5, %v6281_v5  ;;  %v7184_v13 = vpop.eup %7183  ;;  %v5861_v23 = vmul.f32 %v7182_v46, %v4942_v58  ;;  %vm5897_vm15 = vmor %vm5895_vm14, %vm5896_vm13  ;;  %vm5866_vm2 = vweird.f32 %v7182_v46  ;;  %vm5885_vm11 = vcmp.eq.f32.partialorder %v5884_v42, 8.507059e+37 }
 0x4e2   :  { %v5892_v37 = vsub.f32 1.0, %v5891_v35  ;;  %v5876_v2 = vmul.f32 %v7184_v13, %v4943_v39  ;;  %vm5881_vm6 = vweird.f32 %v7184_v13  ;;  %vm14855_vm7 = vmor %vm5865_vm4, %vm5866_vm2 }
 0x4e3   :  { %6410 = vst.msk [vmem:[%s14893_s11 + $0xe0] sm:$0xf] %vm6353_vm5, %v6345_v18  ;;  %v5862_v6 = vsub.f32 1.0, %v5861_v23  ;;  %vm5882_vm9 = vmor %vm5880_vm8, %vm5881_vm6 }
 0x4e4   :  { %v5893_v62 = vmul.f32 %v7180_v38, %v5892_v37  ;;  %v5877_v41 = vsub.f32 1.0, %v5876_v2 }
 0x4e5   :  { %v5863_v17 = vmul.f32 %v7182_v46, %v5862_v6 }
 0x4e6   :  { %v4154_v59 = vpop.permute.xlu0 %4153  ;;  %v5894_v25 = vadd.f32 %v7180_v38, %v5893_v62  ;;  %v5878_v32 = vmul.f32 %v7184_v13, %v5877_v41 }
 0x4e7   :  { %4293 = vst.msk [vmem:[%s14894_s9 + $0xd0] sm:$0xf] %vm2775_vm3, %v4154_v59  ;;  %v4158_v15 = vpop.permute.xlu1 %4157  ;;  %v5864_v19 = vadd.f32 %v7182_v46, %v5863_v17 }
 0x4e8   :  { %4295 = vst.msk [vmem:[%s14894_s9 + $0xd8] sm:$0xf] %vm2775_vm3, %v4158_v15  ;;  %v5898_v48 = vsel %vm5897_vm15, %v7180_v38, %v5894_v25  ;;  %v5879_v56 = vadd.f32 %v7184_v13, %v5878_v32 }
 0x4e9   :  { %v5903_v10 = vsel %vm5900_vm1, %v5902_v29, %v5898_v48  ;;  %v5868_v55 = vsel %vm14855_vm7, %v7182_v46, %v5864_v19 }
 0x4ea   :  { %v5968_v8 = vmul.f32 %v5903_v10, %v14755_v12  ;;  %v5883_v12 = vsel %vm5882_vm9, %v7184_v13, %v5879_v56  ;;  %v5873_v44 = vsel %vm5870_vm10, %v5872_v63, %v5868_v55 }
 0x4eb   :  { %v5888_v1 = vsel %vm5885_vm11, %v5887_v50, %v5883_v12  ;;  %v5966_v59 = vmul.f32 %v5873_v44, %v14633_v3 }
 0x4ec   :  { %v5967_v4 = vmul.f32 %v5888_v1, %v14638_v60 }
 0x4ee   :  { %v6152_v34 = vpop.permute.xlu0 %6151 }
 0x4ef   :  { %v6284_v36 = vmul.f32 %v6152_v34, %v5964_v30 }
 0x4f1   :  { %v6348_v20 = vpack.c.bf16 %v6284_v36, %v6284_v36 }
 0x4f3   :  { %6413 = vst.msk [vmem:[%s14893_s11 + $0xec] sm:$0xf] %vm6353_vm5, %v6348_v20 }
 0x4f5   :  { %v4162_v31 = vpop.permute.xlu2 %4161 }
 0x4f6   :  { %4297 = vst.msk [vmem:[%s14894_s9 + $0xe0] sm:$0xf] %vm2775_vm3, %v4162_v31 }
 0x4fc   :  { %v4164_v26 = vpop.permute.xlu1 %4163 }
 0x4fd   :  { %4298 = vst.msk [vmem:[%s14894_s9 + $0xe4] sm:$0xf] %vm2775_vm3, %v4164_v26 }
 0x4fe   :  { %v4160_v24 = vpop.permute.xlu0 %4159 }
 0x4ff   :  { %4296 = vst.msk [vmem:[%s14894_s9 + $0xdc] sm:$0xf] %vm2775_vm3, %v4160_v24 }
 0x50d   :  { %v4168_v45 = vpop.permute.xlu2 %4167 }
 0x50e   :  { %4300 = vst.msk [vmem:[%s14894_s9 + $0xec] sm:$0xf] %vm2775_vm3, %v4168_v45 }
 0x514   :  { %v4170_v11 = vpop.permute.xlu1 %4169 }
 0x515   :  { %4301 = vst.msk [vmem:[%s14894_s9 + $0xf0] sm:$0xf] %vm2775_vm3, %v4170_v11 }
 0x516   :  { %v4166_v16 = vpop.permute.xlu0 %4165 }
 0x517   :  { %4299 = vst.msk [vmem:[%s14894_s9 + $0xe8] sm:$0xf] %vm2775_vm3, %v4166_v16 }
 0x525   :  { %v4174_v57 = vpop.permute.xlu2 %4173 }
 0x526   :  { %4303 = vst.msk [vmem:[%s14894_s9 + $0xf8] sm:$0xf] %vm2775_vm3, %v4174_v57 }
 0x52c   :  { %v4176_v54 = vpop.permute.xlu1 %4175 }
 0x52d   :  { %4304 = vst.msk [vmem:[%s14894_s9 + $0xfc] sm:$0xf] %vm2775_vm3, %v4176_v54  ;;  %v6160_v61 = vpop.permute.xlu2 %6159 }
 0x52e   :  { %v6288_v5 = vmul.f32 %v6160_v61, %v5968_v8  ;;  %v4172_v0 = vpop.permute.xlu0 %4171 }
 0x52f   :  { %4302 = vst.msk [vmem:[%s14894_s9 + $0xf4] sm:$0xf] %vm2775_vm3, %v4172_v0 }
 0x530   :  { %v6352_v18 = vpack.c.bf16 %v6288_v5, %v6288_v5 }
 0x532   :  { %6417 = vst.msk [vmem:[%s14893_s11 + $0xfc] sm:$0xf] %vm6353_vm5, %v6352_v18 }
 0x534   :  { %v6156_v15 = vpop.permute.xlu1 %6155 }
 0x535   :  { %v6286_v51 = vmul.f32 %v6156_v15, %v5966_v59 }
 0x536   :  { %v6158_v40 = vpop.permute.xlu0 %6157 }
 0x537   :  { %v6350_v30 = vpack.c.bf16 %v6286_v51, %v6286_v51  ;;  %v6287_v34 = vmul.f32 %v6158_v40, %v5967_v4 }
 0x539   :  { %6415 = vst.msk [vmem:[%s14893_s11 + $0xf4] sm:$0xf] %vm6353_vm5, %v6350_v30  ;;  %v6351_v36 = vpack.c.bf16 %v6287_v34, %v6287_v34 }
 0x53b   :  { %6416 = vst.msk [vmem:[%s14893_s11 + $0xf8] sm:$0xf] %vm6353_vm5, %v6351_v36 }

</bundles_post_ra>
